<compile_context>
chip_gen: v5e
topology: v5e:2x2
jax: 0.10.0
libtpu: 0.0.40
codegen_flags: <defaults>
</compile_context>

<pallas_src>
import functools

import jax
import jax.numpy as jnp
from jax.experimental import pallas as pl
from jax.experimental.pallas import tpu as pltpu

BN_EPS = 1e-5
MXU_DTYPE = jnp.bfloat16


# ----------------------------- Pallas kernels ------------------------------

def _matmul_bias_act_kernel(x_ref, w_ref, b_ref, o_ref, *, relu):
    acc = jnp.dot(x_ref[...].astype(w_ref.dtype), w_ref[...],
                  preferred_element_type=jnp.float32)
    out = acc + b_ref[...]
    if relu:
        out = jnp.maximum(out, 0.0)
    o_ref[...] = out.astype(o_ref.dtype)


def matmul_bias_act(x, w, b, relu=True):
    """out = act(x @ w + b); BN scale already folded into w."""
    M, K = x.shape
    N = w.shape[1]
    tm = 256 if (M % 256 == 0 and M > 256) else M
    return pl.pallas_call(
        functools.partial(_matmul_bias_act_kernel, relu=relu),
        grid=(M // tm,),
        in_specs=[
            pl.BlockSpec((tm, K), lambda i: (i, 0)),
            pl.BlockSpec((K, N), lambda i: (0, 0)),
            pl.BlockSpec((1, N), lambda i: (0, 0)),
        ],
        out_specs=pl.BlockSpec((tm, N), lambda i: (i, 0)),
        out_shape=jax.ShapeDtypeStruct((M, N), jnp.float32),
        compiler_params=pltpu.CompilerParams(
            dimension_semantics=("parallel",)),
    )(x, w, b.reshape(1, N))


def _tree_sum(terms):
    """Pairwise tree sum (shorter dependency chain than a serial chain)."""
    while len(terms) > 1:
        nxt = [terms[i] + terms[i + 1] for i in range(0, len(terms) - 1, 2)]
        if len(terms) % 2:
            nxt.append(terms[-1])
        terms = nxt
    return terms[0]


def _dsample_kernel(
        # six padded-input rows, keyed by (kh, kw-parity): each (B, C)
        r00_ref, r01_ref, r10_ref, r11_ref, r20_ref, r21_ref,
        # dwconv_l1: (9, 1, C) weights (BN scale folded) + (1, C) bias
        wl1_ref, bl1_ref,
        # conv_l2: (C, C) block-diagonal bf16 weight + (1, C) bias
        wl2_ref, bl2_ref,
        # conv_r1 / dwconv_r2 / conv_r3 in the same layout
        wr1_ref, br1_ref, wr2_ref, br2_ref, wr3_ref, br3_ref,
        # (B, 1) mask zeroing the left padding column of even-parity rows
        cm0_ref,
        o_ref):
    OW = o_ref.shape[0]
    C = wl2_ref.shape[0]
    oh = pl.program_id(1)

    rows = {(0, 0): r00_ref, (0, 1): r01_ref,
            (1, 0): r10_ref, (1, 1): r11_ref,
            (2, 0): r20_ref, (2, 1): r21_ref}
    xrow = {key: ref[...] for key, ref in rows.items()}   # six (B, C) loads

    # conv_r1 (1x1 grouped conv, BN folded, ReLU) applied once per padded row,
    # then re-zero the positions that correspond to spatial zero padding
    # (padding itself holds 0, but relu(0 @ W + b) != 0).
    cm0 = cm0_ref[...]
    row_keep = jnp.where(oh == 0, 0.0, 1.0)   # row kh==0 is padding iff oh==0
    r1row = {}
    for (kh, q), xr in xrow.items():
        y = jnp.dot(xr.astype(wr1_ref.dtype), wr1_ref[...],
                    preferred_element_type=jnp.float32) + br1_ref[...]
        y = jnp.maximum(y, 0.0)
        if q == 0:
            y = y * cm0
        if kh == 0:
            y = y * row_keep
        r1row[(kh, q)] = y

    # 3x3 stride-2 depthwise taps for both branches (BN scale folded into w).
    terms_l, terms_r = [], []
    for kh in range(3):
        for kw in range(3):
            q, b0, k = kw & 1, kw // 2, kh * 3 + kw
            terms_l.append(xrow[(kh, q)][b0:b0 + OW, :] * wl1_ref[k])
            terms_r.append(r1row[(kh, q)][b0:b0 + OW, :] * wr2_ref[k])

    acc_l = _tree_sum(terms_l) + bl1_ref[...]     # dwconv_l1 + BN (no act)
    acc_r = _tree_sum(terms_r) + br2_ref[...]     # dwconv_r2 + BN (no act)

    out_l = jnp.maximum(
        jnp.dot(acc_l.astype(wl2_ref.dtype), wl2_ref[...],
                preferred_element_type=jnp.float32) + bl2_ref[...], 0.0)
    out_r = jnp.maximum(
        jnp.dot(acc_r.astype(wr3_ref.dtype), wr3_ref[...],
                preferred_element_type=jnp.float32) + br3_ref[...], 0.0)

    # Fused torch.cat((out_l, out_r), channel): lane-dense (OW, 2C) block.
    o_ref[:, :C] = out_l.astype(o_ref.dtype)
    o_ref[:, C:] = out_r.astype(o_ref.dtype)


def _pool_fc_kernel(x_ref, w_ref, b_ref, o_ref):
    pooled = jnp.mean(x_ref[...], axis=1)                  # (N, C)
    out = jnp.dot(pooled.astype(w_ref.dtype), w_ref[...],
                  preferred_element_type=jnp.float32) + b_ref[...]
    o_ref[...] = out.astype(o_ref.dtype)


def pool_fc(x, w, b):
    N, HW, C = x.shape
    NC = w.shape[1]
    return pl.pallas_call(
        _pool_fc_kernel,
        grid=(1,),
        in_specs=[
            pl.BlockSpec((N, HW, C), lambda i: (0, 0, 0)),
            pl.BlockSpec((C, NC), lambda i: (0, 0)),
            pl.BlockSpec((1, NC), lambda i: (0, 0)),
        ],
        out_specs=pl.BlockSpec((N, NC), lambda i: (0, 0)),
        out_shape=jax.ShapeDtypeStruct((N, NC), jnp.float32),
    )(x, w, b.reshape(1, NC))


# ---------------------------- fused DSampling -------------------------------

def dsample_block(x_nhwc, blk):
    """One ShuffleNet-v2 DSampling block as a single pallas_call."""
    N, H, W, C = x_nhwc.shape
    OH, OW = H // 2, W // 2
    A, B = OH + 1, OW + 1

    # Padded input split into stride-2 parity planes (cheap XLA view ops):
    # planes[p, q, n, a, b, c] == xpad[n, 2a + p, 2b + q, c]
    xpad = jnp.pad(x_nhwc, ((0, 0), (1, 1), (1, 1), (0, 0)))
    planes = jnp.stack(
        [jnp.stack([xpad[:, p::2, q::2, :] for q in range(2)], axis=0)
         for p in range(2)], axis=0)                       # (2, 2, N, A, B, C)

    # Mask that zeros plane column b=0 of even-parity rows (the left padding
    # column) after conv_r1.
    cm0 = (jnp.arange(B) > 0).astype(jnp.float32).reshape(B, 1)

    def row_spec(kh, q):
        p, a0 = kh & 1, kh // 2
        return pl.BlockSpec(
            (None, None, None, None, B, C),
            lambda n, oh, p=p, q=q, a0=a0: (p, q, n, oh + a0, 0, 0))

    def full_spec(a):
        return pl.BlockSpec(a.shape, lambda n, oh, r=a.ndim: (0,) * r)

    w_args = (blk["wl1"], blk["bl1"], blk["wl2"], blk["bl2"],
              blk["wr1"], blk["br1"], blk["wr2"], blk["br2"],
              blk["wr3"], blk["br3"], cm0)

    out = pl.pallas_call(
        _dsample_kernel,
        grid=(N, OH),
        in_specs=[row_spec(kh, q) for kh in range(3) for q in range(2)]
                 + [full_spec(a) for a in w_args],
        out_specs=pl.BlockSpec((None, None, OW, 2 * C),
                               lambda n, oh: (n, oh, 0, 0)),
        out_shape=jax.ShapeDtypeStruct((N, OH, OW, 2 * C), jnp.float32),
        compiler_params=pltpu.CompilerParams(
            dimension_semantics=("parallel", "arbitrary"),
            vmem_limit_bytes=32 * 1024 * 1024),
    )(*([planes] * 6 + list(w_args)))
    # shuffle_chnls with groups == out_channels is an exact identity -> skip.
    return out


# ------------------------- parameter preparation ----------------------------

def _fold_bn(bn):
    scale = bn["gamma"] * jax.lax.rsqrt(bn["var"] + BN_EPS)
    bias = bn["beta"] - bn["mean"] * scale
    return scale, bias


def prep_params(params):
    """Fold BN into conv weights, build block-diagonal grouped-conv weights,
    cast MXU weights to bf16, pad FC to a 128-lane multiple."""
    prep = {}

    # Stem: 3x3 conv (groups=1) as im2col matmul weight (9*Cin, Cout).
    w = params["conv1"]["w"]                                 # (64, 1, 3, 3)
    scale, bias = _fold_bn(params["conv1"]["bn"])
    cout, cin = w.shape[0], w.shape[1]
    w2 = jnp.transpose(w, (2, 3, 1, 0)).reshape(9 * cin, cout) * scale[None, :]
    prep["conv1_w"] = w2.astype(MXU_DTYPE)
    prep["conv1_b"] = bias

    def prep_pw(layer):                      # 1x1 conv, groups=2, BN folded
        wp, bn = layer["w"], layer["bn"]     # (C, C//2, 1, 1)
        C = wp.shape[0]
        half = C // 2
        scale, bias = _fold_bn(bn)
        w2 = wp[:, :, 0, 0] * scale[:, None]                 # (C, C//2)
        wf = jnp.zeros((C, C), jnp.float32)                  # (Cin, Cout)
        wf = wf.at[:half, :half].set(jnp.transpose(w2[:half, :]))
        wf = wf.at[half:, half:].set(jnp.transpose(w2[half:, :]))
        return wf.astype(MXU_DTYPE), bias.reshape(1, C)

    def prep_dw(layer):                      # 3x3 depthwise, BN scale folded
        wd, bn = layer["w"], layer["bn"]     # (C, 1, 3, 3)
        C = wd.shape[0]
        scale, bias = _fold_bn(bn)
        w9 = jnp.transpose(wd.reshape(C, 9), (1, 0)) * scale[None, :]  # (9, C)
        return w9.reshape(9, 1, C), bias.reshape(1, C)

    for name in ("layer1", "layer2", "layer3"):
        lp = params[name]
        wl1, bl1 = prep_dw(lp["dwconv_l1"])
        wl2, bl2 = prep_pw(lp["conv_l2"])
        wr1, br1 = prep_pw(lp["conv_r1"])
        wr2, br2 = prep_dw(lp["dwconv_r2"])
        wr3, br3 = prep_pw(lp["conv_r3"])
        prep[name] = dict(wl1=wl1, bl1=bl1, wl2=wl2, bl2=bl2,
                          wr1=wr1, br1=br1, wr2=wr2, br2=br2,
                          wr3=wr3, br3=br3)

    fw, fb = params["fc"]["w"], params["fc"]["b"]            # (512, NC), (NC,)
    NC = fw.shape[1]
    ncp = ((NC + 127) // 128) * 128
    prep["fc_w"] = jnp.pad(fw, ((0, 0), (0, ncp - NC))).astype(MXU_DTYPE)
    prep["fc_b"] = jnp.pad(fb, (0, ncp - NC))
    prep["num_classes"] = NC
    return prep


# ------------------------------- forward ------------------------------------

def shufflenet_v2_forward(x_nchw, params):
    prep = prep_params(params)
    x = jnp.transpose(x_nchw, (0, 2, 3, 1))                  # NCHW -> NHWC

    # Stem: 3x3 / stride 1 / pad 1 conv + BN + ReLU via im2col matmul.
    N, H, W, Cin = x.shape
    xp = jnp.pad(x, ((0, 0), (1, 1), (1, 1), (0, 0)))
    patches = [xp[:, kh:kh + H, kw:kw + W, :]
               for kh in range(3) for kw in range(3)]
    pat = jnp.concatenate(patches, axis=-1).reshape(N * H * W, 9 * Cin)
    out = matmul_bias_act(pat, prep["conv1_w"], prep["conv1_b"], relu=True)
    out = out.reshape(N, H, W, -1)

    out = dsample_block(out, prep["layer1"])                 # 64  -> 128
    out = dsample_block(out, prep["layer2"])                 # 128 -> 256
    out = dsample_block(out, prep["layer3"])                 # 256 -> 512

    n, h, w, c = out.shape
    logits = pool_fc(out.reshape(n, h * w, c), prep["fc_w"], prep["fc_b"])
    return logits[:, :prep["num_classes"]]


# ------------------------- deterministic parameters -------------------------

def init_bn(key, c):
    k1, k2, k3, k4 = jax.random.split(key, 4)
    return dict(
        gamma=1.0 + 0.1 * jax.random.normal(k1, (c,), jnp.float32),
        beta=0.1 * jax.random.normal(k2, (c,), jnp.float32),
        mean=0.1 * jax.random.normal(k3, (c,), jnp.float32),
        var=0.5 + jax.random.uniform(k4, (c,), jnp.float32),
    )


def init_bn_conv(key, cin, cout, k, groups):
    kw, kb = jax.random.split(key)
    w = 0.1 * jax.random.normal(kw, (cout, cin // groups, k, k), jnp.float32)
    return dict(w=w, bn=init_bn(kb, cout))


def init_params(key, num_classes=497):
    keys = iter(jax.random.split(key, 32))
    params = {"conv1": init_bn_conv(next(keys), 1, 64, 3, 1)}
    for name, c in (("layer1", 64), ("layer2", 128), ("layer3", 256)):
        params[name] = dict(
            dwconv_l1=init_bn_conv(next(keys), c, c, 3, c),
            conv_l2=init_bn_conv(next(keys), c, c, 1, 2),
            conv_r1=init_bn_conv(next(keys), c, c, 1, 2),
            dwconv_r2=init_bn_conv(next(keys), c, c, 3, c),
            conv_r3=init_bn_conv(next(keys), c, c, 1, 2),
        )
    kfw, kfb = jax.random.split(next(keys))
    params["fc"] = dict(
        w=0.05 * jax.random.normal(kfw, (512, num_classes), jnp.float32),
        b=0.05 * jax.random.normal(kfb, (num_classes,), jnp.float32),
    )
    return params


# ---------------------------------- main -------------------------------------

if __name__ == "__main__":
    key = jax.random.PRNGKey(0)
    kx, kp = jax.random.split(key)
    # PyTorch stem expects 1 input channel: NCHW input (batch=2, 1, 16, 16).
    x = jax.random.normal(kx, (2, 1, 16, 16), jnp.float32)
    params = init_params(kp, num_classes=497)

    fwd = jax.jit(shufflenet_v2_forward)
    out = fwd(x, params)
    jax.block_until_ready(out)
    assert out.shape == (2, 497) and out.dtype == jnp.float32
    print("KERNEL_OK")
</pallas_src>

<mosaic_0001>
module attributes {stable_mosaic.version = 11 : i64} {
  func.func @_matmul_bias_act_kernel(%arg0: i32, %arg1: memref<256x9xf32, #tpu.memory_space<vmem>>, %arg2: memref<9x64xbf16, #tpu.memory_space<vmem>>, %arg3: memref<1x64xf32, #tpu.memory_space<vmem>>, %arg4: memref<256x64xf32, #tpu.memory_space<vmem>>) attributes {dimension_semantics = [#tpu.dimension_semantics<parallel>], iteration_bounds = array<i64: 2>, scalar_prefetch = 0 : i64, scratch_operands = 0 : i64, tpu.core_type = #tpu.core_type<tc>, window_params = [{transform_indices = @transform_0, window_bounds = array<i64: 256, 9>}, {pipeline_mode = #tpu.pipeline_mode<synchronous>, transform_indices = @transform_1, window_bounds = array<i64: 9, 64>}, {pipeline_mode = #tpu.pipeline_mode<synchronous>, transform_indices = @transform_2, window_bounds = array<i64: 1, 64>}, {transform_indices = @transform_3, window_bounds = array<i64: 256, 64>}]} {
    %c0 = arith.constant 0 : index
    %c0_0 = arith.constant 0 : index
    %0 = vector.load %arg1[%c0, %c0_0] : memref<256x9xf32, #tpu.memory_space<vmem>>, vector<256x9xf32>
    %1 = arith.truncf %0 : vector<256x9xf32> to vector<256x9xbf16>
    %c0_1 = arith.constant 0 : index
    %c0_2 = arith.constant 0 : index
    %2 = vector.load %arg2[%c0_1, %c0_2] : memref<9x64xbf16, #tpu.memory_space<vmem>>, vector<9x64xbf16>
    %cst = arith.constant dense<0.000000e+00> : vector<256x64xf32>
    %3 = tpu.matmul %1, %2, %cst {dimension_numbers = #tpu.dot_dimension_numbers<[1], [0], [0], [1], [0, 0, 1, 1], [], []>} : vector<256x9xbf16>, vector<9x64xbf16>, vector<256x64xf32> -> vector<256x64xf32>
    %c0_3 = arith.constant 0 : index
    %c0_4 = arith.constant 0 : index
    %4 = vector.load %arg3[%c0_3, %c0_4] : memref<1x64xf32, #tpu.memory_space<vmem>>, vector<1x64xf32>
    %5 = vector.broadcast %4 : vector<1x64xf32> to vector<256x64xf32>
    %6 = arith.addf %3, %5 : vector<256x64xf32>
    %cst_5 = arith.constant 0.000000e+00 : f32
    %7 = vector.broadcast %cst_5 : f32 to vector<256x64xf32>
    %8 = arith.maximumf %6, %7 : vector<256x64xf32>
    %c0_6 = arith.constant 0 : index
    %c0_7 = arith.constant 0 : index
    %9 = vector.load %arg4[%c0_6, %c0_7] : memref<256x64xf32, #tpu.memory_space<vmem>>, vector<256x64xf32>
    tpu.vector_store %arg4[%c0_6, %c0_7], %8 {strides = array<i32>} : memref<256x64xf32, #tpu.memory_space<vmem>>, vector<256x64xf32>,
    return
  }
  func.func @transform_0(%arg0: i32) -> (i32, i32) {
    %c0_i32 = arith.constant 0 : i32
    %c0_i32_0 = arith.constant 0 : i32
    return %arg0, %c0_i32 : i32, i32
  }
  func.func @transform_1(%arg0: i32) -> (i32, i32) {
    %c0_i32 = arith.constant 0 : i32
    %c0_i32_0 = arith.constant 0 : i32
    %c0_i32_1 = arith.constant 0 : i32
    return %c0_i32, %c0_i32_0 : i32, i32
  }
  func.func @transform_2(%arg0: i32) -> (i32, i32) {
    %c0_i32 = arith.constant 0 : i32
    %c0_i32_0 = arith.constant 0 : i32
    %c0_i32_1 = arith.constant 0 : i32
    return %c0_i32, %c0_i32_0 : i32, i32
  }
  func.func @transform_3(%arg0: i32) -> (i32, i32) {
    %c0_i32 = arith.constant 0 : i32
    %c0_i32_0 = arith.constant 0 : i32
    return %arg0, %c0_i32 : i32, i32
  }
}

module attributes {stable_mosaic.version = 11 : i64} {
  func.func @_dsample_kernel(%arg0: i32, %arg1: i32, %arg2: memref<1x1x1x1x9x64xf32, #tpu.memory_space<vmem>>, %arg3: memref<1x1x1x1x9x64xf32, #tpu.memory_space<vmem>>, %arg4: memref<1x1x1x1x9x64xf32, #tpu.memory_space<vmem>>, %arg5: memref<1x1x1x1x9x64xf32, #tpu.memory_space<vmem>>, %arg6: memref<1x1x1x1x9x64xf32, #tpu.memory_space<vmem>>, %arg7: memref<1x1x1x1x9x64xf32, #tpu.memory_space<vmem>>, %arg8: memref<9x1x64xf32, #tpu.memory_space<vmem>>, %arg9: memref<1x64xf32, #tpu.memory_space<vmem>>, %arg10: memref<64x64xbf16, #tpu.memory_space<vmem>>, %arg11: memref<1x64xf32, #tpu.memory_space<vmem>>, %arg12: memref<64x64xbf16, #tpu.memory_space<vmem>>, %arg13: memref<1x64xf32, #tpu.memory_space<vmem>>, %arg14: memref<9x1x64xf32, #tpu.memory_space<vmem>>, %arg15: memref<1x64xf32, #tpu.memory_space<vmem>>, %arg16: memref<64x64xbf16, #tpu.memory_space<vmem>>, %arg17: memref<1x64xf32, #tpu.memory_space<vmem>>, %arg18: memref<9x1xf32, #tpu.memory_space<vmem>>, %arg19: memref<1x1x8x128xf32, #tpu.memory_space<vmem>>) attributes {dimension_semantics = [#tpu.dimension_semantics<parallel>, #tpu.dimension_semantics<arbitrary>], iteration_bounds = array<i64: 2, 8>, scalar_prefetch = 0 : i64, scratch_operands = 0 : i64, tpu.core_type = #tpu.core_type<tc>, window_params = [{transform_indices = @transform_0, window_bounds = array<i64: 1, 1, 1, 1, 9, 64>}, {transform_indices = @transform_1, window_bounds = array<i64: 1, 1, 1, 1, 9, 64>}, {transform_indices = @transform_2, window_bounds = array<i64: 1, 1, 1, 1, 9, 64>}, {transform_indices = @transform_3, window_bounds = array<i64: 1, 1, 1, 1, 9, 64>}, {transform_indices = @transform_4, window_bounds = array<i64: 1, 1, 1, 1, 9, 64>}, {transform_indices = @transform_5, window_bounds = array<i64: 1, 1, 1, 1, 9, 64>}, {pipeline_mode = #tpu.pipeline_mode<synchronous>, transform_indices = @transform_6, window_bounds = array<i64: 9, 1, 64>}, {pipeline_mode = #tpu.pipeline_mode<synchronous>, transform_indices = @transform_7, window_bounds = array<i64: 1, 64>}, {pipeline_mode = #tpu.pipeline_mode<synchronous>, transform_indices = @transform_8, window_bounds = array<i64: 64, 64>}, {pipeline_mode = #tpu.pipeline_mode<synchronous>, transform_indices = @transform_9, window_bounds = array<i64: 1, 64>}, {pipeline_mode = #tpu.pipeline_mode<synchronous>, transform_indices = @transform_10, window_bounds = array<i64: 64, 64>}, {pipeline_mode = #tpu.pipeline_mode<synchronous>, transform_indices = @transform_11, window_bounds = array<i64: 1, 64>}, {pipeline_mode = #tpu.pipeline_mode<synchronous>, transform_indices = @transform_12, window_bounds = array<i64: 9, 1, 64>}, {pipeline_mode = #tpu.pipeline_mode<synchronous>, transform_indices = @transform_13, window_bounds = array<i64: 1, 64>}, {pipeline_mode = #tpu.pipeline_mode<synchronous>, transform_indices = @transform_14, window_bounds = array<i64: 64, 64>}, {pipeline_mode = #tpu.pipeline_mode<synchronous>, transform_indices = @transform_15, window_bounds = array<i64: 1, 64>}, {pipeline_mode = #tpu.pipeline_mode<synchronous>, transform_indices = @transform_16, window_bounds = array<i64: 9, 1>}, {transform_indices = @transform_17, window_bounds = array<i64: 1, 1, 8, 128>}]} {
    %c0 = arith.constant 0 : index
    %c0_0 = arith.constant 0 : index
    %c0_1 = arith.constant 0 : index
    %c0_2 = arith.constant 0 : index
    %c0_3 = arith.constant 0 : index
    %c0_4 = arith.constant 0 : index
    %0 = vector.load %arg2[%c0, %c0_0, %c0_1, %c0_2, %c0_3, %c0_4] : memref<1x1x1x1x9x64xf32, #tpu.memory_space<vmem>>, vector<1x1x1x1x9x64xf32>
    %1 = vector.shape_cast %0 : vector<1x1x1x1x9x64xf32> to vector<9x64xf32>
    %c0_5 = arith.constant 0 : index
    %c0_6 = arith.constant 0 : index
    %c0_7 = arith.constant 0 : index
    %c0_8 = arith.constant 0 : index
    %c0_9 = arith.constant 0 : index
    %c0_10 = arith.constant 0 : index
    %2 = vector.load %arg3[%c0_5, %c0_6, %c0_7, %c0_8, %c0_9, %c0_10] : memref<1x1x1x1x9x64xf32, #tpu.memory_space<vmem>>, vector<1x1x1x1x9x64xf32>
    %3 = vector.shape_cast %2 : vector<1x1x1x1x9x64xf32> to vector<9x64xf32>
    %c0_11 = arith.constant 0 : index
    %c0_12 = arith.constant 0 : index
    %c0_13 = arith.constant 0 : index
    %c0_14 = arith.constant 0 : index
    %c0_15 = arith.constant 0 : index
    %c0_16 = arith.constant 0 : index
    %4 = vector.load %arg4[%c0_11, %c0_12, %c0_13, %c0_14, %c0_15, %c0_16] : memref<1x1x1x1x9x64xf32, #tpu.memory_space<vmem>>, vector<1x1x1x1x9x64xf32>
    %5 = vector.shape_cast %4 : vector<1x1x1x1x9x64xf32> to vector<9x64xf32>
    %c0_17 = arith.constant 0 : index
    %c0_18 = arith.constant 0 : index
    %c0_19 = arith.constant 0 : index
    %c0_20 = arith.constant 0 : index
    %c0_21 = arith.constant 0 : index
    %c0_22 = arith.constant 0 : index
    %6 = vector.load %arg5[%c0_17, %c0_18, %c0_19, %c0_20, %c0_21, %c0_22] : memref<1x1x1x1x9x64xf32, #tpu.memory_space<vmem>>, vector<1x1x1x1x9x64xf32>
    %7 = vector.shape_cast %6 : vector<1x1x1x1x9x64xf32> to vector<9x64xf32>
    %c0_23 = arith.constant 0 : index
    %c0_24 = arith.constant 0 : index
    %c0_25 = arith.constant 0 : index
    %c0_26 = arith.constant 0 : index
    %c0_27 = arith.constant 0 : index
    %c0_28 = arith.constant 0 : index
    %8 = vector.load %arg6[%c0_23, %c0_24, %c0_25, %c0_26, %c0_27, %c0_28] : memref<1x1x1x1x9x64xf32, #tpu.memory_space<vmem>>, vector<1x1x1x1x9x64xf32>
    %9 = vector.shape_cast %8 : vector<1x1x1x1x9x64xf32> to vector<9x64xf32>
    %c0_29 = arith.constant 0 : index
    %c0_30 = arith.constant 0 : index
    %c0_31 = arith.constant 0 : index
    %c0_32 = arith.constant 0 : index
    %c0_33 = arith.constant 0 : index
    %c0_34 = arith.constant 0 : index
    %10 = vector.load %arg7[%c0_29, %c0_30, %c0_31, %c0_32, %c0_33, %c0_34] : memref<1x1x1x1x9x64xf32, #tpu.memory_space<vmem>>, vector<1x1x1x1x9x64xf32>
    %11 = vector.shape_cast %10 : vector<1x1x1x1x9x64xf32> to vector<9x64xf32>
    %c0_35 = arith.constant 0 : index
    %c0_36 = arith.constant 0 : index
    %12 = vector.load %arg18[%c0_35, %c0_36] : memref<9x1xf32, #tpu.memory_space<vmem>>, vector<9x1xf32>
    %c0_i32 = arith.constant 0 : i32
    %13 = arith.cmpi eq, %arg1, %c0_i32 : i32
    %cst = arith.constant 0.000000e+00 : f32
    %cst_37 = arith.constant 1.000000e+00 : f32
    %14 = arith.select %13, %cst, %cst_37 : f32
    %15 = arith.truncf %1 : vector<9x64xf32> to vector<9x64xbf16>
    %c0_38 = arith.constant 0 : index
    %c0_39 = arith.constant 0 : index
    %16 = vector.load %arg12[%c0_38, %c0_39] : memref<64x64xbf16, #tpu.memory_space<vmem>>, vector<64x64xbf16>
    %cst_40 = arith.constant dense<0.000000e+00> : vector<9x64xf32>
    %17 = tpu.matmul %15, %16, %cst_40 {dimension_numbers = #tpu.dot_dimension_numbers<[1], [0], [0], [1], [0, 0, 1, 1], [], []>} : vector<9x64xbf16>, vector<64x64xbf16>, vector<9x64xf32> -> vector<9x64xf32>
    %c0_41 = arith.constant 0 : index
    %c0_42 = arith.constant 0 : index
    %18 = vector.load %arg13[%c0_41, %c0_42] : memref<1x64xf32, #tpu.memory_space<vmem>>, vector<1x64xf32>
    %19 = vector.broadcast %18 : vector<1x64xf32> to vector<9x64xf32>
    %20 = arith.addf %17, %19 : vector<9x64xf32>
    %cst_43 = arith.constant 0.000000e+00 : f32
    %21 = vector.broadcast %cst_43 : f32 to vector<9x64xf32>
    %22 = arith.maximumf %20, %21 : vector<9x64xf32>
    %23 = vector.broadcast %12 : vector<9x1xf32> to vector<9x64xf32>
    %24 = arith.mulf %22, %23 : vector<9x64xf32>
    %25 = vector.broadcast %14 : f32 to vector<9x64xf32>
    %26 = arith.mulf %24, %25 : vector<9x64xf32>
    %27 = arith.truncf %3 : vector<9x64xf32> to vector<9x64xbf16>
    %c0_44 = arith.constant 0 : index
    %c0_45 = arith.constant 0 : index
    %28 = vector.load %arg12[%c0_44, %c0_45] : memref<64x64xbf16, #tpu.memory_space<vmem>>, vector<64x64xbf16>
    %cst_46 = arith.constant dense<0.000000e+00> : vector<9x64xf32>
    %29 = tpu.matmul %27, %28, %cst_46 {dimension_numbers = #tpu.dot_dimension_numbers<[1], [0], [0], [1], [0, 0, 1, 1], [], []>} : vector<9x64xbf16>, vector<64x64xbf16>, vector<9x64xf32> -> vector<9x64xf32>
    %c0_47 = arith.constant 0 : index
    %c0_48 = arith.constant 0 : index
    %30 = vector.load %arg13[%c0_47, %c0_48] : memref<1x64xf32, #tpu.memory_space<vmem>>, vector<1x64xf32>
    %31 = vector.broadcast %30 : vector<1x64xf32> to vector<9x64xf32>
    %32 = arith.addf %29, %31 : vector<9x64xf32>
    %cst_49 = arith.constant 0.000000e+00 : f32
    %33 = vector.broadcast %cst_49 : f32 to vector<9x64xf32>
    %34 = arith.maximumf %32, %33 : vector<9x64xf32>
    %35 = vector.broadcast %14 : f32 to vector<9x64xf32>
    %36 = arith.mulf %34, %35 : vector<9x64xf32>
    %37 = arith.truncf %5 : vector<9x64xf32> to vector<9x64xbf16>
    %c0_50 = arith.constant 0 : index
    %c0_51 = arith.constant 0 : index
    %38 = vector.load %arg12[%c0_50, %c0_51] : memref<64x64xbf16, #tpu.memory_space<vmem>>, vector<64x64xbf16>
    %cst_52 = arith.constant dense<0.000000e+00> : vector<9x64xf32>
    %39 = tpu.matmul %37, %38, %cst_52 {dimension_numbers = #tpu.dot_dimension_numbers<[1], [0], [0], [1], [0, 0, 1, 1], [], []>} : vector<9x64xbf16>, vector<64x64xbf16>, vector<9x64xf32> -> vector<9x64xf32>
    %c0_53 = arith.constant 0 : index
    %c0_54 = arith.constant 0 : index
    %40 = vector.load %arg13[%c0_53, %c0_54] : memref<1x64xf32, #tpu.memory_space<vmem>>, vector<1x64xf32>
    %41 = vector.broadcast %40 : vector<1x64xf32> to vector<9x64xf32>
    %42 = arith.addf %39, %41 : vector<9x64xf32>
    %cst_55 = arith.constant 0.000000e+00 : f32
    %43 = vector.broadcast %cst_55 : f32 to vector<9x64xf32>
    %44 = arith.maximumf %42, %43 : vector<9x64xf32>
    %45 = vector.broadcast %12 : vector<9x1xf32> to vector<9x64xf32>
    %46 = arith.mulf %44, %45 : vector<9x64xf32>
    %47 = arith.truncf %7 : vector<9x64xf32> to vector<9x64xbf16>
    %c0_56 = arith.constant 0 : index
    %c0_57 = arith.constant 0 : index
    %48 = vector.load %arg12[%c0_56, %c0_57] : memref<64x64xbf16, #tpu.memory_space<vmem>>, vector<64x64xbf16>
    %cst_58 = arith.constant dense<0.000000e+00> : vector<9x64xf32>
    %49 = tpu.matmul %47, %48, %cst_58 {dimension_numbers = #tpu.dot_dimension_numbers<[1], [0], [0], [1], [0, 0, 1, 1], [], []>} : vector<9x64xbf16>, vector<64x64xbf16>, vector<9x64xf32> -> vector<9x64xf32>
    %c0_59 = arith.constant 0 : index
    %c0_60 = arith.constant 0 : index
    %50 = vector.load %arg13[%c0_59, %c0_60] : memref<1x64xf32, #tpu.memory_space<vmem>>, vector<1x64xf32>
    %51 = vector.broadcast %50 : vector<1x64xf32> to vector<9x64xf32>
    %52 = arith.addf %49, %51 : vector<9x64xf32>
    %cst_61 = arith.constant 0.000000e+00 : f32
    %53 = vector.broadcast %cst_61 : f32 to vector<9x64xf32>
    %54 = arith.maximumf %52, %53 : vector<9x64xf32>
    %55 = arith.truncf %9 : vector<9x64xf32> to vector<9x64xbf16>
    %c0_62 = arith.constant 0 : index
    %c0_63 = arith.constant 0 : index
    %56 = vector.load %arg12[%c0_62, %c0_63] : memref<64x64xbf16, #tpu.memory_space<vmem>>, vector<64x64xbf16>
    %cst_64 = arith.constant dense<0.000000e+00> : vector<9x64xf32>
    %57 = tpu.matmul %55, %56, %cst_64 {dimension_numbers = #tpu.dot_dimension_numbers<[1], [0], [0], [1], [0, 0, 1, 1], [], []>} : vector<9x64xbf16>, vector<64x64xbf16>, vector<9x64xf32> -> vector<9x64xf32>
    %c0_65 = arith.constant 0 : index
    %c0_66 = arith.constant 0 : index
    %58 = vector.load %arg13[%c0_65, %c0_66] : memref<1x64xf32, #tpu.memory_space<vmem>>, vector<1x64xf32>
    %59 = vector.broadcast %58 : vector<1x64xf32> to vector<9x64xf32>
    %60 = arith.addf %57, %59 : vector<9x64xf32>
    %cst_67 = arith.constant 0.000000e+00 : f32
    %61 = vector.broadcast %cst_67 : f32 to vector<9x64xf32>
    %62 = arith.maximumf %60, %61 : vector<9x64xf32>
    %63 = vector.broadcast %12 : vector<9x1xf32> to vector<9x64xf32>
    %64 = arith.mulf %62, %63 : vector<9x64xf32>
    %65 = arith.truncf %11 : vector<9x64xf32> to vector<9x64xbf16>
    %c0_68 = arith.constant 0 : index
    %c0_69 = arith.constant 0 : index
    %66 = vector.load %arg12[%c0_68, %c0_69] : memref<64x64xbf16, #tpu.memory_space<vmem>>, vector<64x64xbf16>
    %cst_70 = arith.constant dense<0.000000e+00> : vector<9x64xf32>
    %67 = tpu.matmul %65, %66, %cst_70 {dimension_numbers = #tpu.dot_dimension_numbers<[1], [0], [0], [1], [0, 0, 1, 1], [], []>} : vector<9x64xbf16>, vector<64x64xbf16>, vector<9x64xf32> -> vector<9x64xf32>
    %c0_71 = arith.constant 0 : index
    %c0_72 = arith.constant 0 : index
    %68 = vector.load %arg13[%c0_71, %c0_72] : memref<1x64xf32, #tpu.memory_space<vmem>>, vector<1x64xf32>
    %69 = vector.broadcast %68 : vector<1x64xf32> to vector<9x64xf32>
    %70 = arith.addf %67, %69 : vector<9x64xf32>
    %cst_73 = arith.constant 0.000000e+00 : f32
    %71 = vector.broadcast %cst_73 : f32 to vector<9x64xf32>
    %72 = arith.maximumf %70, %71 : vector<9x64xf32>
    %73 = vector.extract_strided_slice %1 {offsets = [0, 0], sizes = [8, 64], strides = [1, 1]} : vector<9x64xf32> to vector<8x64xf32>
    %c0_74 = arith.constant 0 : index
    %c0_75 = arith.constant 0 : index
    %c0_76 = arith.constant 0 : index
    %74 = vector.load %arg8[%c0_74, %c0_75, %c0_76] : memref<9x1x64xf32, #tpu.memory_space<vmem>>, vector<1x1x64xf32>
    %75 = vector.shape_cast %74 : vector<1x1x64xf32> to vector<1x64xf32>
    %76 = vector.broadcast %75 : vector<1x64xf32> to vector<8x64xf32>
    %77 = arith.mulf %73, %76 : vector<8x64xf32>
    %78 = vector.extract_strided_slice %26 {offsets = [0, 0], sizes = [8, 64], strides = [1, 1]} : vector<9x64xf32> to vector<8x64xf32>
    %c0_77 = arith.constant 0 : index
    %c0_78 = arith.constant 0 : index
    %c0_79 = arith.constant 0 : index
    %79 = vector.load %arg14[%c0_77, %c0_78, %c0_79] : memref<9x1x64xf32, #tpu.memory_space<vmem>>, vector<1x1x64xf32>
    %80 = vector.shape_cast %79 : vector<1x1x64xf32> to vector<1x64xf32>
    %81 = vector.broadcast %80 : vector<1x64xf32> to vector<8x64xf32>
    %82 = arith.mulf %78, %81 : vector<8x64xf32>
    %83 = vector.extract_strided_slice %3 {offsets = [0, 0], sizes = [8, 64], strides = [1, 1]} : vector<9x64xf32> to vector<8x64xf32>
    %c1 = arith.constant 1 : index
    %c0_80 = arith.constant 0 : index
    %c0_81 = arith.constant 0 : index
    %84 = vector.load %arg8[%c1, %c0_80, %c0_81] : memref<9x1x64xf32, #tpu.memory_space<vmem>>, vector<1x1x64xf32>
    %85 = vector.shape_cast %84 : vector<1x1x64xf32> to vector<1x64xf32>
    %86 = vector.broadcast %85 : vector<1x64xf32> to vector<8x64xf32>
    %87 = arith.mulf %83, %86 : vector<8x64xf32>
    %88 = vector.extract_strided_slice %36 {offsets = [0, 0], sizes = [8, 64], strides = [1, 1]} : vector<9x64xf32> to vector<8x64xf32>
    %c1_82 = arith.constant 1 : index
    %c0_83 = arith.constant 0 : index
    %c0_84 = arith.constant 0 : index
    %89 = vector.load %arg14[%c1_82, %c0_83, %c0_84] : memref<9x1x64xf32, #tpu.memory_space<vmem>>, vector<1x1x64xf32>
    %90 = vector.shape_cast %89 : vector<1x1x64xf32> to vector<1x64xf32>
    %91 = vector.broadcast %90 : vector<1x64xf32> to vector<8x64xf32>
    %92 = arith.mulf %88, %91 : vector<8x64xf32>
    %93 = vector.extract_strided_slice %1 {offsets = [1, 0], sizes = [8, 64], strides = [1, 1]} : vector<9x64xf32> to vector<8x64xf32>
    %c2 = arith.constant 2 : index
    %c0_85 = arith.constant 0 : index
    %c0_86 = arith.constant 0 : index
    %94 = vector.load %arg8[%c2, %c0_85, %c0_86] : memref<9x1x64xf32, #tpu.memory_space<vmem>>, vector<1x1x64xf32>
    %95 = vector.shape_cast %94 : vector<1x1x64xf32> to vector<1x64xf32>
    %96 = vector.broadcast %95 : vector<1x64xf32> to vector<8x64xf32>
    %97 = arith.mulf %93, %96 : vector<8x64xf32>
    %98 = vector.extract_strided_slice %26 {offsets = [1, 0], sizes = [8, 64], strides = [1, 1]} : vector<9x64xf32> to vector<8x64xf32>
    %c2_87 = arith.constant 2 : index
    %c0_88 = arith.constant 0 : index
    %c0_89 = arith.constant 0 : index
    %99 = vector.load %arg14[%c2_87, %c0_88, %c0_89] : memref<9x1x64xf32, #tpu.memory_space<vmem>>, vector<1x1x64xf32>
    %100 = vector.shape_cast %99 : vector<1x1x64xf32> to vector<1x64xf32>
    %101 = vector.broadcast %100 : vector<1x64xf32> to vector<8x64xf32>
    %102 = arith.mulf %98, %101 : vector<8x64xf32>
    %103 = vector.extract_strided_slice %5 {offsets = [0, 0], sizes = [8, 64], strides = [1, 1]} : vector<9x64xf32> to vector<8x64xf32>
    %c3 = arith.constant 3 : index
    %c0_90 = arith.constant 0 : index
    %c0_91 = arith.constant 0 : index
    %104 = vector.load %arg8[%c3, %c0_90, %c0_91] : memref<9x1x64xf32, #tpu.memory_space<vmem>>, vector<1x1x64xf32>
    %105 = vector.shape_cast %104 : vector<1x1x64xf32> to vector<1x64xf32>
    %106 = vector.broadcast %105 : vector<1x64xf32> to vector<8x64xf32>
    %107 = arith.mulf %103, %106 : vector<8x64xf32>
    %108 = vector.extract_strided_slice %46 {offsets = [0, 0], sizes = [8, 64], strides = [1, 1]} : vector<9x64xf32> to vector<8x64xf32>
    %c3_92 = arith.constant 3 : index
    %c0_93 = arith.constant 0 : index
    %c0_94 = arith.constant 0 : index
    %109 = vector.load %arg14[%c3_92, %c0_93, %c0_94] : memref<9x1x64xf32, #tpu.memory_space<vmem>>, vector<1x1x64xf32>
    %110 = vector.shape_cast %109 : vector<1x1x64xf32> to vector<1x64xf32>
    %111 = vector.broadcast %110 : vector<1x64xf32> to vector<8x64xf32>
    %112 = arith.mulf %108, %111 : vector<8x64xf32>
    %113 = vector.extract_strided_slice %7 {offsets = [0, 0], sizes = [8, 64], strides = [1, 1]} : vector<9x64xf32> to vector<8x64xf32>
    %c4 = arith.constant 4 : index
    %c0_95 = arith.constant 0 : index
    %c0_96 = arith.constant 0 : index
    %114 = vector.load %arg8[%c4, %c0_95, %c0_96] : memref<9x1x64xf32, #tpu.memory_space<vmem>>, vector<1x1x64xf32>
    %115 = vector.shape_cast %114 : vector<1x1x64xf32> to vector<1x64xf32>
    %116 = vector.broadcast %115 : vector<1x64xf32> to vector<8x64xf32>
    %117 = arith.mulf %113, %116 : vector<8x64xf32>
    %118 = vector.extract_strided_slice %54 {offsets = [0, 0], sizes = [8, 64], strides = [1, 1]} : vector<9x64xf32> to vector<8x64xf32>
    %c4_97 = arith.constant 4 : index
    %c0_98 = arith.constant 0 : index
    %c0_99 = arith.constant 0 : index
    %119 = vector.load %arg14[%c4_97, %c0_98, %c0_99] : memref<9x1x64xf32, #tpu.memory_space<vmem>>, vector<1x1x64xf32>
    %120 = vector.shape_cast %119 : vector<1x1x64xf32> to vector<1x64xf32>
    %121 = vector.broadcast %120 : vector<1x64xf32> to vector<8x64xf32>
    %122 = arith.mulf %118, %121 : vector<8x64xf32>
    %123 = vector.extract_strided_slice %5 {offsets = [1, 0], sizes = [8, 64], strides = [1, 1]} : vector<9x64xf32> to vector<8x64xf32>
    %c5 = arith.constant 5 : index
    %c0_100 = arith.constant 0 : index
    %c0_101 = arith.constant 0 : index
    %124 = vector.load %arg8[%c5, %c0_100, %c0_101] : memref<9x1x64xf32, #tpu.memory_space<vmem>>, vector<1x1x64xf32>
    %125 = vector.shape_cast %124 : vector<1x1x64xf32> to vector<1x64xf32>
    %126 = vector.broadcast %125 : vector<1x64xf32> to vector<8x64xf32>
    %127 = arith.mulf %123, %126 : vector<8x64xf32>
    %128 = vector.extract_strided_slice %46 {offsets = [1, 0], sizes = [8, 64], strides = [1, 1]} : vector<9x64xf32> to vector<8x64xf32>
    %c5_102 = arith.constant 5 : index
    %c0_103 = arith.constant 0 : index
    %c0_104 = arith.constant 0 : index
    %129 = vector.load %arg14[%c5_102, %c0_103, %c0_104] : memref<9x1x64xf32, #tpu.memory_space<vmem>>, vector<1x1x64xf32>
    %130 = vector.shape_cast %129 : vector<1x1x64xf32> to vector<1x64xf32>
    %131 = vector.broadcast %130 : vector<1x64xf32> to vector<8x64xf32>
    %132 = arith.mulf %128, %131 : vector<8x64xf32>
    %133 = vector.extract_strided_slice %9 {offsets = [0, 0], sizes = [8, 64], strides = [1, 1]} : vector<9x64xf32> to vector<8x64xf32>
    %c6 = arith.constant 6 : index
    %c0_105 = arith.constant 0 : index
    %c0_106 = arith.constant 0 : index
    %134 = vector.load %arg8[%c6, %c0_105, %c0_106] : memref<9x1x64xf32, #tpu.memory_space<vmem>>, vector<1x1x64xf32>
    %135 = vector.shape_cast %134 : vector<1x1x64xf32> to vector<1x64xf32>
    %136 = vector.broadcast %135 : vector<1x64xf32> to vector<8x64xf32>
    %137 = arith.mulf %133, %136 : vector<8x64xf32>
    %138 = vector.extract_strided_slice %64 {offsets = [0, 0], sizes = [8, 64], strides = [1, 1]} : vector<9x64xf32> to vector<8x64xf32>
    %c6_107 = arith.constant 6 : index
    %c0_108 = arith.constant 0 : index
    %c0_109 = arith.constant 0 : index
    %139 = vector.load %arg14[%c6_107, %c0_108, %c0_109] : memref<9x1x64xf32, #tpu.memory_space<vmem>>, vector<1x1x64xf32>
    %140 = vector.shape_cast %139 : vector<1x1x64xf32> to vector<1x64xf32>
    %141 = vector.broadcast %140 : vector<1x64xf32> to vector<8x64xf32>
    %142 = arith.mulf %138, %141 : vector<8x64xf32>
    %143 = vector.extract_strided_slice %11 {offsets = [0, 0], sizes = [8, 64], strides = [1, 1]} : vector<9x64xf32> to vector<8x64xf32>
    %c7 = arith.constant 7 : index
    %c0_110 = arith.constant 0 : index
    %c0_111 = arith.constant 0 : index
    %144 = vector.load %arg8[%c7, %c0_110, %c0_111] : memref<9x1x64xf32, #tpu.memory_space<vmem>>, vector<1x1x64xf32>
    %145 = vector.shape_cast %144 : vector<1x1x64xf32> to vector<1x64xf32>
    %146 = vector.broadcast %145 : vector<1x64xf32> to vector<8x64xf32>
    %147 = arith.mulf %143, %146 : vector<8x64xf32>
    %148 = vector.extract_strided_slice %72 {offsets = [0, 0], sizes = [8, 64], strides = [1, 1]} : vector<9x64xf32> to vector<8x64xf32>
    %c7_112 = arith.constant 7 : index
    %c0_113 = arith.constant 0 : index
    %c0_114 = arith.constant 0 : index
    %149 = vector.load %arg14[%c7_112, %c0_113, %c0_114] : memref<9x1x64xf32, #tpu.memory_space<vmem>>, vector<1x1x64xf32>
    %150 = vector.shape_cast %149 : vector<1x1x64xf32> to vector<1x64xf32>
    %151 = vector.broadcast %150 : vector<1x64xf32> to vector<8x64xf32>
    %152 = arith.mulf %148, %151 : vector<8x64xf32>
    %153 = vector.extract_strided_slice %9 {offsets = [1, 0], sizes = [8, 64], strides = [1, 1]} : vector<9x64xf32> to vector<8x64xf32>
    %c8 = arith.constant 8 : index
    %c0_115 = arith.constant 0 : index
    %c0_116 = arith.constant 0 : index
    %154 = vector.load %arg8[%c8, %c0_115, %c0_116] : memref<9x1x64xf32, #tpu.memory_space<vmem>>, vector<1x1x64xf32>
    %155 = vector.shape_cast %154 : vector<1x1x64xf32> to vector<1x64xf32>
    %156 = vector.broadcast %155 : vector<1x64xf32> to vector<8x64xf32>
    %157 = arith.mulf %153, %156 : vector<8x64xf32>
    %158 = vector.extract_strided_slice %64 {offsets = [1, 0], sizes = [8, 64], strides = [1, 1]} : vector<9x64xf32> to vector<8x64xf32>
    %c8_117 = arith.constant 8 : index
    %c0_118 = arith.constant 0 : index
    %c0_119 = arith.constant 0 : index
    %159 = vector.load %arg14[%c8_117, %c0_118, %c0_119] : memref<9x1x64xf32, #tpu.memory_space<vmem>>, vector<1x1x64xf32>
    %160 = vector.shape_cast %159 : vector<1x1x64xf32> to vector<1x64xf32>
    %161 = vector.broadcast %160 : vector<1x64xf32> to vector<8x64xf32>
    %162 = arith.mulf %158, %161 : vector<8x64xf32>
    %163 = arith.addf %77, %87 : vector<8x64xf32>
    %164 = arith.addf %97, %107 : vector<8x64xf32>
    %165 = arith.addf %117, %127 : vector<8x64xf32>
    %166 = arith.addf %137, %147 : vector<8x64xf32>
    %167 = arith.addf %163, %164 : vector<8x64xf32>
    %168 = arith.addf %165, %166 : vector<8x64xf32>
    %169 = arith.addf %167, %168 : vector<8x64xf32>
    %170 = arith.addf %169, %157 : vector<8x64xf32>
    %c0_120 = arith.constant 0 : index
    %c0_121 = arith.constant 0 : index
    %171 = vector.load %arg9[%c0_120, %c0_121] : memref<1x64xf32, #tpu.memory_space<vmem>>, vector<1x64xf32>
    %172 = vector.broadcast %171 : vector<1x64xf32> to vector<8x64xf32>
    %173 = arith.addf %170, %172 : vector<8x64xf32>
    %174 = arith.addf %82, %92 : vector<8x64xf32>
    %175 = arith.addf %102, %112 : vector<8x64xf32>
    %176 = arith.addf %122, %132 : vector<8x64xf32>
    %177 = arith.addf %142, %152 : vector<8x64xf32>
    %178 = arith.addf %174, %175 : vector<8x64xf32>
    %179 = arith.addf %176, %177 : vector<8x64xf32>
    %180 = arith.addf %178, %179 : vector<8x64xf32>
    %181 = arith.addf %180, %162 : vector<8x64xf32>
    %c0_122 = arith.constant 0 : index
    %c0_123 = arith.constant 0 : index
    %182 = vector.load %arg15[%c0_122, %c0_123] : memref<1x64xf32, #tpu.memory_space<vmem>>, vector<1x64xf32>
    %183 = vector.broadcast %182 : vector<1x64xf32> to vector<8x64xf32>
    %184 = arith.addf %181, %183 : vector<8x64xf32>
    %185 = arith.truncf %173 : vector<8x64xf32> to vector<8x64xbf16>
    %c0_124 = arith.constant 0 : index
    %c0_125 = arith.constant 0 : index
    %186 = vector.load %arg10[%c0_124, %c0_125] : memref<64x64xbf16, #tpu.memory_space<vmem>>, vector<64x64xbf16>
    %cst_126 = arith.constant dense<0.000000e+00> : vector<8x64xf32>
    %187 = tpu.matmul %185, %186, %cst_126 {dimension_numbers = #tpu.dot_dimension_numbers<[1], [0], [0], [1], [0, 0, 1, 1], [], []>} : vector<8x64xbf16>, vector<64x64xbf16>, vector<8x64xf32> -> vector<8x64xf32>
    %c0_127 = arith.constant 0 : index
    %c0_128 = arith.constant 0 : index
    %188 = vector.load %arg11[%c0_127, %c0_128] : memref<1x64xf32, #tpu.memory_space<vmem>>, vector<1x64xf32>
    %189 = vector.broadcast %188 : vector<1x64xf32> to vector<8x64xf32>
    %190 = arith.addf %187, %189 : vector<8x64xf32>
    %cst_129 = arith.constant 0.000000e+00 : f32
    %191 = vector.broadcast %cst_129 : f32 to vector<8x64xf32>
    %192 = arith.maximumf %190, %191 : vector<8x64xf32>
    %193 = arith.truncf %184 : vector<8x64xf32> to vector<8x64xbf16>
    %c0_130 = arith.constant 0 : index
    %c0_131 = arith.constant 0 : index
    %194 = vector.load %arg16[%c0_130, %c0_131] : memref<64x64xbf16, #tpu.memory_space<vmem>>, vector<64x64xbf16>
    %cst_132 = arith.constant dense<0.000000e+00> : vector<8x64xf32>
    %195 = tpu.matmul %193, %194, %cst_132 {dimension_numbers = #tpu.dot_dimension_numbers<[1], [0], [0], [1], [0, 0, 1, 1], [], []>} : vector<8x64xbf16>, vector<64x64xbf16>, vector<8x64xf32> -> vector<8x64xf32>
    %c0_133 = arith.constant 0 : index
    %c0_134 = arith.constant 0 : index
    %196 = vector.load %arg17[%c0_133, %c0_134] : memref<1x64xf32, #tpu.memory_space<vmem>>, vector<1x64xf32>
    %197 = vector.broadcast %196 : vector<1x64xf32> to vector<8x64xf32>
    %198 = arith.addf %195, %197 : vector<8x64xf32>
    %cst_135 = arith.constant 0.000000e+00 : f32
    %199 = vector.broadcast %cst_135 : f32 to vector<8x64xf32>
    %200 = arith.maximumf %198, %199 : vector<8x64xf32>
    %c0_136 = arith.constant 0 : index
    %c0_137 = arith.constant 0 : index
    %c0_138 = arith.constant 0 : index
    %c0_139 = arith.constant 0 : index
    %201 = vector.load %arg19[%c0_136, %c0_137, %c0_138, %c0_139] : memref<1x1x8x128xf32, #tpu.memory_space<vmem>>, vector<1x1x8x64xf32>
    %202 = vector.shape_cast %201 : vector<1x1x8x64xf32> to vector<8x64xf32>
    %203 = vector.shape_cast %192 : vector<8x64xf32> to vector<1x1x8x64xf32>
    tpu.vector_store %arg19[%c0_136, %c0_137, %c0_138, %c0_139], %203 {strides = array<i32>} : memref<1x1x8x128xf32, #tpu.memory_space<vmem>>, vector<1x1x8x64xf32>,
    %c0_140 = arith.constant 0 : index
    %c0_141 = arith.constant 0 : index
    %c0_142 = arith.constant 0 : index
    %c64 = arith.constant 64 : index
    %204 = vector.load %arg19[%c0_140, %c0_141, %c0_142, %c64] : memref<1x1x8x128xf32, #tpu.memory_space<vmem>>, vector<1x1x8x64xf32>
    %205 = vector.shape_cast %204 : vector<1x1x8x64xf32> to vector<8x64xf32>
    %206 = vector.shape_cast %200 : vector<8x64xf32> to vector<1x1x8x64xf32>
    tpu.vector_store %arg19[%c0_140, %c0_141, %c0_142, %c64], %206 {strides = array<i32>} : memref<1x1x8x128xf32, #tpu.memory_space<vmem>>, vector<1x1x8x64xf32>,
    return
  }
  func.func @transform_0(%arg0: i32, %arg1: i32) -> (i32, i32, i32, i32, i32, i32) {
    %c0_i32 = arith.constant 0 : i32
    %0 = arith.addi %arg1, %c0_i32 : i32
    %c0_i32_0 = arith.constant 0 : i32
    %c0_i32_1 = arith.constant 0 : i32
    %c0_i32_2 = arith.constant 0 : i32
    %c0_i32_3 = arith.constant 0 : i32
    %c0_i32_4 = arith.constant 0 : i32
    return %c0_i32_0, %c0_i32_1, %arg0, %0, %c0_i32_2, %c0_i32_3 : i32, i32, i32, i32, i32, i32
  }
  func.func @transform_1(%arg0: i32, %arg1: i32) -> (i32, i32, i32, i32, i32, i32) {
    %c0_i32 = arith.constant 0 : i32
    %0 = arith.addi %arg1, %c0_i32 : i32
    %c0_i32_0 = arith.constant 0 : i32
    %c1_i32 = arith.constant 1 : i32
    %c0_i32_1 = arith.constant 0 : i32
    %c0_i32_2 = arith.constant 0 : i32
    %c0_i32_3 = arith.constant 0 : i32
    return %c0_i32_0, %c1_i32, %arg0, %0, %c0_i32_1, %c0_i32_2 : i32, i32, i32, i32, i32, i32
  }
  func.func @transform_2(%arg0: i32, %arg1: i32) -> (i32, i32, i32, i32, i32, i32) {
    %c0_i32 = arith.constant 0 : i32
    %0 = arith.addi %arg1, %c0_i32 : i32
    %c1_i32 = arith.constant 1 : i32
    %c0_i32_0 = arith.constant 0 : i32
    %c0_i32_1 = arith.constant 0 : i32
    %c0_i32_2 = arith.constant 0 : i32
    %c0_i32_3 = arith.constant 0 : i32
    return %c1_i32, %c0_i32_0, %arg0, %0, %c0_i32_1, %c0_i32_2 : i32, i32, i32, i32, i32, i32
  }
  func.func @transform_3(%arg0: i32, %arg1: i32) -> (i32, i32, i32, i32, i32, i32) {
    %c0_i32 = arith.constant 0 : i32
    %0 = arith.addi %arg1, %c0_i32 : i32
    %c1_i32 = arith.constant 1 : i32
    %c1_i32_0 = arith.constant 1 : i32
    %c0_i32_1 = arith.constant 0 : i32
    %c0_i32_2 = arith.constant 0 : i32
    %c0_i32_3 = arith.constant 0 : i32
    return %c1_i32, %c1_i32_0, %arg0, %0, %c0_i32_1, %c0_i32_2 : i32, i32, i32, i32, i32, i32
  }
  func.func @transform_4(%arg0: i32, %arg1: i32) -> (i32, i32, i32, i32, i32, i32) {
    %c1_i32 = arith.constant 1 : i32
    %0 = arith.addi %arg1, %c1_i32 : i32
    %c0_i32 = arith.constant 0 : i32
    %c0_i32_0 = arith.constant 0 : i32
    %c0_i32_1 = arith.constant 0 : i32
    %c0_i32_2 = arith.constant 0 : i32
    %c0_i32_3 = arith.constant 0 : i32
    return %c0_i32, %c0_i32_0, %arg0, %0, %c0_i32_1, %c0_i32_2 : i32, i32, i32, i32, i32, i32
  }
  func.func @transform_5(%arg0: i32, %arg1: i32) -> (i32, i32, i32, i32, i32, i32) {
    %c1_i32 = arith.constant 1 : i32
    %0 = arith.addi %arg1, %c1_i32 : i32
    %c0_i32 = arith.constant 0 : i32
    %c1_i32_0 = arith.constant 1 : i32
    %c0_i32_1 = arith.constant 0 : i32
    %c0_i32_2 = arith.constant 0 : i32
    %c0_i32_3 = arith.constant 0 : i32
    return %c0_i32, %c1_i32_0, %arg0, %0, %c0_i32_1, %c0_i32_2 : i32, i32, i32, i32, i32, i32
  }
  func.func @transform_6(%arg0: i32, %arg1: i32) -> (i32, i32, i32) {
    %c0_i32 = arith.constant 0 : i32
    %c0_i32_0 = arith.constant 0 : i32
    %c0_i32_1 = arith.constant 0 : i32
    %c0_i32_2 = arith.constant 0 : i32
    return %c0_i32, %c0_i32_0, %c0_i32_1 : i32, i32, i32
  }
  func.func @transform_7(%arg0: i32, %arg1: i32) -> (i32, i32) {
    %c0_i32 = arith.constant 0 : i32
    %c0_i32_0 = arith.constant 0 : i32
    %c0_i32_1 = arith.constant 0 : i32
    return %c0_i32, %c0_i32_0 : i32, i32
  }
  func.func @transform_8(%arg0: i32, %arg1: i32) -> (i32, i32) {
    %c0_i32 = arith.constant 0 : i32
    %c0_i32_0 = arith.constant 0 : i32
    %c0_i32_1 = arith.constant 0 : i32
    return %c0_i32, %c0_i32_0 : i32, i32
  }
  func.func @transform_9(%arg0: i32, %arg1: i32) -> (i32, i32) {
    %c0_i32 = arith.constant 0 : i32
    %c0_i32_0 = arith.constant 0 : i32
    %c0_i32_1 = arith.constant 0 : i32
    return %c0_i32, %c0_i32_0 : i32, i32
  }
  func.func @transform_10(%arg0: i32, %arg1: i32) -> (i32, i32) {
    %c0_i32 = arith.constant 0 : i32
    %c0_i32_0 = arith.constant 0 : i32
    %c0_i32_1 = arith.constant 0 : i32
    return %c0_i32, %c0_i32_0 : i32, i32
  }
  func.func @transform_11(%arg0: i32, %arg1: i32) -> (i32, i32) {
    %c0_i32 = arith.constant 0 : i32
    %c0_i32_0 = arith.constant 0 : i32
    %c0_i32_1 = arith.constant 0 : i32
    return %c0_i32, %c0_i32_0 : i32, i32
  }
  func.func @transform_12(%arg0: i32, %arg1: i32) -> (i32, i32, i32) {
    %c0_i32 = arith.constant 0 : i32
    %c0_i32_0 = arith.constant 0 : i32
    %c0_i32_1 = arith.constant 0 : i32
    %c0_i32_2 = arith.constant 0 : i32
    return %c0_i32, %c0_i32_0, %c0_i32_1 : i32, i32, i32
  }
  func.func @transform_13(%arg0: i32, %arg1: i32) -> (i32, i32) {
    %c0_i32 = arith.constant 0 : i32
    %c0_i32_0 = arith.constant 0 : i32
    %c0_i32_1 = arith.constant 0 : i32
    return %c0_i32, %c0_i32_0 : i32, i32
  }
  func.func @transform_14(%arg0: i32, %arg1: i32) -> (i32, i32) {
    %c0_i32 = arith.constant 0 : i32
    %c0_i32_0 = arith.constant 0 : i32
    %c0_i32_1 = arith.constant 0 : i32
    return %c0_i32, %c0_i32_0 : i32, i32
  }
  func.func @transform_15(%arg0: i32, %arg1: i32) -> (i32, i32) {
    %c0_i32 = arith.constant 0 : i32
    %c0_i32_0 = arith.constant 0 : i32
    %c0_i32_1 = arith.constant 0 : i32
    return %c0_i32, %c0_i32_0 : i32, i32
  }
  func.func @transform_16(%arg0: i32, %arg1: i32) -> (i32, i32) {
    %c0_i32 = arith.constant 0 : i32
    %c0_i32_0 = arith.constant 0 : i32
    %c0_i32_1 = arith.constant 0 : i32
    return %c0_i32, %c0_i32_0 : i32, i32
  }
  func.func @transform_17(%arg0: i32, %arg1: i32) -> (i32, i32, i32, i32) {
    %c0_i32 = arith.constant 0 : i32
    %c0_i32_0 = arith.constant 0 : i32
    %c0_i32_1 = arith.constant 0 : i32
    return %arg0, %arg1, %c0_i32, %c0_i32_0 : i32, i32, i32, i32
  }
}

module attributes {stable_mosaic.version = 11 : i64} {
  func.func @_dsample_kernel(%arg0: i32, %arg1: i32, %arg2: memref<1x1x1x1x5x128xf32, #tpu.memory_space<vmem>>, %arg3: memref<1x1x1x1x5x128xf32, #tpu.memory_space<vmem>>, %arg4: memref<1x1x1x1x5x128xf32, #tpu.memory_space<vmem>>, %arg5: memref<1x1x1x1x5x128xf32, #tpu.memory_space<vmem>>, %arg6: memref<1x1x1x1x5x128xf32, #tpu.memory_space<vmem>>, %arg7: memref<1x1x1x1x5x128xf32, #tpu.memory_space<vmem>>, %arg8: memref<9x1x128xf32, #tpu.memory_space<vmem>>, %arg9: memref<1x128xf32, #tpu.memory_space<vmem>>, %arg10: memref<128x128xbf16, #tpu.memory_space<vmem>>, %arg11: memref<1x128xf32, #tpu.memory_space<vmem>>, %arg12: memref<128x128xbf16, #tpu.memory_space<vmem>>, %arg13: memref<1x128xf32, #tpu.memory_space<vmem>>, %arg14: memref<9x1x128xf32, #tpu.memory_space<vmem>>, %arg15: memref<1x128xf32, #tpu.memory_space<vmem>>, %arg16: memref<128x128xbf16, #tpu.memory_space<vmem>>, %arg17: memref<1x128xf32, #tpu.memory_space<vmem>>, %arg18: memref<5x1xf32, #tpu.memory_space<vmem>>, %arg19: memref<1x1x4x256xf32, #tpu.memory_space<vmem>>) attributes {dimension_semantics = [#tpu.dimension_semantics<parallel>, #tpu.dimension_semantics<arbitrary>], iteration_bounds = array<i64: 2, 4>, scalar_prefetch = 0 : i64, scratch_operands = 0 : i64, tpu.core_type = #tpu.core_type<tc>, window_params = [{transform_indices = @transform_0, window_bounds = array<i64: 1, 1, 1, 1, 5, 128>}, {transform_indices = @transform_1, window_bounds = array<i64: 1, 1, 1, 1, 5, 128>}, {transform_indices = @transform_2, window_bounds = array<i64: 1, 1, 1, 1, 5, 128>}, {transform_indices = @transform_3, window_bounds = array<i64: 1, 1, 1, 1, 5, 128>}, {transform_indices = @transform_4, window_bounds = array<i64: 1, 1, 1, 1, 5, 128>}, {transform_indices = @transform_5, window_bounds = array<i64: 1, 1, 1, 1, 5, 128>}, {pipeline_mode = #tpu.pipeline_mode<synchronous>, transform_indices = @transform_6, window_bounds = array<i64: 9, 1, 128>}, {pipeline_mode = #tpu.pipeline_mode<synchronous>, transform_indices = @transform_7, window_bounds = array<i64: 1, 128>}, {pipeline_mode = #tpu.pipeline_mode<synchronous>, transform_indices = @transform_8, window_bounds = array<i64: 128, 128>}, {pipeline_mode = #tpu.pipeline_mode<synchronous>, transform_indices = @transform_9, window_bounds = array<i64: 1, 128>}, {pipeline_mode = #tpu.pipeline_mode<synchronous>, transform_indices = @transform_10, window_bounds = array<i64: 128, 128>}, {pipeline_mode = #tpu.pipeline_mode<synchronous>, transform_indices = @transform_11, window_bounds = array<i64: 1, 128>}, {pipeline_mode = #tpu.pipeline_mode<synchronous>, transform_indices = @transform_12, window_bounds = array<i64: 9, 1, 128>}, {pipeline_mode = #tpu.pipeline_mode<synchronous>, transform_indices = @transform_13, window_bounds = array<i64: 1, 128>}, {pipeline_mode = #tpu.pipeline_mode<synchronous>, transform_indices = @transform_14, window_bounds = array<i64: 128, 128>}, {pipeline_mode = #tpu.pipeline_mode<synchronous>, transform_indices = @transform_15, window_bounds = array<i64: 1, 128>}, {pipeline_mode = #tpu.pipeline_mode<synchronous>, transform_indices = @transform_16, window_bounds = array<i64: 5, 1>}, {transform_indices = @transform_17, window_bounds = array<i64: 1, 1, 4, 256>}]} {
    %c0 = arith.constant 0 : index
    %c0_0 = arith.constant 0 : index
    %c0_1 = arith.constant 0 : index
    %c0_2 = arith.constant 0 : index
    %c0_3 = arith.constant 0 : index
    %c0_4 = arith.constant 0 : index
    %0 = vector.load %arg2[%c0, %c0_0, %c0_1, %c0_2, %c0_3, %c0_4] : memref<1x1x1x1x5x128xf32, #tpu.memory_space<vmem>>, vector<1x1x1x1x5x128xf32>
    %1 = vector.shape_cast %0 : vector<1x1x1x1x5x128xf32> to vector<5x128xf32>
    %c0_5 = arith.constant 0 : index
    %c0_6 = arith.constant 0 : index
    %c0_7 = arith.constant 0 : index
    %c0_8 = arith.constant 0 : index
    %c0_9 = arith.constant 0 : index
    %c0_10 = arith.constant 0 : index
    %2 = vector.load %arg3[%c0_5, %c0_6, %c0_7, %c0_8, %c0_9, %c0_10] : memref<1x1x1x1x5x128xf32, #tpu.memory_space<vmem>>, vector<1x1x1x1x5x128xf32>
    %3 = vector.shape_cast %2 : vector<1x1x1x1x5x128xf32> to vector<5x128xf32>
    %c0_11 = arith.constant 0 : index
    %c0_12 = arith.constant 0 : index
    %c0_13 = arith.constant 0 : index
    %c0_14 = arith.constant 0 : index
    %c0_15 = arith.constant 0 : index
    %c0_16 = arith.constant 0 : index
    %4 = vector.load %arg4[%c0_11, %c0_12, %c0_13, %c0_14, %c0_15, %c0_16] : memref<1x1x1x1x5x128xf32, #tpu.memory_space<vmem>>, vector<1x1x1x1x5x128xf32>
    %5 = vector.shape_cast %4 : vector<1x1x1x1x5x128xf32> to vector<5x128xf32>
    %c0_17 = arith.constant 0 : index
    %c0_18 = arith.constant 0 : index
    %c0_19 = arith.constant 0 : index
    %c0_20 = arith.constant 0 : index
    %c0_21 = arith.constant 0 : index
    %c0_22 = arith.constant 0 : index
    %6 = vector.load %arg5[%c0_17, %c0_18, %c0_19, %c0_20, %c0_21, %c0_22] : memref<1x1x1x1x5x128xf32, #tpu.memory_space<vmem>>, vector<1x1x1x1x5x128xf32>
    %7 = vector.shape_cast %6 : vector<1x1x1x1x5x128xf32> to vector<5x128xf32>
    %c0_23 = arith.constant 0 : index
    %c0_24 = arith.constant 0 : index
    %c0_25 = arith.constant 0 : index
    %c0_26 = arith.constant 0 : index
    %c0_27 = arith.constant 0 : index
    %c0_28 = arith.constant 0 : index
    %8 = vector.load %arg6[%c0_23, %c0_24, %c0_25, %c0_26, %c0_27, %c0_28] : memref<1x1x1x1x5x128xf32, #tpu.memory_space<vmem>>, vector<1x1x1x1x5x128xf32>
    %9 = vector.shape_cast %8 : vector<1x1x1x1x5x128xf32> to vector<5x128xf32>
    %c0_29 = arith.constant 0 : index
    %c0_30 = arith.constant 0 : index
    %c0_31 = arith.constant 0 : index
    %c0_32 = arith.constant 0 : index
    %c0_33 = arith.constant 0 : index
    %c0_34 = arith.constant 0 : index
    %10 = vector.load %arg7[%c0_29, %c0_30, %c0_31, %c0_32, %c0_33, %c0_34] : memref<1x1x1x1x5x128xf32, #tpu.memory_space<vmem>>, vector<1x1x1x1x5x128xf32>
    %11 = vector.shape_cast %10 : vector<1x1x1x1x5x128xf32> to vector<5x128xf32>
    %c0_35 = arith.constant 0 : index
    %c0_36 = arith.constant 0 : index
    %12 = vector.load %arg18[%c0_35, %c0_36] : memref<5x1xf32, #tpu.memory_space<vmem>>, vector<5x1xf32>
    %c0_i32 = arith.constant 0 : i32
    %13 = arith.cmpi eq, %arg1, %c0_i32 : i32
    %cst = arith.constant 0.000000e+00 : f32
    %cst_37 = arith.constant 1.000000e+00 : f32
    %14 = arith.select %13, %cst, %cst_37 : f32
    %15 = arith.truncf %1 : vector<5x128xf32> to vector<5x128xbf16>
    %c0_38 = arith.constant 0 : index
    %c0_39 = arith.constant 0 : index
    %16 = vector.load %arg12[%c0_38, %c0_39] : memref<128x128xbf16, #tpu.memory_space<vmem>>, vector<128x128xbf16>
    %cst_40 = arith.constant dense<0.000000e+00> : vector<5x128xf32>
    %17 = tpu.matmul %15, %16, %cst_40 {dimension_numbers = #tpu.dot_dimension_numbers<[1], [0], [0], [1], [0, 0, 1, 1], [], []>} : vector<5x128xbf16>, vector<128x128xbf16>, vector<5x128xf32> -> vector<5x128xf32>
    %c0_41 = arith.constant 0 : index
    %c0_42 = arith.constant 0 : index
    %18 = vector.load %arg13[%c0_41, %c0_42] : memref<1x128xf32, #tpu.memory_space<vmem>>, vector<1x128xf32>
    %19 = vector.broadcast %18 : vector<1x128xf32> to vector<5x128xf32>
    %20 = arith.addf %17, %19 : vector<5x128xf32>
    %cst_43 = arith.constant 0.000000e+00 : f32
    %21 = vector.broadcast %cst_43 : f32 to vector<5x128xf32>
    %22 = arith.maximumf %20, %21 : vector<5x128xf32>
    %23 = vector.broadcast %12 : vector<5x1xf32> to vector<5x128xf32>
    %24 = arith.mulf %22, %23 : vector<5x128xf32>
    %25 = vector.broadcast %14 : f32 to vector<5x128xf32>
    %26 = arith.mulf %24, %25 : vector<5x128xf32>
    %27 = arith.truncf %3 : vector<5x128xf32> to vector<5x128xbf16>
    %c0_44 = arith.constant 0 : index
    %c0_45 = arith.constant 0 : index
    %28 = vector.load %arg12[%c0_44, %c0_45] : memref<128x128xbf16, #tpu.memory_space<vmem>>, vector<128x128xbf16>
    %cst_46 = arith.constant dense<0.000000e+00> : vector<5x128xf32>
    %29 = tpu.matmul %27, %28, %cst_46 {dimension_numbers = #tpu.dot_dimension_numbers<[1], [0], [0], [1], [0, 0, 1, 1], [], []>} : vector<5x128xbf16>, vector<128x128xbf16>, vector<5x128xf32> -> vector<5x128xf32>
    %c0_47 = arith.constant 0 : index
    %c0_48 = arith.constant 0 : index
    %30 = vector.load %arg13[%c0_47, %c0_48] : memref<1x128xf32, #tpu.memory_space<vmem>>, vector<1x128xf32>
    %31 = vector.broadcast %30 : vector<1x128xf32> to vector<5x128xf32>
    %32 = arith.addf %29, %31 : vector<5x128xf32>
    %cst_49 = arith.constant 0.000000e+00 : f32
    %33 = vector.broadcast %cst_49 : f32 to vector<5x128xf32>
    %34 = arith.maximumf %32, %33 : vector<5x128xf32>
    %35 = vector.broadcast %14 : f32 to vector<5x128xf32>
    %36 = arith.mulf %34, %35 : vector<5x128xf32>
    %37 = arith.truncf %5 : vector<5x128xf32> to vector<5x128xbf16>
    %c0_50 = arith.constant 0 : index
    %c0_51 = arith.constant 0 : index
    %38 = vector.load %arg12[%c0_50, %c0_51] : memref<128x128xbf16, #tpu.memory_space<vmem>>, vector<128x128xbf16>
    %cst_52 = arith.constant dense<0.000000e+00> : vector<5x128xf32>
    %39 = tpu.matmul %37, %38, %cst_52 {dimension_numbers = #tpu.dot_dimension_numbers<[1], [0], [0], [1], [0, 0, 1, 1], [], []>} : vector<5x128xbf16>, vector<128x128xbf16>, vector<5x128xf32> -> vector<5x128xf32>
    %c0_53 = arith.constant 0 : index
    %c0_54 = arith.constant 0 : index
    %40 = vector.load %arg13[%c0_53, %c0_54] : memref<1x128xf32, #tpu.memory_space<vmem>>, vector<1x128xf32>
    %41 = vector.broadcast %40 : vector<1x128xf32> to vector<5x128xf32>
    %42 = arith.addf %39, %41 : vector<5x128xf32>
    %cst_55 = arith.constant 0.000000e+00 : f32
    %43 = vector.broadcast %cst_55 : f32 to vector<5x128xf32>
    %44 = arith.maximumf %42, %43 : vector<5x128xf32>
    %45 = vector.broadcast %12 : vector<5x1xf32> to vector<5x128xf32>
    %46 = arith.mulf %44, %45 : vector<5x128xf32>
    %47 = arith.truncf %7 : vector<5x128xf32> to vector<5x128xbf16>
    %c0_56 = arith.constant 0 : index
    %c0_57 = arith.constant 0 : index
    %48 = vector.load %arg12[%c0_56, %c0_57] : memref<128x128xbf16, #tpu.memory_space<vmem>>, vector<128x128xbf16>
    %cst_58 = arith.constant dense<0.000000e+00> : vector<5x128xf32>
    %49 = tpu.matmul %47, %48, %cst_58 {dimension_numbers = #tpu.dot_dimension_numbers<[1], [0], [0], [1], [0, 0, 1, 1], [], []>} : vector<5x128xbf16>, vector<128x128xbf16>, vector<5x128xf32> -> vector<5x128xf32>
    %c0_59 = arith.constant 0 : index
    %c0_60 = arith.constant 0 : index
    %50 = vector.load %arg13[%c0_59, %c0_60] : memref<1x128xf32, #tpu.memory_space<vmem>>, vector<1x128xf32>
    %51 = vector.broadcast %50 : vector<1x128xf32> to vector<5x128xf32>
    %52 = arith.addf %49, %51 : vector<5x128xf32>
    %cst_61 = arith.constant 0.000000e+00 : f32
    %53 = vector.broadcast %cst_61 : f32 to vector<5x128xf32>
    %54 = arith.maximumf %52, %53 : vector<5x128xf32>
    %55 = arith.truncf %9 : vector<5x128xf32> to vector<5x128xbf16>
    %c0_62 = arith.constant 0 : index
    %c0_63 = arith.constant 0 : index
    %56 = vector.load %arg12[%c0_62, %c0_63] : memref<128x128xbf16, #tpu.memory_space<vmem>>, vector<128x128xbf16>
    %cst_64 = arith.constant dense<0.000000e+00> : vector<5x128xf32>
    %57 = tpu.matmul %55, %56, %cst_64 {dimension_numbers = #tpu.dot_dimension_numbers<[1], [0], [0], [1], [0, 0, 1, 1], [], []>} : vector<5x128xbf16>, vector<128x128xbf16>, vector<5x128xf32> -> vector<5x128xf32>
    %c0_65 = arith.constant 0 : index
    %c0_66 = arith.constant 0 : index
    %58 = vector.load %arg13[%c0_65, %c0_66] : memref<1x128xf32, #tpu.memory_space<vmem>>, vector<1x128xf32>
    %59 = vector.broadcast %58 : vector<1x128xf32> to vector<5x128xf32>
    %60 = arith.addf %57, %59 : vector<5x128xf32>
    %cst_67 = arith.constant 0.000000e+00 : f32
    %61 = vector.broadcast %cst_67 : f32 to vector<5x128xf32>
    %62 = arith.maximumf %60, %61 : vector<5x128xf32>
    %63 = vector.broadcast %12 : vector<5x1xf32> to vector<5x128xf32>
    %64 = arith.mulf %62, %63 : vector<5x128xf32>
    %65 = arith.truncf %11 : vector<5x128xf32> to vector<5x128xbf16>
    %c0_68 = arith.constant 0 : index
    %c0_69 = arith.constant 0 : index
    %66 = vector.load %arg12[%c0_68, %c0_69] : memref<128x128xbf16, #tpu.memory_space<vmem>>, vector<128x128xbf16>
    %cst_70 = arith.constant dense<0.000000e+00> : vector<5x128xf32>
    %67 = tpu.matmul %65, %66, %cst_70 {dimension_numbers = #tpu.dot_dimension_numbers<[1], [0], [0], [1], [0, 0, 1, 1], [], []>} : vector<5x128xbf16>, vector<128x128xbf16>, vector<5x128xf32> -> vector<5x128xf32>
    %c0_71 = arith.constant 0 : index
    %c0_72 = arith.constant 0 : index
    %68 = vector.load %arg13[%c0_71, %c0_72] : memref<1x128xf32, #tpu.memory_space<vmem>>, vector<1x128xf32>
    %69 = vector.broadcast %68 : vector<1x128xf32> to vector<5x128xf32>
    %70 = arith.addf %67, %69 : vector<5x128xf32>
    %cst_73 = arith.constant 0.000000e+00 : f32
    %71 = vector.broadcast %cst_73 : f32 to vector<5x128xf32>
    %72 = arith.maximumf %70, %71 : vector<5x128xf32>
    %73 = vector.extract_strided_slice %1 {offsets = [0, 0], sizes = [4, 128], strides = [1, 1]} : vector<5x128xf32> to vector<4x128xf32>
    %c0_74 = arith.constant 0 : index
    %c0_75 = arith.constant 0 : index
    %c0_76 = arith.constant 0 : index
    %74 = vector.load %arg8[%c0_74, %c0_75, %c0_76] : memref<9x1x128xf32, #tpu.memory_space<vmem>>, vector<1x1x128xf32>
    %75 = vector.shape_cast %74 : vector<1x1x128xf32> to vector<1x128xf32>
    %76 = vector.broadcast %75 : vector<1x128xf32> to vector<4x128xf32>
    %77 = arith.mulf %73, %76 : vector<4x128xf32>
    %78 = vector.extract_strided_slice %26 {offsets = [0, 0], sizes = [4, 128], strides = [1, 1]} : vector<5x128xf32> to vector<4x128xf32>
    %c0_77 = arith.constant 0 : index
    %c0_78 = arith.constant 0 : index
    %c0_79 = arith.constant 0 : index
    %79 = vector.load %arg14[%c0_77, %c0_78, %c0_79] : memref<9x1x128xf32, #tpu.memory_space<vmem>>, vector<1x1x128xf32>
    %80 = vector.shape_cast %79 : vector<1x1x128xf32> to vector<1x128xf32>
    %81 = vector.broadcast %80 : vector<1x128xf32> to vector<4x128xf32>
    %82 = arith.mulf %78, %81 : vector<4x128xf32>
    %83 = vector.extract_strided_slice %3 {offsets = [0, 0], sizes = [4, 128], strides = [1, 1]} : vector<5x128xf32> to vector<4x128xf32>
    %c1 = arith.constant 1 : index
    %c0_80 = arith.constant 0 : index
    %c0_81 = arith.constant 0 : index
    %84 = vector.load %arg8[%c1, %c0_80, %c0_81] : memref<9x1x128xf32, #tpu.memory_space<vmem>>, vector<1x1x128xf32>
    %85 = vector.shape_cast %84 : vector<1x1x128xf32> to vector<1x128xf32>
    %86 = vector.broadcast %85 : vector<1x128xf32> to vector<4x128xf32>
    %87 = arith.mulf %83, %86 : vector<4x128xf32>
    %88 = vector.extract_strided_slice %36 {offsets = [0, 0], sizes = [4, 128], strides = [1, 1]} : vector<5x128xf32> to vector<4x128xf32>
    %c1_82 = arith.constant 1 : index
    %c0_83 = arith.constant 0 : index
    %c0_84 = arith.constant 0 : index
    %89 = vector.load %arg14[%c1_82, %c0_83, %c0_84] : memref<9x1x128xf32, #tpu.memory_space<vmem>>, vector<1x1x128xf32>
    %90 = vector.shape_cast %89 : vector<1x1x128xf32> to vector<1x128xf32>
    %91 = vector.broadcast %90 : vector<1x128xf32> to vector<4x128xf32>
    %92 = arith.mulf %88, %91 : vector<4x128xf32>
    %93 = vector.extract_strided_slice %1 {offsets = [1, 0], sizes = [4, 128], strides = [1, 1]} : vector<5x128xf32> to vector<4x128xf32>
    %c2 = arith.constant 2 : index
    %c0_85 = arith.constant 0 : index
    %c0_86 = arith.constant 0 : index
    %94 = vector.load %arg8[%c2, %c0_85, %c0_86] : memref<9x1x128xf32, #tpu.memory_space<vmem>>, vector<1x1x128xf32>
    %95 = vector.shape_cast %94 : vector<1x1x128xf32> to vector<1x128xf32>
    %96 = vector.broadcast %95 : vector<1x128xf32> to vector<4x128xf32>
    %97 = arith.mulf %93, %96 : vector<4x128xf32>
    %98 = vector.extract_strided_slice %26 {offsets = [1, 0], sizes = [4, 128], strides = [1, 1]} : vector<5x128xf32> to vector<4x128xf32>
    %c2_87 = arith.constant 2 : index
    %c0_88 = arith.constant 0 : index
    %c0_89 = arith.constant 0 : index
    %99 = vector.load %arg14[%c2_87, %c0_88, %c0_89] : memref<9x1x128xf32, #tpu.memory_space<vmem>>, vector<1x1x128xf32>
    %100 = vector.shape_cast %99 : vector<1x1x128xf32> to vector<1x128xf32>
    %101 = vector.broadcast %100 : vector<1x128xf32> to vector<4x128xf32>
    %102 = arith.mulf %98, %101 : vector<4x128xf32>
    %103 = vector.extract_strided_slice %5 {offsets = [0, 0], sizes = [4, 128], strides = [1, 1]} : vector<5x128xf32> to vector<4x128xf32>
    %c3 = arith.constant 3 : index
    %c0_90 = arith.constant 0 : index
    %c0_91 = arith.constant 0 : index
    %104 = vector.load %arg8[%c3, %c0_90, %c0_91] : memref<9x1x128xf32, #tpu.memory_space<vmem>>, vector<1x1x128xf32>
    %105 = vector.shape_cast %104 : vector<1x1x128xf32> to vector<1x128xf32>
    %106 = vector.broadcast %105 : vector<1x128xf32> to vector<4x128xf32>
    %107 = arith.mulf %103, %106 : vector<4x128xf32>
    %108 = vector.extract_strided_slice %46 {offsets = [0, 0], sizes = [4, 128], strides = [1, 1]} : vector<5x128xf32> to vector<4x128xf32>
    %c3_92 = arith.constant 3 : index
    %c0_93 = arith.constant 0 : index
    %c0_94 = arith.constant 0 : index
    %109 = vector.load %arg14[%c3_92, %c0_93, %c0_94] : memref<9x1x128xf32, #tpu.memory_space<vmem>>, vector<1x1x128xf32>
    %110 = vector.shape_cast %109 : vector<1x1x128xf32> to vector<1x128xf32>
    %111 = vector.broadcast %110 : vector<1x128xf32> to vector<4x128xf32>
    %112 = arith.mulf %108, %111 : vector<4x128xf32>
    %113 = vector.extract_strided_slice %7 {offsets = [0, 0], sizes = [4, 128], strides = [1, 1]} : vector<5x128xf32> to vector<4x128xf32>
    %c4 = arith.constant 4 : index
    %c0_95 = arith.constant 0 : index
    %c0_96 = arith.constant 0 : index
    %114 = vector.load %arg8[%c4, %c0_95, %c0_96] : memref<9x1x128xf32, #tpu.memory_space<vmem>>, vector<1x1x128xf32>
    %115 = vector.shape_cast %114 : vector<1x1x128xf32> to vector<1x128xf32>
    %116 = vector.broadcast %115 : vector<1x128xf32> to vector<4x128xf32>
    %117 = arith.mulf %113, %116 : vector<4x128xf32>
    %118 = vector.extract_strided_slice %54 {offsets = [0, 0], sizes = [4, 128], strides = [1, 1]} : vector<5x128xf32> to vector<4x128xf32>
    %c4_97 = arith.constant 4 : index
    %c0_98 = arith.constant 0 : index
    %c0_99 = arith.constant 0 : index
    %119 = vector.load %arg14[%c4_97, %c0_98, %c0_99] : memref<9x1x128xf32, #tpu.memory_space<vmem>>, vector<1x1x128xf32>
    %120 = vector.shape_cast %119 : vector<1x1x128xf32> to vector<1x128xf32>
    %121 = vector.broadcast %120 : vector<1x128xf32> to vector<4x128xf32>
    %122 = arith.mulf %118, %121 : vector<4x128xf32>
    %123 = vector.extract_strided_slice %5 {offsets = [1, 0], sizes = [4, 128], strides = [1, 1]} : vector<5x128xf32> to vector<4x128xf32>
    %c5 = arith.constant 5 : index
    %c0_100 = arith.constant 0 : index
    %c0_101 = arith.constant 0 : index
    %124 = vector.load %arg8[%c5, %c0_100, %c0_101] : memref<9x1x128xf32, #tpu.memory_space<vmem>>, vector<1x1x128xf32>
    %125 = vector.shape_cast %124 : vector<1x1x128xf32> to vector<1x128xf32>
    %126 = vector.broadcast %125 : vector<1x128xf32> to vector<4x128xf32>
    %127 = arith.mulf %123, %126 : vector<4x128xf32>
    %128 = vector.extract_strided_slice %46 {offsets = [1, 0], sizes = [4, 128], strides = [1, 1]} : vector<5x128xf32> to vector<4x128xf32>
    %c5_102 = arith.constant 5 : index
    %c0_103 = arith.constant 0 : index
    %c0_104 = arith.constant 0 : index
    %129 = vector.load %arg14[%c5_102, %c0_103, %c0_104] : memref<9x1x128xf32, #tpu.memory_space<vmem>>, vector<1x1x128xf32>
    %130 = vector.shape_cast %129 : vector<1x1x128xf32> to vector<1x128xf32>
    %131 = vector.broadcast %130 : vector<1x128xf32> to vector<4x128xf32>
    %132 = arith.mulf %128, %131 : vector<4x128xf32>
    %133 = vector.extract_strided_slice %9 {offsets = [0, 0], sizes = [4, 128], strides = [1, 1]} : vector<5x128xf32> to vector<4x128xf32>
    %c6 = arith.constant 6 : index
    %c0_105 = arith.constant 0 : index
    %c0_106 = arith.constant 0 : index
    %134 = vector.load %arg8[%c6, %c0_105, %c0_106] : memref<9x1x128xf32, #tpu.memory_space<vmem>>, vector<1x1x128xf32>
    %135 = vector.shape_cast %134 : vector<1x1x128xf32> to vector<1x128xf32>
    %136 = vector.broadcast %135 : vector<1x128xf32> to vector<4x128xf32>
    %137 = arith.mulf %133, %136 : vector<4x128xf32>
    %138 = vector.extract_strided_slice %64 {offsets = [0, 0], sizes = [4, 128], strides = [1, 1]} : vector<5x128xf32> to vector<4x128xf32>
    %c6_107 = arith.constant 6 : index
    %c0_108 = arith.constant 0 : index
    %c0_109 = arith.constant 0 : index
    %139 = vector.load %arg14[%c6_107, %c0_108, %c0_109] : memref<9x1x128xf32, #tpu.memory_space<vmem>>, vector<1x1x128xf32>
    %140 = vector.shape_cast %139 : vector<1x1x128xf32> to vector<1x128xf32>
    %141 = vector.broadcast %140 : vector<1x128xf32> to vector<4x128xf32>
    %142 = arith.mulf %138, %141 : vector<4x128xf32>
    %143 = vector.extract_strided_slice %11 {offsets = [0, 0], sizes = [4, 128], strides = [1, 1]} : vector<5x128xf32> to vector<4x128xf32>
    %c7 = arith.constant 7 : index
    %c0_110 = arith.constant 0 : index
    %c0_111 = arith.constant 0 : index
    %144 = vector.load %arg8[%c7, %c0_110, %c0_111] : memref<9x1x128xf32, #tpu.memory_space<vmem>>, vector<1x1x128xf32>
    %145 = vector.shape_cast %144 : vector<1x1x128xf32> to vector<1x128xf32>
    %146 = vector.broadcast %145 : vector<1x128xf32> to vector<4x128xf32>
    %147 = arith.mulf %143, %146 : vector<4x128xf32>
    %148 = vector.extract_strided_slice %72 {offsets = [0, 0], sizes = [4, 128], strides = [1, 1]} : vector<5x128xf32> to vector<4x128xf32>
    %c7_112 = arith.constant 7 : index
    %c0_113 = arith.constant 0 : index
    %c0_114 = arith.constant 0 : index
    %149 = vector.load %arg14[%c7_112, %c0_113, %c0_114] : memref<9x1x128xf32, #tpu.memory_space<vmem>>, vector<1x1x128xf32>
    %150 = vector.shape_cast %149 : vector<1x1x128xf32> to vector<1x128xf32>
    %151 = vector.broadcast %150 : vector<1x128xf32> to vector<4x128xf32>
    %152 = arith.mulf %148, %151 : vector<4x128xf32>
    %153 = vector.extract_strided_slice %9 {offsets = [1, 0], sizes = [4, 128], strides = [1, 1]} : vector<5x128xf32> to vector<4x128xf32>
    %c8 = arith.constant 8 : index
    %c0_115 = arith.constant 0 : index
    %c0_116 = arith.constant 0 : index
    %154 = vector.load %arg8[%c8, %c0_115, %c0_116] : memref<9x1x128xf32, #tpu.memory_space<vmem>>, vector<1x1x128xf32>
    %155 = vector.shape_cast %154 : vector<1x1x128xf32> to vector<1x128xf32>
    %156 = vector.broadcast %155 : vector<1x128xf32> to vector<4x128xf32>
    %157 = arith.mulf %153, %156 : vector<4x128xf32>
    %158 = vector.extract_strided_slice %64 {offsets = [1, 0], sizes = [4, 128], strides = [1, 1]} : vector<5x128xf32> to vector<4x128xf32>
    %c8_117 = arith.constant 8 : index
    %c0_118 = arith.constant 0 : index
    %c0_119 = arith.constant 0 : index
    %159 = vector.load %arg14[%c8_117, %c0_118, %c0_119] : memref<9x1x128xf32, #tpu.memory_space<vmem>>, vector<1x1x128xf32>
    %160 = vector.shape_cast %159 : vector<1x1x128xf32> to vector<1x128xf32>
    %161 = vector.broadcast %160 : vector<1x128xf32> to vector<4x128xf32>
    %162 = arith.mulf %158, %161 : vector<4x128xf32>
    %163 = arith.addf %77, %87 : vector<4x128xf32>
    %164 = arith.addf %97, %107 : vector<4x128xf32>
    %165 = arith.addf %117, %127 : vector<4x128xf32>
    %166 = arith.addf %137, %147 : vector<4x128xf32>
    %167 = arith.addf %163, %164 : vector<4x128xf32>
    %168 = arith.addf %165, %166 : vector<4x128xf32>
    %169 = arith.addf %167, %168 : vector<4x128xf32>
    %170 = arith.addf %169, %157 : vector<4x128xf32>
    %c0_120 = arith.constant 0 : index
    %c0_121 = arith.constant 0 : index
    %171 = vector.load %arg9[%c0_120, %c0_121] : memref<1x128xf32, #tpu.memory_space<vmem>>, vector<1x128xf32>
    %172 = vector.broadcast %171 : vector<1x128xf32> to vector<4x128xf32>
    %173 = arith.addf %170, %172 : vector<4x128xf32>
    %174 = arith.addf %82, %92 : vector<4x128xf32>
    %175 = arith.addf %102, %112 : vector<4x128xf32>
    %176 = arith.addf %122, %132 : vector<4x128xf32>
    %177 = arith.addf %142, %152 : vector<4x128xf32>
    %178 = arith.addf %174, %175 : vector<4x128xf32>
    %179 = arith.addf %176, %177 : vector<4x128xf32>
    %180 = arith.addf %178, %179 : vector<4x128xf32>
    %181 = arith.addf %180, %162 : vector<4x128xf32>
    %c0_122 = arith.constant 0 : index
    %c0_123 = arith.constant 0 : index
    %182 = vector.load %arg15[%c0_122, %c0_123] : memref<1x128xf32, #tpu.memory_space<vmem>>, vector<1x128xf32>
    %183 = vector.broadcast %182 : vector<1x128xf32> to vector<4x128xf32>
    %184 = arith.addf %181, %183 : vector<4x128xf32>
    %185 = arith.truncf %173 : vector<4x128xf32> to vector<4x128xbf16>
    %c0_124 = arith.constant 0 : index
    %c0_125 = arith.constant 0 : index
    %186 = vector.load %arg10[%c0_124, %c0_125] : memref<128x128xbf16, #tpu.memory_space<vmem>>, vector<128x128xbf16>
    %cst_126 = arith.constant dense<0.000000e+00> : vector<4x128xf32>
    %187 = tpu.matmul %185, %186, %cst_126 {dimension_numbers = #tpu.dot_dimension_numbers<[1], [0], [0], [1], [0, 0, 1, 1], [], []>} : vector<4x128xbf16>, vector<128x128xbf16>, vector<4x128xf32> -> vector<4x128xf32>
    %c0_127 = arith.constant 0 : index
    %c0_128 = arith.constant 0 : index
    %188 = vector.load %arg11[%c0_127, %c0_128] : memref<1x128xf32, #tpu.memory_space<vmem>>, vector<1x128xf32>
    %189 = vector.broadcast %188 : vector<1x128xf32> to vector<4x128xf32>
    %190 = arith.addf %187, %189 : vector<4x128xf32>
    %cst_129 = arith.constant 0.000000e+00 : f32
    %191 = vector.broadcast %cst_129 : f32 to vector<4x128xf32>
    %192 = arith.maximumf %190, %191 : vector<4x128xf32>
    %193 = arith.truncf %184 : vector<4x128xf32> to vector<4x128xbf16>
    %c0_130 = arith.constant 0 : index
    %c0_131 = arith.constant 0 : index
    %194 = vector.load %arg16[%c0_130, %c0_131] : memref<128x128xbf16, #tpu.memory_space<vmem>>, vector<128x128xbf16>
    %cst_132 = arith.constant dense<0.000000e+00> : vector<4x128xf32>
    %195 = tpu.matmul %193, %194, %cst_132 {dimension_numbers = #tpu.dot_dimension_numbers<[1], [0], [0], [1], [0, 0, 1, 1], [], []>} : vector<4x128xbf16>, vector<128x128xbf16>, vector<4x128xf32> -> vector<4x128xf32>
    %c0_133 = arith.constant 0 : index
    %c0_134 = arith.constant 0 : index
    %196 = vector.load %arg17[%c0_133, %c0_134] : memref<1x128xf32, #tpu.memory_space<vmem>>, vector<1x128xf32>
    %197 = vector.broadcast %196 : vector<1x128xf32> to vector<4x128xf32>
    %198 = arith.addf %195, %197 : vector<4x128xf32>
    %cst_135 = arith.constant 0.000000e+00 : f32
    %199 = vector.broadcast %cst_135 : f32 to vector<4x128xf32>
    %200 = arith.maximumf %198, %199 : vector<4x128xf32>
    %c0_136 = arith.constant 0 : index
    %c0_137 = arith.constant 0 : index
    %c0_138 = arith.constant 0 : index
    %c0_139 = arith.constant 0 : index
    %201 = vector.load %arg19[%c0_136, %c0_137, %c0_138, %c0_139] : memref<1x1x4x256xf32, #tpu.memory_space<vmem>>, vector<1x1x4x128xf32>
    %202 = vector.shape_cast %201 : vector<1x1x4x128xf32> to vector<4x128xf32>
    %203 = vector.shape_cast %192 : vector<4x128xf32> to vector<1x1x4x128xf32>
    tpu.vector_store %arg19[%c0_136, %c0_137, %c0_138, %c0_139], %203 {strides = array<i32>} : memref<1x1x4x256xf32, #tpu.memory_space<vmem>>, vector<1x1x4x128xf32>,
    %c0_140 = arith.constant 0 : index
    %c0_141 = arith.constant 0 : index
    %c0_142 = arith.constant 0 : index
    %c128 = arith.constant 128 : index
    %204 = vector.load %arg19[%c0_140, %c0_141, %c0_142, %c128] : memref<1x1x4x256xf32, #tpu.memory_space<vmem>>, vector<1x1x4x128xf32>
    %205 = vector.shape_cast %204 : vector<1x1x4x128xf32> to vector<4x128xf32>
    %206 = vector.shape_cast %200 : vector<4x128xf32> to vector<1x1x4x128xf32>
    tpu.vector_store %arg19[%c0_140, %c0_141, %c0_142, %c128], %206 {strides = array<i32>} : memref<1x1x4x256xf32, #tpu.memory_space<vmem>>, vector<1x1x4x128xf32>,
    return
  }
  func.func @transform_0(%arg0: i32, %arg1: i32) -> (i32, i32, i32, i32, i32, i32) {
    %c0_i32 = arith.constant 0 : i32
    %0 = arith.addi %arg1, %c0_i32 : i32
    %c0_i32_0 = arith.constant 0 : i32
    %c0_i32_1 = arith.constant 0 : i32
    %c0_i32_2 = arith.constant 0 : i32
    %c0_i32_3 = arith.constant 0 : i32
    %c0_i32_4 = arith.constant 0 : i32
    return %c0_i32_0, %c0_i32_1, %arg0, %0, %c0_i32_2, %c0_i32_3 : i32, i32, i32, i32, i32, i32
  }
  func.func @transform_1(%arg0: i32, %arg1: i32) -> (i32, i32, i32, i32, i32, i32) {
    %c0_i32 = arith.constant 0 : i32
    %0 = arith.addi %arg1, %c0_i32 : i32
    %c0_i32_0 = arith.constant 0 : i32
    %c1_i32 = arith.constant 1 : i32
    %c0_i32_1 = arith.constant 0 : i32
    %c0_i32_2 = arith.constant 0 : i32
    %c0_i32_3 = arith.constant 0 : i32
    return %c0_i32_0, %c1_i32, %arg0, %0, %c0_i32_1, %c0_i32_2 : i32, i32, i32, i32, i32, i32
  }
  func.func @transform_2(%arg0: i32, %arg1: i32) -> (i32, i32, i32, i32, i32, i32) {
    %c0_i32 = arith.constant 0 : i32
    %0 = arith.addi %arg1, %c0_i32 : i32
    %c1_i32 = arith.constant 1 : i32
    %c0_i32_0 = arith.constant 0 : i32
    %c0_i32_1 = arith.constant 0 : i32
    %c0_i32_2 = arith.constant 0 : i32
    %c0_i32_3 = arith.constant 0 : i32
    return %c1_i32, %c0_i32_0, %arg0, %0, %c0_i32_1, %c0_i32_2 : i32, i32, i32, i32, i32, i32
  }
  func.func @transform_3(%arg0: i32, %arg1: i32) -> (i32, i32, i32, i32, i32, i32) {
    %c0_i32 = arith.constant 0 : i32
    %0 = arith.addi %arg1, %c0_i32 : i32
    %c1_i32 = arith.constant 1 : i32
    %c1_i32_0 = arith.constant 1 : i32
    %c0_i32_1 = arith.constant 0 : i32
    %c0_i32_2 = arith.constant 0 : i32
    %c0_i32_3 = arith.constant 0 : i32
    return %c1_i32, %c1_i32_0, %arg0, %0, %c0_i32_1, %c0_i32_2 : i32, i32, i32, i32, i32, i32
  }
  func.func @transform_4(%arg0: i32, %arg1: i32) -> (i32, i32, i32, i32, i32, i32) {
    %c1_i32 = arith.constant 1 : i32
    %0 = arith.addi %arg1, %c1_i32 : i32
    %c0_i32 = arith.constant 0 : i32
    %c0_i32_0 = arith.constant 0 : i32
    %c0_i32_1 = arith.constant 0 : i32
    %c0_i32_2 = arith.constant 0 : i32
    %c0_i32_3 = arith.constant 0 : i32
    return %c0_i32, %c0_i32_0, %arg0, %0, %c0_i32_1, %c0_i32_2 : i32, i32, i32, i32, i32, i32
  }
  func.func @transform_5(%arg0: i32, %arg1: i32) -> (i32, i32, i32, i32, i32, i32) {
    %c1_i32 = arith.constant 1 : i32
    %0 = arith.addi %arg1, %c1_i32 : i32
    %c0_i32 = arith.constant 0 : i32
    %c1_i32_0 = arith.constant 1 : i32
    %c0_i32_1 = arith.constant 0 : i32
    %c0_i32_2 = arith.constant 0 : i32
    %c0_i32_3 = arith.constant 0 : i32
    return %c0_i32, %c1_i32_0, %arg0, %0, %c0_i32_1, %c0_i32_2 : i32, i32, i32, i32, i32, i32
  }
  func.func @transform_6(%arg0: i32, %arg1: i32) -> (i32, i32, i32) {
    %c0_i32 = arith.constant 0 : i32
    %c0_i32_0 = arith.constant 0 : i32
    %c0_i32_1 = arith.constant 0 : i32
    %c0_i32_2 = arith.constant 0 : i32
    return %c0_i32, %c0_i32_0, %c0_i32_1 : i32, i32, i32
  }
  func.func @transform_7(%arg0: i32, %arg1: i32) -> (i32, i32) {
    %c0_i32 = arith.constant 0 : i32
    %c0_i32_0 = arith.constant 0 : i32
    %c0_i32_1 = arith.constant 0 : i32
    return %c0_i32, %c0_i32_0 : i32, i32
  }
  func.func @transform_8(%arg0: i32, %arg1: i32) -> (i32, i32) {
    %c0_i32 = arith.constant 0 : i32
    %c0_i32_0 = arith.constant 0 : i32
    %c0_i32_1 = arith.constant 0 : i32
    return %c0_i32, %c0_i32_0 : i32, i32
  }
  func.func @transform_9(%arg0: i32, %arg1: i32) -> (i32, i32) {
    %c0_i32 = arith.constant 0 : i32
    %c0_i32_0 = arith.constant 0 : i32
    %c0_i32_1 = arith.constant 0 : i32
    return %c0_i32, %c0_i32_0 : i32, i32
  }
  func.func @transform_10(%arg0: i32, %arg1: i32) -> (i32, i32) {
    %c0_i32 = arith.constant 0 : i32
    %c0_i32_0 = arith.constant 0 : i32
    %c0_i32_1 = arith.constant 0 : i32
    return %c0_i32, %c0_i32_0 : i32, i32
  }
  func.func @transform_11(%arg0: i32, %arg1: i32) -> (i32, i32) {
    %c0_i32 = arith.constant 0 : i32
    %c0_i32_0 = arith.constant 0 : i32
    %c0_i32_1 = arith.constant 0 : i32
    return %c0_i32, %c0_i32_0 : i32, i32
  }
  func.func @transform_12(%arg0: i32, %arg1: i32) -> (i32, i32, i32) {
    %c0_i32 = arith.constant 0 : i32
    %c0_i32_0 = arith.constant 0 : i32
    %c0_i32_1 = arith.constant 0 : i32
    %c0_i32_2 = arith.constant 0 : i32
    return %c0_i32, %c0_i32_0, %c0_i32_1 : i32, i32, i32
  }
  func.func @transform_13(%arg0: i32, %arg1: i32) -> (i32, i32) {
    %c0_i32 = arith.constant 0 : i32
    %c0_i32_0 = arith.constant 0 : i32
    %c0_i32_1 = arith.constant 0 : i32
    return %c0_i32, %c0_i32_0 : i32, i32
  }
  func.func @transform_14(%arg0: i32, %arg1: i32) -> (i32, i32) {
    %c0_i32 = arith.constant 0 : i32
    %c0_i32_0 = arith.constant 0 : i32
    %c0_i32_1 = arith.constant 0 : i32
    return %c0_i32, %c0_i32_0 : i32, i32
  }
  func.func @transform_15(%arg0: i32, %arg1: i32) -> (i32, i32) {
    %c0_i32 = arith.constant 0 : i32
    %c0_i32_0 = arith.constant 0 : i32
    %c0_i32_1 = arith.constant 0 : i32
    return %c0_i32, %c0_i32_0 : i32, i32
  }
  func.func @transform_16(%arg0: i32, %arg1: i32) -> (i32, i32) {
    %c0_i32 = arith.constant 0 : i32
    %c0_i32_0 = arith.constant 0 : i32
    %c0_i32_1 = arith.constant 0 : i32
    return %c0_i32, %c0_i32_0 : i32, i32
  }
  func.func @transform_17(%arg0: i32, %arg1: i32) -> (i32, i32, i32, i32) {
    %c0_i32 = arith.constant 0 : i32
    %c0_i32_0 = arith.constant 0 : i32
    %c0_i32_1 = arith.constant 0 : i32
    return %arg0, %arg1, %c0_i32, %c0_i32_0 : i32, i32, i32, i32
  }
}

module attributes {stable_mosaic.version = 11 : i64} {
  func.func @_dsample_kernel(%arg0: i32, %arg1: i32, %arg2: memref<1x1x1x1x3x256xf32, #tpu.memory_space<vmem>>, %arg3: memref<1x1x1x1x3x256xf32, #tpu.memory_space<vmem>>, %arg4: memref<1x1x1x1x3x256xf32, #tpu.memory_space<vmem>>, %arg5: memref<1x1x1x1x3x256xf32, #tpu.memory_space<vmem>>, %arg6: memref<1x1x1x1x3x256xf32, #tpu.memory_space<vmem>>, %arg7: memref<1x1x1x1x3x256xf32, #tpu.memory_space<vmem>>, %arg8: memref<9x1x256xf32, #tpu.memory_space<vmem>>, %arg9: memref<1x256xf32, #tpu.memory_space<vmem>>, %arg10: memref<256x256xbf16, #tpu.memory_space<vmem>>, %arg11: memref<1x256xf32, #tpu.memory_space<vmem>>, %arg12: memref<256x256xbf16, #tpu.memory_space<vmem>>, %arg13: memref<1x256xf32, #tpu.memory_space<vmem>>, %arg14: memref<9x1x256xf32, #tpu.memory_space<vmem>>, %arg15: memref<1x256xf32, #tpu.memory_space<vmem>>, %arg16: memref<256x256xbf16, #tpu.memory_space<vmem>>, %arg17: memref<1x256xf32, #tpu.memory_space<vmem>>, %arg18: memref<3x1xf32, #tpu.memory_space<vmem>>, %arg19: memref<1x1x2x512xf32, #tpu.memory_space<vmem>>) attributes {dimension_semantics = [#tpu.dimension_semantics<parallel>, #tpu.dimension_semantics<arbitrary>], iteration_bounds = array<i64: 2, 2>, scalar_prefetch = 0 : i64, scratch_operands = 0 : i64, tpu.core_type = #tpu.core_type<tc>, window_params = [{transform_indices = @transform_0, window_bounds = array<i64: 1, 1, 1, 1, 3, 256>}, {transform_indices = @transform_1, window_bounds = array<i64: 1, 1, 1, 1, 3, 256>}, {transform_indices = @transform_2, window_bounds = array<i64: 1, 1, 1, 1, 3, 256>}, {transform_indices = @transform_3, window_bounds = array<i64: 1, 1, 1, 1, 3, 256>}, {transform_indices = @transform_4, window_bounds = array<i64: 1, 1, 1, 1, 3, 256>}, {transform_indices = @transform_5, window_bounds = array<i64: 1, 1, 1, 1, 3, 256>}, {pipeline_mode = #tpu.pipeline_mode<synchronous>, transform_indices = @transform_6, window_bounds = array<i64: 9, 1, 256>}, {pipeline_mode = #tpu.pipeline_mode<synchronous>, transform_indices = @transform_7, window_bounds = array<i64: 1, 256>}, {pipeline_mode = #tpu.pipeline_mode<synchronous>, transform_indices = @transform_8, window_bounds = array<i64: 256, 256>}, {pipeline_mode = #tpu.pipeline_mode<synchronous>, transform_indices = @transform_9, window_bounds = array<i64: 1, 256>}, {pipeline_mode = #tpu.pipeline_mode<synchronous>, transform_indices = @transform_10, window_bounds = array<i64: 256, 256>}, {pipeline_mode = #tpu.pipeline_mode<synchronous>, transform_indices = @transform_11, window_bounds = array<i64: 1, 256>}, {pipeline_mode = #tpu.pipeline_mode<synchronous>, transform_indices = @transform_12, window_bounds = array<i64: 9, 1, 256>}, {pipeline_mode = #tpu.pipeline_mode<synchronous>, transform_indices = @transform_13, window_bounds = array<i64: 1, 256>}, {pipeline_mode = #tpu.pipeline_mode<synchronous>, transform_indices = @transform_14, window_bounds = array<i64: 256, 256>}, {pipeline_mode = #tpu.pipeline_mode<synchronous>, transform_indices = @transform_15, window_bounds = array<i64: 1, 256>}, {pipeline_mode = #tpu.pipeline_mode<synchronous>, transform_indices = @transform_16, window_bounds = array<i64: 3, 1>}, {transform_indices = @transform_17, window_bounds = array<i64: 1, 1, 2, 512>}]} {
    %c0 = arith.constant 0 : index
    %c0_0 = arith.constant 0 : index
    %c0_1 = arith.constant 0 : index
    %c0_2 = arith.constant 0 : index
    %c0_3 = arith.constant 0 : index
    %c0_4 = arith.constant 0 : index
    %0 = vector.load %arg2[%c0, %c0_0, %c0_1, %c0_2, %c0_3, %c0_4] : memref<1x1x1x1x3x256xf32, #tpu.memory_space<vmem>>, vector<1x1x1x1x3x256xf32>
    %1 = vector.shape_cast %0 : vector<1x1x1x1x3x256xf32> to vector<3x256xf32>
    %c0_5 = arith.constant 0 : index
    %c0_6 = arith.constant 0 : index
    %c0_7 = arith.constant 0 : index
    %c0_8 = arith.constant 0 : index
    %c0_9 = arith.constant 0 : index
    %c0_10 = arith.constant 0 : index
    %2 = vector.load %arg3[%c0_5, %c0_6, %c0_7, %c0_8, %c0_9, %c0_10] : memref<1x1x1x1x3x256xf32, #tpu.memory_space<vmem>>, vector<1x1x1x1x3x256xf32>
    %3 = vector.shape_cast %2 : vector<1x1x1x1x3x256xf32> to vector<3x256xf32>
    %c0_11 = arith.constant 0 : index
    %c0_12 = arith.constant 0 : index
    %c0_13 = arith.constant 0 : index
    %c0_14 = arith.constant 0 : index
    %c0_15 = arith.constant 0 : index
    %c0_16 = arith.constant 0 : index
    %4 = vector.load %arg4[%c0_11, %c0_12, %c0_13, %c0_14, %c0_15, %c0_16] : memref<1x1x1x1x3x256xf32, #tpu.memory_space<vmem>>, vector<1x1x1x1x3x256xf32>
    %5 = vector.shape_cast %4 : vector<1x1x1x1x3x256xf32> to vector<3x256xf32>
    %c0_17 = arith.constant 0 : index
    %c0_18 = arith.constant 0 : index
    %c0_19 = arith.constant 0 : index
    %c0_20 = arith.constant 0 : index
    %c0_21 = arith.constant 0 : index
    %c0_22 = arith.constant 0 : index
    %6 = vector.load %arg5[%c0_17, %c0_18, %c0_19, %c0_20, %c0_21, %c0_22] : memref<1x1x1x1x3x256xf32, #tpu.memory_space<vmem>>, vector<1x1x1x1x3x256xf32>
    %7 = vector.shape_cast %6 : vector<1x1x1x1x3x256xf32> to vector<3x256xf32>
    %c0_23 = arith.constant 0 : index
    %c0_24 = arith.constant 0 : index
    %c0_25 = arith.constant 0 : index
    %c0_26 = arith.constant 0 : index
    %c0_27 = arith.constant 0 : index
    %c0_28 = arith.constant 0 : index
    %8 = vector.load %arg6[%c0_23, %c0_24, %c0_25, %c0_26, %c0_27, %c0_28] : memref<1x1x1x1x3x256xf32, #tpu.memory_space<vmem>>, vector<1x1x1x1x3x256xf32>
    %9 = vector.shape_cast %8 : vector<1x1x1x1x3x256xf32> to vector<3x256xf32>
    %c0_29 = arith.constant 0 : index
    %c0_30 = arith.constant 0 : index
    %c0_31 = arith.constant 0 : index
    %c0_32 = arith.constant 0 : index
    %c0_33 = arith.constant 0 : index
    %c0_34 = arith.constant 0 : index
    %10 = vector.load %arg7[%c0_29, %c0_30, %c0_31, %c0_32, %c0_33, %c0_34] : memref<1x1x1x1x3x256xf32, #tpu.memory_space<vmem>>, vector<1x1x1x1x3x256xf32>
    %11 = vector.shape_cast %10 : vector<1x1x1x1x3x256xf32> to vector<3x256xf32>
    %c0_35 = arith.constant 0 : index
    %c0_36 = arith.constant 0 : index
    %12 = vector.load %arg18[%c0_35, %c0_36] : memref<3x1xf32, #tpu.memory_space<vmem>>, vector<3x1xf32>
    %c0_i32 = arith.constant 0 : i32
    %13 = arith.cmpi eq, %arg1, %c0_i32 : i32
    %cst = arith.constant 0.000000e+00 : f32
    %cst_37 = arith.constant 1.000000e+00 : f32
    %14 = arith.select %13, %cst, %cst_37 : f32
    %15 = arith.truncf %1 : vector<3x256xf32> to vector<3x256xbf16>
    %c0_38 = arith.constant 0 : index
    %c0_39 = arith.constant 0 : index
    %16 = vector.load %arg12[%c0_38, %c0_39] : memref<256x256xbf16, #tpu.memory_space<vmem>>, vector<256x256xbf16>
    %cst_40 = arith.constant dense<0.000000e+00> : vector<3x256xf32>
    %17 = tpu.matmul %15, %16, %cst_40 {dimension_numbers = #tpu.dot_dimension_numbers<[1], [0], [0], [1], [0, 0, 1, 1], [], []>} : vector<3x256xbf16>, vector<256x256xbf16>, vector<3x256xf32> -> vector<3x256xf32>
    %c0_41 = arith.constant 0 : index
    %c0_42 = arith.constant 0 : index
    %18 = vector.load %arg13[%c0_41, %c0_42] : memref<1x256xf32, #tpu.memory_space<vmem>>, vector<1x256xf32>
    %19 = vector.broadcast %18 : vector<1x256xf32> to vector<3x256xf32>
    %20 = arith.addf %17, %19 : vector<3x256xf32>
    %cst_43 = arith.constant 0.000000e+00 : f32
    %21 = vector.broadcast %cst_43 : f32 to vector<3x256xf32>
    %22 = arith.maximumf %20, %21 : vector<3x256xf32>
    %23 = vector.broadcast %12 : vector<3x1xf32> to vector<3x256xf32>
    %24 = arith.mulf %22, %23 : vector<3x256xf32>
    %25 = vector.broadcast %14 : f32 to vector<3x256xf32>
    %26 = arith.mulf %24, %25 : vector<3x256xf32>
    %27 = arith.truncf %3 : vector<3x256xf32> to vector<3x256xbf16>
    %c0_44 = arith.constant 0 : index
    %c0_45 = arith.constant 0 : index
    %28 = vector.load %arg12[%c0_44, %c0_45] : memref<256x256xbf16, #tpu.memory_space<vmem>>, vector<256x256xbf16>
    %cst_46 = arith.constant dense<0.000000e+00> : vector<3x256xf32>
    %29 = tpu.matmul %27, %28, %cst_46 {dimension_numbers = #tpu.dot_dimension_numbers<[1], [0], [0], [1], [0, 0, 1, 1], [], []>} : vector<3x256xbf16>, vector<256x256xbf16>, vector<3x256xf32> -> vector<3x256xf32>
    %c0_47 = arith.constant 0 : index
    %c0_48 = arith.constant 0 : index
    %30 = vector.load %arg13[%c0_47, %c0_48] : memref<1x256xf32, #tpu.memory_space<vmem>>, vector<1x256xf32>
    %31 = vector.broadcast %30 : vector<1x256xf32> to vector<3x256xf32>
    %32 = arith.addf %29, %31 : vector<3x256xf32>
    %cst_49 = arith.constant 0.000000e+00 : f32
    %33 = vector.broadcast %cst_49 : f32 to vector<3x256xf32>
    %34 = arith.maximumf %32, %33 : vector<3x256xf32>
    %35 = vector.broadcast %14 : f32 to vector<3x256xf32>
    %36 = arith.mulf %34, %35 : vector<3x256xf32>
    %37 = arith.truncf %5 : vector<3x256xf32> to vector<3x256xbf16>
    %c0_50 = arith.constant 0 : index
    %c0_51 = arith.constant 0 : index
    %38 = vector.load %arg12[%c0_50, %c0_51] : memref<256x256xbf16, #tpu.memory_space<vmem>>, vector<256x256xbf16>
    %cst_52 = arith.constant dense<0.000000e+00> : vector<3x256xf32>
    %39 = tpu.matmul %37, %38, %cst_52 {dimension_numbers = #tpu.dot_dimension_numbers<[1], [0], [0], [1], [0, 0, 1, 1], [], []>} : vector<3x256xbf16>, vector<256x256xbf16>, vector<3x256xf32> -> vector<3x256xf32>
    %c0_53 = arith.constant 0 : index
    %c0_54 = arith.constant 0 : index
    %40 = vector.load %arg13[%c0_53, %c0_54] : memref<1x256xf32, #tpu.memory_space<vmem>>, vector<1x256xf32>
    %41 = vector.broadcast %40 : vector<1x256xf32> to vector<3x256xf32>
    %42 = arith.addf %39, %41 : vector<3x256xf32>
    %cst_55 = arith.constant 0.000000e+00 : f32
    %43 = vector.broadcast %cst_55 : f32 to vector<3x256xf32>
    %44 = arith.maximumf %42, %43 : vector<3x256xf32>
    %45 = vector.broadcast %12 : vector<3x1xf32> to vector<3x256xf32>
    %46 = arith.mulf %44, %45 : vector<3x256xf32>
    %47 = arith.truncf %7 : vector<3x256xf32> to vector<3x256xbf16>
    %c0_56 = arith.constant 0 : index
    %c0_57 = arith.constant 0 : index
    %48 = vector.load %arg12[%c0_56, %c0_57] : memref<256x256xbf16, #tpu.memory_space<vmem>>, vector<256x256xbf16>
    %cst_58 = arith.constant dense<0.000000e+00> : vector<3x256xf32>
    %49 = tpu.matmul %47, %48, %cst_58 {dimension_numbers = #tpu.dot_dimension_numbers<[1], [0], [0], [1], [0, 0, 1, 1], [], []>} : vector<3x256xbf16>, vector<256x256xbf16>, vector<3x256xf32> -> vector<3x256xf32>
    %c0_59 = arith.constant 0 : index
    %c0_60 = arith.constant 0 : index
    %50 = vector.load %arg13[%c0_59, %c0_60] : memref<1x256xf32, #tpu.memory_space<vmem>>, vector<1x256xf32>
    %51 = vector.broadcast %50 : vector<1x256xf32> to vector<3x256xf32>
    %52 = arith.addf %49, %51 : vector<3x256xf32>
    %cst_61 = arith.constant 0.000000e+00 : f32
    %53 = vector.broadcast %cst_61 : f32 to vector<3x256xf32>
    %54 = arith.maximumf %52, %53 : vector<3x256xf32>
    %55 = arith.truncf %9 : vector<3x256xf32> to vector<3x256xbf16>
    %c0_62 = arith.constant 0 : index
    %c0_63 = arith.constant 0 : index
    %56 = vector.load %arg12[%c0_62, %c0_63] : memref<256x256xbf16, #tpu.memory_space<vmem>>, vector<256x256xbf16>
    %cst_64 = arith.constant dense<0.000000e+00> : vector<3x256xf32>
    %57 = tpu.matmul %55, %56, %cst_64 {dimension_numbers = #tpu.dot_dimension_numbers<[1], [0], [0], [1], [0, 0, 1, 1], [], []>} : vector<3x256xbf16>, vector<256x256xbf16>, vector<3x256xf32> -> vector<3x256xf32>
    %c0_65 = arith.constant 0 : index
    %c0_66 = arith.constant 0 : index
    %58 = vector.load %arg13[%c0_65, %c0_66] : memref<1x256xf32, #tpu.memory_space<vmem>>, vector<1x256xf32>
    %59 = vector.broadcast %58 : vector<1x256xf32> to vector<3x256xf32>
    %60 = arith.addf %57, %59 : vector<3x256xf32>
    %cst_67 = arith.constant 0.000000e+00 : f32
    %61 = vector.broadcast %cst_67 : f32 to vector<3x256xf32>
    %62 = arith.maximumf %60, %61 : vector<3x256xf32>
    %63 = vector.broadcast %12 : vector<3x1xf32> to vector<3x256xf32>
    %64 = arith.mulf %62, %63 : vector<3x256xf32>
    %65 = arith.truncf %11 : vector<3x256xf32> to vector<3x256xbf16>
    %c0_68 = arith.constant 0 : index
    %c0_69 = arith.constant 0 : index
    %66 = vector.load %arg12[%c0_68, %c0_69] : memref<256x256xbf16, #tpu.memory_space<vmem>>, vector<256x256xbf16>
    %cst_70 = arith.constant dense<0.000000e+00> : vector<3x256xf32>
    %67 = tpu.matmul %65, %66, %cst_70 {dimension_numbers = #tpu.dot_dimension_numbers<[1], [0], [0], [1], [0, 0, 1, 1], [], []>} : vector<3x256xbf16>, vector<256x256xbf16>, vector<3x256xf32> -> vector<3x256xf32>
    %c0_71 = arith.constant 0 : index
    %c0_72 = arith.constant 0 : index
    %68 = vector.load %arg13[%c0_71, %c0_72] : memref<1x256xf32, #tpu.memory_space<vmem>>, vector<1x256xf32>
    %69 = vector.broadcast %68 : vector<1x256xf32> to vector<3x256xf32>
    %70 = arith.addf %67, %69 : vector<3x256xf32>
    %cst_73 = arith.constant 0.000000e+00 : f32
    %71 = vector.broadcast %cst_73 : f32 to vector<3x256xf32>
    %72 = arith.maximumf %70, %71 : vector<3x256xf32>
    %73 = vector.extract_strided_slice %1 {offsets = [0, 0], sizes = [2, 256], strides = [1, 1]} : vector<3x256xf32> to vector<2x256xf32>
    %c0_74 = arith.constant 0 : index
    %c0_75 = arith.constant 0 : index
    %c0_76 = arith.constant 0 : index
    %74 = vector.load %arg8[%c0_74, %c0_75, %c0_76] : memref<9x1x256xf32, #tpu.memory_space<vmem>>, vector<1x1x256xf32>
    %75 = vector.shape_cast %74 : vector<1x1x256xf32> to vector<1x256xf32>
    %76 = vector.broadcast %75 : vector<1x256xf32> to vector<2x256xf32>
    %77 = arith.mulf %73, %76 : vector<2x256xf32>
    %78 = vector.extract_strided_slice %26 {offsets = [0, 0], sizes = [2, 256], strides = [1, 1]} : vector<3x256xf32> to vector<2x256xf32>
    %c0_77 = arith.constant 0 : index
    %c0_78 = arith.constant 0 : index
    %c0_79 = arith.constant 0 : index
    %79 = vector.load %arg14[%c0_77, %c0_78, %c0_79] : memref<9x1x256xf32, #tpu.memory_space<vmem>>, vector<1x1x256xf32>
    %80 = vector.shape_cast %79 : vector<1x1x256xf32> to vector<1x256xf32>
    %81 = vector.broadcast %80 : vector<1x256xf32> to vector<2x256xf32>
    %82 = arith.mulf %78, %81 : vector<2x256xf32>
    %83 = vector.extract_strided_slice %3 {offsets = [0, 0], sizes = [2, 256], strides = [1, 1]} : vector<3x256xf32> to vector<2x256xf32>
    %c1 = arith.constant 1 : index
    %c0_80 = arith.constant 0 : index
    %c0_81 = arith.constant 0 : index
    %84 = vector.load %arg8[%c1, %c0_80, %c0_81] : memref<9x1x256xf32, #tpu.memory_space<vmem>>, vector<1x1x256xf32>
    %85 = vector.shape_cast %84 : vector<1x1x256xf32> to vector<1x256xf32>
    %86 = vector.broadcast %85 : vector<1x256xf32> to vector<2x256xf32>
    %87 = arith.mulf %83, %86 : vector<2x256xf32>
    %88 = vector.extract_strided_slice %36 {offsets = [0, 0], sizes = [2, 256], strides = [1, 1]} : vector<3x256xf32> to vector<2x256xf32>
    %c1_82 = arith.constant 1 : index
    %c0_83 = arith.constant 0 : index
    %c0_84 = arith.constant 0 : index
    %89 = vector.load %arg14[%c1_82, %c0_83, %c0_84] : memref<9x1x256xf32, #tpu.memory_space<vmem>>, vector<1x1x256xf32>
    %90 = vector.shape_cast %89 : vector<1x1x256xf32> to vector<1x256xf32>
    %91 = vector.broadcast %90 : vector<1x256xf32> to vector<2x256xf32>
    %92 = arith.mulf %88, %91 : vector<2x256xf32>
    %93 = vector.extract_strided_slice %1 {offsets = [1, 0], sizes = [2, 256], strides = [1, 1]} : vector<3x256xf32> to vector<2x256xf32>
    %c2 = arith.constant 2 : index
    %c0_85 = arith.constant 0 : index
    %c0_86 = arith.constant 0 : index
    %94 = vector.load %arg8[%c2, %c0_85, %c0_86] : memref<9x1x256xf32, #tpu.memory_space<vmem>>, vector<1x1x256xf32>
    %95 = vector.shape_cast %94 : vector<1x1x256xf32> to vector<1x256xf32>
    %96 = vector.broadcast %95 : vector<1x256xf32> to vector<2x256xf32>
    %97 = arith.mulf %93, %96 : vector<2x256xf32>
    %98 = vector.extract_strided_slice %26 {offsets = [1, 0], sizes = [2, 256], strides = [1, 1]} : vector<3x256xf32> to vector<2x256xf32>
    %c2_87 = arith.constant 2 : index
    %c0_88 = arith.constant 0 : index
    %c0_89 = arith.constant 0 : index
    %99 = vector.load %arg14[%c2_87, %c0_88, %c0_89] : memref<9x1x256xf32, #tpu.memory_space<vmem>>, vector<1x1x256xf32>
    %100 = vector.shape_cast %99 : vector<1x1x256xf32> to vector<1x256xf32>
    %101 = vector.broadcast %100 : vector<1x256xf32> to vector<2x256xf32>
    %102 = arith.mulf %98, %101 : vector<2x256xf32>
    %103 = vector.extract_strided_slice %5 {offsets = [0, 0], sizes = [2, 256], strides = [1, 1]} : vector<3x256xf32> to vector<2x256xf32>
    %c3 = arith.constant 3 : index
    %c0_90 = arith.constant 0 : index
    %c0_91 = arith.constant 0 : index
    %104 = vector.load %arg8[%c3, %c0_90, %c0_91] : memref<9x1x256xf32, #tpu.memory_space<vmem>>, vector<1x1x256xf32>
    %105 = vector.shape_cast %104 : vector<1x1x256xf32> to vector<1x256xf32>
    %106 = vector.broadcast %105 : vector<1x256xf32> to vector<2x256xf32>
    %107 = arith.mulf %103, %106 : vector<2x256xf32>
    %108 = vector.extract_strided_slice %46 {offsets = [0, 0], sizes = [2, 256], strides = [1, 1]} : vector<3x256xf32> to vector<2x256xf32>
    %c3_92 = arith.constant 3 : index
    %c0_93 = arith.constant 0 : index
    %c0_94 = arith.constant 0 : index
    %109 = vector.load %arg14[%c3_92, %c0_93, %c0_94] : memref<9x1x256xf32, #tpu.memory_space<vmem>>, vector<1x1x256xf32>
    %110 = vector.shape_cast %109 : vector<1x1x256xf32> to vector<1x256xf32>
    %111 = vector.broadcast %110 : vector<1x256xf32> to vector<2x256xf32>
    %112 = arith.mulf %108, %111 : vector<2x256xf32>
    %113 = vector.extract_strided_slice %7 {offsets = [0, 0], sizes = [2, 256], strides = [1, 1]} : vector<3x256xf32> to vector<2x256xf32>
    %c4 = arith.constant 4 : index
    %c0_95 = arith.constant 0 : index
    %c0_96 = arith.constant 0 : index
    %114 = vector.load %arg8[%c4, %c0_95, %c0_96] : memref<9x1x256xf32, #tpu.memory_space<vmem>>, vector<1x1x256xf32>
    %115 = vector.shape_cast %114 : vector<1x1x256xf32> to vector<1x256xf32>
    %116 = vector.broadcast %115 : vector<1x256xf32> to vector<2x256xf32>
    %117 = arith.mulf %113, %116 : vector<2x256xf32>
    %118 = vector.extract_strided_slice %54 {offsets = [0, 0], sizes = [2, 256], strides = [1, 1]} : vector<3x256xf32> to vector<2x256xf32>
    %c4_97 = arith.constant 4 : index
    %c0_98 = arith.constant 0 : index
    %c0_99 = arith.constant 0 : index
    %119 = vector.load %arg14[%c4_97, %c0_98, %c0_99] : memref<9x1x256xf32, #tpu.memory_space<vmem>>, vector<1x1x256xf32>
    %120 = vector.shape_cast %119 : vector<1x1x256xf32> to vector<1x256xf32>
    %121 = vector.broadcast %120 : vector<1x256xf32> to vector<2x256xf32>
    %122 = arith.mulf %118, %121 : vector<2x256xf32>
    %123 = vector.extract_strided_slice %5 {offsets = [1, 0], sizes = [2, 256], strides = [1, 1]} : vector<3x256xf32> to vector<2x256xf32>
    %c5 = arith.constant 5 : index
    %c0_100 = arith.constant 0 : index
    %c0_101 = arith.constant 0 : index
    %124 = vector.load %arg8[%c5, %c0_100, %c0_101] : memref<9x1x256xf32, #tpu.memory_space<vmem>>, vector<1x1x256xf32>
    %125 = vector.shape_cast %124 : vector<1x1x256xf32> to vector<1x256xf32>
    %126 = vector.broadcast %125 : vector<1x256xf32> to vector<2x256xf32>
    %127 = arith.mulf %123, %126 : vector<2x256xf32>
    %128 = vector.extract_strided_slice %46 {offsets = [1, 0], sizes = [2, 256], strides = [1, 1]} : vector<3x256xf32> to vector<2x256xf32>
    %c5_102 = arith.constant 5 : index
    %c0_103 = arith.constant 0 : index
    %c0_104 = arith.constant 0 : index
    %129 = vector.load %arg14[%c5_102, %c0_103, %c0_104] : memref<9x1x256xf32, #tpu.memory_space<vmem>>, vector<1x1x256xf32>
    %130 = vector.shape_cast %129 : vector<1x1x256xf32> to vector<1x256xf32>
    %131 = vector.broadcast %130 : vector<1x256xf32> to vector<2x256xf32>
    %132 = arith.mulf %128, %131 : vector<2x256xf32>
    %133 = vector.extract_strided_slice %9 {offsets = [0, 0], sizes = [2, 256], strides = [1, 1]} : vector<3x256xf32> to vector<2x256xf32>
    %c6 = arith.constant 6 : index
    %c0_105 = arith.constant 0 : index
    %c0_106 = arith.constant 0 : index
    %134 = vector.load %arg8[%c6, %c0_105, %c0_106] : memref<9x1x256xf32, #tpu.memory_space<vmem>>, vector<1x1x256xf32>
    %135 = vector.shape_cast %134 : vector<1x1x256xf32> to vector<1x256xf32>
    %136 = vector.broadcast %135 : vector<1x256xf32> to vector<2x256xf32>
    %137 = arith.mulf %133, %136 : vector<2x256xf32>
    %138 = vector.extract_strided_slice %64 {offsets = [0, 0], sizes = [2, 256], strides = [1, 1]} : vector<3x256xf32> to vector<2x256xf32>
    %c6_107 = arith.constant 6 : index
    %c0_108 = arith.constant 0 : index
    %c0_109 = arith.constant 0 : index
    %139 = vector.load %arg14[%c6_107, %c0_108, %c0_109] : memref<9x1x256xf32, #tpu.memory_space<vmem>>, vector<1x1x256xf32>
    %140 = vector.shape_cast %139 : vector<1x1x256xf32> to vector<1x256xf32>
    %141 = vector.broadcast %140 : vector<1x256xf32> to vector<2x256xf32>
    %142 = arith.mulf %138, %141 : vector<2x256xf32>
    %143 = vector.extract_strided_slice %11 {offsets = [0, 0], sizes = [2, 256], strides = [1, 1]} : vector<3x256xf32> to vector<2x256xf32>
    %c7 = arith.constant 7 : index
    %c0_110 = arith.constant 0 : index
    %c0_111 = arith.constant 0 : index
    %144 = vector.load %arg8[%c7, %c0_110, %c0_111] : memref<9x1x256xf32, #tpu.memory_space<vmem>>, vector<1x1x256xf32>
    %145 = vector.shape_cast %144 : vector<1x1x256xf32> to vector<1x256xf32>
    %146 = vector.broadcast %145 : vector<1x256xf32> to vector<2x256xf32>
    %147 = arith.mulf %143, %146 : vector<2x256xf32>
    %148 = vector.extract_strided_slice %72 {offsets = [0, 0], sizes = [2, 256], strides = [1, 1]} : vector<3x256xf32> to vector<2x256xf32>
    %c7_112 = arith.constant 7 : index
    %c0_113 = arith.constant 0 : index
    %c0_114 = arith.constant 0 : index
    %149 = vector.load %arg14[%c7_112, %c0_113, %c0_114] : memref<9x1x256xf32, #tpu.memory_space<vmem>>, vector<1x1x256xf32>
    %150 = vector.shape_cast %149 : vector<1x1x256xf32> to vector<1x256xf32>
    %151 = vector.broadcast %150 : vector<1x256xf32> to vector<2x256xf32>
    %152 = arith.mulf %148, %151 : vector<2x256xf32>
    %153 = vector.extract_strided_slice %9 {offsets = [1, 0], sizes = [2, 256], strides = [1, 1]} : vector<3x256xf32> to vector<2x256xf32>
    %c8 = arith.constant 8 : index
    %c0_115 = arith.constant 0 : index
    %c0_116 = arith.constant 0 : index
    %154 = vector.load %arg8[%c8, %c0_115, %c0_116] : memref<9x1x256xf32, #tpu.memory_space<vmem>>, vector<1x1x256xf32>
    %155 = vector.shape_cast %154 : vector<1x1x256xf32> to vector<1x256xf32>
    %156 = vector.broadcast %155 : vector<1x256xf32> to vector<2x256xf32>
    %157 = arith.mulf %153, %156 : vector<2x256xf32>
    %158 = vector.extract_strided_slice %64 {offsets = [1, 0], sizes = [2, 256], strides = [1, 1]} : vector<3x256xf32> to vector<2x256xf32>
    %c8_117 = arith.constant 8 : index
    %c0_118 = arith.constant 0 : index
    %c0_119 = arith.constant 0 : index
    %159 = vector.load %arg14[%c8_117, %c0_118, %c0_119] : memref<9x1x256xf32, #tpu.memory_space<vmem>>, vector<1x1x256xf32>
    %160 = vector.shape_cast %159 : vector<1x1x256xf32> to vector<1x256xf32>
    %161 = vector.broadcast %160 : vector<1x256xf32> to vector<2x256xf32>
    %162 = arith.mulf %158, %161 : vector<2x256xf32>
    %163 = arith.addf %77, %87 : vector<2x256xf32>
    %164 = arith.addf %97, %107 : vector<2x256xf32>
    %165 = arith.addf %117, %127 : vector<2x256xf32>
    %166 = arith.addf %137, %147 : vector<2x256xf32>
    %167 = arith.addf %163, %164 : vector<2x256xf32>
    %168 = arith.addf %165, %166 : vector<2x256xf32>
    %169 = arith.addf %167, %168 : vector<2x256xf32>
    %170 = arith.addf %169, %157 : vector<2x256xf32>
    %c0_120 = arith.constant 0 : index
    %c0_121 = arith.constant 0 : index
    %171 = vector.load %arg9[%c0_120, %c0_121] : memref<1x256xf32, #tpu.memory_space<vmem>>, vector<1x256xf32>
    %172 = vector.broadcast %171 : vector<1x256xf32> to vector<2x256xf32>
    %173 = arith.addf %170, %172 : vector<2x256xf32>
    %174 = arith.addf %82, %92 : vector<2x256xf32>
    %175 = arith.addf %102, %112 : vector<2x256xf32>
    %176 = arith.addf %122, %132 : vector<2x256xf32>
    %177 = arith.addf %142, %152 : vector<2x256xf32>
    %178 = arith.addf %174, %175 : vector<2x256xf32>
    %179 = arith.addf %176, %177 : vector<2x256xf32>
    %180 = arith.addf %178, %179 : vector<2x256xf32>
    %181 = arith.addf %180, %162 : vector<2x256xf32>
    %c0_122 = arith.constant 0 : index
    %c0_123 = arith.constant 0 : index
    %182 = vector.load %arg15[%c0_122, %c0_123] : memref<1x256xf32, #tpu.memory_space<vmem>>, vector<1x256xf32>
    %183 = vector.broadcast %182 : vector<1x256xf32> to vector<2x256xf32>
    %184 = arith.addf %181, %183 : vector<2x256xf32>
    %185 = arith.truncf %173 : vector<2x256xf32> to vector<2x256xbf16>
    %c0_124 = arith.constant 0 : index
    %c0_125 = arith.constant 0 : index
    %186 = vector.load %arg10[%c0_124, %c0_125] : memref<256x256xbf16, #tpu.memory_space<vmem>>, vector<256x256xbf16>
    %cst_126 = arith.constant dense<0.000000e+00> : vector<2x256xf32>
    %187 = tpu.matmul %185, %186, %cst_126 {dimension_numbers = #tpu.dot_dimension_numbers<[1], [0], [0], [1], [0, 0, 1, 1], [], []>} : vector<2x256xbf16>, vector<256x256xbf16>, vector<2x256xf32> -> vector<2x256xf32>
    %c0_127 = arith.constant 0 : index
    %c0_128 = arith.constant 0 : index
    %188 = vector.load %arg11[%c0_127, %c0_128] : memref<1x256xf32, #tpu.memory_space<vmem>>, vector<1x256xf32>
    %189 = vector.broadcast %188 : vector<1x256xf32> to vector<2x256xf32>
    %190 = arith.addf %187, %189 : vector<2x256xf32>
    %cst_129 = arith.constant 0.000000e+00 : f32
    %191 = vector.broadcast %cst_129 : f32 to vector<2x256xf32>
    %192 = arith.maximumf %190, %191 : vector<2x256xf32>
    %193 = arith.truncf %184 : vector<2x256xf32> to vector<2x256xbf16>
    %c0_130 = arith.constant 0 : index
    %c0_131 = arith.constant 0 : index
    %194 = vector.load %arg16[%c0_130, %c0_131] : memref<256x256xbf16, #tpu.memory_space<vmem>>, vector<256x256xbf16>
    %cst_132 = arith.constant dense<0.000000e+00> : vector<2x256xf32>
    %195 = tpu.matmul %193, %194, %cst_132 {dimension_numbers = #tpu.dot_dimension_numbers<[1], [0], [0], [1], [0, 0, 1, 1], [], []>} : vector<2x256xbf16>, vector<256x256xbf16>, vector<2x256xf32> -> vector<2x256xf32>
    %c0_133 = arith.constant 0 : index
    %c0_134 = arith.constant 0 : index
    %196 = vector.load %arg17[%c0_133, %c0_134] : memref<1x256xf32, #tpu.memory_space<vmem>>, vector<1x256xf32>
    %197 = vector.broadcast %196 : vector<1x256xf32> to vector<2x256xf32>
    %198 = arith.addf %195, %197 : vector<2x256xf32>
    %cst_135 = arith.constant 0.000000e+00 : f32
    %199 = vector.broadcast %cst_135 : f32 to vector<2x256xf32>
    %200 = arith.maximumf %198, %199 : vector<2x256xf32>
    %c0_136 = arith.constant 0 : index
    %c0_137 = arith.constant 0 : index
    %c0_138 = arith.constant 0 : index
    %c0_139 = arith.constant 0 : index
    %201 = vector.load %arg19[%c0_136, %c0_137, %c0_138, %c0_139] : memref<1x1x2x512xf32, #tpu.memory_space<vmem>>, vector<1x1x2x256xf32>
    %202 = vector.shape_cast %201 : vector<1x1x2x256xf32> to vector<2x256xf32>
    %203 = vector.shape_cast %192 : vector<2x256xf32> to vector<1x1x2x256xf32>
    tpu.vector_store %arg19[%c0_136, %c0_137, %c0_138, %c0_139], %203 {strides = array<i32>} : memref<1x1x2x512xf32, #tpu.memory_space<vmem>>, vector<1x1x2x256xf32>,
    %c0_140 = arith.constant 0 : index
    %c0_141 = arith.constant 0 : index
    %c0_142 = arith.constant 0 : index
    %c256 = arith.constant 256 : index
    %204 = vector.load %arg19[%c0_140, %c0_141, %c0_142, %c256] : memref<1x1x2x512xf32, #tpu.memory_space<vmem>>, vector<1x1x2x256xf32>
    %205 = vector.shape_cast %204 : vector<1x1x2x256xf32> to vector<2x256xf32>
    %206 = vector.shape_cast %200 : vector<2x256xf32> to vector<1x1x2x256xf32>
    tpu.vector_store %arg19[%c0_140, %c0_141, %c0_142, %c256], %206 {strides = array<i32>} : memref<1x1x2x512xf32, #tpu.memory_space<vmem>>, vector<1x1x2x256xf32>,
    return
  }
  func.func @transform_0(%arg0: i32, %arg1: i32) -> (i32, i32, i32, i32, i32, i32) {
    %c0_i32 = arith.constant 0 : i32
    %0 = arith.addi %arg1, %c0_i32 : i32
    %c0_i32_0 = arith.constant 0 : i32
    %c0_i32_1 = arith.constant 0 : i32
    %c0_i32_2 = arith.constant 0 : i32
    %c0_i32_3 = arith.constant 0 : i32
    %c0_i32_4 = arith.constant 0 : i32
    return %c0_i32_0, %c0_i32_1, %arg0, %0, %c0_i32_2, %c0_i32_3 : i32, i32, i32, i32, i32, i32
  }
  func.func @transform_1(%arg0: i32, %arg1: i32) -> (i32, i32, i32, i32, i32, i32) {
    %c0_i32 = arith.constant 0 : i32
    %0 = arith.addi %arg1, %c0_i32 : i32
    %c0_i32_0 = arith.constant 0 : i32
    %c1_i32 = arith.constant 1 : i32
    %c0_i32_1 = arith.constant 0 : i32
    %c0_i32_2 = arith.constant 0 : i32
    %c0_i32_3 = arith.constant 0 : i32
    return %c0_i32_0, %c1_i32, %arg0, %0, %c0_i32_1, %c0_i32_2 : i32, i32, i32, i32, i32, i32
  }
  func.func @transform_2(%arg0: i32, %arg1: i32) -> (i32, i32, i32, i32, i32, i32) {
    %c0_i32 = arith.constant 0 : i32
    %0 = arith.addi %arg1, %c0_i32 : i32
    %c1_i32 = arith.constant 1 : i32
    %c0_i32_0 = arith.constant 0 : i32
    %c0_i32_1 = arith.constant 0 : i32
    %c0_i32_2 = arith.constant 0 : i32
    %c0_i32_3 = arith.constant 0 : i32
    return %c1_i32, %c0_i32_0, %arg0, %0, %c0_i32_1, %c0_i32_2 : i32, i32, i32, i32, i32, i32
  }
  func.func @transform_3(%arg0: i32, %arg1: i32) -> (i32, i32, i32, i32, i32, i32) {
    %c0_i32 = arith.constant 0 : i32
    %0 = arith.addi %arg1, %c0_i32 : i32
    %c1_i32 = arith.constant 1 : i32
    %c1_i32_0 = arith.constant 1 : i32
    %c0_i32_1 = arith.constant 0 : i32
    %c0_i32_2 = arith.constant 0 : i32
    %c0_i32_3 = arith.constant 0 : i32
    return %c1_i32, %c1_i32_0, %arg0, %0, %c0_i32_1, %c0_i32_2 : i32, i32, i32, i32, i32, i32
  }
  func.func @transform_4(%arg0: i32, %arg1: i32) -> (i32, i32, i32, i32, i32, i32) {
    %c1_i32 = arith.constant 1 : i32
    %0 = arith.addi %arg1, %c1_i32 : i32
    %c0_i32 = arith.constant 0 : i32
    %c0_i32_0 = arith.constant 0 : i32
    %c0_i32_1 = arith.constant 0 : i32
    %c0_i32_2 = arith.constant 0 : i32
    %c0_i32_3 = arith.constant 0 : i32
    return %c0_i32, %c0_i32_0, %arg0, %0, %c0_i32_1, %c0_i32_2 : i32, i32, i32, i32, i32, i32
  }
  func.func @transform_5(%arg0: i32, %arg1: i32) -> (i32, i32, i32, i32, i32, i32) {
    %c1_i32 = arith.constant 1 : i32
    %0 = arith.addi %arg1, %c1_i32 : i32
    %c0_i32 = arith.constant 0 : i32
    %c1_i32_0 = arith.constant 1 : i32
    %c0_i32_1 = arith.constant 0 : i32
    %c0_i32_2 = arith.constant 0 : i32
    %c0_i32_3 = arith.constant 0 : i32
    return %c0_i32, %c1_i32_0, %arg0, %0, %c0_i32_1, %c0_i32_2 : i32, i32, i32, i32, i32, i32
  }
  func.func @transform_6(%arg0: i32, %arg1: i32) -> (i32, i32, i32) {
    %c0_i32 = arith.constant 0 : i32
    %c0_i32_0 = arith.constant 0 : i32
    %c0_i32_1 = arith.constant 0 : i32
    %c0_i32_2 = arith.constant 0 : i32
    return %c0_i32, %c0_i32_0, %c0_i32_1 : i32, i32, i32
  }
  func.func @transform_7(%arg0: i32, %arg1: i32) -> (i32, i32) {
    %c0_i32 = arith.constant 0 : i32
    %c0_i32_0 = arith.constant 0 : i32
    %c0_i32_1 = arith.constant 0 : i32
    return %c0_i32, %c0_i32_0 : i32, i32
  }
  func.func @transform_8(%arg0: i32, %arg1: i32) -> (i32, i32) {
    %c0_i32 = arith.constant 0 : i32
    %c0_i32_0 = arith.constant 0 : i32
    %c0_i32_1 = arith.constant 0 : i32
    return %c0_i32, %c0_i32_0 : i32, i32
  }
  func.func @transform_9(%arg0: i32, %arg1: i32) -> (i32, i32) {
    %c0_i32 = arith.constant 0 : i32
    %c0_i32_0 = arith.constant 0 : i32
    %c0_i32_1 = arith.constant 0 : i32
    return %c0_i32, %c0_i32_0 : i32, i32
  }
  func.func @transform_10(%arg0: i32, %arg1: i32) -> (i32, i32) {
    %c0_i32 = arith.constant 0 : i32
    %c0_i32_0 = arith.constant 0 : i32
    %c0_i32_1 = arith.constant 0 : i32
    return %c0_i32, %c0_i32_0 : i32, i32
  }
  func.func @transform_11(%arg0: i32, %arg1: i32) -> (i32, i32) {
    %c0_i32 = arith.constant 0 : i32
    %c0_i32_0 = arith.constant 0 : i32
    %c0_i32_1 = arith.constant 0 : i32
    return %c0_i32, %c0_i32_0 : i32, i32
  }
  func.func @transform_12(%arg0: i32, %arg1: i32) -> (i32, i32, i32) {
    %c0_i32 = arith.constant 0 : i32
    %c0_i32_0 = arith.constant 0 : i32
    %c0_i32_1 = arith.constant 0 : i32
    %c0_i32_2 = arith.constant 0 : i32
    return %c0_i32, %c0_i32_0, %c0_i32_1 : i32, i32, i32
  }
  func.func @transform_13(%arg0: i32, %arg1: i32) -> (i32, i32) {
    %c0_i32 = arith.constant 0 : i32
    %c0_i32_0 = arith.constant 0 : i32
    %c0_i32_1 = arith.constant 0 : i32
    return %c0_i32, %c0_i32_0 : i32, i32
  }
  func.func @transform_14(%arg0: i32, %arg1: i32) -> (i32, i32) {
    %c0_i32 = arith.constant 0 : i32
    %c0_i32_0 = arith.constant 0 : i32
    %c0_i32_1 = arith.constant 0 : i32
    return %c0_i32, %c0_i32_0 : i32, i32
  }
  func.func @transform_15(%arg0: i32, %arg1: i32) -> (i32, i32) {
    %c0_i32 = arith.constant 0 : i32
    %c0_i32_0 = arith.constant 0 : i32
    %c0_i32_1 = arith.constant 0 : i32
    return %c0_i32, %c0_i32_0 : i32, i32
  }
  func.func @transform_16(%arg0: i32, %arg1: i32) -> (i32, i32) {
    %c0_i32 = arith.constant 0 : i32
    %c0_i32_0 = arith.constant 0 : i32
    %c0_i32_1 = arith.constant 0 : i32
    return %c0_i32, %c0_i32_0 : i32, i32
  }
  func.func @transform_17(%arg0: i32, %arg1: i32) -> (i32, i32, i32, i32) {
    %c0_i32 = arith.constant 0 : i32
    %c0_i32_0 = arith.constant 0 : i32
    %c0_i32_1 = arith.constant 0 : i32
    return %arg0, %arg1, %c0_i32, %c0_i32_0 : i32, i32, i32, i32
  }
}

module attributes {stable_mosaic.version = 11 : i64} {
  func.func @_pool_fc_kernel(%arg0: i32, %arg1: memref<2x4x512xf32, #tpu.memory_space<vmem>>, %arg2: memref<512x512xbf16, #tpu.memory_space<vmem>>, %arg3: memref<1x512xf32, #tpu.memory_space<vmem>>, %arg4: memref<2x512xf32, #tpu.memory_space<vmem>>) attributes {dimension_semantics = [#tpu.dimension_semantics<arbitrary>], iteration_bounds = array<i64: 1>, scalar_prefetch = 0 : i64, scratch_operands = 0 : i64, tpu.core_type = #tpu.core_type<tc>, window_params = [{pipeline_mode = #tpu.pipeline_mode<synchronous>, transform_indices = @transform_0, window_bounds = array<i64: 2, 4, 512>}, {pipeline_mode = #tpu.pipeline_mode<synchronous>, transform_indices = @transform_1, window_bounds = array<i64: 512, 512>}, {pipeline_mode = #tpu.pipeline_mode<synchronous>, transform_indices = @transform_2, window_bounds = array<i64: 1, 512>}, {pipeline_mode = #tpu.pipeline_mode<synchronous>, transform_indices = @transform_3, window_bounds = array<i64: 2, 512>}]} {
    %c0 = arith.constant 0 : index
    %c0_0 = arith.constant 0 : index
    %c0_1 = arith.constant 0 : index
    %0 = vector.load %arg1[%c0, %c0_0, %c0_1] : memref<2x4x512xf32, #tpu.memory_space<vmem>>, vector<2x4x512xf32>
    %cst = arith.constant dense<0.000000e+00> : vector<2x512xf32>
    %1 = vector.multi_reduction <add>, %0, %cst [1] : vector<2x4x512xf32> to vector<2x512xf32>
    %cst_2 = arith.constant 4.000000e+00 : f32
    %2 = vector.broadcast %cst_2 : f32 to vector<2x512xf32>
    %3 = arith.divf %1, %2 : vector<2x512xf32>
    %4 = arith.truncf %3 : vector<2x512xf32> to vector<2x512xbf16>
    %c0_3 = arith.constant 0 : index
    %c0_4 = arith.constant 0 : index
    %5 = vector.load %arg2[%c0_3, %c0_4] : memref<512x512xbf16, #tpu.memory_space<vmem>>, vector<512x512xbf16>
    %cst_5 = arith.constant dense<0.000000e+00> : vector<2x512xf32>
    %6 = tpu.matmul %4, %5, %cst_5 {dimension_numbers = #tpu.dot_dimension_numbers<[1], [0], [0], [1], [0, 0, 1, 1], [], []>} : vector<2x512xbf16>, vector<512x512xbf16>, vector<2x512xf32> -> vector<2x512xf32>
    %c0_6 = arith.constant 0 : index
    %c0_7 = arith.constant 0 : index
    %7 = vector.load %arg3[%c0_6, %c0_7] : memref<1x512xf32, #tpu.memory_space<vmem>>, vector<1x512xf32>
    %8 = vector.broadcast %7 : vector<1x512xf32> to vector<2x512xf32>
    %9 = arith.addf %6, %8 : vector<2x512xf32>
    %c0_8 = arith.constant 0 : index
    %c0_9 = arith.constant 0 : index
    %10 = vector.load %arg4[%c0_8, %c0_9] : memref<2x512xf32, #tpu.memory_space<vmem>>, vector<2x512xf32>
    tpu.vector_store %arg4[%c0_8, %c0_9], %9 {strides = array<i32>} : memref<2x512xf32, #tpu.memory_space<vmem>>, vector<2x512xf32>,
    return
  }
  func.func @transform_0(%arg0: i32) -> (i32, i32, i32) {
    %c0_i32 = arith.constant 0 : i32
    %c0_i32_0 = arith.constant 0 : i32
    %c0_i32_1 = arith.constant 0 : i32
    %c0_i32_2 = arith.constant 0 : i32
    return %c0_i32, %c0_i32_0, %c0_i32_1 : i32, i32, i32
  }
  func.func @transform_1(%arg0: i32) -> (i32, i32) {
    %c0_i32 = arith.constant 0 : i32
    %c0_i32_0 = arith.constant 0 : i32
    %c0_i32_1 = arith.constant 0 : i32
    return %c0_i32, %c0_i32_0 : i32, i32
  }
  func.func @transform_2(%arg0: i32) -> (i32, i32) {
    %c0_i32 = arith.constant 0 : i32
    %c0_i32_0 = arith.constant 0 : i32
    %c0_i32_1 = arith.constant 0 : i32
    return %c0_i32, %c0_i32_0 : i32, i32
  }
  func.func @transform_3(%arg0: i32) -> (i32, i32) {
    %c0_i32 = arith.constant 0 : i32
    %c0_i32_0 = arith.constant 0 : i32
    %c0_i32_1 = arith.constant 0 : i32
    return %c0_i32, %c0_i32_0 : i32, i32
  }
}

</mosaic_0001>

<bundles_post_ra>
// kernel: shufflenet_v2_forward.5
= control target key start
LH: loop header
LB: loop body
LE: loop exit
PB: predicated region body
PF: predicated region fallthrough
CT: control target
= control target key end

     0   :  { %s574_s12 = smov 0   ;;  %s757_s0 = inlined_call_operand.vmem [shape: f32[512,9], index: 0, kind: input, shape index: {}]   ;;  %s758_s1 = inlined_call_operand.vmem [shape: bf16[9,64], index: 1, kind: input, shape index: {}]   ;;  %s759_s2 = inlined_call_operand.vmem [shape: f32[1,64], index: 2, kind: input, shape index: {}]   ;;  %s760_s3 = inlined_call_operand.vmem [shape: f32[512,64], index: 3, kind: output, shape index: {}]  }
   0x1 LB: > { %s500_s13 = sadd.s32 4294967295, %s551_s12   ;;  %p504_p0 = scmp.ge.s32.totalorder %s551_s12, 1  ;;  %s551_s12 = sphi %s574_s12, %s13_s12  }
   0x2   : > { %p138_p1 = scmp.lt.s32.totalorder %s551_s12, 3 }
   0x4   : > { %p139_p2 = pnand %p504_p0, %p138_p1 }
   0x5   : > { %s505_s18 = sshll.u32 (!%p139_p2), %s500_s13, 5 }
   0x6   : > { %142 = sbr.rel (%p139_p2) target bundleno = 215 (0xd7), region = 32  ;;  %p163_p3 = scmp.lt.s32.totalorder (!%p139_p2), %s505_s18, 63 }
   0xb   : > { %v511_v0 = vld [vmem:[%s758_s1] sm:$0xf]  ;;  %v531_v1 = vld [vmem:[%s758_s1] sm:$0x10]  ;;  %vm283_vm0 = vcmask 1043456   ;;  %vm284_vm1 = vcmask 1044480  }
   0xc   : > { %v512_v2 = vor.u32 %v531_v1, %v511_v0  ;;  %v553_v3 = vmov 65535   ;;  %s762_s18 = smov (!%p163_p3, %s505_s18), 63  ;;  %vm234_vm2 = vcmask 72704   ;;  %v649_v55 = vld [vmem:[%s759_s2] ss:$0 sm:$0xff]  ;;  %vm411_vm3 = vcmask 523264  }
   0xd   : > { %v285_v4 = vsel %vm283_vm0, 4294967295, %v553_v3  ;;  %s506_s19 = sshll.u32 %s762_s18, 3 }
   0xe   : > { %v286_v5 = vsel %vm284_vm1, %v285_v4, 0  ;;  %s596_s22 = scalar_lea.vmem %s757_s0, %s506_s19  ;;  %s657_s27 = scalar_lea.vmem %s760_s3, %s506_s19 }
   0xf   : > { %v288_v6 = vand.u32 %v512_v2, %v286_v5  ;;  %v175_v7 = vld [vmem:[%s596_s22] sm:$0xff]  ;;  %v176_v8 = vld [vmem:[%s596_s22 + $0x8] sm:$0xff]  ;;  %v177_v19 = vld [vmem:[%s596_s22 + $0x10] sm:$0xff] }
  0x10   : > { %v183_v9 = vld [vmem:[%s596_s22 + $0x40] sm:$0xff]  ;;  %v207_v10 = vpack.c.bf16 %v176_v8, %v175_v7  ;;  %v184_v11 = vld [vmem:[%s596_s22 + $0x48] sm:$0xff]  ;;  %v178_v20 = vld [vmem:[%s596_s22 + $0x18] sm:$0xff] }
  0x11   : > { %297 = vmatpush.bf16.msra.mxu0 %v288_v6  ;;  %532 = vmatpush.bf16.msra.mxu1 %v288_v6  ;;  %v191_v12 = vld [vmem:[%s596_s22 + $0x80] sm:$0xff]  ;;  %v192_v13 = vld [vmem:[%s596_s22 + $0x88] sm:$0xff]  ;;  %v211_v14 = vpack.c.bf16 %v184_v11, %v183_v9  ;;  %v185_v21 = vld [vmem:[%s596_s22 + $0x50] sm:$0xff]  ;;  %v208_v27 = vpack.c.bf16 %v178_v20, %v177_v19 }
  0x12   : > { %533 = vmatpush.bf16.msra.mxu2 %v288_v6  ;;  %534 = vmatpush.bf16.msra.mxu3 %v288_v6  ;;  %v215_v15 = vpack.c.bf16 %v192_v13, %v191_v12  ;;  %v199_v16 = vld [vmem:[%s596_s22 + $0xc0] sm:$0xff]  ;;  %v200_v17 = vld [vmem:[%s596_s22 + $0xc8] sm:$0xff]  ;;  %v186_v22 = vld [vmem:[%s596_s22 + $0x58] sm:$0xff] }
  0x13   : > { %v219_v18 = vpack.c.bf16 %v200_v17, %v199_v16  ;;  %v193_v23 = vld [vmem:[%s596_s22 + $0x90] sm:$0xff]  ;;  %v194_v24 = vld [vmem:[%s596_s22 + $0x98] sm:$0xff]  ;;  %v212_v28 = vpack.c.bf16 %v186_v22, %v185_v21  ;;  %v179_v31 = vld [vmem:[%s596_s22 + $0x20] sm:$0xff] }
  0x14   : > { %513 = vmatmul.msk.bf16.vlgmr.msra.gmra.mxu0 %vm234_vm2, %v207_v10  ;;  %517 = vmatmul.msk.bf16.vlgmr.msra.gmra.mxu1 %vm234_vm2, %v211_v14  ;;  %v201_v25 = vld [vmem:[%s596_s22 + $0xd0] sm:$0xff]  ;;  %v202_v26 = vld [vmem:[%s596_s22 + $0xd8] sm:$0xff]  ;;  %v216_v29 = vpack.c.bf16 %v194_v24, %v193_v23  ;;  %v180_v32 = vld [vmem:[%s596_s22 + $0x28] sm:$0xff] }
  0x15   : > { %521 = vmatmul.msk.bf16.vlgmr.msra.gmra.mxu2 %vm234_vm2, %v215_v15  ;;  %525 = vmatmul.msk.bf16.vlgmr.msra.gmra.mxu3 %vm234_vm2, %v219_v18  ;;  %v220_v30 = vpack.c.bf16 %v202_v26, %v201_v25  ;;  %v187_v33 = vld [vmem:[%s596_s22 + $0x60] sm:$0xff]  ;;  %v188_v34 = vld [vmem:[%s596_s22 + $0x68] sm:$0xff]  ;;  %v209_v39 = vpack.c.bf16 %v180_v32, %v179_v31  ;;  %v181_v43 = vld [vmem:[%s596_s22 + $0x30] sm:$0xff] }
  0x16   : > { %v195_v35 = vld [vmem:[%s596_s22 + $0xa0] sm:$0xff]  ;;  %v196_v36 = vld [vmem:[%s596_s22 + $0xa8] sm:$0xff]  ;;  %v213_v40 = vpack.c.bf16 %v188_v34, %v187_v33  ;;  %v182_v44 = vld [vmem:[%s596_s22 + $0x38] sm:$0xff] }
  0x17   : > { %v203_v37 = vld [vmem:[%s596_s22 + $0xe0] sm:$0xff]  ;;  %v204_v38 = vld [vmem:[%s596_s22 + $0xe8] sm:$0xff]  ;;  %v217_v41 = vpack.c.bf16 %v196_v36, %v195_v35  ;;  %v189_v45 = vld [vmem:[%s596_s22 + $0x70] sm:$0xff]  ;;  %v210_v51 = vpack.c.bf16 %v182_v44, %v181_v43 }
  0x18   : > { %v221_v42 = vpack.c.bf16 %v204_v38, %v203_v37  ;;  %v190_v46 = vld [vmem:[%s596_s22 + $0x78] sm:$0xff]  ;;  %v197_v47 = vld [vmem:[%s596_s22 + $0xb0] sm:$0xff] }
  0x19   : > { %v198_v48 = vld [vmem:[%s596_s22 + $0xb8] sm:$0xff]  ;;  %v205_v49 = vld [vmem:[%s596_s22 + $0xf0] sm:$0xff]  ;;  %v214_v52 = vpack.c.bf16 %v190_v46, %v189_v45 }
  0x1a   : > { %v206_v50 = vld [vmem:[%s596_s22 + $0xf8] sm:$0xff]  ;;  %v218_v53 = vpack.c.bf16 %v198_v48, %v197_v47 }
  0x1b   : > { %v222_v54 = vpack.c.bf16 %v206_v50, %v205_v49 }
  0x24   : > { %514 = vmatmul.msk.bf16.gmra.mxu0 %vm234_vm2, %v208_v27  ;;  %518 = vmatmul.msk.bf16.gmra.mxu1 %vm234_vm2, %v212_v28 }
  0x25   : > { %522 = vmatmul.msk.bf16.gmra.mxu2 %vm234_vm2, %v216_v29  ;;  %526 = vmatmul.msk.bf16.gmra.mxu3 %vm234_vm2, %v220_v30 }
  0x34   : > { %515 = vmatmul.msk.bf16.gmra.mxu0 %vm234_vm2, %v209_v39  ;;  %519 = vmatmul.msk.bf16.gmra.mxu1 %vm234_vm2, %v213_v40 }
  0x35   : > { %523 = vmatmul.msk.bf16.gmra.mxu2 %vm234_vm2, %v217_v41  ;;  %527 = vmatmul.msk.bf16.gmra.mxu3 %vm234_vm2, %v221_v42 }
  0x44   : > { %516 = vmatmul.msk.bf16.gmra.mxu0 %vm234_vm2, %v210_v51  ;;  %520 = vmatmul.msk.bf16.gmra.mxu1 %vm234_vm2, %v214_v52 }
  0x45   : > { %524 = vmatmul.msk.bf16.gmra.mxu2 %vm234_vm2, %v218_v53  ;;  %528 = vmatmul.msk.bf16.gmra.mxu3 %vm234_vm2, %v222_v54 }
  0x91   : > { %v299_v56 = vpop.f32.mrf.mxu0  ;;  %v319_v58 = vpop.f32.mrf.mxu1 }
  0x92   : > { %v300_v57 = vadd.f32 %v649_v55, %v299_v56  ;;  %v320_v59 = vadd.f32 %v649_v55, %v319_v58 }
  0x94   : > { %v379_v60 = vmax.f32 %v300_v57, 0.0  ;;  %v387_v61 = vmax.f32 %v320_v59, 0.0 }
  0x96   : > { %412 = vst.msk [vmem:[%s657_s27] sm:$0xff] %vm411_vm3, %v379_v60 }
  0x97   : > { %420 = vst.msk [vmem:[%s657_s27 + $0x40] sm:$0xff] %vm411_vm3, %v387_v61 }
  0x98   : > { %v339_v62 = vpop.f32.mrf.mxu2  ;;  %v359_v0 = vpop.f32.mrf.mxu3 }
  0x99   : > { %v340_v63 = vadd.f32 %v649_v55, %v339_v62  ;;  %v301_v1 = vpop.f32.mrf.mxu0  ;;  %v360_v2 = vadd.f32 %v649_v55, %v359_v0  ;;  %v321_v4 = vpop.f32.mrf.mxu1 }
  0x9a   : > { %v302_v3 = vadd.f32 %v649_v55, %v301_v1  ;;  %v322_v6 = vadd.f32 %v649_v55, %v321_v4 }
  0x9b   : > { %v395_v5 = vmax.f32 %v340_v63, 0.0  ;;  %v403_v7 = vmax.f32 %v360_v2, 0.0 }
  0x9c   : > { %v380_v8 = vmax.f32 %v302_v3, 0.0  ;;  %v388_v9 = vmax.f32 %v322_v6, 0.0 }
  0x9d   : > { %428 = vst.msk [vmem:[%s657_s27 + $0x80] sm:$0xff] %vm411_vm3, %v395_v5 }
  0x9e   : > { %436 = vst.msk [vmem:[%s657_s27 + $0xc0] sm:$0xff] %vm411_vm3, %v403_v7 }
  0x9f   : > { %413 = vst.msk [vmem:[%s657_s27 + $0x8] sm:$0xff] %vm411_vm3, %v380_v8 }
  0xa0   : > { %421 = vst.msk [vmem:[%s657_s27 + $0x48] sm:$0xff] %vm411_vm3, %v388_v9  ;;  %v341_v10 = vpop.f32.mrf.mxu2  ;;  %v361_v12 = vpop.f32.mrf.mxu3 }
  0xa1   : > { %v342_v11 = vadd.f32 %v649_v55, %v341_v10  ;;  %v304_v13 = vpop.f32.mrf.mxu0  ;;  %v362_v14 = vadd.f32 %v649_v55, %v361_v12  ;;  %v324_v16 = vpop.f32.mrf.mxu1 }
  0xa2   : > { %v305_v15 = vadd.f32 %v649_v55, %v304_v13  ;;  %v325_v18 = vadd.f32 %v649_v55, %v324_v16 }
  0xa3   : > { %v396_v17 = vmax.f32 %v342_v11, 0.0  ;;  %v404_v19 = vmax.f32 %v362_v14, 0.0 }
  0xa4   : > { %v381_v20 = vmax.f32 %v305_v15, 0.0  ;;  %v389_v21 = vmax.f32 %v325_v18, 0.0 }
  0xa5   : > { %429 = vst.msk [vmem:[%s657_s27 + $0x88] sm:$0xff] %vm411_vm3, %v396_v17 }
  0xa6   : > { %437 = vst.msk [vmem:[%s657_s27 + $0xc8] sm:$0xff] %vm411_vm3, %v404_v19 }
  0xa7   : > { %414 = vst.msk [vmem:[%s657_s27 + $0x10] sm:$0xff] %vm411_vm3, %v381_v20 }
  0xa8   : > { %422 = vst.msk [vmem:[%s657_s27 + $0x50] sm:$0xff] %vm411_vm3, %v389_v21  ;;  %v344_v22 = vpop.f32.mrf.mxu2  ;;  %v364_v24 = vpop.f32.mrf.mxu3 }
  0xa9   : > { %v345_v23 = vadd.f32 %v649_v55, %v344_v22  ;;  %v306_v25 = vpop.f32.mrf.mxu0  ;;  %v365_v26 = vadd.f32 %v649_v55, %v364_v24  ;;  %v326_v28 = vpop.f32.mrf.mxu1 }
  0xaa   : > { %v307_v27 = vadd.f32 %v649_v55, %v306_v25  ;;  %v327_v30 = vadd.f32 %v649_v55, %v326_v28 }
  0xab   : > { %v397_v29 = vmax.f32 %v345_v23, 0.0  ;;  %v405_v31 = vmax.f32 %v365_v26, 0.0 }
  0xac   : > { %v382_v32 = vmax.f32 %v307_v27, 0.0  ;;  %v390_v33 = vmax.f32 %v327_v30, 0.0 }
  0xad   : > { %430 = vst.msk [vmem:[%s657_s27 + $0x90] sm:$0xff] %vm411_vm3, %v397_v29 }
  0xae   : > { %438 = vst.msk [vmem:[%s657_s27 + $0xd0] sm:$0xff] %vm411_vm3, %v405_v31 }
  0xaf   : > { %415 = vst.msk [vmem:[%s657_s27 + $0x18] sm:$0xff] %vm411_vm3, %v382_v32 }
  0xb0   : > { %423 = vst.msk [vmem:[%s657_s27 + $0x58] sm:$0xff] %vm411_vm3, %v390_v33  ;;  %v346_v34 = vpop.f32.mrf.mxu2  ;;  %v366_v36 = vpop.f32.mrf.mxu3 }
  0xb1   : > { %v347_v35 = vadd.f32 %v649_v55, %v346_v34  ;;  %v309_v37 = vpop.f32.mrf.mxu0  ;;  %v367_v38 = vadd.f32 %v649_v55, %v366_v36  ;;  %v329_v40 = vpop.f32.mrf.mxu1 }
  0xb2   : > { %v310_v39 = vadd.f32 %v649_v55, %v309_v37  ;;  %v330_v42 = vadd.f32 %v649_v55, %v329_v40 }
  0xb3   : > { %v398_v41 = vmax.f32 %v347_v35, 0.0  ;;  %v406_v43 = vmax.f32 %v367_v38, 0.0 }
  0xb4   : > { %v383_v44 = vmax.f32 %v310_v39, 0.0  ;;  %v391_v45 = vmax.f32 %v330_v42, 0.0 }
  0xb5   : > { %431 = vst.msk [vmem:[%s657_s27 + $0x98] sm:$0xff] %vm411_vm3, %v398_v41 }
  0xb6   : > { %439 = vst.msk [vmem:[%s657_s27 + $0xd8] sm:$0xff] %vm411_vm3, %v406_v43 }
  0xb7   : > { %416 = vst.msk [vmem:[%s657_s27 + $0x20] sm:$0xff] %vm411_vm3, %v383_v44 }
  0xb8   : > { %424 = vst.msk [vmem:[%s657_s27 + $0x60] sm:$0xff] %vm411_vm3, %v391_v45  ;;  %v349_v46 = vpop.f32.mrf.mxu2  ;;  %v369_v48 = vpop.f32.mrf.mxu3 }
  0xb9   : > { %v350_v47 = vadd.f32 %v649_v55, %v349_v46  ;;  %v311_v49 = vpop.f32.mrf.mxu0  ;;  %v370_v50 = vadd.f32 %v649_v55, %v369_v48  ;;  %v331_v52 = vpop.f32.mrf.mxu1 }
  0xba   : > { %v312_v51 = vadd.f32 %v649_v55, %v311_v49  ;;  %v332_v54 = vadd.f32 %v649_v55, %v331_v52 }
  0xbb   : > { %v399_v53 = vmax.f32 %v350_v47, 0.0  ;;  %v407_v56 = vmax.f32 %v370_v50, 0.0 }
  0xbc   : > { %v384_v57 = vmax.f32 %v312_v51, 0.0  ;;  %v392_v58 = vmax.f32 %v332_v54, 0.0 }
  0xbd   : > { %432 = vst.msk [vmem:[%s657_s27 + $0xa0] sm:$0xff] %vm411_vm3, %v399_v53 }
  0xbe   : > { %440 = vst.msk [vmem:[%s657_s27 + $0xe0] sm:$0xff] %vm411_vm3, %v407_v56 }
  0xbf   : > { %417 = vst.msk [vmem:[%s657_s27 + $0x28] sm:$0xff] %vm411_vm3, %v384_v57 }
  0xc0   : > { %425 = vst.msk [vmem:[%s657_s27 + $0x68] sm:$0xff] %vm411_vm3, %v392_v58  ;;  %v351_v59 = vpop.f32.mrf.mxu2  ;;  %v371_v61 = vpop.f32.mrf.mxu3 }
  0xc1   : > { %v352_v60 = vadd.f32 %v649_v55, %v351_v59  ;;  %v314_v62 = vpop.f32.mrf.mxu0  ;;  %v372_v63 = vadd.f32 %v649_v55, %v371_v61  ;;  %v334_v1 = vpop.f32.mrf.mxu1 }
  0xc2   : > { %v315_v0 = vadd.f32 %v649_v55, %v314_v62  ;;  %v335_v3 = vadd.f32 %v649_v55, %v334_v1 }
  0xc3   : > { %v400_v2 = vmax.f32 %v352_v60, 0.0  ;;  %v408_v4 = vmax.f32 %v372_v63, 0.0 }
  0xc4   : > { %v385_v5 = vmax.f32 %v315_v0, 0.0  ;;  %v393_v6 = vmax.f32 %v335_v3, 0.0 }
  0xc5   : > { %433 = vst.msk [vmem:[%s657_s27 + $0xa8] sm:$0xff] %vm411_vm3, %v400_v2 }
  0xc6   : > { %441 = vst.msk [vmem:[%s657_s27 + $0xe8] sm:$0xff] %vm411_vm3, %v408_v4 }
  0xc7   : > { %418 = vst.msk [vmem:[%s657_s27 + $0x30] sm:$0xff] %vm411_vm3, %v385_v5 }
  0xc8   : > { %426 = vst.msk [vmem:[%s657_s27 + $0x70] sm:$0xff] %vm411_vm3, %v393_v6  ;;  %v354_v7 = vpop.f32.mrf.mxu2  ;;  %v374_v9 = vpop.f32.mrf.mxu3 }
  0xc9   : > { %v355_v8 = vadd.f32 %v649_v55, %v354_v7  ;;  %v316_v10 = vpop.f32.mrf.mxu0  ;;  %v375_v11 = vadd.f32 %v649_v55, %v374_v9  ;;  %v336_v13 = vpop.f32.mrf.mxu1 }
  0xca   : > { %v317_v12 = vadd.f32 %v649_v55, %v316_v10  ;;  %v337_v15 = vadd.f32 %v649_v55, %v336_v13 }
  0xcb   : > { %v401_v14 = vmax.f32 %v355_v8, 0.0  ;;  %v409_v16 = vmax.f32 %v375_v11, 0.0 }
  0xcc   : > { %v386_v17 = vmax.f32 %v317_v12, 0.0  ;;  %v394_v18 = vmax.f32 %v337_v15, 0.0 }
  0xcd   : > { %434 = vst.msk [vmem:[%s657_s27 + $0xb0] sm:$0xff] %vm411_vm3, %v401_v14 }
  0xce   : > { %442 = vst.msk [vmem:[%s657_s27 + $0xf0] sm:$0xff] %vm411_vm3, %v409_v16 }
  0xcf   : > { %419 = vst.msk [vmem:[%s657_s27 + $0x38] sm:$0xff] %vm411_vm3, %v386_v17 }
  0xd0   : > { %427 = vst.msk [vmem:[%s657_s27 + $0x78] sm:$0xff] %vm411_vm3, %v394_v18  ;;  %v356_v19 = vpop.f32.mrf.mxu2  ;;  %v376_v21 = vpop.f32.mrf.mxu3 }
  0xd1   : > { %v357_v20 = vadd.f32 %v649_v55, %v356_v19  ;;  %v377_v22 = vadd.f32 %v649_v55, %v376_v21 }
  0xd3   : > { %v402_v23 = vmax.f32 %v357_v20, 0.0  ;;  %v410_v24 = vmax.f32 %v377_v22, 0.0 }
  0xd5   : > { %435 = vst.msk [vmem:[%s657_s27 + $0xb8] sm:$0xff] %vm411_vm3, %v402_v23 }
  0xd6   : > { %443 = vst.msk [vmem:[%s657_s27 + $0xf8] sm:$0xff] %vm411_vm3, %v410_v24 }
  0xd7 PF: > { %s13_s12 = sadd.s32 1, %s551_s12  }
  0xd8   : > { %p10_p4 = scmp.ge.s32.totalorder %s13_s12, 4  }
  0xda   :  { %12 = sbr.rel (!%p10_p4) target bundleno = 1 (0x1), region = 62 }

// kernel: shufflenet_v2_forward.6
= control target key start
LH: loop header
LB: loop body
LE: loop exit
PB: predicated region body
PF: predicated region fallthrough
CT: control target
= control target key end

     0   :  { %s1786_s24 = smov 0   ;;  %s1788_s25 = smov 0   ;;  %s2056_s0 = inlined_call_operand.vmem [shape: f32[2,2,2,9,9,64], index: 0, kind: input, shape index: {}, may-alias: {0,1,2,3,4,5}]   ;;  %s2057_s1 = inlined_call_operand.vmem [shape: f32[2,2,2,9,9,64], index: 1, kind: input, shape index: {}, may-alias: {0,1,2,3,4,5}]   ;;  %s2058_s2 = inlined_call_operand.vmem [shape: f32[2,2,2,9,9,64], index: 2, kind: input, shape index: {}, may-alias: {0,1,2,3,4,5}]   ;;  %s2059_s3 = inlined_call_operand.vmem [shape: f32[2,2,2,9,9,64], index: 3, kind: input, shape index: {}, may-alias: {0,1,2,3,4,5}]   ;;  %s2060_s4 = inlined_call_operand.vmem [shape: f32[2,2,2,9,9,64], index: 4, kind: input, shape index: {}, may-alias: {0,1,2,3,4,5}]   ;;  %s2061_s5 = inlined_call_operand.vmem [shape: f32[2,2,2,9,9,64], index: 5, kind: input, shape index: {}, may-alias: {0,1,2,3,4,5}]   ;;  %s2062_s6 = inlined_call_operand.vmem [shape: f32[9,1,64], index: 6, kind: input, shape index: {}]   ;;  %s2063_s7 = inlined_call_operand.vmem [shape: f32[1,64], index: 7, kind: input, shape index: {}]   ;;  %s2064_s8 = inlined_call_operand.vmem [shape: bf16[64,64], index: 8, kind: input, shape index: {}]   ;;  %s2065_s9 = inlined_call_operand.vmem [shape: f32[1,64], index: 9, kind: input, shape index: {}]   ;;  %s2066_s10 = inlined_call_operand.vmem [shape: bf16[64,64], index: 10, kind: input, shape index: {}]   ;;  %s2067_s11 = inlined_call_operand.vmem [shape: f32[1,64], index: 11, kind: input, shape index: {}]   ;;  %s2068_s12 = inlined_call_operand.vmem [shape: f32[9,1,64], index: 12, kind: input, shape index: {}]   ;;  %s2069_s13 = inlined_call_operand.vmem [shape: f32[1,64], index: 13, kind: input, shape index: {}]   ;;  %s2070_s14 = inlined_call_operand.vmem [shape: bf16[64,64], index: 14, kind: input, shape index: {}]   ;;  %s2071_s15 = inlined_call_operand.vmem [shape: f32[1,64], index: 15, kind: input, shape index: {}]   ;;  %s2072_s16 = inlined_call_operand.vmem [shape: f32[9,1], index: 16, kind: input, shape index: {}]   ;;  %s2073_s17 = inlined_call_operand.vmem [shape: f32[2,8,8,128], index: 17, kind: output, shape index: {}]  }
   0x1   :  { %2078 = sst [smem:[#allocation7_spill]] %s2056_s0  ;;  %s1790_s26 = smov 0  }
   0x2   :  { %2079 = sst [smem:[#allocation8_spill]] %s2057_s1  ;;  %s1792_s27 = smov 0  }
   0x3   :  { %2080 = sst [smem:[#allocation9_spill]] %s2063_s7  ;;  %s1794_s28 = smov 0  }
   0x4   :  { %2081 = sst [smem:[#allocation10_spill]] %s2065_s9 }
   0x5   :  { %2082 = sst [smem:[#allocation11_spill]] %s2069_s13 }
   0x6   :  { %2083 = sst [smem:[#allocation12_spill]] %s2071_s15 }
   0x7   :  { %2084 = sst [smem:[#allocation13_spill]] %s2073_s17 }
   0x8 LB: > { %2085 = sst [smem:[#allocation2_spill]] %s1684_s26  ;;  %s36_s29 = sadd.s32 1, %s1684_s26  ;;  %s1692_s28 = sphi %s1794_s28, %s27_s28   ;;  %s1688_s27 = sphi %s1792_s27, %s2103_s27   ;;  %s1684_s26 = sphi %s1790_s26, %s2102_s26   ;;  %s1680_s25 = sphi %s1788_s25, %s2101_s25   ;;  %s1676_s24 = sphi %s1786_s24, %s2100_s24  }
   0x9   : > { %2086 = sst [smem:[#allocation3_spill]] %s1688_s27  ;;  %s39_s0 = sadd.s32 1, %s1688_s27 }
   0xa   : > { %2087 = sst [smem:[#allocation4_spill]] %s1692_s28  ;;  %p37_p0 = scmp.ge.s32.totalorder %s36_s29, 8 }
   0xb   : > { %p1478_p1 = scmp.ge.s32.totalorder %s1692_s28, 1  ;;  %p600_p2 = scmp.lt.s32.totalorder %s1692_s28, 17 }
   0xc   : > { %s2105_s29 = smov (%p37_p0, %s36_s29), 0  ;;  %s2107_s0 = smov (!%p37_p0, %s39_s0), %s1688_s27 }
   0xd   : > { %2088 = sst [smem:[#allocation5_spill]] %s2105_s29  ;;  %p601_p3 = pnand %p1478_p1, %p600_p2 }
   0xe   : > { %p41_p4 = scmp.ge.s32.totalorder %s2107_s0, 2  ;;  %p711_p5 = scmp.lt.s32.totalorder (!%p601_p3), %s1680_s25, 1 }
   0xf   : > { %604 = sbr.rel (%p601_p3) target bundleno = 455 (0x1c7), region = 88  ;;  %p713_p6 = scmp.lt.s32.totalorder (!%p601_p3), %s1676_s24, 8 }
  0x10   : > { %s2109_s0 = smov (%p41_p4, %s2107_s0), 0  ;;  %s751_s19 = sadd.s32 (!%p601_p3), 1, %s1676_s24 }
  0x11   : > { %2089 = sst [smem:[#allocation6_spill]] %s2109_s0  ;;  %p1856_p7 = scmp.lt.s32.totalorder (!%p601_p3), %s751_s19, 8 }
  0x12   : > { %s2091_s21 = sld [smem:[#allocation7_spill]] (!%p601_p3)  ;;  %p797_p8 = scmp.eq.s32.totalorder (!%p601_p3), %s1676_s24, 0 }
  0x13   : > { %p776_p9 = scmp.lt.s32.totalorder (!%p601_p3), %s1676_s24, 7  ;;  %s2096_s27 = sld [smem:[#allocation10_spill]] (!%p601_p3) }
  0x14   : > { %v1821_v0 = vld [vmem:[%s2066_s10 + $0x18] sm:$0xff]  ;;  %v1829_v1 = vld [vmem:[%s2066_s10 + $0x10] sm:$0xff]  ;;  %s2111_s25 = smov (!%p711_p5, %s1680_s25), 1  ;;  %v795_v2 = vld [vmem:[%s2072_s16] sm:$0xff]  ;;  %v1694_v4 = vmov 0   ;;  %vm836_vm0 = vcmask 523264  }
  0x15   : > { %844 = vmatpush.bf16.msra.mxu0 %v1821_v0  ;;  %879 = vmatpush.bf16.msra.mxu1 %v1821_v0  ;;  %s714_s20 = scalar_select %p713_p6, %s1676_s24, 8  ;;  %v1631_v3 = vld [vmem:[%s2062_s6] ss:$0 sm:$0xff]  ;;  %v1632_v5 = vld [vmem:[%s2062_s6 + $0x2] ss:$0 sm:$0xff]  ;;  %v1852_v6 = vld [vmem:[%s2066_s10 + $0x8] sm:$0xff] }
  0x16   : > { %898 = vmatpush.bf16.msra.mxu2 %v1821_v0  ;;  %920 = vmatpush.bf16.msra.mxu3 %v1821_v0  ;;  %s2077_s23 = smul.u32 18, %s2111_s25  ;;  %v1633_v7 = vld [vmem:[%s2062_s6 + $0x1] ss:$0 sm:$0xff]  ;;  %v1634_v8 = vld [vmem:[%s2062_s6 + $0x3] ss:$0 sm:$0xff]  ;;  %s2113_s19 = smov (!%p1856_p7, %s751_s19), 8 }
  0x17   : > { %1630 = vset.pattern.permute.xlu0 %v1694_v4  ;;  %s1479_s1 = sshll.u32 %s714_s20, 1  ;;  %v1635_v9 = vld [vmem:[%s2062_s6 + $0x5] ss:$0 sm:$0xff]  ;;  %v1636_v12 = vld [vmem:[%s2062_s6 + $0x4] ss:$0 sm:$0xff]  ;;  %vm1090_vm1 = vcmask 1046528  }
  0x18   : > { %858 = vperm.xlu0 %1630, %v795_v2   ;;  %s717_s30 = sadd.s32 %s2077_s23, %s1479_s1  ;;  %s2092_s1 = sld [smem:[#allocation8_spill]]  ;;  %v1880_v10 = vld [vmem:[%s2066_s10] sm:$0xff]  ;;  %v796_v22 = vld [vmem:[%s2072_s16 + $0x8] sm:$0x1]  ;;  %v1586_v53 = vld [vmem:[%s2070_s14 + $0x18] sm:$0xff]  ;;  %vm1266_vm2 = vcmask 1048064  }
  0x19   : > { %845 = vmatpush.bf16.msra.mxu0 %v1829_v1  ;;  %880 = vmatpush.bf16.msra.mxu1 %v1829_v1  ;;  %s1480_s29 = sshll.u32 %s717_s30, 3  ;;  %v1637_v21 = vld [vmem:[%s2062_s6 + $0x6] ss:$0 sm:$0xff]  ;;  %s2093_s18 = smul.u32 18, %s2111_s25  ;;  %v1639_v33 = vld [vmem:[%s2062_s6 + $0x7] ss:$0 sm:$0xff] }
  0x1a   : > { %899 = vmatpush.bf16.msra.mxu2 %v1829_v1  ;;  %921 = vmatpush.bf16.msra.mxu3 %v1829_v1  ;;  %s719_s22 = scalar_lea.vmem %s2091_s21, %s1480_s29  ;;  %s1382_s15 = scalar_lea.vmem %s2058_s2, %s1480_s29  ;;  %v1638_v54 = vld [vmem:[%s2062_s6 + $0x8] ss:$0 sm:$0xff]  ;;  %v1585_v55 = vld [vmem:[%s2070_s14 + $0x10] sm:$0xff]  ;;  %v1949_v59 = vld [vmem:[%s2067_s11] ss:$0 sm:$0xff] }
  0x1b   : > { %v783_v11 = vld [vmem:[%s719_s22] sm:$0xff]  ;;  %s1388_s9 = scalar_lea.vmem %s2059_s3, %s1480_s29  ;;  %v784_v13 = vld [vmem:[%s719_s22 + $0x8] sm:$0x1]  ;;  %s2115_s24 = smov (!%p776_p9, %s1676_s24), 7 }
  0x1c   : > { %v974_v14 = vmul.f32 %v1631_v3, %v783_v11  ;;  %v997_v17 = vmul.f32 %v1632_v5, %v783_v11  ;;  %v1495_v19 = vld [vmem:[%s1382_s15 + $0x240] sm:$0xff]  ;;  %v1496_v20 = vld [vmem:[%s1382_s15 + $0x248] sm:$0x1]  ;;  %v998_v23 = vmul.f32 %v1632_v5, %v784_v13  ;;  %v799_v29 = vpack.c.bf16 %v784_v13, %v783_v11  ;;  %s798_s26 = scalar_select %p797_p8, 0.0, 1.0 }
  0x1d   : > { %846 = vmatpush.bf16.msra.mxu0 %v1852_v6  ;;  %881 = vmatpush.bf16.msra.mxu1 %v1852_v6  ;;  %v1011_v24 = vmul.f32 %v1634_v8, %v1495_v19  ;;  %v1035_v25 = vmul.f32 %v1635_v9, %v1495_v19  ;;  %v1036_v26 = vmul.f32 %v1635_v9, %v1496_v20  ;;  %v1497_v27 = vld [vmem:[%s1388_s9 + $0x360] sm:$0xff]  ;;  %v1498_v28 = vld [vmem:[%s1388_s9 + $0x368] sm:$0x1]  ;;  %s1491_s30 = sshll.u32 %s2111_s25, 3  ;;  %s2098_s13 = sld [smem:[#allocation12_spill]] }
  0x1e   : > { %s1376_s23 = scalar_lea.vmem %s2092_s1, %s1480_s29  ;;  %900 = vmatpush.bf16.msra.mxu2 %v1852_v6  ;;  %922 = vmatpush.bf16.msra.mxu3 %v1852_v6  ;;  %v1023_v32 = vmul.f32 %v1636_v12, %v1497_v27  ;;  %v890_v34 = vpack.c.bf16 %v1496_v20, %v1495_v19  ;;  %v912_v38 = vpack.c.bf16 %v1498_v28, %v1497_v27  ;;  %v1584_v62 = vld [vmem:[%s2070_s14 + $0x8] sm:$0xff]  ;;  %v1583_v63 = vld [vmem:[%s2070_s14] sm:$0xff]  ;;  %s2094_s1 = sld [smem:[#allocation9_spill]] }
  0x1f   : > { %v1493_v15 = vld [vmem:[%s1376_s23 + $0x120] sm:$0xff]  ;;  %v1494_v16 = vld [vmem:[%s1376_s23 + $0x128] sm:$0x1]  ;;  %s1487_s23 = sshll.u32 %s2113_s19, 1  ;;  %v1084_v35 = vrot.slane %v1011_v24, 7  ;;  %v1091_v36 = vrot.slane %v1035_v25, 1  ;;  %v868_v25 = vstv %s798_s26  ;;  %s779_s0 = sadd.s32 %s1491_s30, %s2115_s24 }
  0x20   : > { %v985_v18 = vmul.f32 %v1633_v7, %v1493_v15  ;;  %v871_v30 = vpack.c.bf16 %v1494_v16, %v1493_v15  ;;  %s758_s22 = sadd.s32 %s2093_s18, %s1487_s23  ;;  %863 = vperm.xlu0 %1630, %v796_v22   ;;  %v1092_v37 = vrot.slane %v1036_v26, 1  ;;  %v1643_v28 = vld [vmem:[%s2068_s12 + $0x2] ss:$0 sm:$0xff]  ;;  %s1695_s24 = smov 64  }
  0x21   : > { %847 = vmatpush.bf16.msra.mxu0 %v1880_v10  ;;  %882 = vmatpush.bf16.msra.mxu1 %v1880_v10  ;;  %s1488_s19 = sshll.u32 %s758_s22, 3  ;;  %v1086_v39 = vadd.f32 %v1084_v35, %v997_v17  ;;  %v1087_v40 = vadd.f32 %v1084_v35, %v998_v23  ;;  %v1644_v17 = vld [vmem:[%s2068_s12 + $0x3] ss:$0 sm:$0xff]  ;;  %s2095_s22 = sld [smem:[#allocation11_spill]] }
  0x22   : > { %v1903_v31 = vadd.f32 %v985_v18, %v974_v14  ;;  %901 = vmatpush.bf16.msra.mxu2 %v1880_v10  ;;  %s760_s15 = scalar_lea.vmem %s2060_s4, %s1488_s19  ;;  %s1399_s9 = scalar_lea.vmem %s2061_s5, %s1488_s19  ;;  %923 = vmatpush.bf16.msra.mxu3 %v1880_v10  ;;  %v1093_v41 = vsel %vm1090_vm1, %v1091_v36, %v1092_v37  ;;  %v1582_v14 = vld [vmem:[%s2064_s8 + $0x18] sm:$0xff] }
  0x23   : > { %v791_v42 = vld [vmem:[%s760_s15] sm:$0xff]  ;;  %v1095_v43 = vadd.f32 %v1093_v41, %v1023_v32  ;;  %v792_v49 = vld [vmem:[%s760_s15 + $0x8] sm:$0x1]  ;;  %v1100_v2 = vrot.slane %v1087_v40, 1  ;;  %s1492_s15 = sshll.u32 %s779_s0, 3 }
  0x24   : > { %1517 = vmatmul.msk.bf16.vlgmr.msra.gmra.mxu0 %vm836_vm0, %v799_v29  ;;  %1518 = vmatmul.msk.bf16.vlgmr.msra.gmra.mxu1 %vm836_vm0, %v871_v30  ;;  %v1049_v44 = vmul.f32 %v1637_v21, %v791_v42  ;;  %v1499_v45 = vld [vmem:[%s1399_s9 + $0x120] sm:$0xff]  ;;  %v1500_v50 = vld [vmem:[%s1399_s9 + $0x128] sm:$0x1]  ;;  %v930_v51 = vpack.c.bf16 %v792_v49, %v791_v42  ;;  %v1073_v60 = vmul.f32 %v1638_v54, %v791_v42  ;;  %v1581_v21 = vld [vmem:[%s2064_s8 + $0x10] sm:$0xff]  ;;  %s2097_s9 = sld [smem:[#allocation13_spill]] }
  0x25   : > { %938 = vmatpush.bf16.msrb.mxu0 %v1821_v0  ;;  %960 = vmatpush.bf16.msrb.mxu1 %v1821_v0  ;;  %v1061_v46 = vmul.f32 %v1639_v33, %v1499_v45  ;;  %v952_v52 = vpack.c.bf16 %v1500_v50, %v1499_v45  ;;  %v1074_v61 = vmul.f32 %v1638_v54, %v792_v49  ;;  %v1651_v33 = vld [vmem:[%s2094_s1] ss:$0 sm:$0xff]  ;;  %v1647_v42 = vld [vmem:[%s2068_s12 + $0x6] ss:$0 sm:$0xff]  ;;  %v1646_v50 = vld [vmem:[%s2068_s12 + $0x4] ss:$0 sm:$0xff] }
  0x26   : > { %1519 = vmatmul.msk.bf16.vlgmr.msra.gmra.mxu2 %vm836_vm0, %v890_v34  ;;  %1520 = vmatmul.msk.bf16.vlgmr.msra.gmra.mxu3 %vm836_vm0, %v912_v38  ;;  %v1108_v3 = vrot.slane %v1073_v60, 1  ;;  %v1645_v34 = vld [vmem:[%s2068_s12 + $0x5] ss:$0 sm:$0xff]  ;;  %v1580_v38 = vld [vmem:[%s2064_s8 + $0x8] sm:$0xff] }
  0x27   : > { %v1096_v47 = vadd.f32 %v1061_v46, %v1049_v44  ;;  %1251 = vmatpush.bf16.msrb.mxu3 %v1586_v53  ;;  %v1109_v4 = vrot.slane %v1074_v61, 1  ;;  %1197 = vmatpush.bf16.msrb.mxu2 %v1582_v14 }
  0x29   : > { %939 = vmatpush.bf16.msrb.mxu0 %v1829_v1  ;;  %961 = vmatpush.bf16.msrb.mxu1 %v1829_v1  ;;  %v1104_v48 = vadd.f32 %v1096_v47, %v1095_v43  ;;  %v1099_v1 = vrot.slane %v1086_v39, 1  ;;  %v1110_v16 = vsel %vm1090_vm1, %v1108_v3, %v1109_v4 }
  0x2a   : > { %s781_s17 = scalar_lea.vmem %s2097_s9, %s1492_s15 }
  0x2b   : > { %1252 = vmatpush.bf16.msrb.mxu3 %v1585_v55  ;;  %v1101_v15 = vsel %vm1090_vm1, %v1099_v1, %v1100_v2  ;;  %1198 = vmatpush.bf16.msrb.mxu2 %v1581_v21 }
  0x2c   : > { %v1103_v19 = vadd.f32 %v1101_v15, %v1903_v31 }
  0x2d   : > { %940 = vmatpush.bf16.msrb.mxu0 %v1852_v6  ;;  %962 = vmatpush.bf16.msrb.mxu1 %v1852_v6 }
  0x2e   : > { %v1105_v24 = vadd.f32 %v1104_v48, %v1103_v19  ;;  %v1649_v48 = vld [vmem:[%s2068_s12 + $0x7] ss:$0 sm:$0xff] }
  0x2f   : > { %1253 = vmatpush.bf16.msrb.mxu3 %v1584_v62  ;;  %1199 = vmatpush.bf16.msrb.mxu2 %v1580_v38 }
  0x30   : > { %v1112_v32 = vadd.f32 %v1110_v16, %v1105_v24 }
  0x31   : > { %941 = vmatpush.bf16.msrb.mxu0 %v1880_v10  ;;  %963 = vmatpush.bf16.msrb.mxu1 %v1880_v10 }
  0x32   : > { %v1117_v53 = vadd.f32 %v1651_v33, %v1112_v32 }
  0x33   : > { %1254 = vmatpush.bf16.msrb.mxu3 %v1583_v63  ;;  %v1641_v63 = vld [vmem:[%s2068_s12 + $0x1] ss:$0 sm:$0xff] }
  0x34   : > { %1521 = vmatmul.msk.bf16.vlgmr.msrb.gmra.mxu0 %vm836_vm0, %v930_v51  ;;  %1522 = vmatmul.msk.bf16.vlgmr.msrb.gmra.mxu1 %vm836_vm0, %v952_v52 }
  0x8a   : > { %v1944_v56 = vpop.permute.xlu0 %858 }
  0x92   : > { %v1961_v13 = vpop.permute.xlu0 %863 }
  0xa1   : > { %v849_v57 = vpop.f32.mrf.mxu0  ;;  %v884_v58 = vpop.f32.mrf.mxu1 }
  0xa2   : > { %v850_v0 = vadd.f32 %v1949_v59, %v849_v57  ;;  %v885_v26 = vadd.f32 %v1949_v59, %v884_v58  ;;  %v1579_v57 = vld [vmem:[%s2064_s8] sm:$0xff] }
  0xa3   : > { %1200 = vmatpush.bf16.msrb.mxu2 %v1579_v57 }
  0xa4   : > { %v854_v9 = vmax.f32 %v850_v0, 0.0  ;;  %v888_v45 = vmax.f32 %v885_v26, 0.0  ;;  %v1642_v0 = vld [vmem:[%s2068_s12] ss:$0 sm:$0xff] }
  0xa6   : > { %v866_v22 = vmul.f32 %v1944_v56, %v854_v9  ;;  %v889_v62 = vmul.f32 %v888_v45, %v868_v25 }
  0xa8   : > { %v869_v39 = vmul.f32 %v868_v25, %v866_v22  ;;  %v991_v14 = vmul.f32 %v1641_v63, %v889_v62 }
  0xa9   : > { %v903_v5 = vpop.f32.mrf.mxu2  ;;  %v851_v7 = vpop.f32.mrf.mxu0 }
  0xaa   : > { %v904_v6 = vadd.f32 %v1949_v59, %v903_v5  ;;  %v886_v8 = vpop.f32.mrf.mxu1  ;;  %v852_v10 = vadd.f32 %v1949_v59, %v851_v7  ;;  %v925_v11 = vpop.f32.mrf.mxu3  ;;  %v1004_v58 = vmul.f32 %v1643_v28, %v869_v39  ;;  %v979_v15 = vmul.f32 %v1642_v0, %v869_v39  ;;  %v1652_v39 = vld [vmem:[%s2098_s13] ss:$0 sm:$0xff] }
  0xab   : > { %v926_v27 = vadd.f32 %v1949_v59, %v925_v11  ;;  %v1648_v11 = vld [vmem:[%s2068_s12 + $0x8] ss:$0 sm:$0xff] }
  0xac   : > { %v908_v12 = vmax.f32 %v904_v6, 0.0  ;;  %v855_v18 = vmax.f32 %v852_v10, 0.0  ;;  %v1153_v6 = vpack.c.bf16 %v1117_v53, %v1117_v53  ;;  %v1118_v24 = vadd.f32 %v991_v14, %v979_v15 }
  0xad   : > { %v929_v47 = vmax.f32 %v926_v27, 0.0 }
  0xae   : > { %v910_v20 = vmul.f32 %v908_v12, %v1944_v56  ;;  %v867_v23 = vmul.f32 %v1961_v13, %v855_v18  ;;  %1555 = vmatmul.msk.bf16.vlgmr.msrb.gmra.mxu2 %vm836_vm0, %v1153_v6 }
  0xaf   : > { %v1029_v4 = vmul.f32 %v1646_v50, %v929_v47 }
  0xb0   : > { %v1017_v29 = vmul.f32 %v1644_v17, %v910_v20  ;;  %v870_v30 = vmul.f32 %v868_v25, %v867_v23  ;;  %v1042_v54 = vmul.f32 %v1645_v34, %v910_v20 }
  0xb1   : > { %v905_v31 = vpop.f32.mrf.mxu2  ;;  %v943_v36 = vpop.f32.mrf.mxu0 }
  0xb2   : > { %v906_v35 = vadd.f32 %v1949_v59, %v905_v31  ;;  %v965_v37 = vpop.f32.mrf.mxu1  ;;  %v1005_v40 = vmul.f32 %v1643_v28, %v870_v30  ;;  %v944_v41 = vadd.f32 %v1949_v59, %v943_v36  ;;  %v927_v44 = vpop.f32.mrf.mxu3  ;;  %v1120_v49 = vrot.slane %v1017_v29, 7  ;;  %v1650_v30 = vld [vmem:[%s2095_s22] ss:$0 sm:$0xff] }
  0xb3   : > { %v966_v43 = vadd.f32 %v1949_v59, %v965_v37  ;;  %v1126_v7 = vrot.slane %v1042_v54, 1 }
  0xb4   : > { %v909_v46 = vmax.f32 %v906_v35, 0.0  ;;  %v948_v51 = vmax.f32 %v944_v41, 0.0  ;;  %v1123_v60 = vadd.f32 %v1120_v49, %v1005_v40  ;;  %v1122_v3 = vadd.f32 %v1120_v49, %v1004_v58 }
  0xb5   : > { %v969_v52 = vmax.f32 %v966_v43, 0.0 }
  0xb6   : > { %v911_v55 = vmul.f32 %v909_v46, %v1961_v13  ;;  %v950_v61 = vmul.f32 %v948_v51, %v1944_v56  ;;  %v1135_v56 = vrot.slane %v1123_v60, 1  ;;  %v1134_v18 = vrot.slane %v1122_v3, 1 }
  0xb7   : > { %v1067_v2 = vmul.f32 %v1649_v48, %v969_v52 }
  0xb8   : > { %v1043_v1 = vmul.f32 %v1645_v34, %v911_v55  ;;  %v1055_v5 = vmul.f32 %v1647_v42, %v950_v61  ;;  %v1080_v21 = vmul.f32 %v1648_v11, %v950_v61  ;;  %v1136_v22 = vsel %vm1090_vm1, %v1134_v18, %v1135_v56 }
  0xb9   : > { %v945_v9 = vpop.f32.mrf.mxu0  ;;  %v1138_v26 = vadd.f32 %v1136_v22, %v1118_v24 }
  0xba   : > { %v1127_v8 = vrot.slane %v1043_v1, 1  ;;  %v967_v10 = vpop.f32.mrf.mxu1  ;;  %v946_v12 = vadd.f32 %v1949_v59, %v945_v9  ;;  %v1131_v17 = vadd.f32 %v1067_v2, %v1055_v5  ;;  %v1143_v27 = vrot.slane %v1080_v21, 1 }
  0xbc   : > { %v1128_v16 = vsel %vm1090_vm1, %v1126_v7, %v1127_v8  ;;  %v949_v20 = vmax.f32 %v946_v12, 0.0 }
  0xbd   : > { %v1130_v19 = vadd.f32 %v1128_v16, %v1029_v4 }
  0xbe   : > { %v951_v23 = vmul.f32 %v949_v20, %v1961_v13  ;;  %v1653_v13 = vld [vmem:[%s2096_s27] ss:$0 sm:$0xff] }
  0xbf   : > { %v1139_v59 = vadd.f32 %v1131_v17, %v1130_v19 }
  0xc0   : > { %v1081_v25 = vmul.f32 %v1648_v11, %v951_v23 }
  0xc1   : > { %v1140_v29 = vadd.f32 %v1139_v59, %v1138_v26 }
  0xc2   : > { %v1144_v28 = vrot.slane %v1081_v25, 1 }
  0xc4   : > { %v1145_v31 = vsel %vm1090_vm1, %v1143_v27, %v1144_v28 }
  0xc5   : > { %v1147_v32 = vadd.f32 %v1145_v31, %v1140_v29 }
  0xc7   : > { %v1152_v33 = vadd.f32 %v1650_v30, %v1147_v32 }
  0xc9   : > { %v1207_v34 = vpack.c.bf16 %v1152_v33, %v1152_v33 }
  0xcb   : > { %1572 = vmatmul.msk.bf16.vlgmr.msrb.gmra.mxu3 %vm836_vm0, %v1207_v34 }
 0x131   : > { %v1202_v35 = vpop.f32.mrf.mxu2 }
 0x132   : > { %v1203_v36 = vadd.f32 %v1653_v13, %v1202_v35 }
 0x134   : > { %v1206_v37 = vmax.f32 %v1203_v36, 0.0 }
 0x136   : > { %1261 = vst.msk [vmem:[%s781_s17] sm:$0xff] %vm836_vm0, %v1206_v37 }
 0x139   : > { %v1204_v38 = vpop.f32.mrf.mxu2 }
 0x14e   : > { %v1256_v40 = vpop.f32.mrf.mxu3 }
 0x14f   : > { %v1257_v41 = vadd.f32 %v1652_v39, %v1256_v40 }
 0x151   : > { %v1260_v42 = vmax.f32 %v1257_v41, 0.0 }
 0x153   : > { %1263 = vrot.lane.b32.xlu1 %v1260_v42, %s1695_s24 }
 0x156   : > { %v1258_v43 = vpop.f32.mrf.mxu3 }
 0x1c5   : > { %v1264_v44 = vpop.permute.xlu1 %1263 }
 0x1c6   : > { %1267 = vst.msk [vmem:[%s781_s17] sm:$0xff] %vm1266_vm2, %v1264_v44 }
 0x1c7 PF: > { %s2099_s25 = sld [smem:[#allocation4_spill]] }
 0x1c8   : > { %s2100_s24 = sld [smem:[#allocation2_spill]] }
 0x1c9   : > { %s2102_s26 = sld [smem:[#allocation5_spill]] }
 0x1ca   : > { %s2103_s27 = sld [smem:[#allocation6_spill]] }
 0x1cd   : > { %s27_s28 = sadd.s32 1, %s2099_s25   ;;  %s2101_s25 = sld [smem:[#allocation3_spill]] }
 0x1ce   : > { %p24_p10 = scmp.ge.s32.totalorder %s27_s28, 18  }
 0x1d0   :  { %26 = sbr.rel (!%p24_p10) target bundleno = 8 (0x8), region = 149 }

// kernel: shufflenet_v2_forward.7
= control target key start
LH: loop header
LB: loop body
LE: loop exit
PB: predicated region body
PF: predicated region fallthrough
CT: control target
= control target key end

     0   :  { %s1815_s24 = smov 0   ;;  %s1817_s25 = smov 0   ;;  %s2117_s0 = inlined_call_operand.vmem [shape: f32[2,2,2,5,5,128], index: 0, kind: input, shape index: {}, may-alias: {0,1,2,3,4,5}]   ;;  %s2118_s1 = inlined_call_operand.vmem [shape: f32[2,2,2,5,5,128], index: 1, kind: input, shape index: {}, may-alias: {0,1,2,3,4,5}]   ;;  %s2119_s2 = inlined_call_operand.vmem [shape: f32[2,2,2,5,5,128], index: 2, kind: input, shape index: {}, may-alias: {0,1,2,3,4,5}]   ;;  %s2120_s3 = inlined_call_operand.vmem [shape: f32[2,2,2,5,5,128], index: 3, kind: input, shape index: {}, may-alias: {0,1,2,3,4,5}]   ;;  %s2121_s4 = inlined_call_operand.vmem [shape: f32[2,2,2,5,5,128], index: 4, kind: input, shape index: {}, may-alias: {0,1,2,3,4,5}]   ;;  %s2122_s5 = inlined_call_operand.vmem [shape: f32[2,2,2,5,5,128], index: 5, kind: input, shape index: {}, may-alias: {0,1,2,3,4,5}]   ;;  %s2123_s6 = inlined_call_operand.vmem [shape: f32[9,1,128], index: 6, kind: input, shape index: {}]   ;;  %s2124_s7 = inlined_call_operand.vmem [shape: f32[1,128], index: 7, kind: input, shape index: {}]   ;;  %s2125_s8 = inlined_call_operand.vmem [shape: bf16[128,128], index: 8, kind: input, shape index: {}]   ;;  %s2126_s9 = inlined_call_operand.vmem [shape: f32[1,128], index: 9, kind: input, shape index: {}]   ;;  %s2127_s10 = inlined_call_operand.vmem [shape: bf16[128,128], index: 10, kind: input, shape index: {}]   ;;  %s2128_s11 = inlined_call_operand.vmem [shape: f32[1,128], index: 11, kind: input, shape index: {}]   ;;  %s2129_s12 = inlined_call_operand.vmem [shape: f32[9,1,128], index: 12, kind: input, shape index: {}]   ;;  %s2130_s13 = inlined_call_operand.vmem [shape: f32[1,128], index: 13, kind: input, shape index: {}]   ;;  %s2131_s14 = inlined_call_operand.vmem [shape: bf16[128,128], index: 14, kind: input, shape index: {}]   ;;  %s2132_s15 = inlined_call_operand.vmem [shape: f32[1,128], index: 15, kind: input, shape index: {}]   ;;  %s2133_s16 = inlined_call_operand.vmem [shape: f32[5,1], index: 16, kind: input, shape index: {}]   ;;  %s2134_s17 = inlined_call_operand.vmem [shape: f32[2,4,4,256], index: 17, kind: output, shape index: {}]  }
   0x1   :  { %2139 = sst [smem:[#allocation7_spill]] %s2117_s0  ;;  %s1819_s26 = smov 0  }
   0x2   :  { %2140 = sst [smem:[#allocation8_spill]] %s2118_s1  ;;  %s1821_s27 = smov 0  }
   0x3   :  { %2141 = sst [smem:[#allocation9_spill]] %s2132_s15  ;;  %s1823_s28 = smov 0  }
   0x4   :  { %2142 = sst [smem:[#allocation10_spill]] %s2134_s17 }
   0x5 LB: > { %2143 = sst [smem:[#allocation2_spill]] %s1714_s26  ;;  %s36_s29 = sadd.s32 1, %s1714_s26  ;;  %s1722_s28 = sphi %s1823_s28, %s27_s28   ;;  %s1718_s27 = sphi %s1821_s27, %s2158_s27   ;;  %s1714_s26 = sphi %s1819_s26, %s2157_s26   ;;  %s1710_s25 = sphi %s1817_s25, %s2156_s25   ;;  %s1706_s24 = sphi %s1815_s24, %s2155_s24  }
   0x6   : > { %2144 = sst [smem:[#allocation3_spill]] %s1718_s27  ;;  %s39_s0 = sadd.s32 1, %s1718_s27 }
   0x7   : > { %2145 = sst [smem:[#allocation4_spill]] %s1722_s28  ;;  %p37_p0 = scmp.ge.s32.totalorder %s36_s29, 4 }
   0x8   : > { %p1466_p1 = scmp.ge.s32.totalorder %s1722_s28, 1  ;;  %p594_p2 = scmp.lt.s32.totalorder %s1722_s28, 9 }
   0x9   : > { %s2160_s29 = smov (%p37_p0, %s36_s29), 0  ;;  %s2162_s0 = smov (!%p37_p0, %s39_s0), %s1718_s27 }
   0xa   : > { %2146 = sst [smem:[#allocation5_spill]] %s2160_s29  ;;  %p595_p3 = pnand %p1466_p1, %p594_p2 }
   0xb   : > { %p41_p4 = scmp.ge.s32.totalorder %s2162_s0, 2  ;;  %p700_p5 = scmp.lt.s32.totalorder (!%p595_p3), %s1710_s25, 1 }
   0xc   : > { %598 = sbr.rel (%p595_p3) target bundleno = 367 (0x16f), region = 88  ;;  %p702_p6 = scmp.lt.s32.totalorder (!%p595_p3), %s1706_s24, 4 }
   0xd   : > { %s2164_s0 = smov (%p41_p4, %s2162_s0), 0  ;;  %s2148_s29 = sld [smem:[#allocation7_spill]] (!%p595_p3) }
   0xe   : > { %2147 = sst [smem:[#allocation6_spill]] %s2164_s0  ;;  %s736_s17 = sadd.s32 (!%p595_p3), 1, %s1706_s24 }
   0xf   : > { %s2149_s18 = sld [smem:[#allocation8_spill]] (!%p595_p3)  ;;  %p1938_p7 = scmp.lt.s32.totalorder (!%p595_p3), %s736_s17, 4 }
  0x10   : > { %p773_p8 = scmp.eq.s32.totalorder (!%p595_p3), %s1706_s24, 0  ;;  %p759_p9 = scmp.lt.s32.totalorder (!%p595_p3), %s1706_s24, 3 }
  0x11   : > { %v1850_v0 = vld [vmem:[%s2127_s10 + $0x38] sm:$0xff]  ;;  %v1858_v1 = vld [vmem:[%s2127_s10 + $0x30] sm:$0xff]  ;;  %s2166_s25 = smov (!%p700_p5, %s1710_s25), 1  ;;  %v1868_v2 = vld [vmem:[%s2127_s10 + $0x28] sm:$0xff]  ;;  %s2168_s17 = smov (!%p1938_p7, %s736_s17), 4  ;;  %v1724_v30 = vmov 0  }
  0x12   : > { %844 = vmatpush.bf16.msra.mxu0 %v1850_v0  ;;  %867 = vmatpush.bf16.msra.mxu1 %v1850_v0  ;;  %s703_s20 = scalar_select %p702_p6, %s1706_s24, 4  ;;  %v1661_v3 = vld [vmem:[%s2123_s6] ss:$0 sm:$0xff]  ;;  %v1662_v4 = vld [vmem:[%s2123_s6 + $0x2] ss:$0 sm:$0xff]  ;;  %v1930_v17 = vld [vmem:[%s2127_s10 + $0x18] sm:$0xff] }
  0x13   : > { %883 = vmatpush.bf16.msra.mxu2 %v1850_v0  ;;  %899 = vmatpush.bf16.msra.mxu3 %v1850_v0  ;;  %s2137_s23 = smul.u32 5, %s2166_s25  ;;  %v1663_v5 = vld [vmem:[%s2123_s6 + $0x3] ss:$0 sm:$0xff]  ;;  %v1664_v6 = vld [vmem:[%s2123_s6 + $0x5] ss:$0 sm:$0xff]  ;;  %v1596_v26 = vld [vmem:[%s2127_s10 + $0x10] sm:$0xff] }
  0x14   : > { %v1665_v7 = vld [vmem:[%s2123_s6 + $0x1] ss:$0 sm:$0xff]  ;;  %v1666_v22 = vld [vmem:[%s2123_s6 + $0x4] ss:$0 sm:$0xff]  ;;  %v1595_v29 = vld [vmem:[%s2127_s10 + $0x8] sm:$0xff]  ;;  %s2151_s30 = smul.u32 5, %s2166_s25  ;;  %1660 = vset.pattern.permute.xlu0 %v1724_v30 }
  0x15   : > { %s705_s21 = sadd.s32 %s2137_s23, %s703_s20  ;;  %v1905_v8 = vld [vmem:[%s2127_s10 + $0x20] sm:$0xff]  ;;  %v1609_v47 = vld [vmem:[%s2125_s8 + $0x38] sm:$0xff]  ;;  %v1608_v48 = vld [vmem:[%s2125_s8 + $0x30] sm:$0xff]  ;;  %s2170_s24 = smov (!%p759_p9, %s1706_s24), 3 }
  0x16   : > { %845 = vmatpush.bf16.msra.mxu0 %v1858_v1  ;;  %868 = vmatpush.bf16.msra.mxu1 %v1858_v1  ;;  %s1889_s22 = sshll.u32 %s705_s21, 3  ;;  %v1594_v31 = vld [vmem:[%s2127_s10] sm:$0xff]  ;;  %v1607_v49 = vld [vmem:[%s2125_s8 + $0x28] sm:$0xff]  ;;  %v1617_v50 = vld [vmem:[%s2131_s14 + $0x38] sm:$0xff] }
  0x17   : > { %884 = vmatpush.bf16.msra.mxu2 %v1858_v1  ;;  %900 = vmatpush.bf16.msra.mxu3 %v1858_v1  ;;  %s707_s0 = scalar_lea.vmem %s2148_s29, %s1889_s22  ;;  %s1370_s20 = scalar_lea.vmem %s2119_s2, %s1889_s22  ;;  %v772_v32 = vld [vmem:[%s2133_s16] sm:$0x1f]  ;;  %v1667_v35 = vld [vmem:[%s2123_s6 + $0x6] ss:$0 sm:$0xff]  ;;  %v1669_v36 = vld [vmem:[%s2123_s6 + $0x7] ss:$0 sm:$0xff] }
  0x18   : > { %v1907_v9 = vld [vmem:[%s707_s0] sm:$0x1f]  ;;  %s1365_s15 = scalar_lea.vmem %s2149_s18, %s1889_s22  ;;  %s1375_s27 = scalar_lea.vmem %s2120_s3, %s1889_s22  ;;  %860 = vperm.xlu0 %1660, %v772_v32   ;;  %v1616_v52 = vld [vmem:[%s2131_s14 + $0x30] sm:$0xff]  ;;  %v1605_v53 = vld [vmem:[%s2125_s8 + $0x18] sm:$0xff] }
  0x19   : > { %v948_v10 = vmul.f32 %v1661_v3, %v1907_v9  ;;  %v1917_v11 = vld [vmem:[%s1370_s20 + $0xa0] sm:$0x1f]  ;;  %v1919_v12 = vld [vmem:[%s1365_s15 + $0x50] sm:$0x1f]  ;;  %v971_v13 = vmul.f32 %v1662_v4, %v1907_v9  ;;  %s742_s18 = sadd.s32 %s2151_s30, %s2168_s17  ;;  %v775_v33 = vpack.c.bf16 %v1907_v9, %v1907_v9  ;;  %v1615_v54 = vld [vmem:[%s2131_s14 + $0x28] sm:$0xff]  ;;  %s2153_s20 = sld [smem:[#allocation9_spill]] }
  0x1a   : > { %846 = vmatpush.bf16.msra.mxu0 %v1868_v2  ;;  %869 = vmatpush.bf16.msra.mxu1 %v1868_v2  ;;  %v983_v14 = vmul.f32 %v1663_v5, %v1917_v11  ;;  %v1007_v15 = vmul.f32 %v1664_v6, %v1917_v11  ;;  %v959_v16 = vmul.f32 %v1665_v7, %v1919_v12  ;;  %v1478_v23 = vld [vmem:[%s1375_s27 + $0xf0] sm:$0x1f]  ;;  %s1471_s28 = sshll.u32 %s742_s18, 3  ;;  %v1606_v51 = vld [vmem:[%s2125_s8 + $0x20] sm:$0xff]  ;;  %v1668_v55 = vld [vmem:[%s2123_s6 + $0x8] ss:$0 sm:$0xff] }
  0x1b   : > { %885 = vmatpush.bf16.msra.mxu2 %v1868_v2  ;;  %901 = vmatpush.bf16.msra.mxu3 %v1868_v2  ;;  %v995_v25 = vmul.f32 %v1666_v22, %v1478_v23  ;;  %s744_s0 = scalar_lea.vmem %s2121_s4, %s1471_s28  ;;  %s1384_s1 = scalar_lea.vmem %s2122_s5, %s1471_s28  ;;  %v866_v34 = vpack.c.bf16 %v1919_v12, %v1919_v12  ;;  %v882_v37 = vpack.c.bf16 %v1917_v11, %v1917_v11  ;;  %v1604_v56 = vld [vmem:[%s2125_s8 + $0x10] sm:$0xff]  ;;  %v1614_v57 = vld [vmem:[%s2131_s14 + $0x20] sm:$0xff]  ;;  %v1603_v61 = vld [vmem:[%s2125_s8 + $0x8] sm:$0xff] }
  0x1c   : > { %v1052_v18 = vrot.slane %v983_v14, 7  ;;  %v1050_v19 = vadd.f32 %v959_v16, %v948_v10  ;;  %v1056_v21 = vrot.slane %v1007_v15, 1  ;;  %v770_v38 = vld [vmem:[%s744_s0] sm:$0x1f]  ;;  %v1479_v39 = vld [vmem:[%s1384_s1 + $0x50] sm:$0x1f]  ;;  %v898_v40 = vpack.c.bf16 %v1478_v23, %v1478_v23 }
  0x1d   : > { %v1019_v41 = vmul.f32 %v1667_v35, %v770_v38  ;;  %v1031_v42 = vmul.f32 %v1669_v36, %v1479_v39  ;;  %v913_v45 = vpack.c.bf16 %v770_v38, %v770_v38  ;;  %v929_v46 = vpack.c.bf16 %v1479_v39, %v1479_v39  ;;  %v1613_v62 = vld [vmem:[%s2131_s14 + $0x18] sm:$0xff]  ;;  %v1612_v3 = vld [vmem:[%s2131_s14 + $0x10] sm:$0xff]  ;;  %v1670_v6 = vld [vmem:[%s2128_s11] ss:$0 sm:$0xff]  ;;  %s774_s22 = scalar_select %p773_p8, 0.0, 1.0 }
  0x1e   : > { %847 = vmatpush.bf16.msra.mxu0 %v1905_v8  ;;  %870 = vmatpush.bf16.msra.mxu1 %v1905_v8  ;;  %v1054_v20 = vadd.f32 %v1052_v18, %v971_v13  ;;  %v1058_v28 = vadd.f32 %v1056_v21, %v995_v25  ;;  %v1043_v58 = vmul.f32 %v1668_v55, %v770_v38  ;;  %v1611_v9 = vld [vmem:[%s2131_s14 + $0x8] sm:$0xff]  ;;  %v1610_v13 = vld [vmem:[%s2131_s14] sm:$0xff]  ;;  %s1473_s18 = sshll.u32 %s2170_s24, 1  ;;  %s1474_s28 = sshll.u32 %s2166_s25, 3 }
  0x1f   : > { %886 = vmatpush.bf16.msra.mxu2 %v1905_v8  ;;  %902 = vmatpush.bf16.msra.mxu3 %v1905_v8  ;;  %v1059_v43 = vadd.f32 %v1031_v42, %v1019_v41  ;;  %v1674_v22 = vld [vmem:[%s2129_s12 + $0x3] ss:$0 sm:$0xff]  ;;  %v864_v25 = vstv %s774_s22  ;;  %v1675_v30 = vld [vmem:[%s2129_s12 + $0x5] ss:$0 sm:$0xff]  ;;  %v1676_v41 = vld [vmem:[%s2129_s12 + $0x4] ss:$0 sm:$0xff]  ;;  %s763_s23 = sadd.s32 %s1474_s28, %s1473_s18 }
  0x20   : > { %v1061_v24 = vrot.slane %v1054_v20, 1  ;;  %s1475_s27 = sshll.u32 %s763_s23, 2  ;;  %s2152_s0 = sld [smem:[#allocation10_spill]] }
  0x21   : > { %v1064_v44 = vadd.f32 %v1059_v43, %v1058_v28 }
  0x22   : > { %848 = vmatpush.bf16.msra.mxu0 %v1930_v17  ;;  %871 = vmatpush.bf16.msra.mxu1 %v1930_v17  ;;  %v1960_v27 = vadd.f32 %v1061_v24, %v1050_v19 }
  0x23   : > { %887 = vmatpush.bf16.msra.mxu2 %v1930_v17  ;;  %903 = vmatpush.bf16.msra.mxu3 %v1930_v17 }
  0x24   : > { %v1065_v63 = vadd.f32 %v1064_v44, %v1960_v27  ;;  %v1673_v27 = vld [vmem:[%s2129_s12 + $0x2] ss:$0 sm:$0xff]  ;;  %v1679_v44 = vld [vmem:[%s2129_s12 + $0x7] ss:$0 sm:$0xff] }
  0x26   : > { %849 = vmatpush.bf16.msra.mxu0 %v1596_v26  ;;  %872 = vmatpush.bf16.msra.mxu1 %v1596_v26  ;;  %s765_s22 = scalar_lea.vmem %s2152_s0, %s1475_s27 }
  0x27   : > { %888 = vmatpush.bf16.msra.mxu2 %v1596_v26  ;;  %904 = vmatpush.bf16.msra.mxu3 %v1596_v26 }
  0x2a   : > { %850 = vmatpush.bf16.msra.mxu0 %v1595_v29  ;;  %873 = vmatpush.bf16.msra.mxu1 %v1595_v29 }
  0x2b   : > { %889 = vmatpush.bf16.msra.mxu2 %v1595_v29  ;;  %905 = vmatpush.bf16.msra.mxu3 %v1595_v29 }
  0x2e   : > { %851 = vmatpush.bf16.msra.mxu0 %v1594_v31  ;;  %874 = vmatpush.bf16.msra.mxu1 %v1594_v31 }
  0x2f   : > { %890 = vmatpush.bf16.msra.mxu2 %v1594_v31  ;;  %906 = vmatpush.bf16.msra.mxu3 %v1594_v31 }
  0x31   : > { %852 = vmatmul.bf16.vlgmr.msra.gmra.mxu0 %v775_v33  ;;  %875 = vmatmul.bf16.vlgmr.msra.gmra.mxu1 %v866_v34  ;;  %v1671_v33 = vld [vmem:[%s2129_s12 + $0x1] ss:$0 sm:$0xff]  ;;  %v1672_v34 = vld [vmem:[%s2129_s12] ss:$0 sm:$0xff] }
  0x32   : > { %914 = vmatpush.bf16.msrb.mxu0 %v1850_v0  ;;  %930 = vmatpush.bf16.msrb.mxu1 %v1850_v0  ;;  %v1067_v0 = vrot.slane %v1043_v58, 1 }
  0x33   : > { %891 = vmatmul.bf16.vlgmr.msra.gmra.mxu2 %v882_v37  ;;  %907 = vmatmul.bf16.vlgmr.msra.gmra.mxu3 %v898_v40 }
  0x34   : > { %1169 = vmatpush.bf16.msrb.mxu2 %v1609_v47  ;;  %1252 = vmatpush.bf16.msrb.mxu3 %v1617_v50  ;;  %v1069_v4 = vadd.f32 %v1067_v0, %v1065_v63 }
  0x36   : > { %915 = vmatpush.bf16.msrb.mxu0 %v1858_v1  ;;  %931 = vmatpush.bf16.msrb.mxu1 %v1858_v1  ;;  %v1680_v1 = vld [vmem:[%s2124_s7] ss:$0 sm:$0xff] }
  0x37   : > { %v1074_v5 = vadd.f32 %v1680_v1, %v1069_v4  ;;  %v1681_v4 = vld [vmem:[%s2130_s13] ss:$0 sm:$0xff] }
  0x38   : > { %1170 = vmatpush.bf16.msrb.mxu2 %v1608_v48  ;;  %1253 = vmatpush.bf16.msrb.mxu3 %v1616_v52 }
  0x39   : > { %v1100_v12 = vpack.c.bf16 %v1074_v5, %v1074_v5 }
  0x3a   : > { %916 = vmatpush.bf16.msrb.mxu0 %v1868_v2  ;;  %932 = vmatpush.bf16.msrb.mxu1 %v1868_v2  ;;  %v1602_v2 = vld [vmem:[%s2125_s8] sm:$0xff] }
  0x3c   : > { %1171 = vmatpush.bf16.msrb.mxu2 %v1607_v49  ;;  %1254 = vmatpush.bf16.msrb.mxu3 %v1615_v54  ;;  %v1677_v49 = vld [vmem:[%s2129_s12 + $0x6] ss:$0 sm:$0xff]  ;;  %v1678_v54 = vld [vmem:[%s2129_s12 + $0x8] ss:$0 sm:$0xff] }
  0x3e   : > { %917 = vmatpush.bf16.msrb.mxu0 %v1905_v8  ;;  %933 = vmatpush.bf16.msrb.mxu1 %v1905_v8 }
  0x40   : > { %1172 = vmatpush.bf16.msrb.mxu2 %v1606_v51  ;;  %1255 = vmatpush.bf16.msrb.mxu3 %v1614_v57 }
  0x42   : > { %918 = vmatpush.bf16.msrb.mxu0 %v1930_v17  ;;  %934 = vmatpush.bf16.msrb.mxu1 %v1930_v17 }
  0x44   : > { %1173 = vmatpush.bf16.msrb.mxu2 %v1605_v53  ;;  %1256 = vmatpush.bf16.msrb.mxu3 %v1613_v62 }
  0x46   : > { %919 = vmatpush.bf16.msrb.mxu0 %v1596_v26  ;;  %935 = vmatpush.bf16.msrb.mxu1 %v1596_v26 }
  0x48   : > { %1174 = vmatpush.bf16.msrb.mxu2 %v1604_v56  ;;  %1257 = vmatpush.bf16.msrb.mxu3 %v1612_v3 }
  0x4a   : > { %920 = vmatpush.bf16.msrb.mxu0 %v1595_v29  ;;  %936 = vmatpush.bf16.msrb.mxu1 %v1595_v29 }
  0x4c   : > { %1175 = vmatpush.bf16.msrb.mxu2 %v1603_v61  ;;  %1258 = vmatpush.bf16.msrb.mxu3 %v1611_v9 }
  0x4e   : > { %921 = vmatpush.bf16.msrb.mxu0 %v1594_v31  ;;  %937 = vmatpush.bf16.msrb.mxu1 %v1594_v31 }
  0x50   : > { %1176 = vmatpush.bf16.msrb.mxu2 %v1602_v2  ;;  %1259 = vmatpush.bf16.msrb.mxu3 %v1610_v13  ;;  %v1683_v13 = vld [vmem:[%s2153_s20] ss:$0 sm:$0xff] }
  0x51   : > { %922 = vmatmul.bf16.vlgmr.msrb.gmra.mxu0 %v913_v45  ;;  %938 = vmatmul.bf16.vlgmr.msrb.gmra.mxu1 %v929_v46 }
  0x53   : > { %1177 = vmatmul.bf16.vlgmr.msrb.gmra.mxu2 %v1100_v12 }
  0x8a   : > { %v861_v18 = vpop.permute.xlu0 %860 }
  0xae   : > { %v853_v59 = vpop.f32.mrf.mxu0  ;;  %v876_v60 = vpop.f32.mrf.mxu1 }
  0xaf   : > { %v854_v14 = vadd.f32 %v1670_v6, %v853_v59  ;;  %v877_v21 = vadd.f32 %v1670_v6, %v876_v60 }
  0xb1   : > { %v857_v16 = vmax.f32 %v854_v14, 0.0  ;;  %v880_v26 = vmax.f32 %v877_v21, 0.0 }
  0xb3   : > { %v863_v23 = vmul.f32 %v861_v18, %v857_v16  ;;  %v881_v32 = vmul.f32 %v880_v26, %v864_v25 }
  0xb5   : > { %v865_v28 = vmul.f32 %v864_v25, %v863_v23  ;;  %v965_v45 = vmul.f32 %v1671_v33, %v881_v32 }
  0xb6   : > { %v855_v7 = vpop.f32.mrf.mxu0  ;;  %v878_v8 = vpop.f32.mrf.mxu1 }
  0xb7   : > { %v892_v10 = vpop.f32.mrf.mxu2  ;;  %v908_v11 = vpop.f32.mrf.mxu3  ;;  %v977_v35 = vmul.f32 %v1673_v27, %v865_v28  ;;  %v953_v46 = vmul.f32 %v1672_v34, %v865_v28  ;;  %v1682_v8 = vld [vmem:[%s2126_s9] ss:$0 sm:$0xff] }
  0xb8   : > { %v893_v15 = vadd.f32 %v1670_v6, %v892_v10  ;;  %v909_v31 = vadd.f32 %v1670_v6, %v908_v11 }
  0xb9   : > { %v1075_v56 = vadd.f32 %v965_v45, %v953_v46 }
  0xba   : > { %v896_v17 = vmax.f32 %v893_v15, 0.0  ;;  %v912_v40 = vmax.f32 %v909_v31, 0.0 }
  0xbc   : > { %v897_v24 = vmul.f32 %v896_v17, %v861_v18  ;;  %v1001_v52 = vmul.f32 %v1676_v41, %v912_v40 }
  0xbe   : > { %v989_v29 = vmul.f32 %v1674_v22, %v897_v24  ;;  %v1013_v39 = vmul.f32 %v1675_v30, %v897_v24 }
  0xbf   : > { %v894_v19 = vpop.f32.mrf.mxu2  ;;  %v910_v20 = vpop.f32.mrf.mxu3 }
  0xc0   : > { %v1077_v36 = vrot.slane %v989_v29, 7  ;;  %v1081_v51 = vrot.slane %v1013_v39, 1 }
  0xc2   : > { %v1079_v47 = vadd.f32 %v1077_v36, %v977_v35  ;;  %v1083_v61 = vadd.f32 %v1081_v51, %v1001_v52 }
  0xc4   : > { %v1086_v57 = vrot.slane %v1079_v47, 1 }
  0xc6   : > { %v1088_v0 = vadd.f32 %v1086_v57, %v1075_v56 }
  0xce   : > { %v923_v37 = vpop.f32.mrf.mxu0  ;;  %v939_v38 = vpop.f32.mrf.mxu1 }
  0xcf   : > { %v924_v42 = vadd.f32 %v1670_v6, %v923_v37  ;;  %v940_v43 = vadd.f32 %v1670_v6, %v939_v38 }
  0xd1   : > { %v927_v48 = vmax.f32 %v924_v42, 0.0  ;;  %v943_v50 = vmax.f32 %v940_v43, 0.0 }
  0xd3   : > { %v928_v53 = vmul.f32 %v927_v48, %v861_v18  ;;  %v1037_v55 = vmul.f32 %v1679_v44, %v943_v50 }
  0xd5   : > { %v1025_v58 = vmul.f32 %v1677_v49, %v928_v53  ;;  %v1049_v62 = vmul.f32 %v1678_v54, %v928_v53 }
  0xd6   : > { %v925_v59 = vpop.f32.mrf.mxu0  ;;  %v941_v60 = vpop.f32.mrf.mxu1 }
  0xd7   : > { %v1084_v63 = vadd.f32 %v1037_v55, %v1025_v58  ;;  %v1092_v2 = vrot.slane %v1049_v62, 1  ;;  %v1178_v9 = vpop.f32.mrf.mxu2 }
  0xd8   : > { %v1179_v10 = vadd.f32 %v1682_v8, %v1178_v9 }
  0xd9   : > { %v1089_v1 = vadd.f32 %v1084_v63, %v1083_v61 }
  0xda   : > { %v1182_v11 = vmax.f32 %v1179_v10, 0.0 }
  0xdb   : > { %v1090_v3 = vadd.f32 %v1089_v1, %v1088_v0 }
  0xdc   : > { %1266 = vst [vmem:[%s765_s22] sm:$0xf] %v1182_v11 }
  0xdd   : > { %v1094_v5 = vadd.f32 %v1092_v2, %v1090_v3 }
  0xdf   : > { %v1099_v6 = vadd.f32 %v1681_v4, %v1094_v5  ;;  %v1180_v12 = vpop.f32.mrf.mxu2 }
  0xe1   : > { %v1183_v7 = vpack.c.bf16 %v1099_v6, %v1099_v6 }
  0xe3   : > { %1260 = vmatmul.bf16.vlgmr.msrb.gmra.mxu3 %v1183_v7 }
 0x166   : > { %v1261_v14 = vpop.f32.mrf.mxu3 }
 0x167   : > { %v1262_v15 = vadd.f32 %v1683_v13, %v1261_v14 }
 0x169   : > { %v1265_v16 = vmax.f32 %v1262_v15, 0.0 }
 0x16b   : > { %1267 = vst [vmem:[%s765_s22 + $0x4] sm:$0xf] %v1265_v16 }
 0x16e   : > { %v1263_v17 = vpop.f32.mrf.mxu3 }
 0x16f PF: > { %s2154_s24 = sld [smem:[#allocation4_spill]] }
 0x170   : > { %s2156_s25 = sld [smem:[#allocation3_spill]] }
 0x171   : > { %s2157_s26 = sld [smem:[#allocation5_spill]] }
 0x172   : > { %s2158_s27 = sld [smem:[#allocation6_spill]] }
 0x175   : > { %s27_s28 = sadd.s32 1, %s2154_s24   ;;  %s2155_s24 = sld [smem:[#allocation2_spill]] }
 0x176   : > { %p24_p10 = scmp.ge.s32.totalorder %s27_s28, 10  }
 0x178   :  { %26 = sbr.rel (!%p24_p10) target bundleno = 5 (0x5), region = 149 }

// kernel: shufflenet_v2_forward.8
= control target key start
LH: loop header
LB: loop body
LE: loop exit
PB: predicated region body
PF: predicated region fallthrough
CT: control target
= control target key end

     0   :  { %s3060_s24 = smov 0   ;;  %s3062_s25 = smov 0   ;;  %s4175_s0 = inlined_call_operand.vmem [shape: f32[2,2,2,3,3,256], index: 0, kind: input, shape index: {}, may-alias: {0,1,2,3,4,5}]   ;;  %s4176_s1 = inlined_call_operand.vmem [shape: f32[2,2,2,3,3,256], index: 1, kind: input, shape index: {}, may-alias: {0,1,2,3,4,5}]   ;;  %s4177_s2 = inlined_call_operand.vmem [shape: f32[2,2,2,3,3,256], index: 2, kind: input, shape index: {}, may-alias: {0,1,2,3,4,5}]   ;;  %s4178_s3 = inlined_call_operand.vmem [shape: f32[2,2,2,3,3,256], index: 3, kind: input, shape index: {}, may-alias: {0,1,2,3,4,5}]   ;;  %s4179_s4 = inlined_call_operand.vmem [shape: f32[2,2,2,3,3,256], index: 4, kind: input, shape index: {}, may-alias: {0,1,2,3,4,5}]   ;;  %s4180_s5 = inlined_call_operand.vmem [shape: f32[2,2,2,3,3,256], index: 5, kind: input, shape index: {}, may-alias: {0,1,2,3,4,5}]   ;;  %s4181_s6 = inlined_call_operand.vmem [shape: f32[9,1,256], index: 6, kind: input, shape index: {}]   ;;  %s4182_s7 = inlined_call_operand.vmem [shape: f32[1,256], index: 7, kind: input, shape index: {}]   ;;  %s4183_s8 = inlined_call_operand.vmem [shape: bf16[256,256], index: 8, kind: input, shape index: {}]   ;;  %s4184_s9 = inlined_call_operand.vmem [shape: f32[1,256], index: 9, kind: input, shape index: {}]   ;;  %s4185_s10 = inlined_call_operand.vmem [shape: bf16[256,256], index: 10, kind: input, shape index: {}]   ;;  %s4186_s11 = inlined_call_operand.vmem [shape: f32[1,256], index: 11, kind: input, shape index: {}]   ;;  %s4187_s12 = inlined_call_operand.vmem [shape: f32[9,1,256], index: 12, kind: input, shape index: {}]   ;;  %s4188_s13 = inlined_call_operand.vmem [shape: f32[1,256], index: 13, kind: input, shape index: {}]   ;;  %s4189_s14 = inlined_call_operand.vmem [shape: bf16[256,256], index: 14, kind: input, shape index: {}]   ;;  %s4190_s15 = inlined_call_operand.vmem [shape: f32[1,256], index: 15, kind: input, shape index: {}]   ;;  %s4191_s16 = inlined_call_operand.vmem [shape: f32[3,1], index: 16, kind: input, shape index: {}]   ;;  %s4192_s17 = inlined_call_operand.vmem [shape: f32[2,2,2,512], index: 17, kind: output, shape index: {}]  }
   0x1   :  { %4196 = sst [smem:[#allocation6_spill]] %s4175_s0  ;;  %s3064_s26 = smov 0  }
   0x2   :  { %4197 = sst [smem:[#allocation7_spill]] %s4176_s1  ;;  %s3066_s27 = smov 0  }
   0x3   :  { %s3068_s28 = smov 0  }
   0x4 LB: > { %4198 = sst [smem:[#allocation2_spill]] %s2959_s26  ;;  %s36_s29 = sadd.s32 1, %s2959_s26  ;;  %s2967_s28 = sphi %s3068_s28, %s27_s28   ;;  %s2963_s27 = sphi %s3066_s27, %s4209_s27   ;;  %s2959_s26 = sphi %s3064_s26, %s4208_s26   ;;  %s2955_s25 = sphi %s3062_s25, %s4207_s25   ;;  %s2951_s24 = sphi %s3060_s24, %s4206_s24  }
   0x5   : > { %4199 = sst [smem:[#allocation3_spill]] %s2963_s27  ;;  %s39_s0 = sadd.s32 1, %s2963_s27 }
   0x6   : > { %p37_p0 = scmp.ge.s32.totalorder %s36_s29, 2  ;;  %p2365_p1 = scmp.ge.s32.totalorder %s2967_s28, 1 }
   0x7   : > { %p600_p2 = scmp.lt.s32.totalorder %s2967_s28, 5 }
   0x8   : > { %s4211_s29 = smov (%p37_p0, %s36_s29), 0  ;;  %s4213_s0 = smov (!%p37_p0, %s39_s0), %s2963_s27 }
   0x9   : > { %4200 = sst [smem:[#allocation4_spill]] %s4211_s29  ;;  %p601_p3 = pnand %p2365_p1, %p600_p2 }
   0xa   : > { %p41_p4 = scmp.ge.s32.totalorder %s4213_s0, 2  ;;  %p712_p5 = scmp.lt.s32.totalorder (!%p601_p3), %s2955_s25, 1 }
   0xb   : > { %604 = sbr.rel (%p601_p3) target bundleno = 503 (0x1f7), region = 88  ;;  %p714_p6 = scmp.lt.s32.totalorder (!%p601_p3), %s2951_s24, 2 }
   0xc   : > { %s4215_s0 = smov (%p41_p4, %s4213_s0), 0  ;;  %s752_s19 = sadd.s32 (!%p601_p3), 1, %s2951_s24 }
   0xd   : > { %4201 = sst [smem:[#allocation5_spill]] %s4215_s0  ;;  %p3391_p7 = scmp.lt.s32.totalorder (!%p601_p3), %s752_s19, 2 }
   0xe   : > { %s4203_s20 = sld [smem:[#allocation6_spill]] (!%p601_p3)  ;;  %p791_p8 = scmp.eq.s32.totalorder (!%p601_p3), %s2951_s24, 0 }
   0xf   : > { %p777_p9 = scmp.lt.s32.totalorder (!%p601_p3), %s2951_s24, 1 }
  0x10   : > { %v2443_v0 = vld [vmem:[%s4185_s10 + $0x70] sm:$0xf]  ;;  %v2805_v1 = vld [vmem:[%s4185_s10 + $0x74] sm:$0xf0]  ;;  %v2804_v5 = vld [vmem:[%s4185_s10 + $0x74] sm:$0xf] }
  0x11   : > { %v2507_v2 = vld [vmem:[%s4185_s10 + $0xf0] sm:$0xf]  ;;  %v3103_v3 = vor.u32 %v2805_v1, %v2443_v0  ;;  %v2821_v4 = vld [vmem:[%s4185_s10 + $0xf4] sm:$0xf0]  ;;  %v2445_v6 = vld [vmem:[%s4185_s10 + $0x78] sm:$0xf0] }
  0x12   : > { %v3114_v7 = vor.u32 %v2821_v4, %v2507_v2  ;;  %v3116_v8 = vor.u32 %v2804_v5, %v2445_v6  ;;  %v2820_v9 = vld [vmem:[%s4185_s10 + $0xf4] sm:$0xf]  ;;  %v2509_v10 = vld [vmem:[%s4185_s10 + $0xf8] sm:$0xf0]  ;;  %v2435_v11 = vld [vmem:[%s4185_s10 + $0x60] sm:$0xf] }
  0x13   : > { %999 = vmatpush.bf16.msra.mxu0 %v3103_v3  ;;  %v3128_v12 = vor.u32 %v2820_v9, %v2509_v10  ;;  %v2803_v13 = vld [vmem:[%s4185_s10 + $0x64] sm:$0xf0]  ;;  %v2499_v14 = vld [vmem:[%s4185_s10 + $0xe0] sm:$0xf]  ;;  %v2802_v18 = vld [vmem:[%s4185_s10 + $0x64] sm:$0xf] }
  0x14   : > { %v2819_v15 = vld [vmem:[%s4185_s10 + $0xe4] sm:$0xf0]  ;;  %1012 = vmatpush.bf16.msra.mxu1 %v3114_v7  ;;  %1025 = vmatpush.bf16.msra.mxu2 %v3116_v8  ;;  %v3141_v16 = vor.u32 %v2803_v13, %v2435_v11  ;;  %v2437_v19 = vld [vmem:[%s4185_s10 + $0x68] sm:$0xf0]  ;;  %v2818_v20 = vld [vmem:[%s4185_s10 + $0xe4] sm:$0xf] }
  0x15   : > { %v3143_v17 = vor.u32 %v2819_v15, %v2499_v14  ;;  %1038 = vmatpush.bf16.msra.mxu3 %v3128_v12  ;;  %v3155_v21 = vor.u32 %v2802_v18, %v2437_v19  ;;  %v2501_v22 = vld [vmem:[%s4185_s10 + $0xe8] sm:$0xf0]  ;;  %v2427_v23 = vld [vmem:[%s4185_s10 + $0x50] sm:$0xf]  ;;  %v2801_v24 = vld [vmem:[%s4185_s10 + $0x54] sm:$0xf0] }
  0x16   : > { %v3166_v25 = vor.u32 %v2818_v20, %v2501_v22  ;;  %v2491_v26 = vld [vmem:[%s4185_s10 + $0xd0] sm:$0xf]  ;;  %v2817_v27 = vld [vmem:[%s4185_s10 + $0xd4] sm:$0xf0]  ;;  %v2800_v28 = vld [vmem:[%s4185_s10 + $0x54] sm:$0xf]  ;;  %v3178_v29 = vor.u32 %v2801_v24, %v2427_v23 }
  0x17   : > { %1000 = vmatpush.bf16.msra.mxu0 %v3141_v16  ;;  %v2429_v30 = vld [vmem:[%s4185_s10 + $0x58] sm:$0xf0]  ;;  %v2816_v31 = vld [vmem:[%s4185_s10 + $0xd4] sm:$0xf]  ;;  %v3191_v33 = vor.u32 %v2817_v27, %v2491_v26  ;;  %v2419_v35 = vld [vmem:[%s4185_s10 + $0x40] sm:$0xf] }
  0x18   : > { %v2493_v32 = vld [vmem:[%s4185_s10 + $0xd8] sm:$0xf0]  ;;  %1013 = vmatpush.bf16.msra.mxu1 %v3143_v17  ;;  %1026 = vmatpush.bf16.msra.mxu2 %v3155_v21  ;;  %v3193_v34 = vor.u32 %v2800_v28, %v2429_v30  ;;  %v2799_v36 = vld [vmem:[%s4185_s10 + $0x44] sm:$0xf0]  ;;  %v2483_v37 = vld [vmem:[%s4185_s10 + $0xc0] sm:$0xf] }
  0x19   : > { %1039 = vmatpush.bf16.msra.mxu3 %v3166_v25  ;;  %v3205_v38 = vor.u32 %v2816_v31, %v2493_v32  ;;  %v2815_v39 = vld [vmem:[%s4185_s10 + $0xc4] sm:$0xf0]  ;;  %v2798_v40 = vld [vmem:[%s4185_s10 + $0x44] sm:$0xf]  ;;  %v2421_v41 = vld [vmem:[%s4185_s10 + $0x48] sm:$0xf0]  ;;  %v3223_v44 = vor.u32 %v2799_v36, %v2419_v35 }
  0x1a   : > { %v2814_v42 = vld [vmem:[%s4185_s10 + $0xc4] sm:$0xf]  ;;  %v2485_v43 = vld [vmem:[%s4185_s10 + $0xc8] sm:$0xf0]  ;;  %v3227_v45 = vor.u32 %v2815_v39, %v2483_v37  ;;  %v3229_v46 = vor.u32 %v2798_v40, %v2421_v41  ;;  %v2411_v47 = vld [vmem:[%s4185_s10 + $0x30] sm:$0xf] }
  0x1b   : > { %1001 = vmatpush.bf16.msra.mxu0 %v3178_v29  ;;  %v2797_v48 = vld [vmem:[%s4185_s10 + $0x34] sm:$0xf0]  ;;  %v2475_v49 = vld [vmem:[%s4185_s10 + $0xb0] sm:$0xf]  ;;  %v3241_v50 = vor.u32 %v2814_v42, %v2485_v43  ;;  %v2796_v52 = vld [vmem:[%s4185_s10 + $0x34] sm:$0xf] }
  0x1c   : > { %1014 = vmatpush.bf16.msra.mxu1 %v3191_v33  ;;  %1027 = vmatpush.bf16.msra.mxu2 %v3193_v34  ;;  %v2813_v51 = vld [vmem:[%s4185_s10 + $0xb4] sm:$0xf0]  ;;  %v2413_v53 = vld [vmem:[%s4185_s10 + $0x38] sm:$0xf0]  ;;  %v2812_v54 = vld [vmem:[%s4185_s10 + $0xb4] sm:$0xf]  ;;  %v3259_v56 = vor.u32 %v2797_v48, %v2411_v47 }
  0x1d   : > { %1040 = vmatpush.bf16.msra.mxu3 %v3205_v38  ;;  %v2477_v55 = vld [vmem:[%s4185_s10 + $0xb8] sm:$0xf0]  ;;  %v3263_v57 = vor.u32 %v2813_v51, %v2475_v49  ;;  %v3265_v58 = vor.u32 %v2796_v52, %v2413_v53  ;;  %v2403_v59 = vld [vmem:[%s4185_s10 + $0x20] sm:$0xf]  ;;  %v2795_v60 = vld [vmem:[%s4185_s10 + $0x24] sm:$0xf0] }
  0x1e   : > { %v2467_v61 = vld [vmem:[%s4185_s10 + $0xa0] sm:$0xf]  ;;  %v3277_v62 = vor.u32 %v2812_v54, %v2477_v55  ;;  %v2811_v63 = vld [vmem:[%s4185_s10 + $0xa4] sm:$0xf0]  ;;  %v2794_v0 = vld [vmem:[%s4185_s10 + $0x24] sm:$0xf]  ;;  %v3298_v6 = vor.u32 %v2795_v60, %v2403_v59 }
  0x1f   : > { %1002 = vmatpush.bf16.msra.mxu0 %v3223_v44  ;;  %v2405_v1 = vld [vmem:[%s4185_s10 + $0x28] sm:$0xf0]  ;;  %v2810_v2 = vld [vmem:[%s4185_s10 + $0xa4] sm:$0xf]  ;;  %v2395_v5 = vld [vmem:[%s4185_s10 + $0x10] sm:$0xf]  ;;  %v3311_v13 = vor.u32 %v2811_v63, %v2467_v61 }
  0x20   : > { %1015 = vmatpush.bf16.msra.mxu1 %v3227_v45  ;;  %1028 = vmatpush.bf16.msra.mxu2 %v3229_v46  ;;  %v2469_v4 = vld [vmem:[%s4185_s10 + $0xa8] sm:$0xf0]  ;;  %v2793_v9 = vld [vmem:[%s4185_s10 + $0x14] sm:$0xf0]  ;;  %v2459_v10 = vld [vmem:[%s4185_s10 + $0x90] sm:$0xf]  ;;  %v3313_v14 = vor.u32 %v2794_v0, %v2405_v1 }
  0x21   : > { %1041 = vmatpush.bf16.msra.mxu3 %v3241_v50  ;;  %v2809_v11 = vld [vmem:[%s4185_s10 + $0x94] sm:$0xf0]  ;;  %v2792_v15 = vld [vmem:[%s4185_s10 + $0x14] sm:$0xf]  ;;  %v2397_v18 = vld [vmem:[%s4185_s10 + $0x18] sm:$0xf0]  ;;  %v3325_v20 = vor.u32 %v2810_v2, %v2469_v4  ;;  %v3343_v28 = vor.u32 %v2793_v9, %v2395_v5 }
  0x22   : > { %v2808_v19 = vld [vmem:[%s4185_s10 + $0x94] sm:$0xf]  ;;  %v2461_v22 = vld [vmem:[%s4185_s10 + $0x98] sm:$0xf0]  ;;  %v1379_v23 = vld [vmem:[%s4181_s6] sm:$0x3]  ;;  %v3345_v30 = vor.u32 %v2809_v11, %v2459_v10  ;;  %v3358_v36 = vor.u32 %v2792_v15, %v2397_v18 }
  0x23   : > { %1003 = vmatpush.bf16.msra.mxu0 %v3259_v56  ;;  %v2387_v24 = vld [vmem:[%s4185_s10] sm:$0xf]  ;;  %v1382_v26 = vperm.slane %v1379_v23, 1  ;;  %v2791_v31 = vld [vmem:[%s4185_s10 + $0x4] sm:$0xf0]  ;;  %s4217_s25 = smov (!%p712_p5, %s2955_s25), 1  ;;  %v3367_v42 = vor.u32 %v2808_v19, %v2461_v22 }
  0x24   : > { %1016 = vmatpush.bf16.msra.mxu1 %v3263_v57  ;;  %1029 = vmatpush.bf16.msra.mxu2 %v3265_v58  ;;  %v2513_v27 = vld [vmem:[%s4181_s6 + $0x2] sm:$0x3]  ;;  %v2807_v37 = vld [vmem:[%s4185_s10 + $0x84] sm:$0xf0]  ;;  %s715_s0 = scalar_select %p714_p6, %s2951_s24, 2  ;;  %v1381_v39 = vperm.slane %v1379_v23, 0  ;;  %v3383_v52 = vor.u32 %v2791_v31, %v2387_v24 }
  0x25   : > { %1042 = vmatpush.bf16.msra.mxu3 %v3277_v62  ;;  %v2451_v32 = vld [vmem:[%s4185_s10 + $0x80] sm:$0xf]  ;;  %v1400_v35 = vperm.slane %v2513_v27, 1  ;;  %v1383_v40 = vrot.slane %v1382_v26, 4  ;;  %v1399_v41 = vperm.slane %v2513_v27, 0  ;;  %s4195_s1 = smul.u32 6, %s4217_s25 }
  0x26   : > { %v2790_v43 = vld [vmem:[%s4185_s10 + $0x4] sm:$0xf]  ;;  %v2389_v47 = vld [vmem:[%s4185_s10 + $0x8] sm:$0xf0]  ;;  %s2366_s29 = sshll.u32 %s715_s0, 1  ;;  %v3385_v53 = vor.u32 %v2807_v37, %v2451_v32  ;;  %vm1384_vm0 = vcmask 1043456  }
  0x27   : > { %1004 = vmatpush.bf16.msra.mxu0 %v3298_v6  ;;  %v1401_v48 = vrot.slane %v1400_v35, 4  ;;  %v2806_v49 = vld [vmem:[%s4185_s10 + $0x84] sm:$0xf]  ;;  %v2453_v51 = vld [vmem:[%s4185_s10 + $0x88] sm:$0xf0]  ;;  %s718_s30 = sadd.s32 %s4195_s1, %s2366_s29  ;;  %v3397_v54 = vor.u32 %v2790_v43, %v2389_v47  ;;  %v1385_v55 = vsel %vm1384_vm0, %v1381_v39, %v1383_v40  ;;  %s4204_s29 = sld [smem:[#allocation7_spill]] }
  0x28   : > { %1017 = vmatpush.bf16.msra.mxu1 %v3311_v13  ;;  %1030 = vmatpush.bf16.msra.mxu2 %v3313_v14  ;;  %s3399_s0 = sshll.u32 %s718_s30, 2  ;;  %v3404_v60 = vor.u32 %v2806_v49, %v2453_v51  ;;  %s4219_s19 = smov (!%p3391_p7, %s752_s19), 2  ;;  %v2515_v4 = vld [vmem:[%s4181_s6 + $0x4] sm:$0x3]  ;;  %v2517_v5 = vld [vmem:[%s4181_s6 + $0x6] sm:$0x3] }
  0x29   : > { %1043 = vmatpush.bf16.msra.mxu3 %v3325_v20  ;;  %v1402_v59 = vsel %vm1384_vm0, %v1399_v41, %v1401_v48  ;;  %s720_s21 = scalar_lea.vmem %s4203_s20, %s3399_s0  ;;  %v2519_v9 = vld [vmem:[%s4181_s6 + $0x8] sm:$0x3]  ;;  %s2266_s23 = scalar_lea.vmem %s4177_s2, %s3399_s0  ;;  %v1417_v10 = vperm.slane %v2515_v4, 0  ;;  %v1418_v11 = vperm.slane %v2515_v4, 1  ;;  %v1437_v15 = vperm.slane %v2517_v5, 1 }
  0x2a   : > { %v784_v61 = vld [vmem:[%s720_s21] sm:$0x77]  ;;  %v1436_v18 = vperm.slane %v2517_v5, 0  ;;  %v1454_v19 = vperm.slane %v2519_v9, 0  ;;  %v1455_v22 = vperm.slane %v2519_v9, 1  ;;  %s2272_s18 = scalar_lea.vmem %s4178_s3, %s3399_s0  ;;  %s4221_s24 = smov (!%p777_p9, %s2951_s24), 1 }
  0x2b   : > { %1005 = vmatpush.bf16.msra.mxu0 %v3343_v28  ;;  %794 = vst [vmem:[#allocation1] ss:$2 sm:$0xff] %v784_v61  ;;  %v1387_v0 = vmul.f32 %v1385_v55, %v784_v61  ;;  %v1419_v23 = vrot.slane %v1418_v11, 4  ;;  %v1438_v24 = vrot.slane %v1437_v15, 4  ;;  %v2521_v26 = vld [vmem:[%s4181_s6 + $0xa] sm:$0x3] }
  0x2c   : > { %1018 = vmatpush.bf16.msra.mxu1 %v3345_v30  ;;  %1031 = vmatpush.bf16.msra.mxu2 %v3358_v36  ;;  %v2523_v27 = vld [vmem:[%s4181_s6 + $0xc] sm:$0x3]  ;;  %v2382_v35 = vld [vmem:[%s2266_s23 + $0x60] sm:$0x77]  ;;  %v1456_v41 = vrot.slane %v1455_v22, 4  ;;  %v1472_v49 = vperm.slane %v2521_v26, 0 }
  0x2d   : > { %1044 = vmatpush.bf16.msra.mxu3 %v3367_v42  ;;  %s2260_s1 = scalar_lea.vmem %s4204_s29, %s3399_s0  ;;  %s4205_s29 = smul.u32 6, %s4217_s25  ;;  %v1420_v40 = vsel %vm1384_vm0, %v1417_v10, %v1419_v23  ;;  %v2525_v43 = vld [vmem:[%s4181_s6 + $0xe] sm:$0x3]  ;;  %v1439_v48 = vsel %vm1384_vm0, %v1436_v18, %v1438_v24  ;;  %v1473_v51 = vperm.slane %v2521_v26, 1  ;;  %v2527_v55 = vld [vmem:[%s4181_s6 + $0x10] sm:$0x3] }
  0x2e   : > { %v2381_v63 = vld [vmem:[%s2260_s1 + $0x30] sm:$0x77]  ;;  %s2374_s1 = sshll.u32 %s4219_s19, 1  ;;  %v1421_v47 = vrot.slane %v1420_v40, 7  ;;  %v1457_v5 = vsel %vm1384_vm0, %v1454_v19, %v1456_v41  ;;  %v1510_v10 = vperm.slane %v2525_v43, 1  ;;  %v1528_v11 = vperm.slane %v2527_v55, 1 }
  0x2f   : > { %1006 = vmatpush.bf16.msra.mxu0 %v3383_v52  ;;  %v1404_v1 = vmul.f32 %v2381_v63, %v1402_v59  ;;  %s3443_s30 = sadd.s32 %s4205_s29, %s2374_s1  ;;  %v1441_v59 = vmul.f32 %v2382_v35, %v1439_v48  ;;  %v1474_v4 = vrot.slane %v1473_v51, 4  ;;  %v3478_v15 = vld [vmem:[%s2272_s18 + $0x90] sm:$0x77]  ;;  %v1509_v22 = vperm.slane %v2525_v43, 0  ;;  %s2378_s0 = sshll.u32 %s4221_s24, 2 }
  0x30   : > { %1019 = vmatpush.bf16.msra.mxu1 %v3385_v53  ;;  %1032 = vmatpush.bf16.msra.mxu2 %v3397_v54  ;;  %s2375_s1 = sshll.u32 %s3443_s30, 2  ;;  %v1527_v23 = vperm.slane %v2527_v55, 0  ;;  %v1459_v40 = vmul.f32 %v3478_v15, %v1457_v5  ;;  %v2969_v5 = vmov 0   ;;  %s2379_s22 = sshll.u32 %s4217_s25, 3  ;;  %vm2139_vm1 = vcmask 1041408  }
  0x31   : > { %1045 = vmatpush.bf16.msra.mxu3 %v3404_v60  ;;  %v3423_v2 = vadd.f32 %v1404_v1, %v1387_v0  ;;  %v1492_v0 = vperm.slane %v2523_v27, 1  ;;  %s761_s21 = scalar_lea.vmem %s4179_s4, %s2375_s1  ;;  %v1423_v1 = vmul.f32 %v1421_v47, %v784_v61  ;;  %v1475_v18 = vsel %vm1384_vm0, %v1472_v49, %v1474_v4  ;;  %s2283_s19 = scalar_lea.vmem %s4180_s5, %s2375_s1  ;;  %2928 = vset.pattern.permute.xlu0 %v2969_v5 }
  0x32   : > { %v795_v31 = vld.sshfl [vmem:[#allocation1] sm:$0xff pattern:$0x75316420]  ;;  %v796_v32 = vld.sshfl [vmem:[#allocation1 + $0x8] sm:$0xff pattern:$0x75316420] }
  0x33   : > { %1071 = vmatpush.bf16.msrb.mxu0 %v3103_v3  ;;  %v799_v37 = vpack.c.bf16 %v795_v31, %v795_v31  ;;  %v800_v39 = vpack.c.bf16 %v796_v32, %v796_v32  ;;  %1064 = vst [vmem:[#allocation1] ss:$2 sm:$0xff] %v2381_v63  ;;  %v1491_v63 = vperm.slane %v2523_v27, 0  ;;  %v1493_v9 = vrot.slane %v1492_v0, 4  ;;  %v3487_v61 = vld [vmem:[%s761_s21] sm:$0x77] }
  0x34   : > { %1084 = vmatpush.bf16.msrb.mxu1 %v3114_v7  ;;  %1097 = vmatpush.bf16.msrb.mxu2 %v3116_v8  ;;  %v1545_v24 = vrot.slane %v1441_v59, 7  ;;  %v1476_v19 = vrot.slane %v1475_v18, 7  ;;  %v1511_v27 = vrot.slane %v1510_v10, 4  ;;  %v1529_v31 = vrot.slane %v1528_v11, 4  ;;  %v3495_v47 = vld [vmem:[%s2283_s19 + $0x30] sm:$0x77]  ;;  %s781_s19 = sadd.s32 %s2379_s22, %s2378_s0 }
  0x35   : > { %1110 = vmatpush.bf16.msrb.mxu3 %v3128_v12  ;;  %1033 = vmatmul.bf16.vlgmr.msra.gmra.mxu2 %v799_v37  ;;  %v1494_v26 = vsel %vm1384_vm0, %v1491_v63, %v1493_v9  ;;  %v790_v11 = vld [vmem:[%s4191_s16] sm:$0x7]  ;;  %s792_s27 = scalar_select %p791_p8, 0.0, 1.0 }
  0x36   : > { %1007 = vmatmul.bf16.vlgmr.msra.gmra.mxu0 %v799_v37  ;;  %1046 = vmatmul.bf16.vlgmr.msra.gmra.mxu3 %v800_v39  ;;  %v1478_v41 = vmul.f32 %v2382_v35, %v1476_v19  ;;  %v1496_v43 = vmul.f32 %v1494_v26, %v3487_v61  ;;  %v1512_v48 = vsel %vm1384_vm0, %v1509_v22, %v1511_v27  ;;  %s2380_s30 = sshll.u32 %s781_s19, 1 }
  0x37   : > { %1072 = vmatpush.bf16.msrb.mxu0 %v3141_v16  ;;  %1020 = vmatmul.bf16.vlgmr.msra.gmra.mxu1 %v800_v39  ;;  %v1547_v39 = vadd.f32 %v1545_v24, %v1423_v1  ;;  %v1530_v49 = vsel %vm1384_vm0, %v1527_v23, %v1529_v31  ;;  %v1514_v55 = vmul.f32 %v3495_v47, %v1512_v48  ;;  %s783_s29 = scalar_lea.vmem %s4192_s17, %s2380_s30 }
  0x38   : > { %1085 = vmatpush.bf16.msrb.mxu1 %v3143_v17  ;;  %1098 = vmatpush.bf16.msrb.mxu2 %v3155_v21  ;;  %v1531_v59 = vrot.slane %v1530_v49, 7  ;;  %v2529_v63 = vrot.slane %v1478_v41, 9 }
  0x39   : > { %1111 = vmatpush.bf16.msrb.mxu3 %v3166_v25  ;;  %v2530_v51 = vrot.slane %v1547_v39, 9  ;;  %v1553_v4 = vadd.f32 %v1514_v55, %v1496_v43  ;;  %1055 = vperm.xlu0 %2928, %v790_v11  }
  0x3a   : > { %v1065_v32 = vld.sshfl [vmem:[#allocation1] sm:$0xff pattern:$0x75316420]  ;;  %v1066_v37 = vld.sshfl [vmem:[#allocation1 + $0x8] sm:$0xff pattern:$0x75316420]  ;;  %v1533_v0 = vmul.f32 %v1531_v59, %v3487_v61  ;;  %v1552_v1 = vadd.f32 %v2529_v63, %v1459_v40 }
  0x3b   : > { %1073 = vmatpush.bf16.msrb.mxu0 %v3178_v29  ;;  %1128 = vst [vmem:[#allocation1] ss:$2 sm:$0xff] %v2382_v35  ;;  %v1558_v35 = vadd.f32 %v2530_v51, %v3423_v2  ;;  %v1069_v22 = vpack.c.bf16 %v1065_v32, %v1065_v32  ;;  %v1070_v23 = vpack.c.bf16 %v1066_v37, %v1066_v37  ;;  %v1566_v40 = vld [vmem:[%s4182_s7] sm:$0x3] }
  0x3c   : > { %1086 = vmatpush.bf16.msrb.mxu1 %v3191_v33  ;;  %1099 = vmatpush.bf16.msrb.mxu2 %v3193_v34  ;;  %v1559_v9 = vadd.f32 %v1553_v4, %v1552_v1  ;;  %v2531_v10 = vrot.slane %v1533_v0, 9  ;;  %v1569_v41 = vperm.slane %v1566_v40, 1  ;;  %v1568_v43 = vperm.slane %v1566_v40, 0 }
  0x3d   : > { %1112 = vmatpush.bf16.msrb.mxu3 %v3205_v38 }
  0x3e   : > { %v1560_v2 = vadd.f32 %v1559_v9, %v1558_v35 }
  0x3f   : > { %1074 = vmatpush.bf16.msrb.mxu0 %v3223_v44 }
  0x40   : > { %1087 = vmatpush.bf16.msrb.mxu1 %v3227_v45  ;;  %1100 = vmatpush.bf16.msrb.mxu2 %v3229_v46  ;;  %v3514_v18 = vadd.f32 %v2531_v10, %v1560_v2 }
  0x41   : > { %1113 = vmatpush.bf16.msrb.mxu3 %v3241_v50 }
  0x42   : > { %v1129_v24 = vld.sshfl [vmem:[#allocation1] sm:$0xff pattern:$0x75316420]  ;;  %v1130_v19 = vld.sshfl [vmem:[#allocation1 + $0x8] sm:$0xff pattern:$0x75316420] }
  0x43   : > { %1075 = vmatpush.bf16.msrb.mxu0 %v3259_v56  ;;  %1192 = vst [vmem:[#allocation1] ss:$2 sm:$0xff] %v3478_v15  ;;  %v1133_v15 = vpack.c.bf16 %v1129_v24, %v1129_v24  ;;  %v1134_v26 = vpack.c.bf16 %v1130_v19, %v1130_v19 }
  0x44   : > { %1088 = vmatpush.bf16.msrb.mxu1 %v3263_v57  ;;  %1101 = vmatpush.bf16.msrb.mxu2 %v3265_v58 }
  0x45   : > { %1114 = vmatpush.bf16.msrb.mxu3 %v3277_v62 }
  0x47   : > { %1076 = vmatpush.bf16.msrb.mxu0 %v3298_v6 }
  0x48   : > { %1089 = vmatpush.bf16.msrb.mxu1 %v3311_v13  ;;  %1102 = vmatpush.bf16.msrb.mxu2 %v3313_v14 }
  0x49   : > { %1115 = vmatpush.bf16.msrb.mxu3 %v3325_v20 }
  0x4a   : > { %v1193_v27 = vld.sshfl [vmem:[#allocation1] sm:$0xff pattern:$0x75316420]  ;;  %v1194_v31 = vld.sshfl [vmem:[#allocation1 + $0x8] sm:$0xff pattern:$0x75316420] }
  0x4b   : > { %1077 = vmatpush.bf16.msrb.mxu0 %v3343_v28  ;;  %1254 = vst [vmem:[#allocation1] ss:$2 sm:$0xff] %v3487_v61  ;;  %v1197_v61 = vpack.c.bf16 %v1193_v27, %v1193_v27  ;;  %v1198_v32 = vpack.c.bf16 %v1194_v31, %v1194_v31 }
  0x4c   : > { %1090 = vmatpush.bf16.msrb.mxu1 %v3345_v30  ;;  %1103 = vmatpush.bf16.msrb.mxu2 %v3358_v36 }
  0x4d   : > { %1116 = vmatpush.bf16.msrb.mxu3 %v3367_v42 }
  0x4f   : > { %1078 = vmatpush.bf16.msrb.mxu0 %v3383_v52 }
  0x50   : > { %1091 = vmatpush.bf16.msrb.mxu1 %v3385_v53  ;;  %1104 = vmatpush.bf16.msrb.mxu2 %v3397_v54 }
  0x51   : > { %1117 = vmatpush.bf16.msrb.mxu3 %v3404_v60 }
  0x52   : > { %1079 = vmatmul.bf16.vlgmr.msrb.gmra.mxu0 %v1069_v22  ;;  %v1255_v37 = vld.sshfl [vmem:[#allocation1] sm:$0xff pattern:$0x75316420]  ;;  %v1256_v39 = vld.sshfl [vmem:[#allocation1 + $0x8] sm:$0xff pattern:$0x75316420] }
  0x53   : > { %1135 = vmatpush.bf16.msra.mxu0 %v3103_v3  ;;  %1105 = vmatmul.bf16.vlgmr.msrb.gmra.mxu2 %v1069_v22  ;;  %1318 = vst [vmem:[#allocation1] ss:$2 sm:$0xff] %v3495_v47  ;;  %v1570_v47 = vrot.slane %v1569_v41, 4  ;;  %v1259_v51 = vpack.c.bf16 %v1255_v37, %v1255_v37  ;;  %v1260_v55 = vpack.c.bf16 %v1256_v39, %v1256_v39 }
  0x54   : > { %1148 = vmatpush.bf16.msra.mxu1 %v3114_v7  ;;  %1161 = vmatpush.bf16.msra.mxu2 %v3116_v8 }
  0x55   : > { %1174 = vmatpush.bf16.msra.mxu3 %v3128_v12  ;;  %1092 = vmatmul.bf16.vlgmr.msrb.gmra.mxu1 %v1070_v23  ;;  %v1571_v48 = vsel %vm1384_vm0, %v1568_v43, %v1570_v47  ;;  %v2518_v43 = vld [vmem:[%s4187_s12 + $0x6] sm:$0x3] }
  0x56   : > { %1118 = vmatmul.bf16.vlgmr.msrb.gmra.mxu3 %v1070_v23  ;;  %v1573_v49 = vadd.f32 %v1571_v48, %v3514_v18  ;;  %v2516_v48 = vld [vmem:[%s4187_s12 + $0x4] sm:$0x3] }
  0x57   : > { %1136 = vmatpush.bf16.msra.mxu0 %v3141_v16 }
  0x58   : > { %1149 = vmatpush.bf16.msra.mxu1 %v3143_v17  ;;  %1162 = vmatpush.bf16.msra.mxu2 %v3155_v21 }
  0x59   : > { %1175 = vmatpush.bf16.msra.mxu3 %v3166_v25 }
  0x5a   : > { %v1319_v59 = vld.sshfl [vmem:[#allocation1] sm:$0xff pattern:$0x75316420]  ;;  %v1320_v63 = vld.sshfl [vmem:[#allocation1 + $0x8] sm:$0xff pattern:$0x75316420] }
  0x5b   : > { %1137 = vmatpush.bf16.msra.mxu0 %v3178_v29  ;;  %1623 = vst [vmem:[#allocation1] ss:$2 sm:$0xff] %v1573_v49 }
  0x5c   : > { %1150 = vmatpush.bf16.msra.mxu1 %v3191_v33  ;;  %1163 = vmatpush.bf16.msra.mxu2 %v3193_v34 }
  0x5d   : > { %1176 = vmatpush.bf16.msra.mxu3 %v3205_v38 }
  0x5f   : > { %1138 = vmatpush.bf16.msra.mxu0 %v3223_v44 }
  0x60   : > { %1151 = vmatpush.bf16.msra.mxu1 %v3227_v45  ;;  %1164 = vmatpush.bf16.msra.mxu2 %v3229_v46 }
  0x61   : > { %1177 = vmatpush.bf16.msra.mxu3 %v3241_v50 }
  0x63   : > { %1139 = vmatpush.bf16.msra.mxu0 %v3259_v56 }
  0x64   : > { %1152 = vmatpush.bf16.msra.mxu1 %v3263_v57  ;;  %1165 = vmatpush.bf16.msra.mxu2 %v3265_v58 }
  0x65   : > { %1178 = vmatpush.bf16.msra.mxu3 %v3277_v62 }
  0x67   : > { %1140 = vmatpush.bf16.msra.mxu0 %v3298_v6 }
  0x68   : > { %1153 = vmatpush.bf16.msra.mxu1 %v3311_v13  ;;  %1166 = vmatpush.bf16.msra.mxu2 %v3313_v14 }
  0x69   : > { %1179 = vmatpush.bf16.msra.mxu3 %v3325_v20 }
  0x6b   : > { %1141 = vmatpush.bf16.msra.mxu0 %v3343_v28 }
  0x6c   : > { %1154 = vmatpush.bf16.msra.mxu1 %v3345_v30  ;;  %1167 = vmatpush.bf16.msra.mxu2 %v3358_v36 }
  0x6d   : > { %1180 = vmatpush.bf16.msra.mxu3 %v3367_v42 }
  0x6f   : > { %1142 = vmatpush.bf16.msra.mxu0 %v3383_v52 }
  0x70   : > { %1155 = vmatpush.bf16.msra.mxu1 %v3385_v53  ;;  %1168 = vmatpush.bf16.msra.mxu2 %v3397_v54 }
  0x71   : > { %1181 = vmatpush.bf16.msra.mxu3 %v3404_v60 }
  0x72   : > { %1143 = vmatmul.bf16.vlgmr.msra.gmra.mxu0 %v1133_v15 }
  0x73   : > { %1199 = vmatpush.bf16.msrb.mxu0 %v3103_v3  ;;  %1169 = vmatmul.bf16.vlgmr.msra.gmra.mxu2 %v1133_v15 }
  0x74   : > { %1212 = vmatpush.bf16.msrb.mxu1 %v3114_v7  ;;  %1225 = vmatpush.bf16.msrb.mxu2 %v3116_v8 }
  0x75   : > { %1238 = vmatpush.bf16.msrb.mxu3 %v3128_v12  ;;  %1156 = vmatmul.bf16.vlgmr.msra.gmra.mxu1 %v1134_v26 }
  0x76   : > { %1182 = vmatmul.bf16.vlgmr.msra.gmra.mxu3 %v1134_v26 }
  0x77   : > { %1200 = vmatpush.bf16.msrb.mxu0 %v3141_v16 }
  0x78   : > { %1213 = vmatpush.bf16.msrb.mxu1 %v3143_v17  ;;  %1226 = vmatpush.bf16.msrb.mxu2 %v3155_v21 }
  0x79   : > { %1239 = vmatpush.bf16.msrb.mxu3 %v3166_v25 }
  0x7b   : > { %1201 = vmatpush.bf16.msrb.mxu0 %v3178_v29 }
  0x7c   : > { %1214 = vmatpush.bf16.msrb.mxu1 %v3191_v33  ;;  %1227 = vmatpush.bf16.msrb.mxu2 %v3193_v34 }
  0x7d   : > { %1240 = vmatpush.bf16.msrb.mxu3 %v3205_v38 }
  0x7f   : > { %1202 = vmatpush.bf16.msrb.mxu0 %v3223_v44 }
  0x80   : > { %1215 = vmatpush.bf16.msrb.mxu1 %v3227_v45  ;;  %1228 = vmatpush.bf16.msrb.mxu2 %v3229_v46 }
  0x81   : > { %1241 = vmatpush.bf16.msrb.mxu3 %v3241_v50 }
  0x83   : > { %1203 = vmatpush.bf16.msrb.mxu0 %v3259_v56 }
  0x84   : > { %1216 = vmatpush.bf16.msrb.mxu1 %v3263_v57  ;;  %1229 = vmatpush.bf16.msrb.mxu2 %v3265_v58 }
  0x85   : > { %1242 = vmatpush.bf16.msrb.mxu3 %v3277_v62 }
  0x87   : > { %1204 = vmatpush.bf16.msrb.mxu0 %v3298_v6 }
  0x88   : > { %1217 = vmatpush.bf16.msrb.mxu1 %v3311_v13  ;;  %1230 = vmatpush.bf16.msrb.mxu2 %v3313_v14 }
  0x89   : > { %1243 = vmatpush.bf16.msrb.mxu3 %v3325_v20 }
  0x8b   : > { %1205 = vmatpush.bf16.msrb.mxu0 %v3343_v28 }
  0x8c   : > { %1218 = vmatpush.bf16.msrb.mxu1 %v3345_v30  ;;  %1231 = vmatpush.bf16.msrb.mxu2 %v3358_v36 }
  0x8d   : > { %1244 = vmatpush.bf16.msrb.mxu3 %v3367_v42 }
  0x8f   : > { %1206 = vmatpush.bf16.msrb.mxu0 %v3383_v52 }
  0x90   : > { %1219 = vmatpush.bf16.msrb.mxu1 %v3385_v53  ;;  %1232 = vmatpush.bf16.msrb.mxu2 %v3397_v54 }
  0x91   : > { %1245 = vmatpush.bf16.msrb.mxu3 %v3404_v60 }
  0x92   : > { %1207 = vmatmul.bf16.vlgmr.msrb.gmra.mxu0 %v1197_v61 }
  0x93   : > { %1261 = vmatpush.bf16.msra.mxu0 %v3103_v3  ;;  %1233 = vmatmul.bf16.vlgmr.msrb.gmra.mxu2 %v1197_v61 }
  0x94   : > { %1274 = vmatpush.bf16.msra.mxu1 %v3114_v7  ;;  %1287 = vmatpush.bf16.msra.mxu2 %v3116_v8 }
  0x95   : > { %1300 = vmatpush.bf16.msra.mxu3 %v3128_v12  ;;  %1220 = vmatmul.bf16.vlgmr.msrb.gmra.mxu1 %v1198_v32 }
  0x96   : > { %1246 = vmatmul.bf16.vlgmr.msrb.gmra.mxu3 %v1198_v32 }
  0x97   : > { %1262 = vmatpush.bf16.msra.mxu0 %v3141_v16 }
  0x98   : > { %1275 = vmatpush.bf16.msra.mxu1 %v3143_v17  ;;  %1288 = vmatpush.bf16.msra.mxu2 %v3155_v21 }
  0x99   : > { %1301 = vmatpush.bf16.msra.mxu3 %v3166_v25 }
  0x9b   : > { %1263 = vmatpush.bf16.msra.mxu0 %v3178_v29 }
  0x9c   : > { %1276 = vmatpush.bf16.msra.mxu1 %v3191_v33  ;;  %1289 = vmatpush.bf16.msra.mxu2 %v3193_v34 }
  0x9d   : > { %1302 = vmatpush.bf16.msra.mxu3 %v3205_v38 }
  0x9f   : > { %1264 = vmatpush.bf16.msra.mxu0 %v3223_v44 }
  0xa0   : > { %1277 = vmatpush.bf16.msra.mxu1 %v3227_v45  ;;  %1290 = vmatpush.bf16.msra.mxu2 %v3229_v46 }
  0xa1   : > { %1303 = vmatpush.bf16.msra.mxu3 %v3241_v50 }
  0xa3   : > { %1265 = vmatpush.bf16.msra.mxu0 %v3259_v56 }
  0xa4   : > { %1278 = vmatpush.bf16.msra.mxu1 %v3263_v57  ;;  %1291 = vmatpush.bf16.msra.mxu2 %v3265_v58 }
  0xa5   : > { %1304 = vmatpush.bf16.msra.mxu3 %v3277_v62 }
  0xa7   : > { %1266 = vmatpush.bf16.msra.mxu0 %v3298_v6 }
  0xa8   : > { %1279 = vmatpush.bf16.msra.mxu1 %v3311_v13  ;;  %1292 = vmatpush.bf16.msra.mxu2 %v3313_v14 }
  0xa9   : > { %1305 = vmatpush.bf16.msra.mxu3 %v3325_v20 }
  0xab   : > { %1267 = vmatpush.bf16.msra.mxu0 %v3343_v28 }
  0xac   : > { %1280 = vmatpush.bf16.msra.mxu1 %v3345_v30  ;;  %1293 = vmatpush.bf16.msra.mxu2 %v3358_v36 }
  0xad   : > { %1306 = vmatpush.bf16.msra.mxu3 %v3367_v42 }
  0xaf   : > { %1268 = vmatpush.bf16.msra.mxu0 %v3383_v52 }
  0xb0   : > { %1281 = vmatpush.bf16.msra.mxu1 %v3385_v53  ;;  %1294 = vmatpush.bf16.msra.mxu2 %v3397_v54 }
  0xb1   : > { %1307 = vmatpush.bf16.msra.mxu3 %v3404_v60 }
  0xb2   : > { %1269 = vmatmul.bf16.vlgmr.msra.gmra.mxu0 %v1259_v51 }
  0xb3   : > { %1325 = vmatpush.bf16.msrb.mxu0 %v3103_v3  ;;  %1295 = vmatmul.bf16.vlgmr.msra.gmra.mxu2 %v1259_v51  ;;  %v833_v3 = vld [vmem:[%s4186_s11] sm:$0x3]  ;;  %v1445_v51 = vperm.slane %v2518_v43, 0 }
  0xb4   : > { %1338 = vmatpush.bf16.msrb.mxu1 %v3114_v7  ;;  %1351 = vmatpush.bf16.msrb.mxu2 %v3116_v8  ;;  %v3643_v7 = vperm.slane %v833_v3, 0  ;;  %v1008_v8 = vpop.f32.mrf.mxu0 }
  0xb5   : > { %1364 = vmatpush.bf16.msrb.mxu3 %v3128_v12  ;;  %1282 = vmatmul.bf16.vlgmr.msra.gmra.mxu1 %v1260_v55 }
  0xb6   : > { %1308 = vmatmul.bf16.vlgmr.msra.gmra.mxu3 %v1260_v55  ;;  %v1009_v12 = vadd.f32 %v1008_v8, %v3643_v7 }
  0xb7   : > { %1326 = vmatpush.bf16.msrb.mxu0 %v3141_v16  ;;  %v1021_v16 = vpop.f32.mrf.mxu1 }
  0xb8   : > { %1339 = vmatpush.bf16.msrb.mxu1 %v3143_v17  ;;  %1352 = vmatpush.bf16.msrb.mxu2 %v3155_v21  ;;  %v3650_v17 = vperm.slane %v833_v3, 1  ;;  %v1022_v21 = vadd.f32 %v1021_v16, %v1009_v12 }
  0xb9   : > { %1365 = vmatpush.bf16.msrb.mxu3 %v3166_v25  ;;  %v1034_v25 = vpop.f32.mrf.mxu2 }
  0xbb   : > { %1327 = vmatpush.bf16.msrb.mxu0 %v3178_v29  ;;  %v1035_v29 = vadd.f32 %v1034_v25, %v3650_v17 }
  0xbc   : > { %1340 = vmatpush.bf16.msrb.mxu1 %v3191_v33  ;;  %1353 = vmatpush.bf16.msrb.mxu2 %v3193_v34  ;;  %v1047_v33 = vpop.f32.mrf.mxu3 }
  0xbd   : > { %1366 = vmatpush.bf16.msrb.mxu3 %v3205_v38  ;;  %v1048_v34 = vadd.f32 %v1047_v33, %v1035_v29  ;;  %v1010_v38 = vpop.f32.mrf.mxu0 }
  0xbe   : > { %v1428_v38 = vperm.slane %v2516_v48, 1 }
  0xbf   : > { %1328 = vmatpush.bf16.msrb.mxu0 %v3223_v44  ;;  %v1023_v44 = vpop.f32.mrf.mxu1 }
  0xc0   : > { %1341 = vmatpush.bf16.msrb.mxu1 %v3227_v45  ;;  %1354 = vmatpush.bf16.msrb.mxu2 %v3229_v46  ;;  %v1323_v45 = vpack.c.bf16 %v1319_v59, %v1319_v59  ;;  %v1427_v59 = vperm.slane %v2516_v48, 0  ;;  %v1446_v44 = vperm.slane %v2518_v43, 1  ;;  %v2568_v48 = vld [vmem:[%s4183_s8 + $0x48] sm:$0xf0] }
  0xc1   : > { %1367 = vmatpush.bf16.msrb.mxu3 %v3241_v50  ;;  %v1036_v46 = vpop.f32.mrf.mxu2  ;;  %v1324_v50 = vpack.c.bf16 %v1320_v63, %v1320_v63 }
  0xc2   : > { %v2590_v46 = vld [vmem:[%s4183_s8 + $0x70] sm:$0xf] }
  0xc3   : > { %1329 = vmatpush.bf16.msrb.mxu0 %v3259_v56 }
  0xc4   : > { %1342 = vmatpush.bf16.msrb.mxu1 %v3263_v57  ;;  %1355 = vmatpush.bf16.msrb.mxu2 %v3265_v58  ;;  %v1049_v56 = vpop.f32.mrf.mxu3  ;;  %v1051_v57 = vmax.f32 %v1022_v21, 0.0  ;;  %v3669_v58 = vpop.permute.xlu0 %1055 }
  0xc5   : > { %1368 = vmatpush.bf16.msrb.mxu3 %v3277_v62  ;;  %v2836_v56 = vld [vmem:[%s4183_s8 + $0x74] sm:$0xf] }
  0xc6   : > { %v1058_v62 = vmul.f32 %v3669_v58, %v1051_v57 }
  0xc7   : > { %1330 = vmatpush.bf16.msrb.mxu0 %v3298_v6  ;;  %v1052_v6 = vmax.f32 %v1048_v34, 0.0 }
  0xc8   : > { %1343 = vmatpush.bf16.msrb.mxu1 %v3311_v13  ;;  %1356 = vmatpush.bf16.msrb.mxu2 %v3313_v14  ;;  %v1060_v14 = vstv %s792_s27 }
  0xc9   : > { %1369 = vmatpush.bf16.msrb.mxu3 %v3325_v20  ;;  %v1388_v20 = vld [vmem:[%s4187_s12] sm:$0x3] }
  0xca   : > { %v1391_v2 = vperm.slane %v1388_v20, 1 }
  0xcb   : > { %1331 = vmatpush.bf16.msrb.mxu0 %v3343_v28 }
  0xcc   : > { %1344 = vmatpush.bf16.msrb.mxu1 %v3345_v30  ;;  %1357 = vmatpush.bf16.msrb.mxu2 %v3358_v36  ;;  %v2514_v36 = vld [vmem:[%s4187_s12 + $0x2] sm:$0x3] }
  0xcd   : > { %1370 = vmatpush.bf16.msrb.mxu3 %v3367_v42  ;;  %v1408_v35 = vperm.slane %v2514_v36, 0  ;;  %v1409_v19 = vperm.slane %v2514_v36, 1  ;;  %v2834_v36 = vld [vmem:[%s4183_s8 + $0x64] sm:$0xf] }
  0xcf   : > { %1332 = vmatpush.bf16.msrb.mxu0 %v3383_v52  ;;  %v1080_v13 = vpop.f32.mrf.mxu0  ;;  %v1061_v52 = vmul.f32 %v1060_v14, %v1058_v62 }
  0xd0   : > { %1345 = vmatpush.bf16.msrb.mxu1 %v3385_v53  ;;  %1358 = vmatpush.bf16.msrb.mxu2 %v3397_v54  ;;  %v1081_v28 = vadd.f32 %v1080_v13, %v3643_v7  ;;  %v1390_v53 = vperm.slane %v1388_v20, 0  ;;  %v1059_v54 = vmul.f32 %v3669_v58, %v1052_v6  ;;  %v2592_v6 = vld [vmem:[%s4183_s8 + $0x78] sm:$0xf0]  ;;  %v2582_v13 = vld [vmem:[%s4183_s8 + $0x60] sm:$0xf] }
  0xd1   : > { %1371 = vmatpush.bf16.msrb.mxu3 %v3404_v60  ;;  %v1431_v29 = vmul.f32 %v1427_v59, %v1061_v52  ;;  %v2849_v59 = vld [vmem:[%s4183_s8 + $0xd4] sm:$0xf0] }
  0xd2   : > { %1333 = vmatmul.bf16.vlgmr.msrb.gmra.mxu0 %v1323_v45  ;;  %v1093_v30 = vpop.f32.mrf.mxu1  ;;  %v1394_v9 = vmul.f32 %v1390_v53, %v1061_v52  ;;  %v3681_v10 = vmul.f32 %v1060_v14, %v1059_v54 }
  0xd3   : > { %1346 = vmatmul.bf16.vlgmr.msrb.gmra.mxu1 %v1324_v50  ;;  %1359 = vmatmul.bf16.vlgmr.msrb.gmra.mxu2 %v1323_v45  ;;  %v1094_v42 = vadd.f32 %v1093_v30, %v1081_v28  ;;  %v2595_v30 = vor.u32 %v2836_v56, %v2592_v6 }
  0xd4   : > { %1372 = vmatmul.bf16.vlgmr.msrb.gmra.mxu3 %v1324_v50  ;;  %v1395_v27 = vmul.f32 %v1391_v2, %v3681_v10  ;;  %v2837_v50 = vld [vmem:[%s4183_s8 + $0x74] sm:$0xf0] }
  0xd5   : > { %v1123_v60 = vmax.f32 %v1094_v42, 0.0  ;;  %v2591_v62 = vor.u32 %v2837_v50, %v2590_v46  ;;  %v2584_v42 = vld [vmem:[%s4183_s8 + $0x68] sm:$0xf0]  ;;  %1854 = vmatpush.bf16.msra.mxu2 %v2595_v30  ;;  %v2833_v2 = vld [vmem:[%s4183_s8 + $0x54] sm:$0xf0] }
  0xd6   : > { %v1106_v0 = vpop.f32.mrf.mxu2  ;;  %v2560_v46 = vld [vmem:[%s4183_s8 + $0x38] sm:$0xf0]  ;;  %v2552_v30 = vld [vmem:[%s4183_s8 + $0x28] sm:$0xf0] }
  0xd7   : > { %v1107_v1 = vadd.f32 %v1106_v0, %v3650_v17  ;;  %v1125_v5 = vmul.f32 %v1123_v60, %v1060_v14  ;;  %v1082_v18 = vpop.f32.mrf.mxu0  ;;  %1828 = vmatpush.bf16.msra.mxu0 %v2591_v62  ;;  %v2654_v60 = vld [vmem:[%s4183_s8 + $0xf0] sm:$0xf]  ;;  %v2852_v0 = vld [vmem:[%s4183_s8 + $0xf4] sm:$0xf] }
  0xd8   : > { %v1432_v18 = vmul.f32 %v1428_v38, %v3681_v10  ;;  %v2850_v10 = vld [vmem:[%s4183_s8 + $0xe4] sm:$0xf] }
  0xd9   : > { %v1119_v4 = vpop.f32.mrf.mxu3  ;;  %v1412_v22 = vmul.f32 %v1408_v35, %v1125_v5  ;;  %v2853_v35 = vld [vmem:[%s4183_s8 + $0xf4] sm:$0xf0]  ;;  %v2846_v38 = vld [vmem:[%s4183_s8 + $0xc4] sm:$0xf] }
  0xda   : > { %v1120_v11 = vadd.f32 %v1119_v4, %v1107_v1  ;;  %v1095_v23 = vpop.f32.mrf.mxu1  ;;  %v2587_v4 = vor.u32 %v2834_v36, %v2584_v42  ;;  %v2655_v5 = vor.u32 %v2853_v35, %v2654_v60  ;;  %v2622_v35 = vld [vmem:[%s4183_s8 + $0xb0] sm:$0xf] }
  0xdb   : > { %v1574_v15 = vadd.f32 %v1412_v22, %v1394_v9  ;;  %v2656_v9 = vld [vmem:[%s4183_s8 + $0xf8] sm:$0xf0] }
  0xdc   : > { %v1124_v24 = vmax.f32 %v1120_v11, 0.0  ;;  %v2574_v11 = vld [vmem:[%s4183_s8 + $0x50] sm:$0xf]  ;;  %v2659_v23 = vor.u32 %v2852_v0, %v2656_v9  ;;  %1841 = vmatpush.bf16.msra.mxu1 %v2655_v5  ;;  %1855 = vmatpush.bf16.msra.mxu2 %v2587_v4  ;;  %v2845_v0 = vld [vmem:[%s4183_s8 + $0xb4] sm:$0xf0] }
  0xdd   : > { %v2623_v5 = vor.u32 %v2845_v0, %v2622_v35  ;;  %v2844_v9 = vld [vmem:[%s4183_s8 + $0xb4] sm:$0xf]  ;;  %v2784_v0 = vld [vmem:[%s4189_s14 + $0xf8] sm:$0xf0] }
  0xde   : > { %v1126_v26 = vmul.f32 %v1124_v24, %v1060_v14  ;;  %v1108_v31 = vpop.f32.mrf.mxu2  ;;  %v2835_v14 = vld [vmem:[%s4183_s8 + $0x64] sm:$0xf0]  ;;  %v2832_v24 = vld [vmem:[%s4183_s8 + $0x54] sm:$0xf]  ;;  %1867 = vmatpush.bf16.msra.mxu3 %v2659_v23 }
  0xdf   : > { %v2583_v54 = vor.u32 %v2835_v14, %v2582_v13  ;;  %v2575_v31 = vor.u32 %v2833_v2, %v2574_v11  ;;  %v2550_v13 = vld [vmem:[%s4183_s8 + $0x20] sm:$0xf]  ;;  %v2827_v14 = vld [vmem:[%s4183_s8 + $0x24] sm:$0xf0]  ;;  %v2624_v11 = vld [vmem:[%s4183_s8 + $0xb8] sm:$0xf0] }
  0xe0   : > { %v1413_v61 = vmul.f32 %v1409_v19, %v1126_v26  ;;  %v2576_v19 = vld [vmem:[%s4183_s8 + $0x58] sm:$0xf0]  ;;  %v2851_v26 = vld [vmem:[%s4183_s8 + $0xe4] sm:$0xf0]  ;;  %v2551_v42 = vor.u32 %v2827_v14, %v2550_v13  ;;  %v2627_v2 = vor.u32 %v2844_v9, %v2624_v11  ;;  %v2884_v35 = vld [vmem:[%s4189_s14 + $0xf4] sm:$0xf] }
  0xe1   : > { %v1121_v32 = vpop.f32.mrf.mxu3  ;;  %1829 = vmatpush.bf16.msra.mxu0 %v2583_v54  ;;  %v2702_v9 = vld [vmem:[%s4189_s14 + $0x50] sm:$0xf]  ;;  %v2865_v11 = vld [vmem:[%s4189_s14 + $0x54] sm:$0xf0] }
  0xe2   : > { %v3684_v37 = vadd.f32 %v1413_v61, %v1395_v27  ;;  %v2648_v32 = vld [vmem:[%s4183_s8 + $0xe8] sm:$0xf0] }
  0xe3   : > { %v2651_v43 = vor.u32 %v2850_v10, %v2648_v32  ;;  %v2843_v10 = vld [vmem:[%s4183_s8 + $0xa4] sm:$0xf0]  ;;  %v2616_v32 = vld [vmem:[%s4183_s8 + $0xa8] sm:$0xf0] }
  0xe5   : > { %1830 = vmatpush.bf16.msra.mxu0 %v2575_v31  ;;  %1868 = vmatpush.bf16.msra.mxu3 %v2651_v43  ;;  %v2823_v43 = vld [vmem:[%s4183_s8 + $0x4] sm:$0xf0] }
  0xef   : > { %v1144_v39 = vpop.f32.mrf.mxu0 }
  0xf0   : > { %v1145_v40 = vadd.f32 %v1144_v39, %v3643_v7  ;;  %v2566_v39 = vld [vmem:[%s4183_s8 + $0x40] sm:$0xf] }
  0xf2   : > { %v1157_v41 = vpop.f32.mrf.mxu1 }
  0xf3   : > { %v1158_v47 = vadd.f32 %v1157_v41, %v1145_v40  ;;  %v2831_v40 = vld [vmem:[%s4183_s8 + $0x44] sm:$0xf0]  ;;  %v2579_v41 = vor.u32 %v2832_v24, %v2576_v19  ;;  %v2824_v24 = vld [vmem:[%s4183_s8 + $0x14] sm:$0xf]  ;;  %v2544_v19 = vld [vmem:[%s4183_s8 + $0x18] sm:$0xf0] }
  0xf5   : > { %v1187_v49 = vmax.f32 %v1158_v47, 0.0  ;;  %v2830_v47 = vld [vmem:[%s4183_s8 + $0x44] sm:$0xf]  ;;  %1856 = vmatpush.bf16.msra.mxu2 %v2579_v41  ;;  %v2534_v41 = vld [vmem:[%s4183_s8] sm:$0xf] }
  0xf6   : > { %v1170_v63 = vpop.f32.mrf.mxu2 }
  0xf7   : > { %v3694_v55 = vmul.f32 %v1187_v49, %v3669_v58  ;;  %v1171_v3 = vadd.f32 %v1170_v63, %v3650_v17  ;;  %v1146_v12 = vpop.f32.mrf.mxu0  ;;  %v2638_v49 = vld [vmem:[%s4183_s8 + $0xd0] sm:$0xf]  ;;  %v2848_v63 = vld [vmem:[%s4183_s8 + $0xd4] sm:$0xf] }
  0xf9   : > { %v1183_v8 = vpop.f32.mrf.mxu3  ;;  %v1449_v16 = vmul.f32 %v1445_v51, %v3694_v55 }
  0xfa   : > { %v1159_v21 = vpop.f32.mrf.mxu1  ;;  %v1184_v25 = vadd.f32 %v1183_v8, %v1171_v3  ;;  %v2639_v3 = vor.u32 %v2849_v59, %v2638_v49  ;;  %v2640_v8 = vld [vmem:[%s4183_s8 + $0xd8] sm:$0xf0]  ;;  %v2536_v49 = vld [vmem:[%s4183_s8 + $0x8] sm:$0xf0]  ;;  %v2869_v59 = vld [vmem:[%s4189_s14 + $0x74] sm:$0xf0] }
  0xfb   : > { %v1578_v33 = vrot.slane %v1449_v16, 7  ;;  %v2567_v16 = vor.u32 %v2831_v40, %v2566_v39  ;;  %v2643_v21 = vor.u32 %v2848_v63, %v2640_v8  ;;  %v2868_v8 = vld [vmem:[%s4189_s14 + $0x74] sm:$0xf] }
  0xfc   : > { %v1188_v34 = vmax.f32 %v1184_v25, 0.0  ;;  %v2558_v25 = vld [vmem:[%s4183_s8 + $0x30] sm:$0xf] }
  0xfd   : > { %v1582_v45 = vadd.f32 %v1578_v33, %v1431_v29  ;;  %v2829_v29 = vld [vmem:[%s4183_s8 + $0x34] sm:$0xf0]  ;;  %v2630_v33 = vld [vmem:[%s4183_s8 + $0xc0] sm:$0xf]  ;;  %1831 = vmatpush.bf16.msra.mxu0 %v2567_v16  ;;  %1869 = vmatpush.bf16.msra.mxu3 %v2643_v21  ;;  %v2720_v16 = vld [vmem:[%s4189_s14 + $0x78] sm:$0xf0] }
  0xfe   : > { %v3708_v57 = vmul.f32 %v1188_v34, %v3669_v58  ;;  %v1172_v28 = vpop.f32.mrf.mxu2  ;;  %v2571_v34 = vor.u32 %v2830_v47, %v2568_v48  ;;  %v2559_v56 = vor.u32 %v2829_v29, %v2558_v25  ;;  %v2822_v47 = vld [vmem:[%s4183_s8 + $0x4] sm:$0xf]  ;;  %v2535_v48 = vor.u32 %v2823_v43, %v2534_v41  ;;  %v2606_v21 = vld [vmem:[%s4183_s8 + $0x90] sm:$0xf]  ;;  %v2841_v29 = vld [vmem:[%s4183_s8 + $0x94] sm:$0xf0] }
  0xff   : > { %v1596_v20 = vrot.slane %v1582_v45, 1  ;;  %v2828_v45 = vld [vmem:[%s4183_s8 + $0x34] sm:$0xf]  ;;  %v2539_v63 = vor.u32 %v2822_v47, %v2536_v49  ;;  %v2723_v25 = vor.u32 %v2868_v8, %v2720_v16  ;;  %v2696_v43 = vld [vmem:[%s4189_s14 + $0x48] sm:$0xf0] }
 0x100   : > { %v1450_v52 = vmul.f32 %v1446_v44, %v3708_v57  ;;  %v2632_v44 = vld [vmem:[%s4183_s8 + $0xc8] sm:$0xf0]  ;;  %1857 = vmatpush.bf16.msra.mxu2 %v2571_v34  ;;  %v2563_v6 = vor.u32 %v2828_v45, %v2560_v46  ;;  %v2608_v34 = vld [vmem:[%s4183_s8 + $0x98] sm:$0xf0]  ;;  %v2867_v45 = vld [vmem:[%s4189_s14 + $0x64] sm:$0xf0] }
 0x101   : > { %v1185_v53 = vpop.f32.mrf.mxu3  ;;  %v3735_v1 = vadd.f32 %v1596_v20, %v1574_v15  ;;  %v2646_v15 = vld [vmem:[%s4183_s8 + $0xe0] sm:$0xf]  ;;  %v2635_v62 = vor.u32 %v2846_v38, %v2632_v44  ;;  %v2826_v20 = vld [vmem:[%s4183_s8 + $0x24] sm:$0xf]  ;;  %1832 = vmatpush.bf16.msra.mxu0 %v2559_v56  ;;  %v2712_v56 = vld [vmem:[%s4189_s14 + $0x68] sm:$0xf0] }
 0x102   : > { %v1579_v22 = vrot.slane %v1450_v52, 7  ;;  %v2647_v61 = vor.u32 %v2851_v26, %v2646_v15  ;;  %v2555_v52 = vor.u32 %v2826_v20, %v2552_v30  ;;  %v2547_v15 = vor.u32 %v2824_v24, %v2544_v19  ;;  %v2614_v26 = vld [vmem:[%s4183_s8 + $0xa0] sm:$0xf]  ;;  %v2866_v46 = vld [vmem:[%s4189_s14 + $0x64] sm:$0xf] }
 0x103   : > { %1870 = vmatpush.bf16.msra.mxu3 %v2635_v62  ;;  %v2615_v31 = vor.u32 %v2843_v10, %v2614_v26  ;;  %v2710_v44 = vld [vmem:[%s4189_s14 + $0x60] sm:$0xf]  ;;  %v2715_v13 = vor.u32 %v2866_v46, %v2712_v56  ;;  %v2838_v20 = vld [vmem:[%s4183_s8 + $0x84] sm:$0xf]  ;;  %v2600_v30 = vld [vmem:[%s4183_s8 + $0x88] sm:$0xf0] }
 0x104   : > { %v1583_v27 = vadd.f32 %v1579_v22, %v1432_v18  ;;  %1842 = vmatpush.bf16.msra.mxu1 %v2647_v61  ;;  %1858 = vmatpush.bf16.msra.mxu2 %v2563_v6  ;;  %v2542_v18 = vld [vmem:[%s4183_s8 + $0x10] sm:$0xf]  ;;  %v2825_v22 = vld [vmem:[%s4183_s8 + $0x14] sm:$0xf0]  ;;  %v2842_v61 = vld [vmem:[%s4183_s8 + $0xa4] sm:$0xf] }
 0x105   : > { %1833 = vmatpush.bf16.msra.mxu0 %v2551_v42  ;;  %v2543_v23 = vor.u32 %v2825_v22, %v2542_v18  ;;  %v2619_v40 = vor.u32 %v2842_v61, %v2616_v32  ;;  %v2598_v62 = vld [vmem:[%s4183_s8 + $0x80] sm:$0xf]  ;;  %v2839_v6 = vld [vmem:[%s4183_s8 + $0x84] sm:$0xf0]  ;;  %v2782_v42 = vld [vmem:[%s4189_s14 + $0xf0] sm:$0xf]  ;;  %v2703_v18 = vor.u32 %v2865_v11, %v2702_v9 }
 0x106   : > { %v1597_v51 = vrot.slane %v1583_v27, 1  ;;  %v2599_v14 = vor.u32 %v2839_v6, %v2598_v62  ;;  %v2704_v22 = vld [vmem:[%s4189_s14 + $0x58] sm:$0xf0]  ;;  %v2774_v24 = vld [vmem:[%s4189_s14 + $0xe0] sm:$0xf] }
 0x107   : > { %1871 = vmatpush.bf16.msra.mxu3 %v2627_v2  ;;  %v2864_v2 = vld [vmem:[%s4189_s14 + $0x54] sm:$0xf]  ;;  %v2883_v19 = vld [vmem:[%s4189_s14 + $0xe4] sm:$0xf0]  ;;  %v2776_v10 = vld [vmem:[%s4189_s14 + $0xe8] sm:$0xf0] }
 0x108   : > { %v3790_v12 = vadd.f32 %v1597_v51, %v3684_v37  ;;  %v2847_v37 = vld [vmem:[%s4183_s8 + $0xc4] sm:$0xf0]  ;;  %1843 = vmatpush.bf16.msra.mxu1 %v2639_v3  ;;  %1859 = vmatpush.bf16.msra.mxu2 %v2555_v52  ;;  %v2718_v51 = vld [vmem:[%s4189_s14 + $0x70] sm:$0xf]  ;;  %v2603_v52 = vor.u32 %v2838_v20, %v2600_v30  ;;  %v2775_v26 = vor.u32 %v2883_v19, %v2774_v24  ;;  %v2694_v32 = vld [vmem:[%s4189_s14 + $0x40] sm:$0xf] }
 0x109   : > { %v2631_v50 = vor.u32 %v2847_v37, %v2630_v33  ;;  %1834 = vmatpush.bf16.msra.mxu0 %v2543_v23  ;;  %v2719_v3 = vor.u32 %v2869_v59, %v2718_v51  ;;  %v2840_v33 = vld [vmem:[%s4183_s8 + $0x94] sm:$0xf]  ;;  %v2607_v37 = vor.u32 %v2841_v29, %v2606_v21  ;;  %v2707_v23 = vor.u32 %v2864_v2, %v2704_v22  ;;  %v1625_v47 = vld.sshfl [vmem:[#allocation1 + $0x8] sm:$0xff pattern:$0x75316420] }
 0x10a   : > { %v2611_v38 = vor.u32 %v2840_v33, %v2608_v34  ;;  %v1629_v49 = vpack.c.bf16 %v1625_v47, %v1625_v47  ;;  %v2766_v51 = vld [vmem:[%s4189_s14 + $0xd0] sm:$0xf]  ;;  %v2881_v59 = vld [vmem:[%s4189_s14 + $0xd4] sm:$0xf0]  ;;  %v2768_v16 = vld [vmem:[%s4189_s14 + $0xd8] sm:$0xf0] }
 0x10b   : > { %1872 = vmatpush.bf16.msra.mxu3 %v2619_v40  ;;  %v2862_v40 = vld [vmem:[%s4189_s14 + $0x44] sm:$0xf]  ;;  %v2767_v8 = vor.u32 %v2881_v59, %v2766_v51  ;;  %v2686_v29 = vld [vmem:[%s4189_s14 + $0x30] sm:$0xf]  ;;  %v2861_v33 = vld [vmem:[%s4189_s14 + $0x34] sm:$0xf0] }
 0x10c   : > { %1844 = vmatpush.bf16.msra.mxu1 %v2631_v50  ;;  %1860 = vmatpush.bf16.msra.mxu2 %v2547_v15  ;;  %v2711_v50 = vor.u32 %v2867_v45, %v2710_v44  ;;  %v2882_v15 = vld [vmem:[%s4189_s14 + $0xe4] sm:$0xf]  ;;  %v2687_v34 = vor.u32 %v2861_v33, %v2686_v29  ;;  %v2758_v45 = vld [vmem:[%s4189_s14 + $0xc0] sm:$0xf]  ;;  %v2879_v46 = vld [vmem:[%s4189_s14 + $0xc4] sm:$0xf0] }
 0x10d   : > { %1835 = vmatpush.bf16.msra.mxu0 %v2535_v48  ;;  %v2699_v48 = vor.u32 %v2862_v40, %v2696_v43  ;;  %v2759_v56 = vor.u32 %v2879_v46, %v2758_v45  ;;  %v2760_v62 = vld [vmem:[%s4189_s14 + $0xc8] sm:$0xf0]  ;;  %v2859_v20 = vld [vmem:[%s4189_s14 + $0x24] sm:$0xf0]  ;;  %v2752_v2 = vld [vmem:[%s4189_s14 + $0xb8] sm:$0xf0] }
 0x10e   : > { %v2857_v24 = vld [vmem:[%s4189_s14 + $0x14] sm:$0xf0]  ;;  %v2662_v43 = vld [vmem:[%s4189_s14] sm:$0xf]  ;;  %v2855_v47 = vld [vmem:[%s4189_s14 + $0x4] sm:$0xf0] }
 0x10f   : > { %v3825_v28 = vpop.f32.mrf.mxu0  ;;  %1873 = vmatpush.bf16.msra.mxu3 %v2611_v38  ;;  %v2688_v38 = vld [vmem:[%s4189_s14 + $0x38] sm:$0xf0]  ;;  %v2663_v51 = vor.u32 %v2855_v47, %v2662_v43  ;;  %v2664_v59 = vld [vmem:[%s4189_s14 + $0x8] sm:$0xf0] }
 0x110   : > { %1845 = vmatpush.bf16.msra.mxu1 %v2623_v5  ;;  %1861 = vmatpush.bf16.msra.mxu2 %v2539_v63  ;;  %v2787_v5 = vor.u32 %v2884_v35, %v2784_v0  ;;  %v2880_v63 = vld [vmem:[%s4189_s14 + $0xd4] sm:$0xf]  ;;  %v2750_v0 = vld [vmem:[%s4189_s14 + $0xb0] sm:$0xf]  ;;  %v2736_v33 = vld [vmem:[%s4189_s14 + $0x98] sm:$0xf0] }
 0x111   : > { %2082 = vmatpush.bf16.msrb.mxu0 %v2719_v3  ;;  %v2728_v45 = vld [vmem:[%s4189_s14 + $0x88] sm:$0xf0] }
 0x112   : > { %v3830_v36 = vpop.f32.mrf.mxu1 }
 0x113   : > { %1874 = vmatpush.bf16.msra.mxu3 %v2603_v52  ;;  %v2858_v52 = vld [vmem:[%s4189_s14 + $0x24] sm:$0xf] }
 0x114   : > { %1846 = vmatpush.bf16.msra.mxu1 %v2615_v31  ;;  %2108 = vmatpush.bf16.msrb.mxu2 %v2723_v25  ;;  %v2779_v31 = vor.u32 %v2882_v15, %v2776_v10  ;;  %v2771_v25 = vor.u32 %v2880_v63, %v2768_v16  ;;  %v2856_v15 = vld [vmem:[%s4189_s14 + $0x14] sm:$0xf]  ;;  %v2873_v16 = vld [vmem:[%s4189_s14 + $0x94] sm:$0xf0] }
 0x115   : > { %2083 = vmatpush.bf16.msrb.mxu0 %v2711_v50  ;;  %v2878_v50 = vld [vmem:[%s4189_s14 + $0xc4] sm:$0xf] }
 0x116   : > { %v3832_v53 = vpop.f32.mrf.mxu2  ;;  %1875 = vmatmul.bf16.vlgmr.msra.gmra.mxu3 %v1629_v49 }
 0x117   : > { %v1210_v60 = vpop.f32.mrf.mxu0  ;;  %2121 = vmatpush.bf16.msrb.mxu3 %v2787_v5  ;;  %v2876_v5 = vld [vmem:[%s4189_s14 + $0xb4] sm:$0xf] }
 0x118   : > { %1847 = vmatpush.bf16.msra.mxu1 %v2607_v37  ;;  %v2885_v60 = vld [vmem:[%s4189_s14 + $0xf4] sm:$0xf0]  ;;  %2109 = vmatpush.bf16.msrb.mxu2 %v2715_v13  ;;  %v2860_v37 = vld [vmem:[%s4189_s14 + $0x34] sm:$0xf]  ;;  %v2763_v13 = vor.u32 %v2878_v50, %v2760_v62  ;;  %v2755_v22 = vor.u32 %v2876_v5, %v2752_v2  ;;  %v1209_v62 = vadd.f32 %v3825_v28, %v3643_v7 }
 0x119   : > { %v3834_v54 = vpop.f32.mrf.mxu3  ;;  %2084 = vmatpush.bf16.msrb.mxu0 %v2703_v18  ;;  %v2691_v44 = vor.u32 %v2860_v37, %v2688_v38  ;;  %v2726_v37 = vld [vmem:[%s4189_s14 + $0x80] sm:$0xf]  ;;  %v2871_v38 = vld [vmem:[%s4189_s14 + $0x84] sm:$0xf0]  ;;  %v1235_v28 = vadd.f32 %v3832_v53, %v3650_v17  ;;  %v2528_v53 = vld [vmem:[%s4187_s12 + $0x10] sm:$0x3] }
 0x11a   : > { %v1223_v4 = vpop.f32.mrf.mxu1  ;;  %v2727_v50 = vor.u32 %v2871_v38, %v2726_v37 }
 0x11b   : > { %v2783_v4 = vor.u32 %v2885_v60, %v2782_v42  ;;  %2122 = vmatpush.bf16.msrb.mxu3 %v2779_v31  ;;  %v2680_v60 = vld [vmem:[%s4189_s14 + $0x28] sm:$0xf0]  ;;  %v2875_v31 = vld [vmem:[%s4189_s14 + $0xa4] sm:$0xf0] }
 0x11c   : > { %1848 = vmatpush.bf16.msra.mxu1 %v2599_v14  ;;  %2110 = vmatpush.bf16.msrb.mxu2 %v2707_v23  ;;  %v2678_v14 = vld [vmem:[%s4189_s14 + $0x20] sm:$0xf]  ;;  %v2683_v35 = vor.u32 %v2858_v52, %v2680_v60  ;;  %v2670_v23 = vld [vmem:[%s4189_s14 + $0x10] sm:$0xf] }
 0x11d   : > { %v2679_v42 = vor.u32 %v2859_v20, %v2678_v14  ;;  %v2671_v19 = vor.u32 %v2857_v24, %v2670_v23 }
 0x11e   : > { %v1236_v27 = vpop.f32.mrf.mxu2 }
 0x11f   : > { %v1624_v27 = vld.sshfl [vmem:[#allocation1] sm:$0xff pattern:$0x75316420]  ;;  %1849 = vmatmul.bf16.vlgmr.msra.gmra.mxu1 %v1629_v49  ;;  %2123 = vmatpush.bf16.msrb.mxu3 %v2771_v25  ;;  %v2872_v25 = vld [vmem:[%s4189_s14 + $0x94] sm:$0xf] }
 0x120   : > { %2095 = vmatpush.bf16.msrb.mxu1 %v2783_v4  ;;  %v1628_v61 = vpack.c.bf16 %v1624_v27, %v1624_v27  ;;  %2111 = vmatpush.bf16.msrb.mxu2 %v2699_v48  ;;  %v2877_v4 = vld [vmem:[%s4189_s14 + $0xb4] sm:$0xf0]  ;;  %v2742_v27 = vld [vmem:[%s4189_s14 + $0xa0] sm:$0xf]  ;;  %v2854_v48 = vld [vmem:[%s4189_s14 + $0x4] sm:$0xf] }
 0x121   : > { %v1249_v39 = vpop.f32.mrf.mxu3  ;;  %v2751_v11 = vor.u32 %v2877_v4, %v2750_v0  ;;  %v2667_v63 = vor.u32 %v2854_v48, %v2664_v59 }
 0x122   : > { %v2863_v39 = vld [vmem:[%s4189_s14 + $0x44] sm:$0xf0]  ;;  %1862 = vmatmul.bf16.vlgmr.msra.gmra.mxu2 %v1628_v61  ;;  %1836 = vmatmul.bf16.vlgmr.msra.gmra.mxu0 %v1628_v61  ;;  %v2743_v61 = vor.u32 %v2875_v31, %v2742_v27 }
 0x123   : > { %v2695_v41 = vor.u32 %v2863_v39, %v2694_v32  ;;  %2124 = vmatpush.bf16.msrb.mxu3 %v2763_v13  ;;  %v2874_v32 = vld [vmem:[%s4189_s14 + $0xa4] sm:$0xf]  ;;  %v2744_v39 = vld [vmem:[%s4189_s14 + $0xa8] sm:$0xf0]  ;;  %v2522_v13 = vld [vmem:[%s4187_s12 + $0xa] sm:$0x3] }
 0x124   : > { %2096 = vmatpush.bf16.msrb.mxu1 %v2775_v26  ;;  %2112 = vmatpush.bf16.msrb.mxu2 %v2691_v44  ;;  %v2672_v26 = vld [vmem:[%s4189_s14 + $0x18] sm:$0xf0]  ;;  %v2870_v44 = vld [vmem:[%s4189_s14 + $0x84] sm:$0xf]  ;;  %v1482_v20 = vperm.slane %v2522_v13, 0  ;;  %v1483_v24 = vperm.slane %v2522_v13, 1 }
 0x125   : > { %2085 = vmatpush.bf16.msrb.mxu0 %v2695_v41  ;;  %v2675_v10 = vor.u32 %v2856_v15, %v2672_v26  ;;  %v2747_v41 = vor.u32 %v2874_v32, %v2744_v39  ;;  %v1537_v26 = vperm.slane %v2528_v53, 0 }
 0x126   : > { %v1486_v0 = vmul.f32 %v1482_v20, %v3694_v55  ;;  %v1487_v32 = vmul.f32 %v1483_v24, %v3708_v57 }
 0x127   : > { %2125 = vmatpush.bf16.msrb.mxu3 %v2755_v22 }
 0x128   : > { %2097 = vmatpush.bf16.msrb.mxu1 %v2767_v8  ;;  %2113 = vmatpush.bf16.msrb.mxu2 %v2683_v35  ;;  %v2734_v8 = vld [vmem:[%s4189_s14 + $0x90] sm:$0xf]  ;;  %v1586_v55 = vrot.slane %v1486_v0, 1 }
 0x129   : > { %2086 = vmatpush.bf16.msrb.mxu0 %v2687_v34  ;;  %v2735_v29 = vor.u32 %v2873_v16, %v2734_v8  ;;  %v2739_v34 = vor.u32 %v2872_v25, %v2736_v33  ;;  %v1614_v16 = vld [vmem:[%s4188_s13] sm:$0x3]  ;;  %v1587_v25 = vrot.slane %v1487_v32, 1  ;;  %v1538_v33 = vperm.slane %v2528_v53, 1 }
 0x12a   : > { %v1616_v38 = vperm.slane %v1614_v16, 0 }
 0x12b   : > { %2126 = vmatpush.bf16.msrb.mxu3 %v2747_v41 }
 0x12c   : > { %2098 = vmatpush.bf16.msrb.mxu1 %v2759_v56  ;;  %2114 = vmatpush.bf16.msrb.mxu2 %v2675_v10  ;;  %v2731_v56 = vor.u32 %v2870_v44, %v2728_v45 }
 0x12d   : > { %2087 = vmatpush.bf16.msrb.mxu0 %v2679_v42  ;;  %v1222_v42 = vadd.f32 %v3830_v36, %v1209_v62  ;;  %v2526_v36 = vld [vmem:[%s4187_s12 + $0xe] sm:$0x3] }
 0x12e   : > { %v1518_v23 = vperm.slane %v2526_v36, 0  ;;  %v1519_v8 = vperm.slane %v2526_v36, 1 }
 0x12f   : > { %v3989_v3 = vpop.f32.mrf.mxu0  ;;  %2127 = vmatpush.bf16.msrb.mxu3 %v2739_v34  ;;  %v1251_v4 = vmax.f32 %v1222_v42, 0.0 }
 0x130   : > { %2099 = vmatpush.bf16.msrb.mxu1 %v2751_v11  ;;  %2115 = vmatpush.bf16.msrb.mxu2 %v2667_v63  ;;  %v1271_v46 = vadd.f32 %v3989_v3, %v3643_v7  ;;  %v2520_v3 = vld [vmem:[%s4187_s12 + $0x8] sm:$0x3] }
 0x131   : > { %2088 = vmatpush.bf16.msrb.mxu0 %v2671_v19  ;;  %v1463_v5 = vperm.slane %v2520_v3, 0  ;;  %v1248_v19 = vadd.f32 %v3834_v54, %v1235_v28 }
 0x132   : > { %v3994_v21 = vpop.f32.mrf.mxu1 }
 0x133   : > { %v1284_v14 = vadd.f32 %v3994_v21, %v1271_v46  ;;  %2128 = vmatpush.bf16.msrb.mxu3 %v2731_v56  ;;  %v2524_v21 = vld [vmem:[%s4187_s12 + $0xc] sm:$0x3]  ;;  %v1467_v15 = vmul.f32 %v1463_v5, %v1251_v4  ;;  %v1252_v39 = vmax.f32 %v1248_v19, 0.0 }
 0x134   : > { %2100 = vmatpush.bf16.msrb.mxu1 %v2743_v61  ;;  %v1501_v59 = vperm.slane %v2524_v21, 1 }
 0x135   : > { %2089 = vmatpush.bf16.msrb.mxu0 %v2663_v51  ;;  %v1313_v60 = vmax.f32 %v1284_v14, 0.0  ;;  %v1590_v47 = vadd.f32 %v1586_v55, %v1467_v15 }
 0x136   : > { %v4020_v6 = vpop.f32.mrf.mxu2 }
 0x137   : > { %v1272_v9 = vpop.f32.mrf.mxu0  ;;  %v1297_v52 = vadd.f32 %v4020_v6, %v3650_v17  ;;  %v1315_v2 = vmul.f32 %v1313_v60, %v3669_v58  ;;  %v1617_v60 = vperm.slane %v1614_v16, 1 }
 0x138   : > { %2101 = vmatpush.bf16.msrb.mxu1 %v2735_v29 }
 0x139   : > { %v4028_v30 = vpop.f32.mrf.mxu3  ;;  %v1541_v48 = vmul.f32 %v1537_v26, %v1315_v2 }
 0x13a   : > { %v1285_v18 = vpop.f32.mrf.mxu1  ;;  %v1310_v11 = vadd.f32 %v4028_v30, %v1297_v52  ;;  %v1464_v30 = vperm.slane %v2520_v3, 1 }
 0x13b   : > { %v1500_v18 = vperm.slane %v2524_v21, 0  ;;  %v1608_v34 = vrot.slane %v1541_v48, 1 }
 0x13c   : > { %2102 = vmatpush.bf16.msrb.mxu1 %v2727_v50  ;;  %v1468_v29 = vmul.f32 %v1464_v30, %v1252_v39 }
 0x13d   : > { %v1504_v27 = vmul.f32 %v1500_v18, %v1315_v2 }
 0x13e   : > { %v1298_v40 = vpop.f32.mrf.mxu2  ;;  %v1591_v50 = vadd.f32 %v1587_v25, %v1468_v29 }
 0x141   : > { %v1311_v49 = vpop.f32.mrf.mxu3 }
 0x14f   : > { %v1334_v35 = vpop.f32.mrf.mxu0 }
 0x150   : > { %v1335_v9 = vadd.f32 %v1334_v35, %v3643_v7  ;;  %v1347_v6 = vpop.f32.mrf.mxu1  ;;  %v1314_v7 = vmax.f32 %v1310_v11, 0.0  ;;  %v1662_v35 = vld [vmem:[%s4184_s9] sm:$0x3] }
 0x151   : > { %v1664_v36 = vperm.slane %v1662_v35, 0 }
 0x152   : > { %v1348_v22 = vadd.f32 %v1347_v6, %v1335_v9  ;;  %v1316_v51 = vmul.f32 %v1314_v7, %v3669_v58  ;;  %v1916_v7 = vld [vmem:[%s4190_s15] sm:$0x3] }
 0x153   : > { %v1919_v32 = vperm.slane %v1916_v7, 1 }
 0x154   : > { %v1377_v10 = vmax.f32 %v1348_v22, 0.0  ;;  %v1505_v44 = vmul.f32 %v1501_v59, %v1316_v51  ;;  %v1542_v56 = vmul.f32 %v1538_v33, %v1316_v51 }
 0x156   : > { %v1522_v31 = vmul.f32 %v1518_v23, %v1377_v10  ;;  %v1360_v61 = vpop.f32.mrf.mxu2  ;;  %v1609_v3 = vrot.slane %v1542_v56, 1 }
 0x157   : > { %v1361_v40 = vadd.f32 %v1360_v61, %v3650_v17  ;;  %v1373_v41 = vpop.f32.mrf.mxu3  ;;  %v1336_v43 = vpop.f32.mrf.mxu0  ;;  %v1918_v61 = vperm.slane %v1916_v7, 0 }
 0x158   : > { %v1592_v49 = vadd.f32 %v1522_v31, %v1504_v27  ;;  %v1349_v54 = vpop.f32.mrf.mxu1 }
 0x159   : > { %v1374_v63 = vadd.f32 %v1373_v41, %v1361_v40 }
 0x15a   : > { %v1602_v57 = vadd.f32 %v1592_v49, %v1590_v47 }
 0x15b   : > { %v1378_v17 = vmax.f32 %v1374_v63, 0.0 }
 0x15c   : > { %v1604_v37 = vadd.f32 %v1602_v57, %v3735_v1 }
 0x15d   : > { %v1523_v45 = vmul.f32 %v1519_v8, %v1378_v17 }
 0x15e   : > { %v1362_v46 = vpop.f32.mrf.mxu2  ;;  %v1612_v58 = vadd.f32 %v1608_v34, %v1604_v37 }
 0x15f   : > { %v1593_v62 = vadd.f32 %v1523_v45, %v1505_v44  ;;  %v1375_v13 = vpop.f32.mrf.mxu3 }
 0x160   : > { %v1620_v14 = vadd.f32 %v1616_v38, %v1612_v58 }
 0x161   : > { %v1603_v20 = vadd.f32 %v1593_v62, %v1591_v50 }
 0x162   : > { %v1882_v42 = vpack.c.bf16 %v1620_v14, %v1620_v14 }
 0x163   : > { %v1605_v52 = vadd.f32 %v1603_v20, %v3790_v12  ;;  %v1665_v12 = vperm.slane %v1662_v35, 1 }
 0x164   : > { %2090 = vmatmul.bf16.vlgmr.msrb.gmra.mxu0 %v1882_v42  ;;  %2116 = vmatmul.bf16.vlgmr.msrb.gmra.mxu2 %v1882_v42 }
 0x165   : > { %v1613_v1 = vadd.f32 %v1609_v3, %v1605_v52 }
 0x167   : > { %v1621_v28 = vadd.f32 %v1617_v60, %v1613_v1 }
 0x169   : > { %v1883_v21 = vpack.c.bf16 %v1621_v28, %v1621_v28 }
 0x16b   : > { %2103 = vmatmul.bf16.vlgmr.msrb.gmra.mxu1 %v1883_v21  ;;  %2129 = vmatmul.bf16.vlgmr.msrb.gmra.mxu3 %v1883_v21 }
 0x199   : > { %v1876_v11 = vpop.f32.mrf.mxu3 }
 0x19c   : > { %v1850_v4 = vpop.f32.mrf.mxu1 }
 0x19f   : > { %v1837_v0 = vpop.f32.mrf.mxu0 }
 0x1a0   : > { %v1838_v5 = vadd.f32 %v1837_v0, %v1664_v36 }
 0x1a1   : > { %v1878_v26 = vpop.f32.mrf.mxu3 }
 0x1a2   : > { %v1851_v53 = vadd.f32 %v1850_v4, %v1838_v5 }
 0x1a4   : > { %v1852_v22 = vpop.f32.mrf.mxu1  ;;  %v1880_v23 = vmax.f32 %v1851_v53, 0.0 }
 0x1a5   : > { %v1863_v9 = vpop.f32.mrf.mxu2 }
 0x1a6   : > { %v1864_v6 = vadd.f32 %v1863_v9, %v1665_v12 }
 0x1a7   : > { %v1839_v18 = vpop.f32.mrf.mxu0 }
 0x1a8   : > { %v1877_v2 = vadd.f32 %v1876_v11, %v1864_v6 }
 0x1aa   : > { %v1881_v24 = vmax.f32 %v1877_v2, 0.0 }
 0x1ac   : > { %v2138_v19 = vrot.slane %v1881_v24, 6 }
 0x1ad   : > { %v1865_v55 = vpop.f32.mrf.mxu2 }
 0x1ae   : > { %v2140_v15 = vsel %vm2139_vm1, %v1880_v23, %v2138_v19 }
 0x1af   : > { %2142 = vst [vmem:[%s783_s29] sm:$0xf] %v2140_v15 }
 0x1e1   : > { %v2091_v10 = vpop.f32.mrf.mxu0 }
 0x1e2   : > { %v2092_v30 = vadd.f32 %v2091_v10, %v1918_v61 }
 0x1e7   : > { %v2117_v27 = vpop.f32.mrf.mxu2 }
 0x1e8   : > { %v2104_v31 = vpop.f32.mrf.mxu1  ;;  %v2118_v40 = vadd.f32 %v2117_v27, %v1919_v32 }
 0x1e9   : > { %v2093_v39 = vpop.f32.mrf.mxu0  ;;  %v2105_v43 = vadd.f32 %v2104_v31, %v2092_v30 }
 0x1eb   : > { %v2134_v51 = vmax.f32 %v2105_v43, 0.0 }
 0x1ee   : > { %v2130_v41 = vpop.f32.mrf.mxu3 }
 0x1ef   : > { %v2131_v47 = vadd.f32 %v2130_v41, %v2118_v40  ;;  %v2119_v48 = vpop.f32.mrf.mxu2 }
 0x1f0   : > { %v2106_v49 = vpop.f32.mrf.mxu1 }
 0x1f1   : > { %v2135_v54 = vmax.f32 %v2131_v47, 0.0 }
 0x1f3   : > { %v2145_v59 = vrot.slane %v2135_v54, 6 }
 0x1f5   : > { %v2146_v63 = vsel %vm2139_vm1, %v2134_v51, %v2145_v59 }
 0x1f6   : > { %2148 = vst [vmem:[%s783_s29 + $0x4] sm:$0xf] %v2146_v63  ;;  %v2132_v8 = vpop.f32.mrf.mxu3 }
 0x1f7 PF: > { %s27_s28 = sadd.s32 1, %s2967_s28   ;;  %s4206_s24 = sld [smem:[#allocation2_spill]] }
 0x1f8   : > { %p24_p10 = scmp.ge.s32.totalorder %s27_s28, 6   ;;  %s4207_s25 = sld [smem:[#allocation3_spill]] }
 0x1f9   : > { %s4208_s26 = sld [smem:[#allocation4_spill]] }
 0x1fa   : > { %s4209_s27 = sld [smem:[#allocation5_spill]]  ;;  %26 = sbr.rel (!%p24_p10) target bundleno = 4 (0x4), region = 149 }

// kernel: shufflenet_v2_forward.9
= control target key start
LH: loop header
LB: loop body
LE: loop exit
PB: predicated region body
PF: predicated region fallthrough
CT: control target
= control target key end

     0   :  { %vm46_vm0 = vcmask 1043456   ;;  %s2763_s0 = inlined_call_operand.vmem [shape: f32[2,4,512], index: 0, kind: input, shape index: {}]   ;;  %s2764_s1 = inlined_call_operand.vmem [shape: bf16[512,512], index: 1, kind: input, shape index: {}]   ;;  %s2765_s2 = inlined_call_operand.vmem [shape: f32[1,512], index: 2, kind: input, shape index: {}]   ;;  %s2766_s3 = inlined_call_operand.hbm [shape: f32[2,512], index: 3, kind: output, shape index: {}]  }
   0x1   :  { %v1285_v0 = vld [vmem:[%s2764_s1 + $0xe0] sm:$0xf]  ;;  %v1713_v1 = vld [vmem:[%s2764_s1 + $0xec] sm:$0xf0] }
   0x2   :  { %v1413_v2 = vld [vmem:[%s2764_s1 + $0x1e0] sm:$0xf]  ;;  %v1286_v3 = vor.u32 %v1713_v1, %v1285_v0  ;;  %v1745_v4 = vld [vmem:[%s2764_s1 + $0x1ec] sm:$0xf0] }
   0x3   :  { %v1541_v5 = vld [vmem:[%s2764_s1 + $0x2e0] sm:$0xf]  ;;  %v1777_v6 = vld [vmem:[%s2764_s1 + $0x2ec] sm:$0xf0]  ;;  %v1414_v7 = vor.u32 %v1745_v4, %v1413_v2 }
   0x4   :  { %v1542_v8 = vor.u32 %v1777_v6, %v1541_v5  ;;  %v1669_v9 = vld [vmem:[%s2764_s1 + $0x3e0] sm:$0xf]  ;;  %v1809_v10 = vld [vmem:[%s2764_s1 + $0x3ec] sm:$0xf0]  ;;  %933 = vmatpush.bf16.msra.mxu0 %v1286_v3 }
   0x5   :  { %v1269_v11 = vld [vmem:[%s2764_s1 + $0xc0] sm:$0xf]  ;;  %v1670_v12 = vor.u32 %v1809_v10, %v1669_v9  ;;  %v1709_v13 = vld [vmem:[%s2764_s1 + $0xcc] sm:$0xf0]  ;;  %946 = vmatpush.bf16.msra.mxu1 %v1414_v7 }
   0x6   :  { %v1397_v14 = vld [vmem:[%s2764_s1 + $0x1c0] sm:$0xf]  ;;  %v1741_v15 = vld [vmem:[%s2764_s1 + $0x1cc] sm:$0xf0]  ;;  %959 = vmatpush.bf16.msra.mxu2 %v1542_v8  ;;  %v1270_v16 = vor.u32 %v1709_v13, %v1269_v11 }
   0x7   :  { %v1398_v17 = vor.u32 %v1741_v15, %v1397_v14  ;;  %v1525_v18 = vld [vmem:[%s2764_s1 + $0x2c0] sm:$0xf]  ;;  %v1773_v19 = vld [vmem:[%s2764_s1 + $0x2cc] sm:$0xf0]  ;;  %972 = vmatpush.bf16.msra.mxu3 %v1670_v12 }
   0x8   :  { %v1653_v20 = vld [vmem:[%s2764_s1 + $0x3c0] sm:$0xf]  ;;  %v1526_v21 = vor.u32 %v1773_v19, %v1525_v18  ;;  %v1805_v22 = vld [vmem:[%s2764_s1 + $0x3cc] sm:$0xf0]  ;;  %934 = vmatpush.bf16.msra.mxu0 %v1270_v16 }
   0x9   :  { %v1253_v23 = vld [vmem:[%s2764_s1 + $0xa0] sm:$0xf]  ;;  %v1705_v24 = vld [vmem:[%s2764_s1 + $0xac] sm:$0xf0]  ;;  %v1654_v25 = vor.u32 %v1805_v22, %v1653_v20  ;;  %947 = vmatpush.bf16.msra.mxu1 %v1398_v17 }
   0xa   :  { %v1381_v26 = vld [vmem:[%s2764_s1 + $0x1a0] sm:$0xf]  ;;  %v1737_v27 = vld [vmem:[%s2764_s1 + $0x1ac] sm:$0xf0]  ;;  %v1254_v29 = vor.u32 %v1705_v24, %v1253_v23  ;;  %960 = vmatpush.bf16.msra.mxu2 %v1526_v21 }
   0xb   :  { %v1509_v28 = vld [vmem:[%s2764_s1 + $0x2a0] sm:$0xf]  ;;  %v1769_v30 = vld [vmem:[%s2764_s1 + $0x2ac] sm:$0xf0]  ;;  %v1382_v33 = vor.u32 %v1737_v27, %v1381_v26  ;;  %973 = vmatpush.bf16.msra.mxu3 %v1654_v25 }
   0xc   :  { %v1637_v31 = vld [vmem:[%s2764_s1 + $0x3a0] sm:$0xf]  ;;  %v1801_v32 = vld [vmem:[%s2764_s1 + $0x3ac] sm:$0xf0]  ;;  %v1510_v34 = vor.u32 %v1769_v30, %v1509_v28  ;;  %935 = vmatpush.bf16.msra.mxu0 %v1254_v29  ;;  %v1711_v28 = vld [vmem:[%s2764_s1 + $0xe4] sm:$0xf] }
   0xd   :  { %v1237_v35 = vld [vmem:[%s2764_s1 + $0x80] sm:$0xf]  ;;  %v1701_v36 = vld [vmem:[%s2764_s1 + $0x8c] sm:$0xf0]  ;;  %v1638_v38 = vor.u32 %v1801_v32, %v1637_v31  ;;  %948 = vmatpush.bf16.msra.mxu1 %v1382_v33  ;;  %v1287_v29 = vld [vmem:[%s2764_s1 + $0xf0] sm:$0xf0] }
   0xe   :  { %v1365_v37 = vld [vmem:[%s2764_s1 + $0x180] sm:$0xf]  ;;  %v1733_v39 = vld [vmem:[%s2764_s1 + $0x18c] sm:$0xf0]  ;;  %v1238_v44 = vor.u32 %v1701_v36, %v1237_v35  ;;  %961 = vmatpush.bf16.msra.mxu2 %v1510_v34  ;;  %v1743_v30 = vld [vmem:[%s2764_s1 + $0x1e4] sm:$0xf] }
   0xf   :  { %v1493_v40 = vld [vmem:[%s2764_s1 + $0x280] sm:$0xf]  ;;  %v1765_v41 = vld [vmem:[%s2764_s1 + $0x28c] sm:$0xf0]  ;;  %v1366_v45 = vor.u32 %v1733_v39, %v1365_v37  ;;  %974 = vmatpush.bf16.msra.mxu3 %v1638_v38  ;;  %v1415_v32 = vld [vmem:[%s2764_s1 + $0x1f0] sm:$0xf0] }
  0x10   :  { %v1621_v42 = vld [vmem:[%s2764_s1 + $0x380] sm:$0xf]  ;;  %v1797_v43 = vld [vmem:[%s2764_s1 + $0x38c] sm:$0xf0]  ;;  %v1494_v46 = vor.u32 %v1765_v41, %v1493_v40  ;;  %936 = vmatpush.bf16.msra.mxu0 %v1238_v44  ;;  %v1775_v33 = vld [vmem:[%s2764_s1 + $0x2e4] sm:$0xf]  ;;  %v1290_v40 = vor.u32 %v1711_v28, %v1287_v29 }
  0x11   :  { %v1221_v47 = vld [vmem:[%s2764_s1 + $0x60] sm:$0xf]  ;;  %v1697_v48 = vld [vmem:[%s2764_s1 + $0x6c] sm:$0xf0]  ;;  %v1622_v50 = vor.u32 %v1797_v43, %v1621_v42  ;;  %949 = vmatpush.bf16.msra.mxu1 %v1366_v45  ;;  %v1543_v34 = vld [vmem:[%s2764_s1 + $0x2f0] sm:$0xf0]  ;;  %v1418_v43 = vor.u32 %v1743_v30, %v1415_v32 }
  0x12   :  { %v1349_v49 = vld [vmem:[%s2764_s1 + $0x160] sm:$0xf]  ;;  %v1729_v51 = vld [vmem:[%s2764_s1 + $0x16c] sm:$0xf0]  ;;  %v1222_v56 = vor.u32 %v1697_v48, %v1221_v47  ;;  %962 = vmatpush.bf16.msra.mxu2 %v1494_v46  ;;  %v1807_v37 = vld [vmem:[%s2764_s1 + $0x3e4] sm:$0xf]  ;;  %v1546_v44 = vor.u32 %v1775_v33, %v1543_v34 }
  0x13   :  { %v1477_v52 = vld [vmem:[%s2764_s1 + $0x260] sm:$0xf]  ;;  %v1761_v53 = vld [vmem:[%s2764_s1 + $0x26c] sm:$0xf0]  ;;  %v1350_v57 = vor.u32 %v1729_v51, %v1349_v49  ;;  %975 = vmatpush.bf16.msra.mxu3 %v1622_v50  ;;  %v1671_v38 = vld [vmem:[%s2764_s1 + $0x3f0] sm:$0xf0] }
  0x14   :  { %v1605_v54 = vld [vmem:[%s2764_s1 + $0x360] sm:$0xf]  ;;  %v1793_v55 = vld [vmem:[%s2764_s1 + $0x36c] sm:$0xf0]  ;;  %v1478_v58 = vor.u32 %v1761_v53, %v1477_v52  ;;  %937 = vmatpush.bf16.msra.mxu0 %v1222_v56  ;;  %v1707_v41 = vld [vmem:[%s2764_s1 + $0xc4] sm:$0xf]  ;;  %v1674_v48 = vor.u32 %v1807_v37, %v1671_v38 }
  0x15   :  { %v1205_v59 = vld [vmem:[%s2764_s1 + $0x40] sm:$0xf]  ;;  %v1693_v60 = vld [vmem:[%s2764_s1 + $0x4c] sm:$0xf0]  ;;  %v1606_v62 = vor.u32 %v1793_v55, %v1605_v54  ;;  %950 = vmatpush.bf16.msra.mxu1 %v1350_v57  ;;  %v1271_v42 = vld [vmem:[%s2764_s1 + $0xd0] sm:$0xf0] }
  0x16   :  { %v1333_v61 = vld [vmem:[%s2764_s1 + $0x140] sm:$0xf]  ;;  %v1725_v63 = vld [vmem:[%s2764_s1 + $0x14c] sm:$0xf0]  ;;  %v1206_v4 = vor.u32 %v1693_v60, %v1205_v59  ;;  %963 = vmatpush.bf16.msra.mxu2 %v1478_v58  ;;  %v1739_v45 = vld [vmem:[%s2764_s1 + $0x1c4] sm:$0xf]  ;;  %v1274_v56 = vor.u32 %v1707_v41, %v1271_v42 }
  0x17   :  { %v1461_v0 = vld [vmem:[%s2764_s1 + $0x240] sm:$0xf]  ;;  %v1757_v1 = vld [vmem:[%s2764_s1 + $0x24c] sm:$0xf0]  ;;  %v1334_v5 = vor.u32 %v1725_v63, %v1333_v61  ;;  %976 = vmatpush.bf16.msra.mxu3 %v1606_v62  ;;  %v1399_v46 = vld [vmem:[%s2764_s1 + $0x1d0] sm:$0xf0] }
  0x18   :  { %v1589_v2 = vld [vmem:[%s2764_s1 + $0x340] sm:$0xf]  ;;  %v1789_v3 = vld [vmem:[%s2764_s1 + $0x34c] sm:$0xf0]  ;;  %v1462_v6 = vor.u32 %v1757_v1, %v1461_v0  ;;  %938 = vmatpush.bf16.msra.mxu0 %v1206_v4  ;;  %v1771_v47 = vld [vmem:[%s2764_s1 + $0x2c4] sm:$0xf]  ;;  %v1402_v63 = vor.u32 %v1739_v45, %v1399_v46 }
  0x19   :  { %v1189_v7 = vld [vmem:[%s2764_s1 + $0x20] sm:$0xf]  ;;  %v1689_v8 = vld [vmem:[%s2764_s1 + $0x2c] sm:$0xf0]  ;;  %v1590_v10 = vor.u32 %v1789_v3, %v1589_v2  ;;  %951 = vmatpush.bf16.msra.mxu1 %v1334_v5  ;;  %v1527_v49 = vld [vmem:[%s2764_s1 + $0x2d0] sm:$0xf0] }
  0x1a   :  { %v1317_v9 = vld [vmem:[%s2764_s1 + $0x120] sm:$0xf]  ;;  %v1721_v11 = vld [vmem:[%s2764_s1 + $0x12c] sm:$0xf0]  ;;  %v1190_v16 = vor.u32 %v1689_v8, %v1189_v7  ;;  %964 = vmatpush.bf16.msra.mxu2 %v1462_v6  ;;  %v1803_v50 = vld [vmem:[%s2764_s1 + $0x3c4] sm:$0xf]  ;;  %v1530_v0 = vor.u32 %v1771_v47, %v1527_v49 }
  0x1b   :  { %v1445_v12 = vld [vmem:[%s2764_s1 + $0x220] sm:$0xf]  ;;  %v1753_v13 = vld [vmem:[%s2764_s1 + $0x22c] sm:$0xf0]  ;;  %v1318_v19 = vor.u32 %v1721_v11, %v1317_v9  ;;  %977 = vmatpush.bf16.msra.mxu3 %v1590_v10  ;;  %v1655_v51 = vld [vmem:[%s2764_s1 + $0x3d0] sm:$0xf0] }
  0x1c   :  { %v1573_v14 = vld [vmem:[%s2764_s1 + $0x320] sm:$0xf]  ;;  %v1785_v15 = vld [vmem:[%s2764_s1 + $0x32c] sm:$0xf0]  ;;  %v1446_v20 = vor.u32 %v1753_v13, %v1445_v12  ;;  %939 = vmatpush.bf16.msra.mxu0 %v1190_v16  ;;  %v2106_v52 = vld [vmem:[%s2764_s1 + $0xa4] sm:$0xf]  ;;  %v1658_v5 = vor.u32 %v1803_v50, %v1655_v51 }
  0x1d   :  { %v1173_v17 = vld [vmem:[%s2764_s1] sm:$0xf]  ;;  %v1685_v18 = vld [vmem:[%s2764_s1 + $0xc] sm:$0xf0]  ;;  %v1574_v24 = vor.u32 %v1785_v15, %v1573_v14  ;;  %952 = vmatpush.bf16.msra.mxu1 %v1318_v19  ;;  %v1255_v53 = vld [vmem:[%s2764_s1 + $0xb0] sm:$0xf0] }
  0x1e   :  { %v1301_v21 = vld [vmem:[%s2764_s1 + $0x100] sm:$0xf]  ;;  %v1717_v22 = vld [vmem:[%s2764_s1 + $0x10c] sm:$0xf0]  ;;  %v1174_v31 = vor.u32 %v1685_v18, %v1173_v17  ;;  %965 = vmatpush.bf16.msra.mxu2 %v1446_v20  ;;  %v16_v54 = vld [vmem:[%s2763_s0 + $0x8] sm:$0xff]  ;;  %v1841_v61 = vmov 4.0   ;;  %v1258_v16 = vor.u32 %v2106_v52, %v1255_v53 }
  0x1f   :  { %v1429_v23 = vld [vmem:[%s2764_s1 + $0x200] sm:$0xf]  ;;  %v1749_v25 = vld [vmem:[%s2764_s1 + $0x20c] sm:$0xf0]  ;;  %v1302_v35 = vor.u32 %v1717_v22, %v1301_v21  ;;  %978 = vmatpush.bf16.msra.mxu3 %v1574_v24  ;;  %v18_v55 = vld [vmem:[%s2763_s0 + $0x18] sm:$0xff]  ;;  %1813 = vrcp.f32 %v1841_v61 }
  0x20   :  { %v1557_v26 = vld [vmem:[%s2764_s1 + $0x300] sm:$0xf]  ;;  %v1781_v27 = vld [vmem:[%s2764_s1 + $0x30c] sm:$0xf0]  ;;  %v1430_v36 = vor.u32 %v1749_v25, %v1429_v23  ;;  %940 = vmatpush.bf16.msra.mxu0 %v1174_v31  ;;  %v2120_v57 = vld [vmem:[%s2764_s1 + $0x1a4] sm:$0xf] }
  0x21   :  { %v1558_v39 = vor.u32 %v1781_v27, %v1557_v26  ;;  %953 = vmatpush.bf16.msra.mxu1 %v1302_v35  ;;  %v1383_v58 = vld [vmem:[%s2764_s1 + $0x1b0] sm:$0xf0]  ;;  %v1767_v59 = vld [vmem:[%s2764_s1 + $0x2a4] sm:$0xf]  ;;  %25 = vst [vmem:[#allocation1 + $0x10] ss:$2 sm:$0xff] %v16_v54 }
  0x22   :  { %966 = vmatpush.bf16.msra.mxu2 %v1430_v36  ;;  %v1511_v60 = vld [vmem:[%s2764_s1 + $0x2b0] sm:$0xf0]  ;;  %v15_v62 = vld [vmem:[%s2763_s0] sm:$0xff]  ;;  %33 = vst [vmem:[#allocation1 + $0x30] ss:$2 sm:$0xff] %v18_v55 }
  0x23   :  { %979 = vmatpush.bf16.msra.mxu3 %v1558_v39  ;;  %v1799_v1 = vld [vmem:[%s2764_s1 + $0x3a4] sm:$0xf]  ;;  %v1639_v2 = vld [vmem:[%s2764_s1 + $0x3b0] sm:$0xf0]  ;;  %23 = vst [vmem:[#allocation1] ss:$2 sm:$0xff] %v15_v62 }
  0x24   :  { %985 = vmatpush.bf16.msrb.mxu0 %v1290_v40  ;;  %v2143_v3 = vld [vmem:[%s2764_s1 + $0x84] sm:$0xf]  ;;  %v2148_v4 = vld [vmem:[%s2764_s1 + $0x90] sm:$0xf0] }
  0x25   :  { %998 = vmatpush.bf16.msrb.mxu1 %v1418_v43  ;;  %v2153_v6 = vld [vmem:[%s2764_s1 + $0x184] sm:$0xf]  ;;  %v2158_v7 = vld [vmem:[%s2764_s1 + $0x190] sm:$0xf0] }
  0x26   :  { %1011 = vmatpush.bf16.msrb.mxu2 %v1546_v44  ;;  %v2163_v8 = vld [vmem:[%s2764_s1 + $0x284] sm:$0xf]  ;;  %v2168_v9 = vld [vmem:[%s2764_s1 + $0x290] sm:$0xf0] }
  0x27   :  { %1024 = vmatpush.bf16.msrb.mxu3 %v1674_v48  ;;  %v2173_v10 = vld [vmem:[%s2764_s1 + $0x384] sm:$0xf]  ;;  %v2178_v11 = vld [vmem:[%s2764_s1 + $0x390] sm:$0xf0] }
  0x28   :  { %v2183_v12 = vld [vmem:[%s2764_s1 + $0x64] sm:$0xf]  ;;  %v2188_v13 = vld [vmem:[%s2764_s1 + $0x70] sm:$0xf0]  ;;  %986 = vmatpush.bf16.msrb.mxu0 %v1274_v56 }
  0x29   :  { %v2193_v14 = vld [vmem:[%s2764_s1 + $0x164] sm:$0xf]  ;;  %v17_v15 = vld [vmem:[%s2763_s0 + $0x10] sm:$0xff] }
  0x2a   :  { %v2202_v17 = vld [vmem:[%s2764_s1 + $0x170] sm:$0xf0]  ;;  %31 = vst [vmem:[#allocation1 + $0x20] ss:$2 sm:$0xff] %v17_v15 }
  0x2b   :  { %8 = vsyncpa [#allocation3], 0  ;;  %999 = vmatpush.bf16.msrb.mxu1 %v1402_v63  ;;  %1012 = vmatpush.bf16.msrb.mxu2 %v1530_v0  ;;  %v1386_v18 = vor.u32 %v2120_v57, %v1383_v58  ;;  %v1514_v19 = vor.u32 %v1767_v59, %v1511_v60  ;;  %v2208_v20 = vld [vmem:[%s2764_s1 + $0x264] sm:$0xf]  ;;  %v2213_v21 = vld [vmem:[%s2764_s1 + $0x270] sm:$0xf0]  ;;  %v1814_v23 = vpop.eup %1813  ;;  %v1642_v24 = vor.u32 %v1799_v1, %v1639_v2 }
  0x2c   :  { %v2218_v22 = vld [vmem:[%s2764_s1 + $0x364] sm:$0xf]  ;;  %1025 = vmatpush.bf16.msrb.mxu3 %v1658_v5  ;;  %v1242_v25 = vor.u32 %v2143_v3, %v2148_v4  ;;  %v2225_v26 = vld [vmem:[%s2764_s1 + $0x370] sm:$0xf0]  ;;  %v1370_v29 = vor.u32 %v2153_v6, %v2158_v7  ;;  %v1498_v30 = vor.u32 %v2163_v8, %v2168_v9  ;;  %v1626_v31 = vor.u32 %v2173_v10, %v2178_v11  ;;  %s1162_s11 = sshll.u32 %s2766_s3, 4  ;;  %s1163_s11 = int_to_ptr.hbm [resolvable:$true] %s1162_s11 }
  0x2d   :  { %v2230_v27 = vld [vmem:[%s2764_s1 + $0x44] sm:$0xf]  ;;  %v2235_v28 = vld [vmem:[%s2764_s1 + $0x50] sm:$0xf0]  ;;  %v104_v33 = vmul.f32 4.0, %v1814_v23  ;;  %987 = vmatpush.bf16.msrb.mxu0 %v1258_v16  ;;  %v1226_v37 = vor.u32 %v2183_v12, %v2188_v13  ;;  %v1354_v38 = vor.u32 %v2193_v14, %v2202_v17  ;;  %v1482_v39 = vor.u32 %v2208_v20, %v2213_v21 }
  0x2e   :  { %v28_v32 = vld.sshfl [vmem:[#allocation1 + $0x10] sm:$0xff pattern:$0x75316420]  ;;  %v2246_v34 = vld [vmem:[%s2764_s1 + $0x144] sm:$0xf]  ;;  %v1610_v44 = vor.u32 %v2218_v22, %v2225_v26  ;;  %vm108_vm1 = vweird.f32 %v1814_v23  ;;  %v1210_v49 = vor.u32 %v2230_v27, %v2235_v28  ;;  %vm280_vm2 = vcmask 1041409  }
  0x2f   :  { %v36_v35 = vld.sshfl [vmem:[#allocation1 + $0x30] sm:$0xff pattern:$0x75316420]  ;;  %v61_v36 = vsel %vm46_vm0, %v28_v32, 0.0  ;;  %1000 = vmatpush.bf16.msrb.mxu1 %v1386_v18  ;;  %1013 = vmatpush.bf16.msrb.mxu2 %v1514_v19  ;;  %v105_v43 = vsub.f32 1.0, %v104_v33  ;;  %vm1148_vm3 = vcmask 1041408  }
  0x30   :  { %v2258_v40 = vld [vmem:[%s2764_s1 + $0x150] sm:$0xf0]  ;;  %v62_v41 = vrot.slane %v61_v36, 4  ;;  %v89_v42 = vsel %vm46_vm0, %v36_v35, 0.0  ;;  %1026 = vmatpush.bf16.msrb.mxu3 %v1642_v24  ;;  %vm1150_vm4 = vcmask 1045508  }
  0x31   :  { %v29_v45 = vld.sshfl [vmem:[#allocation1 + $0x18] sm:$0xff pattern:$0x75316420]  ;;  %v90_v46 = vrot.slane %v89_v42, 4  ;;  %v106_v51 = vmul.f32 %v1814_v23, %v105_v43  ;;  %988 = vmatpush.bf16.msrb.mxu0 %v1242_v25  ;;  %v1338_v59 = vor.u32 %v2246_v34, %v2258_v40 }
  0x32   :  { %v26_v47 = vld.sshfl [vmem:[#allocation1] sm:$0xff pattern:$0x75316420]  ;;  %v68_v48 = vsel %vm46_vm0, %v29_v45, 0.0  ;;  %v63_v50 = vadd.f32 %v62_v41, %v61_v36 }
  0x33   :  { %v34_v52 = vld.sshfl [vmem:[#allocation1 + $0x20] sm:$0xff pattern:$0x75316420]  ;;  %v47_v53 = vsel %vm46_vm0, %v26_v47, 0.0  ;;  %v69_v54 = vrot.slane %v68_v48, 4  ;;  %v91_v55 = vadd.f32 %v90_v46, %v89_v42  ;;  %1001 = vmatpush.bf16.msrb.mxu1 %v1370_v29  ;;  %1014 = vmatpush.bf16.msrb.mxu2 %v1498_v30  ;;  %v107_v61 = vadd.f32 %v1814_v23, %v106_v51 }
  0x34   :  { %v48_v56 = vrot.slane %v47_v53, 4  ;;  %v75_v57 = vsel %vm46_vm0, %v34_v52, 0.0  ;;  %v37_v58 = vld.sshfl [vmem:[#allocation1 + $0x38] sm:$0xff pattern:$0x75316420]  ;;  %v64_v60 = vrot.slane %v63_v50, 2  ;;  %1027 = vmatpush.bf16.msrb.mxu3 %v1626_v31 }
  0x35   :  { %v76_v62 = vrot.slane %v75_v57, 4  ;;  %v70_v63 = vadd.f32 %v69_v54, %v68_v48  ;;  %v27_v0 = vld.sshfl [vmem:[#allocation1 + $0x8] sm:$0xff pattern:$0x75316420]  ;;  %v92_v1 = vrot.slane %v91_v55, 2  ;;  %v96_v3 = vsel %vm46_vm0, %v37_v58, 0.0  ;;  %989 = vmatpush.bf16.msrb.mxu0 %v1226_v37 }
  0x36   :  { %v49_v2 = vadd.f32 %v48_v56, %v47_v53  ;;  %v35_v4 = vld.sshfl [vmem:[#allocation1 + $0x28] sm:$0xff pattern:$0x75316420]  ;;  %v54_v5 = vsel %vm46_vm0, %v27_v0, 0.0  ;;  %v65_v6 = vadd.f32 %v64_v60, %v63_v50  ;;  %v2273_v7 = vsel %vm108_vm1, %v1814_v23, %v107_v61  ;;  %v1755_v46 = vld [vmem:[%s2764_s1 + $0x244] sm:$0xf] }
  0x37   :  { %v77_v8 = vadd.f32 %v76_v62, %v75_v57  ;;  %v71_v9 = vrot.slane %v70_v63, 2  ;;  %v93_v10 = vadd.f32 %v92_v1, %v91_v55  ;;  %v97_v12 = vrot.slane %v96_v3, 4  ;;  %1002 = vmatpush.bf16.msrb.mxu1 %v1354_v38  ;;  %1015 = vmatpush.bf16.msrb.mxu2 %v1482_v39  ;;  %v1463_v47 = vld [vmem:[%s2764_s1 + $0x250] sm:$0xf0]  ;;  %v1787_v52 = vld [vmem:[%s2764_s1 + $0x344] sm:$0xf] }
  0x38   :  { %v50_v11 = vrot.slane %v49_v2, 2  ;;  %v55_v13 = vrot.slane %v54_v5, 4  ;;  %v66_v14 = vrot.slane %v65_v6, 1  ;;  %v82_v17 = vsel %vm46_vm0, %v35_v4, 0.0  ;;  %1028 = vmatpush.bf16.msrb.mxu3 %v1610_v44  ;;  %v1591_v53 = vld [vmem:[%s2764_s1 + $0x350] sm:$0xf0] }
  0x39   :  { %v78_v15 = vrot.slane %v77_v8, 2  ;;  %v72_v16 = vadd.f32 %v71_v9, %v70_v63  ;;  %v94_v18 = vrot.slane %v93_v10, 1  ;;  %v98_v20 = vadd.f32 %v97_v12, %v96_v3  ;;  %990 = vmatpush.bf16.msrb.mxu0 %v1210_v49  ;;  %v1687_v58 = vld [vmem:[%s2764_s1 + $0x24] sm:$0xf]  ;;  %v1319_v1 = vld [vmem:[%s2764_s1 + $0x130] sm:$0xf0] }
  0x3a   :  { %v51_v19 = vadd.f32 %v50_v11, %v49_v2  ;;  %v56_v21 = vadd.f32 %v55_v13, %v54_v5  ;;  %v67_v22 = vadd.f32 %v66_v14, %v65_v6  ;;  %v83_v25 = vrot.slane %v82_v17, 4  ;;  %v1719_v60 = vld [vmem:[%s2764_s1 + $0x124] sm:$0xf] }
  0x3b   :  { %v79_v23 = vadd.f32 %v78_v15, %v77_v8  ;;  %v73_v24 = vrot.slane %v72_v16, 1  ;;  %v95_v26 = vadd.f32 %v94_v18, %v93_v10  ;;  %v99_v28 = vrot.slane %v98_v20, 2  ;;  %1003 = vmatpush.bf16.msrb.mxu1 %v1338_v59  ;;  %v1191_v59 = vld [vmem:[%s2764_s1 + $0x30] sm:$0xf0]  ;;  %v1751_v2 = vld [vmem:[%s2764_s1 + $0x224] sm:$0xf] }
  0x3c   :  { %v52_v27 = vrot.slane %v51_v19, 1  ;;  %v57_v29 = vrot.slane %v56_v21, 2  ;;  %v112_v30 = vmul.f32 %v2273_v7, %v67_v22  ;;  %v84_v33 = vadd.f32 %v83_v25, %v82_v17  ;;  %v1447_v8 = vld [vmem:[%s2764_s1 + $0x230] sm:$0xf0]  ;;  %v1783_v9 = vld [vmem:[%s2764_s1 + $0x324] sm:$0xf] }
  0x3d   :  { %v80_v31 = vrot.slane %v79_v23, 1  ;;  %v74_v32 = vadd.f32 %v73_v24, %v72_v16  ;;  %v116_v34 = vmul.f32 %v2273_v7, %v95_v26  ;;  %v100_v36 = vadd.f32 %v99_v28, %v98_v20  ;;  %v1575_v10 = vld [vmem:[%s2764_s1 + $0x330] sm:$0xf0]  ;;  %v1683_v15 = vld [vmem:[%s2764_s1 + $0x4] sm:$0xf] }
  0x3e   :  { %v53_v35 = vadd.f32 %v52_v27, %v51_v19  ;;  %v58_v37 = vadd.f32 %v57_v29, %v56_v21  ;;  %v120_v38 = vpack.c.bf16 %v112_v30, %v112_v30  ;;  %v85_v41 = vrot.slane %v84_v33, 2  ;;  %v1175_v16 = vld [vmem:[%s2764_s1 + $0x10] sm:$0xf0]  ;;  %v1715_v17 = vld [vmem:[%s2764_s1 + $0x104] sm:$0xf] }
  0x3f   :  { %v81_v39 = vadd.f32 %v80_v31, %v79_v23  ;;  %v113_v40 = vmul.f32 %v2273_v7, %v74_v32  ;;  %v124_v42 = vpack.c.bf16 %v116_v34, %v116_v34  ;;  %v101_v44 = vrot.slane %v100_v36, 1  ;;  %v1303_v22 = vld [vmem:[%s2764_s1 + $0x110] sm:$0xf0]  ;;  %v1747_v23 = vld [vmem:[%s2764_s1 + $0x204] sm:$0xf] }
  0x40   :  { %v110_v43 = vmul.f32 %v2273_v7, %v53_v35  ;;  %v59_v45 = vrot.slane %v58_v37, 1  ;;  %v274_v48 = vunpack.c.l.b16 %v120_v38  ;;  %v86_v51 = vadd.f32 %v85_v41, %v84_v33  ;;  %v1431_v24 = vld [vmem:[%s2764_s1 + $0x210] sm:$0xf0]  ;;  %v1779_v28 = vld [vmem:[%s2764_s1 + $0x304] sm:$0xf] }
  0x41   :  { %v114_v49 = vmul.f32 %v2273_v7, %v81_v39  ;;  %v121_v50 = vpack.c.bf16 %v113_v40, %v113_v40  ;;  %v278_v54 = vunpack.c.l.b16 %v124_v42  ;;  %v102_v56 = vadd.f32 %v101_v44, %v100_v36  ;;  %v1293_v29 = vld [vmem:[%s2764_s1 + $0xe8] sm:$0xf]  ;;  %v1714_v30 = vld [vmem:[%s2764_s1 + $0xf4] sm:$0xf0]  ;;  %v1559_v34 = vld [vmem:[%s2764_s1 + $0x310] sm:$0xf0] }
  0x42   :  { %v118_v55 = vpack.c.bf16 %v110_v43, %v110_v43  ;;  %v60_v57 = vadd.f32 %v59_v45, %v58_v37  ;;  %v87_v63 = vrot.slane %v86_v51, 1  ;;  %v1466_v0 = vor.u32 %v1755_v46, %v1463_v47  ;;  %v1549_v35 = vld [vmem:[%s2764_s1 + $0x2e8] sm:$0xf]  ;;  %v1778_v36 = vld [vmem:[%s2764_s1 + $0x2f4] sm:$0xf0] }
  0x43   :  { %v122_v61 = vpack.c.bf16 %v114_v49, %v114_v49  ;;  %v275_v62 = vunpack.c.l.b16 %v121_v50  ;;  %v283_v3 = vsel %vm280_vm2, %v278_v54, %v274_v48  ;;  %v117_v5 = vmul.f32 %v2273_v7, %v102_v56  ;;  %v1677_v41 = vld [vmem:[%s2764_s1 + $0x3e8] sm:$0xf]  ;;  %v1810_v42 = vld [vmem:[%s2764_s1 + $0x3f4] sm:$0xf0] }
  0x44   :  { %v272_v4 = vunpack.c.l.b16 %v118_v55  ;;  %v111_v6 = vmul.f32 %v2273_v7, %v60_v57  ;;  %v2320_v11 = vpack.c.b16 %v283_v3, %v283_v3  ;;  %v88_v13 = vadd.f32 %v87_v63, %v86_v51  ;;  %1016 = vmatpush.bf16.msrb.mxu2 %v1466_v0  ;;  %v1421_v45 = vld [vmem:[%s2764_s1 + $0x1e8] sm:$0xf]  ;;  %v1746_v46 = vld [vmem:[%s2764_s1 + $0x1f4] sm:$0xf0] }
  0x45   :  { %v276_v12 = vunpack.c.l.b16 %v122_v61  ;;  %v1594_v14 = vor.u32 %v1787_v52, %v1591_v53  ;;  %v125_v18 = vpack.c.bf16 %v117_v5, %v117_v5  ;;  %v1194_v20 = vor.u32 %v1687_v58, %v1191_v59  ;;  %v1277_v47 = vld [vmem:[%s2764_s1 + $0xc8] sm:$0xf]  ;;  %v1710_v52 = vld [vmem:[%s2764_s1 + $0xd4] sm:$0xf0] }
  0x46   :  { %v119_v19 = vpack.c.bf16 %v111_v6, %v111_v6  ;;  %v1322_v21 = vor.u32 %v1719_v60, %v1319_v1  ;;  %967 = vmatmul.bf16.vlgmr.msra.gmra.mxu2 %v2320_v11  ;;  %v115_v26 = vmul.f32 %v2273_v7, %v88_v13  ;;  %v1450_v27 = vor.u32 %v1751_v2, %v1447_v8  ;;  %v1533_v53 = vld [vmem:[%s2764_s1 + $0x2c8] sm:$0xf]  ;;  %v1774_v54 = vld [vmem:[%s2764_s1 + $0x2d4] sm:$0xf0] }
  0x47   :  { %v281_v25 = vsel %vm280_vm2, %v276_v12, %v272_v4  ;;  %1029 = vmatpush.bf16.msrb.mxu3 %v1594_v14  ;;  %v279_v32 = vunpack.c.l.b16 %v125_v18  ;;  %991 = vmatpush.bf16.msrb.mxu0 %v1194_v20  ;;  %v1578_v7 = vor.u32 %v1783_v9, %v1575_v10  ;;  %v1178_v38 = vor.u32 %v1683_v15, %v1175_v16  ;;  %v1661_v58 = vld [vmem:[%s2764_s1 + $0x3c8] sm:$0xf]  ;;  %v1806_v59 = vld [vmem:[%s2764_s1 + $0x3d4] sm:$0xf0] }
  0x48   :  { %v2352_v31 = vpack.c.b16 %v281_v25, %v281_v25  ;;  %v273_v33 = vunpack.c.l.b16 %v119_v19  ;;  %1004 = vmatpush.bf16.msrb.mxu1 %v1322_v21  ;;  %v123_v37 = vpack.c.bf16 %v115_v26, %v115_v26  ;;  %1017 = vmatpush.bf16.msrb.mxu2 %v1450_v27  ;;  %v1306_v39 = vor.u32 %v1715_v17, %v1303_v22  ;;  %v1742_v63 = vld [vmem:[%s2764_s1 + $0x1d4] sm:$0xf0]  ;;  %v1261_v1 = vld [vmem:[%s2764_s1 + $0xa8] sm:$0xf] }
  0x49   :  { %v1434_v40 = vor.u32 %v1747_v23, %v1431_v24  ;;  %v284_v43 = vsel %vm280_vm2, %v279_v32, %v275_v62  ;;  %v1294_v44 = vor.u32 %v1714_v30, %v1293_v29  ;;  %v1562_v50 = vor.u32 %v1779_v28, %v1559_v34  ;;  %v1405_v62 = vld [vmem:[%s2764_s1 + $0x1c8] sm:$0xf]  ;;  %v1706_v2 = vld [vmem:[%s2764_s1 + $0xb4] sm:$0xf0] }
  0x4a   :  { %941 = vmatmul.bf16.vlgmr.msra.gmra.mxu0 %v2352_v31  ;;  %v2380_v48 = vpack.c.b16 %v284_v43, %v284_v43  ;;  %v277_v49 = vunpack.c.l.b16 %v123_v37  ;;  %v1550_v51 = vor.u32 %v1778_v36, %v1549_v35  ;;  %v1678_v55 = vor.u32 %v1810_v42, %v1677_v41  ;;  %v1517_v3 = vld [vmem:[%s2764_s1 + $0x2a8] sm:$0xf]  ;;  %v1770_v4 = vld [vmem:[%s2764_s1 + $0x2b4] sm:$0xf0] }
  0x4b   :  { %1030 = vmatpush.bf16.msrb.mxu3 %v1578_v7  ;;  %992 = vmatpush.bf16.msrb.mxu0 %v1178_v38  ;;  %v1422_v57 = vor.u32 %v1746_v46, %v1421_v45  ;;  %v1278_v61 = vor.u32 %v1710_v52, %v1277_v47  ;;  %v1534_v0 = vor.u32 %v1774_v54, %v1533_v53  ;;  %v1645_v8 = vld [vmem:[%s2764_s1 + $0x3a8] sm:$0xf]  ;;  %v1802_v9 = vld [vmem:[%s2764_s1 + $0x3b4] sm:$0xf0] }
  0x4c   :  { %1005 = vmatpush.bf16.msrb.mxu1 %v1306_v39  ;;  %980 = vmatmul.bf16.vlgmr.msra.gmra.mxu3 %v2380_v48  ;;  %v282_v56 = vsel %vm280_vm2, %v277_v49, %v273_v33  ;;  %v1662_v5 = vor.u32 %v1806_v59, %v1661_v58  ;;  %v1406_v6 = vor.u32 %v1742_v63, %v1405_v62  ;;  %v1389_v12 = vld [vmem:[%s2764_s1 + $0x1a8] sm:$0xf]  ;;  %v1738_v13 = vld [vmem:[%s2764_s1 + $0x1b4] sm:$0xf0] }
  0x4d   :  { %1018 = vmatpush.bf16.msrb.mxu2 %v1434_v40  ;;  %v2399_v60 = vpack.c.b16 %v282_v56, %v282_v56  ;;  %v1262_v10 = vor.u32 %v1706_v2, %v1261_v1  ;;  %v1518_v14 = vor.u32 %v1770_v4, %v1517_v3  ;;  %v1501_v15 = vld [vmem:[%s2764_s1 + $0x288] sm:$0xf]  ;;  %v1766_v16 = vld [vmem:[%s2764_s1 + $0x294] sm:$0xf0]  ;;  %v1646_v17 = vor.u32 %v1802_v9, %v1645_v8  ;;  %v1776_v9 = vld [vmem:[%s2764_s1 + $0x2ec] sm:$0xf] }
  0x4e   :  { %v1245_v18 = vld [vmem:[%s2764_s1 + $0x88] sm:$0xf]  ;;  %v1702_v19 = vld [vmem:[%s2764_s1 + $0x94] sm:$0xf0]  ;;  %v1390_v20 = vor.u32 %v1738_v13, %v1389_v12  ;;  %v1502_v25 = vor.u32 %v1766_v16, %v1501_v15  ;;  %v1295_v15 = vld [vmem:[%s2764_s1 + $0xf8] sm:$0xf0] }
  0x4f   :  { %1037 = vmatpush.bf16.msra.mxu0 %v1294_v44  ;;  %1031 = vmatpush.bf16.msrb.mxu3 %v1562_v50  ;;  %v1629_v21 = vld [vmem:[%s2764_s1 + $0x388] sm:$0xf]  ;;  %v1798_v22 = vld [vmem:[%s2764_s1 + $0x394] sm:$0xf0]  ;;  %v1246_v26 = vor.u32 %v1702_v19, %v1245_v18  ;;  %v1808_v18 = vld [vmem:[%s2764_s1 + $0x3ec] sm:$0xf] }
  0x50   :  { %954 = vmatmul.bf16.vlgmr.msra.gmra.mxu1 %v2399_v60  ;;  %v1373_v23 = vld [vmem:[%s2764_s1 + $0x188] sm:$0xf]  ;;  %v1734_v24 = vld [vmem:[%s2764_s1 + $0x194] sm:$0xf0]  ;;  %v1630_v29 = vor.u32 %v1798_v22, %v1629_v21  ;;  %v1679_v19 = vld [vmem:[%s2764_s1 + $0x3f8] sm:$0xf0] }
  0x51   :  { %1063 = vmatpush.bf16.msra.mxu2 %v1550_v51  ;;  %1050 = vmatpush.bf16.msra.mxu1 %v1422_v57  ;;  %v1485_v27 = vld [vmem:[%s2764_s1 + $0x268] sm:$0xf]  ;;  %v1762_v28 = vld [vmem:[%s2764_s1 + $0x274] sm:$0xf0]  ;;  %v1374_v33 = vor.u32 %v1734_v24, %v1373_v23  ;;  %v1744_v21 = vld [vmem:[%s2764_s1 + $0x1ec] sm:$0xf] }
  0x52   :  { %v1229_v30 = vld [vmem:[%s2764_s1 + $0x68] sm:$0xf]  ;;  %v1698_v32 = vld [vmem:[%s2764_s1 + $0x74] sm:$0xf0]  ;;  %v1486_v37 = vor.u32 %v1762_v28, %v1485_v27  ;;  %v1423_v22 = vld [vmem:[%s2764_s1 + $0x1f8] sm:$0xf0] }
  0x53   :  { %1076 = vmatpush.bf16.msra.mxu3 %v1678_v55  ;;  %1038 = vmatpush.bf16.msra.mxu0 %v1278_v61  ;;  %v1613_v7 = vld [vmem:[%s2764_s1 + $0x368] sm:$0xf]  ;;  %v1794_v34 = vld [vmem:[%s2764_s1 + $0x374] sm:$0xf0]  ;;  %v1230_v38 = vor.u32 %v1698_v32, %v1229_v30  ;;  %v1535_v27 = vld [vmem:[%s2764_s1 + $0x2d8] sm:$0xf0] }
  0x54   :  { %v1357_v35 = vld [vmem:[%s2764_s1 + $0x168] sm:$0xf]  ;;  %v1730_v36 = vld [vmem:[%s2764_s1 + $0x174] sm:$0xf0]  ;;  %v1614_v41 = vor.u32 %v1794_v34, %v1613_v7  ;;  %v1708_v30 = vld [vmem:[%s2764_s1 + $0xcc] sm:$0xf] }
  0x55   :  { %1064 = vmatpush.bf16.msra.mxu2 %v1534_v0  ;;  %1051 = vmatpush.bf16.msra.mxu1 %v1406_v6  ;;  %v1469_v39 = vld [vmem:[%s2764_s1 + $0x248] sm:$0xf]  ;;  %v1758_v40 = vld [vmem:[%s2764_s1 + $0x254] sm:$0xf0]  ;;  %v1358_v44 = vor.u32 %v1730_v36, %v1357_v35  ;;  %v1279_v32 = vld [vmem:[%s2764_s1 + $0xd8] sm:$0xf0] }
  0x56   :  { %1019 = vmatmul.bf16.vlgmr.msrb.gmra.mxu2 %v2320_v11  ;;  %v1213_v42 = vld [vmem:[%s2764_s1 + $0x48] sm:$0xf]  ;;  %v1694_v43 = vld [vmem:[%s2764_s1 + $0x54] sm:$0xf0]  ;;  %v1470_v50 = vor.u32 %v1758_v40, %v1469_v39  ;;  %v1804_v7 = vld [vmem:[%s2764_s1 + $0x3cc] sm:$0xf] }
  0x57   :  { %1077 = vmatpush.bf16.msra.mxu3 %v1662_v5  ;;  %1039 = vmatpush.bf16.msra.mxu0 %v1262_v10  ;;  %v1597_v45 = vld [vmem:[%s2764_s1 + $0x348] sm:$0xf]  ;;  %v1790_v46 = vld [vmem:[%s2764_s1 + $0x354] sm:$0xf0]  ;;  %v1214_v51 = vor.u32 %v1694_v43, %v1213_v42  ;;  %v1551_v10 = vld [vmem:[%s2764_s1 + $0x2f8] sm:$0xf0] }
  0x58   :  { %v1341_v47 = vld [vmem:[%s2764_s1 + $0x148] sm:$0xf]  ;;  %v1726_v49 = vld [vmem:[%s2764_s1 + $0x154] sm:$0xf0]  ;;  %v1598_v54 = vor.u32 %v1790_v46, %v1597_v45  ;;  %v1554_v23 = vor.u32 %v1776_v9, %v1551_v10  ;;  %v1663_v34 = vld [vmem:[%s2764_s1 + $0x3d8] sm:$0xf0] }
  0x59   :  { %1065 = vmatpush.bf16.msra.mxu2 %v1518_v14  ;;  %1052 = vmatpush.bf16.msra.mxu1 %v1390_v20  ;;  %v1453_v52 = vld [vmem:[%s2764_s1 + $0x228] sm:$0xf]  ;;  %v1754_v53 = vld [vmem:[%s2764_s1 + $0x234] sm:$0xf0]  ;;  %v1342_v57 = vor.u32 %v1726_v49, %v1341_v47  ;;  %v1712_v14 = vld [vmem:[%s2764_s1 + $0xec] sm:$0xf] }
  0x5a   :  { %993 = vmatmul.bf16.vlgmr.msrb.gmra.mxu0 %v2352_v31  ;;  %v1197_v55 = vld [vmem:[%s2764_s1 + $0x28] sm:$0xf]  ;;  %v1690_v56 = vld [vmem:[%s2764_s1 + $0x34] sm:$0xf0]  ;;  %v1454_v63 = vor.u32 %v1754_v53, %v1453_v52  ;;  %v1740_v35 = vld [vmem:[%s2764_s1 + $0x1cc] sm:$0xf] }
  0x5b   :  { %1078 = vmatpush.bf16.msra.mxu3 %v1646_v17  ;;  %1040 = vmatpush.bf16.msra.mxu0 %v1246_v26  ;;  %v1581_v58 = vld [vmem:[%s2764_s1 + $0x328] sm:$0xf]  ;;  %v1786_v59 = vld [vmem:[%s2764_s1 + $0x334] sm:$0xf0]  ;;  %v1198_v1 = vor.u32 %v1690_v56, %v1197_v55  ;;  %v1772_v26 = vld [vmem:[%s2764_s1 + $0x2cc] sm:$0xf] }
  0x5c   :  { %1032 = vmatmul.bf16.vlgmr.msrb.gmra.mxu3 %v2380_v48  ;;  %v1325_v61 = vld [vmem:[%s2764_s1 + $0x128] sm:$0xf]  ;;  %v1722_v62 = vld [vmem:[%s2764_s1 + $0x134] sm:$0xf0]  ;;  %v1582_v5 = vor.u32 %v1786_v59, %v1581_v58  ;;  %v1407_v36 = vld [vmem:[%s2764_s1 + $0x1d8] sm:$0xf0] }
  0x5d   :  { %1066 = vmatpush.bf16.msra.mxu2 %v1502_v25  ;;  %1053 = vmatpush.bf16.msra.mxu1 %v1374_v33  ;;  %v1181_v0 = vld [vmem:[%s2764_s1 + $0x8] sm:$0xf]  ;;  %v1686_v2 = vld [vmem:[%s2764_s1 + $0x14] sm:$0xf0]  ;;  %v1326_v12 = vor.u32 %v1722_v62, %v1325_v61  ;;  %v1298_v25 = vor.u32 %v1712_v14, %v1295_v15  ;;  %v1426_v33 = vor.u32 %v1744_v21, %v1423_v22  ;;  %v1768_v39 = vld [vmem:[%s2764_s1 + $0x2ac] sm:$0xf] }
  0x5e   :  { %v1437_v3 = vld [vmem:[%s2764_s1 + $0x208] sm:$0xf]  ;;  %v1750_v4 = vld [vmem:[%s2764_s1 + $0x214] sm:$0xf0]  ;;  %v1182_v20 = vor.u32 %v1686_v2, %v1181_v0  ;;  %v1519_v40 = vld [vmem:[%s2764_s1 + $0x2b8] sm:$0xf0] }
  0x5f   :  { %1079 = vmatpush.bf16.msra.mxu3 %v1630_v29  ;;  %1041 = vmatpush.bf16.msra.mxu0 %v1230_v38  ;;  %v1309_v6 = vld [vmem:[%s2764_s1 + $0x108] sm:$0xf]  ;;  %v1782_v13 = vld [vmem:[%s2764_s1 + $0x314] sm:$0xf0]  ;;  %v1438_v17 = vor.u32 %v1750_v4, %v1437_v3  ;;  %v1682_v29 = vor.u32 %v1808_v18, %v1679_v19  ;;  %v1282_v38 = vor.u32 %v1708_v30, %v1279_v32  ;;  %v1704_v42 = vld [vmem:[%s2764_s1 + $0xac] sm:$0xf] }
  0x60   :  { %1006 = vmatmul.bf16.vlgmr.msrb.gmra.mxu1 %v2399_v60  ;;  %v1565_v8 = vld [vmem:[%s2764_s1 + $0x308] sm:$0xf]  ;;  %v1718_v16 = vld [vmem:[%s2764_s1 + $0x114] sm:$0xf0]  ;;  %v1263_v43 = vld [vmem:[%s2764_s1 + $0xb8] sm:$0xf0] }
  0x61   :  { %1067 = vmatpush.bf16.msra.mxu2 %v1486_v37  ;;  %1054 = vmatpush.bf16.msra.mxu1 %v1358_v44  ;;  %v1566_v24 = vor.u32 %v1782_v13, %v1565_v8  ;;  %v1310_v28 = vor.u32 %v1718_v16, %v1309_v6  ;;  %v1538_v37 = vor.u32 %v1772_v26, %v1535_v27  ;;  %v1800_v45 = vld [vmem:[%s2764_s1 + $0x3ac] sm:$0xf]  ;;  %v1647_v46 = vld [vmem:[%s2764_s1 + $0x3b8] sm:$0xf0] }
  0x62   :  { %v1410_v44 = vor.u32 %v1740_v35, %v1407_v36  ;;  %v1736_v47 = vld [vmem:[%s2764_s1 + $0x1ac] sm:$0xf]  ;;  %v1391_v49 = vld [vmem:[%s2764_s1 + $0x1b8] sm:$0xf0] }
  0x63   :  { %1080 = vmatpush.bf16.msra.mxu3 %v1614_v41  ;;  %1042 = vmatpush.bf16.msra.mxu0 %v1214_v51  ;;  %v1666_v41 = vor.u32 %v1804_v7, %v1663_v34  ;;  %v1266_v51 = vor.u32 %v1704_v42, %v1263_v43  ;;  %v1764_v52 = vld [vmem:[%s2764_s1 + $0x28c] sm:$0xf]  ;;  %v1503_v53 = vld [vmem:[%s2764_s1 + $0x298] sm:$0xf0] }
  0x64   :  { %v1700_v55 = vld [vmem:[%s2764_s1 + $0x8c] sm:$0xf]  ;;  %v1247_v56 = vld [vmem:[%s2764_s1 + $0x98] sm:$0xf0] }
  0x65   :  { %1068 = vmatpush.bf16.msra.mxu2 %v1470_v50  ;;  %1055 = vmatpush.bf16.msra.mxu1 %v1342_v57  ;;  %v1522_v50 = vor.u32 %v1768_v39, %v1519_v40  ;;  %v1394_v57 = vor.u32 %v1736_v47, %v1391_v49  ;;  %v1796_v58 = vld [vmem:[%s2764_s1 + $0x38c] sm:$0xf]  ;;  %v1631_v59 = vld [vmem:[%s2764_s1 + $0x398] sm:$0xf0]  ;;  %v1250_v0 = vor.u32 %v1700_v55, %v1247_v56 }
  0x66   :  { %v1732_v61 = vld [vmem:[%s2764_s1 + $0x18c] sm:$0xf]  ;;  %v1375_v62 = vld [vmem:[%s2764_s1 + $0x198] sm:$0xf0]  ;;  %v1634_v3 = vor.u32 %v1796_v58, %v1631_v59 }
  0x67   :  { %1081 = vmatpush.bf16.msra.mxu3 %v1598_v54  ;;  %1043 = vmatpush.bf16.msra.mxu0 %v1198_v1  ;;  %v1650_v54 = vor.u32 %v1800_v45, %v1647_v46  ;;  %v1760_v1 = vld [vmem:[%s2764_s1 + $0x26c] sm:$0xf]  ;;  %v1487_v2 = vld [vmem:[%s2764_s1 + $0x278] sm:$0xf0]  ;;  %v1378_v6 = vor.u32 %v1732_v61, %v1375_v62 }
  0x68   :  { %v1696_v4 = vld [vmem:[%s2764_s1 + $0x6c] sm:$0xf]  ;;  %v1615_v9 = vld [vmem:[%s2764_s1 + $0x378] sm:$0xf0]  ;;  %v1490_v13 = vor.u32 %v1760_v1, %v1487_v2 }
  0x69   :  { %1069 = vmatpush.bf16.msra.mxu2 %v1454_v63  ;;  %1056 = vmatpush.bf16.msra.mxu1 %v1326_v12  ;;  %v1506_v63 = vor.u32 %v1764_v52, %v1503_v53  ;;  %v1792_v8 = vld [vmem:[%s2764_s1 + $0x36c] sm:$0xf]  ;;  %v1359_v12 = vld [vmem:[%s2764_s1 + $0x178] sm:$0xf0] }
  0x6a   :  { %v1728_v10 = vld [vmem:[%s2764_s1 + $0x16c] sm:$0xf]  ;;  %v1471_v16 = vld [vmem:[%s2764_s1 + $0x258] sm:$0xf0] }
  0x6b   :  { %1082 = vmatpush.bf16.msra.mxu3 %v1582_v5  ;;  %1044 = vmatpush.bf16.msra.mxu0 %v1182_v20  ;;  %v1231_v5 = vld [vmem:[%s2764_s1 + $0x78] sm:$0xf0]  ;;  %v1756_v15 = vld [vmem:[%s2764_s1 + $0x24c] sm:$0xf]  ;;  %v1362_v20 = vor.u32 %v1728_v10, %v1359_v12 }
  0x6c   :  { %v1234_v14 = vor.u32 %v1696_v4, %v1231_v5  ;;  %v1692_v18 = vld [vmem:[%s2764_s1 + $0x4c] sm:$0xf]  ;;  %v1215_v19 = vld [vmem:[%s2764_s1 + $0x58] sm:$0xf0] }
  0x6d   :  { %1070 = vmatpush.bf16.msra.mxu2 %v1438_v17  ;;  %1057 = vmatpush.bf16.msra.mxu1 %v1310_v28  ;;  %v1618_v17 = vor.u32 %v1792_v8, %v1615_v9  ;;  %v1788_v21 = vld [vmem:[%s2764_s1 + $0x34c] sm:$0xf]  ;;  %v1599_v22 = vld [vmem:[%s2764_s1 + $0x358] sm:$0xf0]  ;;  %v1218_v26 = vor.u32 %v1692_v18, %v1215_v19 }
  0x6e   :  { %1045 = vmatmul.bf16.vlgmr.msra.gmra.mxu0 %v2352_v31  ;;  %v1752_v27 = vld [vmem:[%s2764_s1 + $0x22c] sm:$0xf]  ;;  %v1455_v28 = vld [vmem:[%s2764_s1 + $0x238] sm:$0xf0] }
  0x6f   :  { %1083 = vmatpush.bf16.msra.mxu3 %v1566_v24  ;;  %1089 = vmatpush.bf16.msrb.mxu0 %v1298_v25  ;;  %v1343_v24 = vld [vmem:[%s2764_s1 + $0x158] sm:$0xf0]  ;;  %v1474_v25 = vor.u32 %v1756_v15, %v1471_v16  ;;  %v1688_v30 = vld [vmem:[%s2764_s1 + $0x2c] sm:$0xf] }
  0x70   :  { %1071 = vmatmul.bf16.vlgmr.msra.gmra.mxu2 %v2320_v11  ;;  %1058 = vmatmul.bf16.vlgmr.msra.gmra.mxu1 %v2399_v60  ;;  %v1199_v32 = vld [vmem:[%s2764_s1 + $0x38] sm:$0xf0]  ;;  %v1784_v7 = vld [vmem:[%s2764_s1 + $0x32c] sm:$0xf] }
  0x71   :  { %1115 = vmatpush.bf16.msrb.mxu2 %v1554_v23  ;;  %1102 = vmatpush.bf16.msrb.mxu1 %v1426_v33  ;;  %v1724_v23 = vld [vmem:[%s2764_s1 + $0x14c] sm:$0xf]  ;;  %v1583_v34 = vld [vmem:[%s2764_s1 + $0x338] sm:$0xf0] }
  0x72   :  { %1084 = vmatmul.bf16.vlgmr.msra.gmra.mxu3 %v2380_v48  ;;  %v1346_v33 = vor.u32 %v1724_v23, %v1343_v24  ;;  %v1720_v35 = vld [vmem:[%s2764_s1 + $0x12c] sm:$0xf]  ;;  %v1327_v36 = vld [vmem:[%s2764_s1 + $0x138] sm:$0xf0] }
  0x73   :  { %1128 = vmatpush.bf16.msrb.mxu3 %v1682_v29  ;;  %1090 = vmatpush.bf16.msrb.mxu0 %v1282_v38  ;;  %v1602_v29 = vor.u32 %v1788_v21, %v1599_v22  ;;  %v1202_v38 = vor.u32 %v1688_v30, %v1199_v32  ;;  %v1748_v39 = vld [vmem:[%s2764_s1 + $0x20c] sm:$0xf]  ;;  %v1439_v40 = vld [vmem:[%s2764_s1 + $0x218] sm:$0xf0] }
  0x74   :  { %v1684_v42 = vld [vmem:[%s2764_s1 + $0xc] sm:$0xf]  ;;  %v1183_v43 = vld [vmem:[%s2764_s1 + $0x18] sm:$0xf0] }
  0x75   :  { %1116 = vmatpush.bf16.msrb.mxu2 %v1538_v37  ;;  %1103 = vmatpush.bf16.msrb.mxu1 %v1410_v44  ;;  %v1458_v37 = vor.u32 %v1752_v27, %v1455_v28  ;;  %v1330_v44 = vor.u32 %v1720_v35, %v1327_v36  ;;  %v1780_v45 = vld [vmem:[%s2764_s1 + $0x30c] sm:$0xf]  ;;  %v1567_v46 = vld [vmem:[%s2764_s1 + $0x318] sm:$0xf0] }
  0x76   :  { %v1716_v47 = vld [vmem:[%s2764_s1 + $0x10c] sm:$0xf]  ;;  %v1311_v49 = vld [vmem:[%s2764_s1 + $0x118] sm:$0xf0]  ;;  %v1570_v52 = vor.u32 %v1780_v45, %v1567_v46 }
  0x77   :  { %1129 = vmatpush.bf16.msrb.mxu3 %v1666_v41  ;;  %1091 = vmatpush.bf16.msrb.mxu0 %v1266_v51  ;;  %v1586_v41 = vor.u32 %v1784_v7, %v1583_v34  ;;  %v1186_v51 = vor.u32 %v1684_v42, %v1183_v43  ;;  %v1314_v53 = vor.u32 %v1716_v47, %v1311_v49 }
  0x79   :  { %1117 = vmatpush.bf16.msrb.mxu2 %v1522_v50  ;;  %1104 = vmatpush.bf16.msrb.mxu1 %v1394_v57  ;;  %v1442_v50 = vor.u32 %v1748_v39, %v1439_v40 }
  0x7b   :  { %1130 = vmatpush.bf16.msrb.mxu3 %v1650_v54  ;;  %1092 = vmatpush.bf16.msrb.mxu0 %v1250_v0  ;;  %v254_v54 = vld [vmem:[%s2765_s2] sm:$0xf]  ;;  %s1842_s2 = smov [#allocation2]  }
  0x7c   :  { %v256_v55 = vperm.slane %v254_v54, 0  ;;  %v257_v19 = vperm.slane %v254_v54, 1  ;;  %v259_v24 = vperm.slane %v254_v54, 3  ;;  %s1160_s8 = sshll.u32 %s1842_s2, 4  ;;  %s1161_s8 = int_to_ptr.vmem [resolvable:$true] %s1160_s8 }
  0x7d   :  { %1118 = vmatpush.bf16.msrb.mxu2 %v1506_v63  ;;  %1105 = vmatpush.bf16.msrb.mxu1 %v1378_v6 }
  0x7f   :  { %1131 = vmatpush.bf16.msrb.mxu3 %v1634_v3  ;;  %1093 = vmatpush.bf16.msrb.mxu0 %v1234_v14 }
  0x81   :  { %1119 = vmatpush.bf16.msrb.mxu2 %v1490_v13  ;;  %1106 = vmatpush.bf16.msrb.mxu1 %v1362_v20  ;;  %v258_v20 = vperm.slane %v254_v54, 2 }
  0x83   :  { %1132 = vmatpush.bf16.msrb.mxu3 %v1618_v17  ;;  %1094 = vmatpush.bf16.msrb.mxu0 %v1218_v26 }
  0x85   :  { %1120 = vmatpush.bf16.msrb.mxu2 %v1474_v25  ;;  %1107 = vmatpush.bf16.msrb.mxu1 %v1346_v33 }
  0x87   :  { %1133 = vmatpush.bf16.msrb.mxu3 %v1602_v29  ;;  %1095 = vmatpush.bf16.msrb.mxu0 %v1202_v38 }
  0x89   :  { %1121 = vmatpush.bf16.msrb.mxu2 %v1458_v37  ;;  %1108 = vmatpush.bf16.msrb.mxu1 %v1330_v44 }
  0x8b   :  { %1134 = vmatpush.bf16.msrb.mxu3 %v1586_v41  ;;  %1096 = vmatpush.bf16.msrb.mxu0 %v1186_v51 }
  0x8d   :  { %1122 = vmatpush.bf16.msrb.mxu2 %v1442_v50  ;;  %1109 = vmatpush.bf16.msrb.mxu1 %v1314_v53 }
  0x8e   :  { %1097 = vmatmul.bf16.vlgmr.msrb.gmra.mxu0 %v2352_v31 }
  0x8f   :  { %1135 = vmatpush.bf16.msrb.mxu3 %v1570_v52 }
  0x90   :  { %1123 = vmatmul.bf16.vlgmr.msrb.gmra.mxu2 %v2320_v11  ;;  %1110 = vmatmul.bf16.vlgmr.msrb.gmra.mxu1 %v2399_v60 }
  0x92   :  { %1136 = vmatmul.bf16.vlgmr.msrb.gmra.mxu3 %v2380_v48 }
  0xc7   :  { %v942_v56 = vpop.f32.mrf.mxu0 }
  0xc8   :  { %v943_v57 = vadd.f32 %v942_v56, %v256_v55 }
  0xc9   :  { %v968_v58 = vpop.f32.mrf.mxu2 }
  0xcd   :  { %v955_v59 = vpop.f32.mrf.mxu1 }
  0xce   :  { %v956_v61 = vadd.f32 %v955_v59, %v943_v57 }
  0xcf   :  { %v944_v62 = vpop.f32.mrf.mxu0  ;;  %v981_v0 = vpop.f32.mrf.mxu3 }
  0xd0   :  { %v969_v63 = vadd.f32 %v968_v58, %v956_v61 }
  0xd1   :  { %v970_v1 = vpop.f32.mrf.mxu2 }
  0xd2   :  { %v982_v11 = vadd.f32 %v981_v0, %v969_v63 }
  0xd5   :  { %v957_v31 = vpop.f32.mrf.mxu1 }
  0xd7   :  { %v994_v2 = vpop.f32.mrf.mxu0  ;;  %v983_v48 = vpop.f32.mrf.mxu3 }
  0xd8   :  { %v995_v21 = vadd.f32 %v994_v2, %v257_v19 }
  0xd9   :  { %v1020_v3 = vpop.f32.mrf.mxu2 }
  0xdd   :  { %v1007_v60 = vpop.f32.mrf.mxu1 }
  0xde   :  { %v1008_v23 = vadd.f32 %v1007_v60, %v995_v21 }
  0xdf   :  { %v996_v4 = vpop.f32.mrf.mxu0  ;;  %v1033_v5 = vpop.f32.mrf.mxu3 }
  0xe0   :  { %v1021_v26 = vadd.f32 %v1020_v3, %v1008_v23 }
  0xe1   :  { %v1022_v6 = vpop.f32.mrf.mxu2 }
  0xe2   :  { %v1034_v33 = vadd.f32 %v1033_v5, %v1021_v26 }
  0xe4   :  { %v1145_v37 = vrot.slane %v1034_v33, 6 }
  0xe5   :  { %v1009_v8 = vpop.f32.mrf.mxu1 }
  0xe6   :  { %v1149_v43 = vsel %vm1148_vm3, %v982_v11, %v1145_v37 }
  0xe7   :  { %v1035_v9 = vpop.f32.mrf.mxu3 }
  0xeb   :  { %v1046_v10 = vpop.f32.mrf.mxu0 }
  0xec   :  { %v1047_v22 = vadd.f32 %v1046_v10, %v258_v20 }
  0xed   :  { %v1059_v12 = vpop.f32.mrf.mxu1 }
  0xee   :  { %v1060_v25 = vadd.f32 %v1059_v12, %v1047_v22 }
  0xf3   :  { %v1072_v13 = vpop.f32.mrf.mxu2  ;;  %v1048_v15 = vpop.f32.mrf.mxu0 }
  0xf4   :  { %v1073_v29 = vadd.f32 %v1072_v13, %v1060_v25 }
  0xf5   :  { %v1085_v14 = vpop.f32.mrf.mxu3  ;;  %v1061_v16 = vpop.f32.mrf.mxu1 }
  0xf6   :  { %v1086_v34 = vadd.f32 %v1085_v14, %v1073_v29 }
  0xf8   :  { %v1146_v40 = vrot.slane %v1086_v34, 4 }
  0xfb   :  { %v1074_v17 = vpop.f32.mrf.mxu2 }
  0xfd   :  { %v1087_v18 = vpop.f32.mrf.mxu3 }
 0x10b   :  { %v1098_v27 = vpop.f32.mrf.mxu0 }
 0x10c   :  { %v1099_v28 = vadd.f32 %v1098_v27, %v259_v24 }
 0x10d   :  { %v1111_v30 = vpop.f32.mrf.mxu1 }
 0x10e   :  { %v1112_v32 = vadd.f32 %v1111_v30, %v1099_v28 }
 0x113   :  { %v1124_v7 = vpop.f32.mrf.mxu2  ;;  %v1100_v39 = vpop.f32.mrf.mxu0 }
 0x114   :  { %v1125_v35 = vadd.f32 %v1124_v7, %v1112_v32 }
 0x115   :  { %v1137_v36 = vpop.f32.mrf.mxu3  ;;  %v1113_v42 = vpop.f32.mrf.mxu1 }
 0x116   :  { %v1138_v38 = vadd.f32 %v1137_v36, %v1125_v35 }
 0x118   :  { %v1147_v41 = vrot.slane %v1138_v38, 2 }
 0x11a   :  { %v1151_v44 = vsel %vm1150_vm4, %v1146_v40, %v1147_v41 }
 0x11b   :  { %v1126_v45 = vpop.f32.mrf.mxu2  ;;  %v1152_v46 = vsel %vm46_vm0, %v1149_v43, %v1151_v44 }
 0x11c   :  { %1154 = vst [vmem:[#allocation2] sm:$0xff] %v1152_v46 }
 0x11d   :  { %v1139_v47 = vpop.f32.mrf.mxu3  ;;  %1165 = dma.vmem_to_hbm [thread:$0]  %s1161_s8, 128, %s1163_s11, [#allocation3]  }
 0x11e   :  { %1839 = dma.done.wait [#allocation3], 128  }
 0x11f   :  { %1840 = vsyncadd [#allocation3], 4294967168 }
 0x120   :  { %1170 = vsyncpa [#allocation3], 1 }

</bundles_post_ra>
